<compile_context>
chip_gen: v7x
topology: tpu7x:2x2x1
jax: 0.10.0
libtpu: 0.0.40
codegen_flags: <defaults>
</compile_context>

<pallas_src>
import functools

import jax
import jax.numpy as jnp
import numpy as np
from jax import lax
from jax.experimental import pallas as pl
from jax.experimental.pallas import tpu as pltpu

SOS_TOKEN = 1
N_LAYERS = 1   # both encoder and decoder are single-layer GRUs here

# Kept f32 at toy size so tokens/scores stay bit-close to the f32 reference.
MATMUL_DTYPE = jnp.float32


def _vmem():
    return pl.BlockSpec(memory_space=pltpu.MemorySpace.VMEM)


def _mm(a, b):
    return jnp.dot(a.astype(MATMUL_DTYPE), b.astype(MATMUL_DTYPE),
                   preferred_element_type=jnp.float32)


def _gru_step(gi, h, whh_ref, bhh_ref):
    """One PyTorch-semantics GRU cell update.

    gi: (1, 3H) precomputed input-side gates (x @ Wih + bih), gate order [r,z,n].
    h : (1, H) previous hidden state.
    """
    H = h.shape[1]
    gh = _mm(h, whh_ref[...]) + bhh_ref[...]           # (1, 3H), one MXU push
    r = jax.nn.sigmoid(gi[:, 0:H] + gh[:, 0:H])
    z = jax.nn.sigmoid(gi[:, H:2 * H] + gh[:, H:2 * H])
    n = jnp.tanh(gi[:, 2 * H:3 * H] + r * gh[:, 2 * H:3 * H])
    return (1.0 - z) * n + z * h


# ----------------------------- Pallas kernels ------------------------------

def encoder_kernel(emb_ref, wih_fb_ref, bih_fb_ref,
                   whh_f_ref, bhh_f_ref, whh_b_ref, bhh_b_ref,
                   enc_out_ref, h_fwd_ref):
    """Full bidirectional GRU encoder, fwd/bwd recurrences interleaved."""
    T, H = emb_ref.shape
    emb = emb_ref[...]                                  # (T, H)

    # Input-side gates for both directions in ONE (T, 6H) matmul.
    gi = _mm(emb, wih_fb_ref[...]) + bih_fb_ref[...]    # (T, 6H)
    gi_f = gi[:, 0:3 * H]
    gi_b = gi[:, 3 * H:6 * H]

    row_idx = lax.broadcasted_iota(jnp.int32, (T, H), 0)
    enc = jnp.zeros((T, H), jnp.float32)
    hf = jnp.zeros((1, H), jnp.float32)
    hb = jnp.zeros((1, H), jnp.float32)

    # Interleave the two independent recurrence chains (step t fwd + step T-1-t
    # bwd per iteration); accumulate the summed outputs in registers.
    for t in range(T):
        tb = T - 1 - t
        hf = _gru_step(gi_f[t:t + 1, :], hf, whh_f_ref, bhh_f_ref)
        hb = _gru_step(gi_b[tb:tb + 1, :], hb, whh_b_ref, bhh_b_ref)
        enc = enc + jnp.where(row_idx == t, hf, 0.0) \
                  + jnp.where(row_idx == tb, hb, 0.0)

    enc_out_ref[...] = enc                              # single unmasked store
    h_fwd_ref[...] = hf        # encoder_hidden[:n_layers] == final fwd hidden


def decode_kernel(gi_tbl_ref, enc_ref, enc_t_ref, h0_ref,
                  whh_ref, bhh_ref, wcat_ref, bc_ref, wo_ref, bo_ref,
                  tokens_ref, scores_ref,
                  *, max_length, sos_token):
    """Whole greedy decode loop (Luong 'dot' attention decoder) in one kernel."""
    V = gi_tbl_ref.shape[0]
    H = h0_ref.shape[1]
    enc = enc_ref[...]                                   # (T, H), VMEM-resident
    enc_t = enc_t_ref[...]                               # (H, T), pre-transposed
    h = h0_ref[...]                                      # (1, H) recurrent carry

    vocab_idx = lax.broadcasted_iota(jnp.int32, (1, V), 1)
    out_lane = lax.broadcasted_iota(jnp.int32, (1, max_length), 1)
    tokens = jnp.zeros((1, max_length), jnp.int32)
    scores = jnp.zeros((1, max_length), jnp.float32)

    # Input gates of the SOS token (embedding @ wih + bih already folded).
    gi = gi_tbl_ref[sos_token:sos_token + 1, :]          # (1, 3H)

    # TODO(synk): switch to lax.fori_loop for large max_length / real vocab.
    for step in range(max_length):
        # --- GRU cell: single h @ Whh matmul (input gates precomputed) ---
        h = _gru_step(gi, h, whh_ref, bhh_ref)

        # --- Luong "dot" attention over encoder outputs ---
        att = _mm(h, enc_t)                                              # (1, T)
        att_m = jnp.max(att, axis=1, keepdims=True)
        att_e = jnp.exp(att - att_m)
        attn_w = att_e * pl.reciprocal(jnp.sum(att_e, axis=1, keepdims=True))
        context = _mm(attn_w, enc)                                       # (1, H)

        # --- concat -> tanh(Linear), fused into one K=2H matmul ---
        cat = jnp.concatenate([h, context], axis=1)                      # (1, 2H)
        cat_out = jnp.tanh(_mm(cat, wcat_ref[...]) + bc_ref[...])        # (1, H)

        # --- output projection; greedy max taken directly from the logits ---
        logits = _mm(cat_out, wo_ref[...]) + bo_ref[...]                 # (1, V)
        lmax = jnp.max(logits, axis=1, keepdims=True)
        sum_e = jnp.sum(jnp.exp(logits - lmax), axis=1, keepdims=True)
        score = pl.reciprocal(sum_e, approx=True)    # max prob = 1/sum(exp(l-lmax))
        tok = jnp.min(jnp.where(logits == lmax, vocab_idx, V),
                      axis=1, keepdims=True)         # first argmax (torch.max rule)

        # --- accumulate step outputs; one lane-masked store at the very end ---
        tokens = jnp.where(out_lane == step, tok, tokens)
        scores = jnp.where(out_lane == step, score, scores)

        # --- feed back: next step's input gates via one-hot @ gi_table ---
        if step + 1 < max_length:
            onehot = (vocab_idx == tok).astype(MATMUL_DTYPE)             # (1, V)
            gi = _mm(onehot, gi_tbl_ref[...])                            # (1, 3H)

    tokens_ref[...] = tokens
    scores_ref[...] = scores


# ----------------------------- model wrappers -------------------------------

def run_encoder(input_seq, params):
    emb = params["embedding"][input_seq]                 # (T, H) gather (XLA)
    T, H = emb.shape
    ef, eb = params["enc_fwd"], params["enc_bwd"]
    # Pack the two directions' input-gate weights horizontally: one matmul.
    wih_fb = jnp.concatenate([ef["wih"], eb["wih"]], axis=1)   # (H, 6H)
    bih_fb = jnp.concatenate([ef["bih"], eb["bih"]], axis=1)   # (1, 6H)
    enc_out, h_fwd = pl.pallas_call(
        encoder_kernel,
        out_shape=(jax.ShapeDtypeStruct((T, H), jnp.float32),
                   jax.ShapeDtypeStruct((1, H), jnp.float32)),
        in_specs=[_vmem()] * 7,
        out_specs=(_vmem(), _vmem()),
    )(emb, wih_fb, bih_fb, ef["whh"], ef["bhh"], eb["whh"], eb["bhh"])
    return enc_out, h_fwd


@functools.partial(jax.jit, static_argnums=(2,))
def greedy_search_decode(input_seq, input_length, max_length, params):
    del input_length   # batch=1, full-length sequence assumed
    enc_out, h0 = run_encoder(input_seq, params)
    d = params["dec"]

    # One-time precomputes (XLA, amortized over the whole decode):
    gi_tbl = params["embedding"] @ d["wih"] + d["bih"]          # (V, 3H)
    wcat = jnp.concatenate([d["wch"], d["wcc"]], axis=0)        # (2H, H)
    enc_t = enc_out.T                                           # (H, T)

    kern = functools.partial(decode_kernel, max_length=max_length,
                             sos_token=SOS_TOKEN)
    tokens, scores = pl.pallas_call(
        kern,
        out_shape=(jax.ShapeDtypeStruct((1, max_length), jnp.int32),
                   jax.ShapeDtypeStruct((1, max_length), jnp.float32)),
        in_specs=[_vmem()] * 10,
        out_specs=(_vmem(), _vmem()),
    )(gi_tbl, enc_out, enc_t, h0,
      d["whh"], d["bhh"], wcat, d["bc"], d["wo"], d["bo"])
    return tokens[0], scores[0]


# ----------------------------- pure-JAX reference ---------------------------

def _gru_cell_ref(x, h, wih, whh, bih, bhh):
    H = h.shape[1]
    gi = x @ wih + bih
    gh = h @ whh + bhh
    r = jax.nn.sigmoid(gi[:, :H] + gh[:, :H])
    z = jax.nn.sigmoid(gi[:, H:2 * H] + gh[:, H:2 * H])
    n = jnp.tanh(gi[:, 2 * H:] + r * gh[:, 2 * H:])
    return (1.0 - z) * n + z * h


def greedy_search_ref(input_seq, max_length, params):
    emb = params["embedding"][input_seq]
    T, H = emb.shape
    ef, eb = params["enc_fwd"], params["enc_bwd"]

    h = jnp.zeros((1, H), jnp.float32)
    fwd = []
    for t in range(T):
        h = _gru_cell_ref(emb[t:t + 1], h, **ef)
        fwd.append(h)
    h_fwd = h

    h = jnp.zeros((1, H), jnp.float32)
    bwd = [None] * T
    for t in reversed(range(T)):
        h = _gru_cell_ref(emb[t:t + 1], h, **eb)
        bwd[t] = h
    enc = jnp.concatenate(fwd, 0) + jnp.concatenate(bwd, 0)

    d = params["dec"]
    h = h_fwd
    tok = SOS_TOKEN
    toks, scs = [], []
    for _ in range(max_length):
        x = params["embedding"][tok][None, :]
        h = _gru_cell_ref(x, h, d["wih"], d["whh"], d["bih"], d["bhh"])
        att = h @ enc.T
        w = jax.nn.softmax(att, axis=1)
        ctx = w @ enc
        cat = jnp.tanh(h @ d["wch"] + ctx @ d["wcc"] + d["bc"])
        probs = jax.nn.softmax(cat @ d["wo"] + d["bo"], axis=1)
        tok = int(jnp.argmax(probs[0]))
        toks.append(tok)
        scs.append(float(probs[0, tok]))
    return np.array(toks, np.int64), np.array(scs, np.float32)


# ----------------------------- parameter init -------------------------------

def init_params(key, vocab, hidden):
    keys = jax.random.split(key, 9)

    def w(k, shape, scale):
        return jax.random.normal(k, shape, jnp.float32) * scale

    ws, bs = 0.1, 0.1

    def gru(k):
        k1, k2, k3, k4 = jax.random.split(k, 4)
        return dict(wih=w(k1, (hidden, 3 * hidden), ws),
                    whh=w(k2, (hidden, 3 * hidden), ws),
                    bih=w(k3, (1, 3 * hidden), bs),
                    bhh=w(k4, (1, 3 * hidden), bs))

    dec = gru(keys[3])
    dec.update(wch=w(keys[4], (hidden, hidden), ws),
               wcc=w(keys[5], (hidden, hidden), ws),
               bc=w(keys[6], (1, hidden), bs),
               wo=w(keys[7], (hidden, vocab), ws),
               bo=w(keys[8], (1, vocab), bs))
    return dict(embedding=w(keys[0], (vocab, hidden), 0.5),
                enc_fwd=gru(keys[1]),
                enc_bwd=gru(keys[2]),
                dec=dec)


# --------------------------------- main --------------------------------------

if __name__ == "__main__":
    # Lane-aligned small config: H and V multiples of 128 (no masked-lane waste).
    VOCAB, HIDDEN, SEQ_LEN, MAX_LENGTH = 256, 128, 8, 6
    key = jax.random.PRNGKey(0)
    pkey, skey = jax.random.split(key)
    params = init_params(pkey, VOCAB, HIDDEN)

    input_seq = jax.random.randint(skey, (SEQ_LEN,), 2, VOCAB, dtype=jnp.int32)
    input_length = jnp.array([SEQ_LEN], jnp.int32)

    tokens, scores = greedy_search_decode(input_seq, input_length, MAX_LENGTH, params)
    tokens, scores = jax.block_until_ready((tokens, scores))

    ref_tokens, ref_scores = greedy_search_ref(input_seq, MAX_LENGTH, params)
    assert (np.asarray(tokens) == ref_tokens).all(), (np.asarray(tokens), ref_tokens)
    np.testing.assert_allclose(np.asarray(scores), ref_scores, rtol=1e-3, atol=1e-3)

    print("KERNEL_OK")
</pallas_src>

<mosaic_0001>
module attributes {stable_mosaic.version = 11 : i64} {
  func.func @encoder_kernel(%arg0: memref<8x128xf32, #tpu.memory_space<vmem>>, %arg1: memref<128x768xf32, #tpu.memory_space<vmem>>, %arg2: memref<1x768xf32, #tpu.memory_space<vmem>>, %arg3: memref<128x384xf32, #tpu.memory_space<vmem>>, %arg4: memref<1x384xf32, #tpu.memory_space<vmem>>, %arg5: memref<128x384xf32, #tpu.memory_space<vmem>>, %arg6: memref<1x384xf32, #tpu.memory_space<vmem>>, %arg7: memref<8x128xf32, #tpu.memory_space<vmem>>, %arg8: memref<1x128xf32, #tpu.memory_space<vmem>>) attributes {dimension_semantics = [], scalar_prefetch = 0 : i64, scratch_operands = 0 : i64, tpu.core_type = #tpu.core_type<tc>} {
    %c0 = arith.constant 0 : index
    %c0_0 = arith.constant 0 : index
    %0 = vector.load %arg0[%c0, %c0_0] : memref<8x128xf32, #tpu.memory_space<vmem>>, vector<8x128xf32>
    %c0_1 = arith.constant 0 : index
    %c0_2 = arith.constant 0 : index
    %1 = vector.load %arg1[%c0_1, %c0_2] : memref<128x768xf32, #tpu.memory_space<vmem>>, vector<128x768xf32>
    %cst = arith.constant dense<0.000000e+00> : vector<8x768xf32>
    %2 = tpu.matmul %0, %1, %cst {dimension_numbers = #tpu.dot_dimension_numbers<[1], [0], [0], [1], [0, 0, 1, 1], [], []>} : vector<8x128xf32>, vector<128x768xf32>, vector<8x768xf32> -> vector<8x768xf32>
    %c0_3 = arith.constant 0 : index
    %c0_4 = arith.constant 0 : index
    %3 = vector.load %arg2[%c0_3, %c0_4] : memref<1x768xf32, #tpu.memory_space<vmem>>, vector<1x768xf32>
    %4 = vector.broadcast %3 : vector<1x768xf32> to vector<8x768xf32>
    %5 = arith.addf %2, %4 : vector<8x768xf32>
    %6 = vector.extract_strided_slice %5 {offsets = [0, 0], sizes = [8, 384], strides = [1, 1]} : vector<8x768xf32> to vector<8x384xf32>
    %7 = vector.extract_strided_slice %5 {offsets = [0, 384], sizes = [8, 384], strides = [1, 1]} : vector<8x768xf32> to vector<8x384xf32>
    %8 = tpu.iota {dimensions = array<i32: 0>} : vector<8x128xi32>
    %cst_5 = arith.constant 0.000000e+00 : f32
    %9 = vector.broadcast %cst_5 : f32 to vector<8x128xf32>
    %cst_6 = arith.constant 0.000000e+00 : f32
    %10 = vector.broadcast %cst_6 : f32 to vector<1x128xf32>
    %cst_7 = arith.constant 0.000000e+00 : f32
    %11 = vector.broadcast %cst_7 : f32 to vector<1x128xf32>
    %12 = vector.extract_strided_slice %6 {offsets = [0, 0], sizes = [1, 384], strides = [1, 1]} : vector<8x384xf32> to vector<1x384xf32>
    %c0_8 = arith.constant 0 : index
    %c0_9 = arith.constant 0 : index
    %13 = vector.load %arg3[%c0_8, %c0_9] : memref<128x384xf32, #tpu.memory_space<vmem>>, vector<128x384xf32>
    %cst_10 = arith.constant dense<0.000000e+00> : vector<1x384xf32>
    %14 = tpu.matmul %10, %13, %cst_10 {dimension_numbers = #tpu.dot_dimension_numbers<[1], [0], [0], [1], [0, 0, 1, 1], [], []>} : vector<1x128xf32>, vector<128x384xf32>, vector<1x384xf32> -> vector<1x384xf32>
    %c0_11 = arith.constant 0 : index
    %c0_12 = arith.constant 0 : index
    %15 = vector.load %arg4[%c0_11, %c0_12] : memref<1x384xf32, #tpu.memory_space<vmem>>, vector<1x384xf32>
    %16 = arith.addf %14, %15 : vector<1x384xf32>
    %17 = vector.extract_strided_slice %12 {offsets = [0, 0], sizes = [1, 128], strides = [1, 1]} : vector<1x384xf32> to vector<1x128xf32>
    %18 = vector.extract_strided_slice %16 {offsets = [0, 0], sizes = [1, 128], strides = [1, 1]} : vector<1x384xf32> to vector<1x128xf32>
    %19 = arith.addf %17, %18 : vector<1x128xf32>
    %20 = arith.negf %19 : vector<1x128xf32>
    %21 = math.exp %20 : vector<1x128xf32>
    %cst_13 = arith.constant 1.000000e+00 : f32
    %22 = vector.broadcast %cst_13 : f32 to vector<1x128xf32>
    %23 = arith.addf %22, %21 : vector<1x128xf32>
    %24 = arith.divf %22, %23 : vector<1x128xf32>
    %25 = vector.extract_strided_slice %12 {offsets = [0, 128], sizes = [1, 128], strides = [1, 1]} : vector<1x384xf32> to vector<1x128xf32>
    %26 = vector.extract_strided_slice %16 {offsets = [0, 128], sizes = [1, 128], strides = [1, 1]} : vector<1x384xf32> to vector<1x128xf32>
    %27 = arith.addf %25, %26 : vector<1x128xf32>
    %28 = arith.negf %27 : vector<1x128xf32>
    %29 = math.exp %28 : vector<1x128xf32>
    %cst_14 = arith.constant 1.000000e+00 : f32
    %30 = vector.broadcast %cst_14 : f32 to vector<1x128xf32>
    %31 = arith.addf %30, %29 : vector<1x128xf32>
    %32 = arith.divf %30, %31 : vector<1x128xf32>
    %33 = vector.extract_strided_slice %12 {offsets = [0, 256], sizes = [1, 128], strides = [1, 1]} : vector<1x384xf32> to vector<1x128xf32>
    %34 = vector.extract_strided_slice %16 {offsets = [0, 256], sizes = [1, 128], strides = [1, 1]} : vector<1x384xf32> to vector<1x128xf32>
    %35 = arith.mulf %24, %34 : vector<1x128xf32>
    %36 = arith.addf %33, %35 : vector<1x128xf32>
    %37 = math.tanh %36 : vector<1x128xf32>
    %cst_15 = arith.constant 1.000000e+00 : f32
    %38 = vector.broadcast %cst_15 : f32 to vector<1x128xf32>
    %39 = arith.subf %38, %32 : vector<1x128xf32>
    %40 = arith.mulf %39, %37 : vector<1x128xf32>
    %41 = arith.mulf %32, %10 : vector<1x128xf32>
    %42 = arith.addf %40, %41 : vector<1x128xf32>
    %43 = vector.extract_strided_slice %7 {offsets = [7, 0], sizes = [1, 384], strides = [1, 1]} : vector<8x384xf32> to vector<1x384xf32>
    %c0_16 = arith.constant 0 : index
    %c0_17 = arith.constant 0 : index
    %44 = vector.load %arg5[%c0_16, %c0_17] : memref<128x384xf32, #tpu.memory_space<vmem>>, vector<128x384xf32>
    %cst_18 = arith.constant dense<0.000000e+00> : vector<1x384xf32>
    %45 = tpu.matmul %11, %44, %cst_18 {dimension_numbers = #tpu.dot_dimension_numbers<[1], [0], [0], [1], [0, 0, 1, 1], [], []>} : vector<1x128xf32>, vector<128x384xf32>, vector<1x384xf32> -> vector<1x384xf32>
    %c0_19 = arith.constant 0 : index
    %c0_20 = arith.constant 0 : index
    %46 = vector.load %arg6[%c0_19, %c0_20] : memref<1x384xf32, #tpu.memory_space<vmem>>, vector<1x384xf32>
    %47 = arith.addf %45, %46 : vector<1x384xf32>
    %48 = vector.extract_strided_slice %43 {offsets = [0, 0], sizes = [1, 128], strides = [1, 1]} : vector<1x384xf32> to vector<1x128xf32>
    %49 = vector.extract_strided_slice %47 {offsets = [0, 0], sizes = [1, 128], strides = [1, 1]} : vector<1x384xf32> to vector<1x128xf32>
    %50 = arith.addf %48, %49 : vector<1x128xf32>
    %51 = arith.negf %50 : vector<1x128xf32>
    %52 = math.exp %51 : vector<1x128xf32>
    %cst_21 = arith.constant 1.000000e+00 : f32
    %53 = vector.broadcast %cst_21 : f32 to vector<1x128xf32>
    %54 = arith.addf %53, %52 : vector<1x128xf32>
    %55 = arith.divf %53, %54 : vector<1x128xf32>
    %56 = vector.extract_strided_slice %43 {offsets = [0, 128], sizes = [1, 128], strides = [1, 1]} : vector<1x384xf32> to vector<1x128xf32>
    %57 = vector.extract_strided_slice %47 {offsets = [0, 128], sizes = [1, 128], strides = [1, 1]} : vector<1x384xf32> to vector<1x128xf32>
    %58 = arith.addf %56, %57 : vector<1x128xf32>
    %59 = arith.negf %58 : vector<1x128xf32>
    %60 = math.exp %59 : vector<1x128xf32>
    %cst_22 = arith.constant 1.000000e+00 : f32
    %61 = vector.broadcast %cst_22 : f32 to vector<1x128xf32>
    %62 = arith.addf %61, %60 : vector<1x128xf32>
    %63 = arith.divf %61, %62 : vector<1x128xf32>
    %64 = vector.extract_strided_slice %43 {offsets = [0, 256], sizes = [1, 128], strides = [1, 1]} : vector<1x384xf32> to vector<1x128xf32>
    %65 = vector.extract_strided_slice %47 {offsets = [0, 256], sizes = [1, 128], strides = [1, 1]} : vector<1x384xf32> to vector<1x128xf32>
    %66 = arith.mulf %55, %65 : vector<1x128xf32>
    %67 = arith.addf %64, %66 : vector<1x128xf32>
    %68 = math.tanh %67 : vector<1x128xf32>
    %cst_23 = arith.constant 1.000000e+00 : f32
    %69 = vector.broadcast %cst_23 : f32 to vector<1x128xf32>
    %70 = arith.subf %69, %63 : vector<1x128xf32>
    %71 = arith.mulf %70, %68 : vector<1x128xf32>
    %72 = arith.mulf %63, %11 : vector<1x128xf32>
    %73 = arith.addf %71, %72 : vector<1x128xf32>
    %c0_i32 = arith.constant 0 : i32
    %74 = vector.broadcast %c0_i32 : i32 to vector<8x128xi32>
    %75 = arith.cmpi eq, %8, %74 : vector<8x128xi32>
    %cst_24 = arith.constant 0.000000e+00 : f32
    %76 = vector.shape_cast %42 : vector<1x128xf32> to vector<1x128xf32>
    %77 = vector.broadcast %76 : vector<1x128xf32> to vector<8x128xf32>
    %78 = vector.broadcast %cst_24 : f32 to vector<8x128xf32>
    %79 = arith.select %75, %77, %78 : vector<8x128xi1>, vector<8x128xf32>
    %80 = arith.addf %9, %79 : vector<8x128xf32>
    %c7_i32 = arith.constant 7 : i32
    %81 = vector.broadcast %c7_i32 : i32 to vector<8x128xi32>
    %82 = arith.cmpi eq, %8, %81 : vector<8x128xi32>
    %cst_25 = arith.constant 0.000000e+00 : f32
    %83 = vector.shape_cast %73 : vector<1x128xf32> to vector<1x128xf32>
    %84 = vector.broadcast %83 : vector<1x128xf32> to vector<8x128xf32>
    %85 = vector.broadcast %cst_25 : f32 to vector<8x128xf32>
    %86 = arith.select %82, %84, %85 : vector<8x128xi1>, vector<8x128xf32>
    %87 = arith.addf %80, %86 : vector<8x128xf32>
    %88 = vector.extract_strided_slice %6 {offsets = [1, 0], sizes = [1, 384], strides = [1, 1]} : vector<8x384xf32> to vector<1x384xf32>
    %c0_26 = arith.constant 0 : index
    %c0_27 = arith.constant 0 : index
    %89 = vector.load %arg3[%c0_26, %c0_27] : memref<128x384xf32, #tpu.memory_space<vmem>>, vector<128x384xf32>
    %cst_28 = arith.constant dense<0.000000e+00> : vector<1x384xf32>
    %90 = tpu.matmul %42, %89, %cst_28 {dimension_numbers = #tpu.dot_dimension_numbers<[1], [0], [0], [1], [0, 0, 1, 1], [], []>} : vector<1x128xf32>, vector<128x384xf32>, vector<1x384xf32> -> vector<1x384xf32>
    %c0_29 = arith.constant 0 : index
    %c0_30 = arith.constant 0 : index
    %91 = vector.load %arg4[%c0_29, %c0_30] : memref<1x384xf32, #tpu.memory_space<vmem>>, vector<1x384xf32>
    %92 = arith.addf %90, %91 : vector<1x384xf32>
    %93 = vector.extract_strided_slice %88 {offsets = [0, 0], sizes = [1, 128], strides = [1, 1]} : vector<1x384xf32> to vector<1x128xf32>
    %94 = vector.extract_strided_slice %92 {offsets = [0, 0], sizes = [1, 128], strides = [1, 1]} : vector<1x384xf32> to vector<1x128xf32>
    %95 = arith.addf %93, %94 : vector<1x128xf32>
    %96 = arith.negf %95 : vector<1x128xf32>
    %97 = math.exp %96 : vector<1x128xf32>
    %cst_31 = arith.constant 1.000000e+00 : f32
    %98 = vector.broadcast %cst_31 : f32 to vector<1x128xf32>
    %99 = arith.addf %98, %97 : vector<1x128xf32>
    %100 = arith.divf %98, %99 : vector<1x128xf32>
    %101 = vector.extract_strided_slice %88 {offsets = [0, 128], sizes = [1, 128], strides = [1, 1]} : vector<1x384xf32> to vector<1x128xf32>
    %102 = vector.extract_strided_slice %92 {offsets = [0, 128], sizes = [1, 128], strides = [1, 1]} : vector<1x384xf32> to vector<1x128xf32>
    %103 = arith.addf %101, %102 : vector<1x128xf32>
    %104 = arith.negf %103 : vector<1x128xf32>
    %105 = math.exp %104 : vector<1x128xf32>
    %cst_32 = arith.constant 1.000000e+00 : f32
    %106 = vector.broadcast %cst_32 : f32 to vector<1x128xf32>
    %107 = arith.addf %106, %105 : vector<1x128xf32>
    %108 = arith.divf %106, %107 : vector<1x128xf32>
    %109 = vector.extract_strided_slice %88 {offsets = [0, 256], sizes = [1, 128], strides = [1, 1]} : vector<1x384xf32> to vector<1x128xf32>
    %110 = vector.extract_strided_slice %92 {offsets = [0, 256], sizes = [1, 128], strides = [1, 1]} : vector<1x384xf32> to vector<1x128xf32>
    %111 = arith.mulf %100, %110 : vector<1x128xf32>
    %112 = arith.addf %109, %111 : vector<1x128xf32>
    %113 = math.tanh %112 : vector<1x128xf32>
    %cst_33 = arith.constant 1.000000e+00 : f32
    %114 = vector.broadcast %cst_33 : f32 to vector<1x128xf32>
    %115 = arith.subf %114, %108 : vector<1x128xf32>
    %116 = arith.mulf %115, %113 : vector<1x128xf32>
    %117 = arith.mulf %108, %42 : vector<1x128xf32>
    %118 = arith.addf %116, %117 : vector<1x128xf32>
    %119 = vector.extract_strided_slice %7 {offsets = [6, 0], sizes = [1, 384], strides = [1, 1]} : vector<8x384xf32> to vector<1x384xf32>
    %c0_34 = arith.constant 0 : index
    %c0_35 = arith.constant 0 : index
    %120 = vector.load %arg5[%c0_34, %c0_35] : memref<128x384xf32, #tpu.memory_space<vmem>>, vector<128x384xf32>
    %cst_36 = arith.constant dense<0.000000e+00> : vector<1x384xf32>
    %121 = tpu.matmul %73, %120, %cst_36 {dimension_numbers = #tpu.dot_dimension_numbers<[1], [0], [0], [1], [0, 0, 1, 1], [], []>} : vector<1x128xf32>, vector<128x384xf32>, vector<1x384xf32> -> vector<1x384xf32>
    %c0_37 = arith.constant 0 : index
    %c0_38 = arith.constant 0 : index
    %122 = vector.load %arg6[%c0_37, %c0_38] : memref<1x384xf32, #tpu.memory_space<vmem>>, vector<1x384xf32>
    %123 = arith.addf %121, %122 : vector<1x384xf32>
    %124 = vector.extract_strided_slice %119 {offsets = [0, 0], sizes = [1, 128], strides = [1, 1]} : vector<1x384xf32> to vector<1x128xf32>
    %125 = vector.extract_strided_slice %123 {offsets = [0, 0], sizes = [1, 128], strides = [1, 1]} : vector<1x384xf32> to vector<1x128xf32>
    %126 = arith.addf %124, %125 : vector<1x128xf32>
    %127 = arith.negf %126 : vector<1x128xf32>
    %128 = math.exp %127 : vector<1x128xf32>
    %cst_39 = arith.constant 1.000000e+00 : f32
    %129 = vector.broadcast %cst_39 : f32 to vector<1x128xf32>
    %130 = arith.addf %129, %128 : vector<1x128xf32>
    %131 = arith.divf %129, %130 : vector<1x128xf32>
    %132 = vector.extract_strided_slice %119 {offsets = [0, 128], sizes = [1, 128], strides = [1, 1]} : vector<1x384xf32> to vector<1x128xf32>
    %133 = vector.extract_strided_slice %123 {offsets = [0, 128], sizes = [1, 128], strides = [1, 1]} : vector<1x384xf32> to vector<1x128xf32>
    %134 = arith.addf %132, %133 : vector<1x128xf32>
    %135 = arith.negf %134 : vector<1x128xf32>
    %136 = math.exp %135 : vector<1x128xf32>
    %cst_40 = arith.constant 1.000000e+00 : f32
    %137 = vector.broadcast %cst_40 : f32 to vector<1x128xf32>
    %138 = arith.addf %137, %136 : vector<1x128xf32>
    %139 = arith.divf %137, %138 : vector<1x128xf32>
    %140 = vector.extract_strided_slice %119 {offsets = [0, 256], sizes = [1, 128], strides = [1, 1]} : vector<1x384xf32> to vector<1x128xf32>
    %141 = vector.extract_strided_slice %123 {offsets = [0, 256], sizes = [1, 128], strides = [1, 1]} : vector<1x384xf32> to vector<1x128xf32>
    %142 = arith.mulf %131, %141 : vector<1x128xf32>
    %143 = arith.addf %140, %142 : vector<1x128xf32>
    %144 = math.tanh %143 : vector<1x128xf32>
    %cst_41 = arith.constant 1.000000e+00 : f32
    %145 = vector.broadcast %cst_41 : f32 to vector<1x128xf32>
    %146 = arith.subf %145, %139 : vector<1x128xf32>
    %147 = arith.mulf %146, %144 : vector<1x128xf32>
    %148 = arith.mulf %139, %73 : vector<1x128xf32>
    %149 = arith.addf %147, %148 : vector<1x128xf32>
    %c1_i32 = arith.constant 1 : i32
    %150 = vector.broadcast %c1_i32 : i32 to vector<8x128xi32>
    %151 = arith.cmpi eq, %8, %150 : vector<8x128xi32>
    %cst_42 = arith.constant 0.000000e+00 : f32
    %152 = vector.shape_cast %118 : vector<1x128xf32> to vector<1x128xf32>
    %153 = vector.broadcast %152 : vector<1x128xf32> to vector<8x128xf32>
    %154 = vector.broadcast %cst_42 : f32 to vector<8x128xf32>
    %155 = arith.select %151, %153, %154 : vector<8x128xi1>, vector<8x128xf32>
    %156 = arith.addf %87, %155 : vector<8x128xf32>
    %c6_i32 = arith.constant 6 : i32
    %157 = vector.broadcast %c6_i32 : i32 to vector<8x128xi32>
    %158 = arith.cmpi eq, %8, %157 : vector<8x128xi32>
    %cst_43 = arith.constant 0.000000e+00 : f32
    %159 = vector.shape_cast %149 : vector<1x128xf32> to vector<1x128xf32>
    %160 = vector.broadcast %159 : vector<1x128xf32> to vector<8x128xf32>
    %161 = vector.broadcast %cst_43 : f32 to vector<8x128xf32>
    %162 = arith.select %158, %160, %161 : vector<8x128xi1>, vector<8x128xf32>
    %163 = arith.addf %156, %162 : vector<8x128xf32>
    %164 = vector.extract_strided_slice %6 {offsets = [2, 0], sizes = [1, 384], strides = [1, 1]} : vector<8x384xf32> to vector<1x384xf32>
    %c0_44 = arith.constant 0 : index
    %c0_45 = arith.constant 0 : index
    %165 = vector.load %arg3[%c0_44, %c0_45] : memref<128x384xf32, #tpu.memory_space<vmem>>, vector<128x384xf32>
    %cst_46 = arith.constant dense<0.000000e+00> : vector<1x384xf32>
    %166 = tpu.matmul %118, %165, %cst_46 {dimension_numbers = #tpu.dot_dimension_numbers<[1], [0], [0], [1], [0, 0, 1, 1], [], []>} : vector<1x128xf32>, vector<128x384xf32>, vector<1x384xf32> -> vector<1x384xf32>
    %c0_47 = arith.constant 0 : index
    %c0_48 = arith.constant 0 : index
    %167 = vector.load %arg4[%c0_47, %c0_48] : memref<1x384xf32, #tpu.memory_space<vmem>>, vector<1x384xf32>
    %168 = arith.addf %166, %167 : vector<1x384xf32>
    %169 = vector.extract_strided_slice %164 {offsets = [0, 0], sizes = [1, 128], strides = [1, 1]} : vector<1x384xf32> to vector<1x128xf32>
    %170 = vector.extract_strided_slice %168 {offsets = [0, 0], sizes = [1, 128], strides = [1, 1]} : vector<1x384xf32> to vector<1x128xf32>
    %171 = arith.addf %169, %170 : vector<1x128xf32>
    %172 = arith.negf %171 : vector<1x128xf32>
    %173 = math.exp %172 : vector<1x128xf32>
    %cst_49 = arith.constant 1.000000e+00 : f32
    %174 = vector.broadcast %cst_49 : f32 to vector<1x128xf32>
    %175 = arith.addf %174, %173 : vector<1x128xf32>
    %176 = arith.divf %174, %175 : vector<1x128xf32>
    %177 = vector.extract_strided_slice %164 {offsets = [0, 128], sizes = [1, 128], strides = [1, 1]} : vector<1x384xf32> to vector<1x128xf32>
    %178 = vector.extract_strided_slice %168 {offsets = [0, 128], sizes = [1, 128], strides = [1, 1]} : vector<1x384xf32> to vector<1x128xf32>
    %179 = arith.addf %177, %178 : vector<1x128xf32>
    %180 = arith.negf %179 : vector<1x128xf32>
    %181 = math.exp %180 : vector<1x128xf32>
    %cst_50 = arith.constant 1.000000e+00 : f32
    %182 = vector.broadcast %cst_50 : f32 to vector<1x128xf32>
    %183 = arith.addf %182, %181 : vector<1x128xf32>
    %184 = arith.divf %182, %183 : vector<1x128xf32>
    %185 = vector.extract_strided_slice %164 {offsets = [0, 256], sizes = [1, 128], strides = [1, 1]} : vector<1x384xf32> to vector<1x128xf32>
    %186 = vector.extract_strided_slice %168 {offsets = [0, 256], sizes = [1, 128], strides = [1, 1]} : vector<1x384xf32> to vector<1x128xf32>
    %187 = arith.mulf %176, %186 : vector<1x128xf32>
    %188 = arith.addf %185, %187 : vector<1x128xf32>
    %189 = math.tanh %188 : vector<1x128xf32>
    %cst_51 = arith.constant 1.000000e+00 : f32
    %190 = vector.broadcast %cst_51 : f32 to vector<1x128xf32>
    %191 = arith.subf %190, %184 : vector<1x128xf32>
    %192 = arith.mulf %191, %189 : vector<1x128xf32>
    %193 = arith.mulf %184, %118 : vector<1x128xf32>
    %194 = arith.addf %192, %193 : vector<1x128xf32>
    %195 = vector.extract_strided_slice %7 {offsets = [5, 0], sizes = [1, 384], strides = [1, 1]} : vector<8x384xf32> to vector<1x384xf32>
    %c0_52 = arith.constant 0 : index
    %c0_53 = arith.constant 0 : index
    %196 = vector.load %arg5[%c0_52, %c0_53] : memref<128x384xf32, #tpu.memory_space<vmem>>, vector<128x384xf32>
    %cst_54 = arith.constant dense<0.000000e+00> : vector<1x384xf32>
    %197 = tpu.matmul %149, %196, %cst_54 {dimension_numbers = #tpu.dot_dimension_numbers<[1], [0], [0], [1], [0, 0, 1, 1], [], []>} : vector<1x128xf32>, vector<128x384xf32>, vector<1x384xf32> -> vector<1x384xf32>
    %c0_55 = arith.constant 0 : index
    %c0_56 = arith.constant 0 : index
    %198 = vector.load %arg6[%c0_55, %c0_56] : memref<1x384xf32, #tpu.memory_space<vmem>>, vector<1x384xf32>
    %199 = arith.addf %197, %198 : vector<1x384xf32>
    %200 = vector.extract_strided_slice %195 {offsets = [0, 0], sizes = [1, 128], strides = [1, 1]} : vector<1x384xf32> to vector<1x128xf32>
    %201 = vector.extract_strided_slice %199 {offsets = [0, 0], sizes = [1, 128], strides = [1, 1]} : vector<1x384xf32> to vector<1x128xf32>
    %202 = arith.addf %200, %201 : vector<1x128xf32>
    %203 = arith.negf %202 : vector<1x128xf32>
    %204 = math.exp %203 : vector<1x128xf32>
    %cst_57 = arith.constant 1.000000e+00 : f32
    %205 = vector.broadcast %cst_57 : f32 to vector<1x128xf32>
    %206 = arith.addf %205, %204 : vector<1x128xf32>
    %207 = arith.divf %205, %206 : vector<1x128xf32>
    %208 = vector.extract_strided_slice %195 {offsets = [0, 128], sizes = [1, 128], strides = [1, 1]} : vector<1x384xf32> to vector<1x128xf32>
    %209 = vector.extract_strided_slice %199 {offsets = [0, 128], sizes = [1, 128], strides = [1, 1]} : vector<1x384xf32> to vector<1x128xf32>
    %210 = arith.addf %208, %209 : vector<1x128xf32>
    %211 = arith.negf %210 : vector<1x128xf32>
    %212 = math.exp %211 : vector<1x128xf32>
    %cst_58 = arith.constant 1.000000e+00 : f32
    %213 = vector.broadcast %cst_58 : f32 to vector<1x128xf32>
    %214 = arith.addf %213, %212 : vector<1x128xf32>
    %215 = arith.divf %213, %214 : vector<1x128xf32>
    %216 = vector.extract_strided_slice %195 {offsets = [0, 256], sizes = [1, 128], strides = [1, 1]} : vector<1x384xf32> to vector<1x128xf32>
    %217 = vector.extract_strided_slice %199 {offsets = [0, 256], sizes = [1, 128], strides = [1, 1]} : vector<1x384xf32> to vector<1x128xf32>
    %218 = arith.mulf %207, %217 : vector<1x128xf32>
    %219 = arith.addf %216, %218 : vector<1x128xf32>
    %220 = math.tanh %219 : vector<1x128xf32>
    %cst_59 = arith.constant 1.000000e+00 : f32
    %221 = vector.broadcast %cst_59 : f32 to vector<1x128xf32>
    %222 = arith.subf %221, %215 : vector<1x128xf32>
    %223 = arith.mulf %222, %220 : vector<1x128xf32>
    %224 = arith.mulf %215, %149 : vector<1x128xf32>
    %225 = arith.addf %223, %224 : vector<1x128xf32>
    %c2_i32 = arith.constant 2 : i32
    %226 = vector.broadcast %c2_i32 : i32 to vector<8x128xi32>
    %227 = arith.cmpi eq, %8, %226 : vector<8x128xi32>
    %cst_60 = arith.constant 0.000000e+00 : f32
    %228 = vector.shape_cast %194 : vector<1x128xf32> to vector<1x128xf32>
    %229 = vector.broadcast %228 : vector<1x128xf32> to vector<8x128xf32>
    %230 = vector.broadcast %cst_60 : f32 to vector<8x128xf32>
    %231 = arith.select %227, %229, %230 : vector<8x128xi1>, vector<8x128xf32>
    %232 = arith.addf %163, %231 : vector<8x128xf32>
    %c5_i32 = arith.constant 5 : i32
    %233 = vector.broadcast %c5_i32 : i32 to vector<8x128xi32>
    %234 = arith.cmpi eq, %8, %233 : vector<8x128xi32>
    %cst_61 = arith.constant 0.000000e+00 : f32
    %235 = vector.shape_cast %225 : vector<1x128xf32> to vector<1x128xf32>
    %236 = vector.broadcast %235 : vector<1x128xf32> to vector<8x128xf32>
    %237 = vector.broadcast %cst_61 : f32 to vector<8x128xf32>
    %238 = arith.select %234, %236, %237 : vector<8x128xi1>, vector<8x128xf32>
    %239 = arith.addf %232, %238 : vector<8x128xf32>
    %240 = vector.extract_strided_slice %6 {offsets = [3, 0], sizes = [1, 384], strides = [1, 1]} : vector<8x384xf32> to vector<1x384xf32>
    %c0_62 = arith.constant 0 : index
    %c0_63 = arith.constant 0 : index
    %241 = vector.load %arg3[%c0_62, %c0_63] : memref<128x384xf32, #tpu.memory_space<vmem>>, vector<128x384xf32>
    %cst_64 = arith.constant dense<0.000000e+00> : vector<1x384xf32>
    %242 = tpu.matmul %194, %241, %cst_64 {dimension_numbers = #tpu.dot_dimension_numbers<[1], [0], [0], [1], [0, 0, 1, 1], [], []>} : vector<1x128xf32>, vector<128x384xf32>, vector<1x384xf32> -> vector<1x384xf32>
    %c0_65 = arith.constant 0 : index
    %c0_66 = arith.constant 0 : index
    %243 = vector.load %arg4[%c0_65, %c0_66] : memref<1x384xf32, #tpu.memory_space<vmem>>, vector<1x384xf32>
    %244 = arith.addf %242, %243 : vector<1x384xf32>
    %245 = vector.extract_strided_slice %240 {offsets = [0, 0], sizes = [1, 128], strides = [1, 1]} : vector<1x384xf32> to vector<1x128xf32>
    %246 = vector.extract_strided_slice %244 {offsets = [0, 0], sizes = [1, 128], strides = [1, 1]} : vector<1x384xf32> to vector<1x128xf32>
    %247 = arith.addf %245, %246 : vector<1x128xf32>
    %248 = arith.negf %247 : vector<1x128xf32>
    %249 = math.exp %248 : vector<1x128xf32>
    %cst_67 = arith.constant 1.000000e+00 : f32
    %250 = vector.broadcast %cst_67 : f32 to vector<1x128xf32>
    %251 = arith.addf %250, %249 : vector<1x128xf32>
    %252 = arith.divf %250, %251 : vector<1x128xf32>
    %253 = vector.extract_strided_slice %240 {offsets = [0, 128], sizes = [1, 128], strides = [1, 1]} : vector<1x384xf32> to vector<1x128xf32>
    %254 = vector.extract_strided_slice %244 {offsets = [0, 128], sizes = [1, 128], strides = [1, 1]} : vector<1x384xf32> to vector<1x128xf32>
    %255 = arith.addf %253, %254 : vector<1x128xf32>
    %256 = arith.negf %255 : vector<1x128xf32>
    %257 = math.exp %256 : vector<1x128xf32>
    %cst_68 = arith.constant 1.000000e+00 : f32
    %258 = vector.broadcast %cst_68 : f32 to vector<1x128xf32>
    %259 = arith.addf %258, %257 : vector<1x128xf32>
    %260 = arith.divf %258, %259 : vector<1x128xf32>
    %261 = vector.extract_strided_slice %240 {offsets = [0, 256], sizes = [1, 128], strides = [1, 1]} : vector<1x384xf32> to vector<1x128xf32>
    %262 = vector.extract_strided_slice %244 {offsets = [0, 256], sizes = [1, 128], strides = [1, 1]} : vector<1x384xf32> to vector<1x128xf32>
    %263 = arith.mulf %252, %262 : vector<1x128xf32>
    %264 = arith.addf %261, %263 : vector<1x128xf32>
    %265 = math.tanh %264 : vector<1x128xf32>
    %cst_69 = arith.constant 1.000000e+00 : f32
    %266 = vector.broadcast %cst_69 : f32 to vector<1x128xf32>
    %267 = arith.subf %266, %260 : vector<1x128xf32>
    %268 = arith.mulf %267, %265 : vector<1x128xf32>
    %269 = arith.mulf %260, %194 : vector<1x128xf32>
    %270 = arith.addf %268, %269 : vector<1x128xf32>
    %271 = vector.extract_strided_slice %7 {offsets = [4, 0], sizes = [1, 384], strides = [1, 1]} : vector<8x384xf32> to vector<1x384xf32>
    %c0_70 = arith.constant 0 : index
    %c0_71 = arith.constant 0 : index
    %272 = vector.load %arg5[%c0_70, %c0_71] : memref<128x384xf32, #tpu.memory_space<vmem>>, vector<128x384xf32>
    %cst_72 = arith.constant dense<0.000000e+00> : vector<1x384xf32>
    %273 = tpu.matmul %225, %272, %cst_72 {dimension_numbers = #tpu.dot_dimension_numbers<[1], [0], [0], [1], [0, 0, 1, 1], [], []>} : vector<1x128xf32>, vector<128x384xf32>, vector<1x384xf32> -> vector<1x384xf32>
    %c0_73 = arith.constant 0 : index
    %c0_74 = arith.constant 0 : index
    %274 = vector.load %arg6[%c0_73, %c0_74] : memref<1x384xf32, #tpu.memory_space<vmem>>, vector<1x384xf32>
    %275 = arith.addf %273, %274 : vector<1x384xf32>
    %276 = vector.extract_strided_slice %271 {offsets = [0, 0], sizes = [1, 128], strides = [1, 1]} : vector<1x384xf32> to vector<1x128xf32>
    %277 = vector.extract_strided_slice %275 {offsets = [0, 0], sizes = [1, 128], strides = [1, 1]} : vector<1x384xf32> to vector<1x128xf32>
    %278 = arith.addf %276, %277 : vector<1x128xf32>
    %279 = arith.negf %278 : vector<1x128xf32>
    %280 = math.exp %279 : vector<1x128xf32>
    %cst_75 = arith.constant 1.000000e+00 : f32
    %281 = vector.broadcast %cst_75 : f32 to vector<1x128xf32>
    %282 = arith.addf %281, %280 : vector<1x128xf32>
    %283 = arith.divf %281, %282 : vector<1x128xf32>
    %284 = vector.extract_strided_slice %271 {offsets = [0, 128], sizes = [1, 128], strides = [1, 1]} : vector<1x384xf32> to vector<1x128xf32>
    %285 = vector.extract_strided_slice %275 {offsets = [0, 128], sizes = [1, 128], strides = [1, 1]} : vector<1x384xf32> to vector<1x128xf32>
    %286 = arith.addf %284, %285 : vector<1x128xf32>
    %287 = arith.negf %286 : vector<1x128xf32>
    %288 = math.exp %287 : vector<1x128xf32>
    %cst_76 = arith.constant 1.000000e+00 : f32
    %289 = vector.broadcast %cst_76 : f32 to vector<1x128xf32>
    %290 = arith.addf %289, %288 : vector<1x128xf32>
    %291 = arith.divf %289, %290 : vector<1x128xf32>
    %292 = vector.extract_strided_slice %271 {offsets = [0, 256], sizes = [1, 128], strides = [1, 1]} : vector<1x384xf32> to vector<1x128xf32>
    %293 = vector.extract_strided_slice %275 {offsets = [0, 256], sizes = [1, 128], strides = [1, 1]} : vector<1x384xf32> to vector<1x128xf32>
    %294 = arith.mulf %283, %293 : vector<1x128xf32>
    %295 = arith.addf %292, %294 : vector<1x128xf32>
    %296 = math.tanh %295 : vector<1x128xf32>
    %cst_77 = arith.constant 1.000000e+00 : f32
    %297 = vector.broadcast %cst_77 : f32 to vector<1x128xf32>
    %298 = arith.subf %297, %291 : vector<1x128xf32>
    %299 = arith.mulf %298, %296 : vector<1x128xf32>
    %300 = arith.mulf %291, %225 : vector<1x128xf32>
    %301 = arith.addf %299, %300 : vector<1x128xf32>
    %c3_i32 = arith.constant 3 : i32
    %302 = vector.broadcast %c3_i32 : i32 to vector<8x128xi32>
    %303 = arith.cmpi eq, %8, %302 : vector<8x128xi32>
    %cst_78 = arith.constant 0.000000e+00 : f32
    %304 = vector.shape_cast %270 : vector<1x128xf32> to vector<1x128xf32>
    %305 = vector.broadcast %304 : vector<1x128xf32> to vector<8x128xf32>
    %306 = vector.broadcast %cst_78 : f32 to vector<8x128xf32>
    %307 = arith.select %303, %305, %306 : vector<8x128xi1>, vector<8x128xf32>
    %308 = arith.addf %239, %307 : vector<8x128xf32>
    %c4_i32 = arith.constant 4 : i32
    %309 = vector.broadcast %c4_i32 : i32 to vector<8x128xi32>
    %310 = arith.cmpi eq, %8, %309 : vector<8x128xi32>
    %cst_79 = arith.constant 0.000000e+00 : f32
    %311 = vector.shape_cast %301 : vector<1x128xf32> to vector<1x128xf32>
    %312 = vector.broadcast %311 : vector<1x128xf32> to vector<8x128xf32>
    %313 = vector.broadcast %cst_79 : f32 to vector<8x128xf32>
    %314 = arith.select %310, %312, %313 : vector<8x128xi1>, vector<8x128xf32>
    %315 = arith.addf %308, %314 : vector<8x128xf32>
    %316 = vector.extract_strided_slice %6 {offsets = [4, 0], sizes = [1, 384], strides = [1, 1]} : vector<8x384xf32> to vector<1x384xf32>
    %c0_80 = arith.constant 0 : index
    %c0_81 = arith.constant 0 : index
    %317 = vector.load %arg3[%c0_80, %c0_81] : memref<128x384xf32, #tpu.memory_space<vmem>>, vector<128x384xf32>
    %cst_82 = arith.constant dense<0.000000e+00> : vector<1x384xf32>
    %318 = tpu.matmul %270, %317, %cst_82 {dimension_numbers = #tpu.dot_dimension_numbers<[1], [0], [0], [1], [0, 0, 1, 1], [], []>} : vector<1x128xf32>, vector<128x384xf32>, vector<1x384xf32> -> vector<1x384xf32>
    %c0_83 = arith.constant 0 : index
    %c0_84 = arith.constant 0 : index
    %319 = vector.load %arg4[%c0_83, %c0_84] : memref<1x384xf32, #tpu.memory_space<vmem>>, vector<1x384xf32>
    %320 = arith.addf %318, %319 : vector<1x384xf32>
    %321 = vector.extract_strided_slice %316 {offsets = [0, 0], sizes = [1, 128], strides = [1, 1]} : vector<1x384xf32> to vector<1x128xf32>
    %322 = vector.extract_strided_slice %320 {offsets = [0, 0], sizes = [1, 128], strides = [1, 1]} : vector<1x384xf32> to vector<1x128xf32>
    %323 = arith.addf %321, %322 : vector<1x128xf32>
    %324 = arith.negf %323 : vector<1x128xf32>
    %325 = math.exp %324 : vector<1x128xf32>
    %cst_85 = arith.constant 1.000000e+00 : f32
    %326 = vector.broadcast %cst_85 : f32 to vector<1x128xf32>
    %327 = arith.addf %326, %325 : vector<1x128xf32>
    %328 = arith.divf %326, %327 : vector<1x128xf32>
    %329 = vector.extract_strided_slice %316 {offsets = [0, 128], sizes = [1, 128], strides = [1, 1]} : vector<1x384xf32> to vector<1x128xf32>
    %330 = vector.extract_strided_slice %320 {offsets = [0, 128], sizes = [1, 128], strides = [1, 1]} : vector<1x384xf32> to vector<1x128xf32>
    %331 = arith.addf %329, %330 : vector<1x128xf32>
    %332 = arith.negf %331 : vector<1x128xf32>
    %333 = math.exp %332 : vector<1x128xf32>
    %cst_86 = arith.constant 1.000000e+00 : f32
    %334 = vector.broadcast %cst_86 : f32 to vector<1x128xf32>
    %335 = arith.addf %334, %333 : vector<1x128xf32>
    %336 = arith.divf %334, %335 : vector<1x128xf32>
    %337 = vector.extract_strided_slice %316 {offsets = [0, 256], sizes = [1, 128], strides = [1, 1]} : vector<1x384xf32> to vector<1x128xf32>
    %338 = vector.extract_strided_slice %320 {offsets = [0, 256], sizes = [1, 128], strides = [1, 1]} : vector<1x384xf32> to vector<1x128xf32>
    %339 = arith.mulf %328, %338 : vector<1x128xf32>
    %340 = arith.addf %337, %339 : vector<1x128xf32>
    %341 = math.tanh %340 : vector<1x128xf32>
    %cst_87 = arith.constant 1.000000e+00 : f32
    %342 = vector.broadcast %cst_87 : f32 to vector<1x128xf32>
    %343 = arith.subf %342, %336 : vector<1x128xf32>
    %344 = arith.mulf %343, %341 : vector<1x128xf32>
    %345 = arith.mulf %336, %270 : vector<1x128xf32>
    %346 = arith.addf %344, %345 : vector<1x128xf32>
    %347 = vector.extract_strided_slice %7 {offsets = [3, 0], sizes = [1, 384], strides = [1, 1]} : vector<8x384xf32> to vector<1x384xf32>
    %c0_88 = arith.constant 0 : index
    %c0_89 = arith.constant 0 : index
    %348 = vector.load %arg5[%c0_88, %c0_89] : memref<128x384xf32, #tpu.memory_space<vmem>>, vector<128x384xf32>
    %cst_90 = arith.constant dense<0.000000e+00> : vector<1x384xf32>
    %349 = tpu.matmul %301, %348, %cst_90 {dimension_numbers = #tpu.dot_dimension_numbers<[1], [0], [0], [1], [0, 0, 1, 1], [], []>} : vector<1x128xf32>, vector<128x384xf32>, vector<1x384xf32> -> vector<1x384xf32>
    %c0_91 = arith.constant 0 : index
    %c0_92 = arith.constant 0 : index
    %350 = vector.load %arg6[%c0_91, %c0_92] : memref<1x384xf32, #tpu.memory_space<vmem>>, vector<1x384xf32>
    %351 = arith.addf %349, %350 : vector<1x384xf32>
    %352 = vector.extract_strided_slice %347 {offsets = [0, 0], sizes = [1, 128], strides = [1, 1]} : vector<1x384xf32> to vector<1x128xf32>
    %353 = vector.extract_strided_slice %351 {offsets = [0, 0], sizes = [1, 128], strides = [1, 1]} : vector<1x384xf32> to vector<1x128xf32>
    %354 = arith.addf %352, %353 : vector<1x128xf32>
    %355 = arith.negf %354 : vector<1x128xf32>
    %356 = math.exp %355 : vector<1x128xf32>
    %cst_93 = arith.constant 1.000000e+00 : f32
    %357 = vector.broadcast %cst_93 : f32 to vector<1x128xf32>
    %358 = arith.addf %357, %356 : vector<1x128xf32>
    %359 = arith.divf %357, %358 : vector<1x128xf32>
    %360 = vector.extract_strided_slice %347 {offsets = [0, 128], sizes = [1, 128], strides = [1, 1]} : vector<1x384xf32> to vector<1x128xf32>
    %361 = vector.extract_strided_slice %351 {offsets = [0, 128], sizes = [1, 128], strides = [1, 1]} : vector<1x384xf32> to vector<1x128xf32>
    %362 = arith.addf %360, %361 : vector<1x128xf32>
    %363 = arith.negf %362 : vector<1x128xf32>
    %364 = math.exp %363 : vector<1x128xf32>
    %cst_94 = arith.constant 1.000000e+00 : f32
    %365 = vector.broadcast %cst_94 : f32 to vector<1x128xf32>
    %366 = arith.addf %365, %364 : vector<1x128xf32>
    %367 = arith.divf %365, %366 : vector<1x128xf32>
    %368 = vector.extract_strided_slice %347 {offsets = [0, 256], sizes = [1, 128], strides = [1, 1]} : vector<1x384xf32> to vector<1x128xf32>
    %369 = vector.extract_strided_slice %351 {offsets = [0, 256], sizes = [1, 128], strides = [1, 1]} : vector<1x384xf32> to vector<1x128xf32>
    %370 = arith.mulf %359, %369 : vector<1x128xf32>
    %371 = arith.addf %368, %370 : vector<1x128xf32>
    %372 = math.tanh %371 : vector<1x128xf32>
    %cst_95 = arith.constant 1.000000e+00 : f32
    %373 = vector.broadcast %cst_95 : f32 to vector<1x128xf32>
    %374 = arith.subf %373, %367 : vector<1x128xf32>
    %375 = arith.mulf %374, %372 : vector<1x128xf32>
    %376 = arith.mulf %367, %301 : vector<1x128xf32>
    %377 = arith.addf %375, %376 : vector<1x128xf32>
    %c4_i32_96 = arith.constant 4 : i32
    %378 = vector.broadcast %c4_i32_96 : i32 to vector<8x128xi32>
    %379 = arith.cmpi eq, %8, %378 : vector<8x128xi32>
    %cst_97 = arith.constant 0.000000e+00 : f32
    %380 = vector.shape_cast %346 : vector<1x128xf32> to vector<1x128xf32>
    %381 = vector.broadcast %380 : vector<1x128xf32> to vector<8x128xf32>
    %382 = vector.broadcast %cst_97 : f32 to vector<8x128xf32>
    %383 = arith.select %379, %381, %382 : vector<8x128xi1>, vector<8x128xf32>
    %384 = arith.addf %315, %383 : vector<8x128xf32>
    %c3_i32_98 = arith.constant 3 : i32
    %385 = vector.broadcast %c3_i32_98 : i32 to vector<8x128xi32>
    %386 = arith.cmpi eq, %8, %385 : vector<8x128xi32>
    %cst_99 = arith.constant 0.000000e+00 : f32
    %387 = vector.shape_cast %377 : vector<1x128xf32> to vector<1x128xf32>
    %388 = vector.broadcast %387 : vector<1x128xf32> to vector<8x128xf32>
    %389 = vector.broadcast %cst_99 : f32 to vector<8x128xf32>
    %390 = arith.select %386, %388, %389 : vector<8x128xi1>, vector<8x128xf32>
    %391 = arith.addf %384, %390 : vector<8x128xf32>
    %392 = vector.extract_strided_slice %6 {offsets = [5, 0], sizes = [1, 384], strides = [1, 1]} : vector<8x384xf32> to vector<1x384xf32>
    %c0_100 = arith.constant 0 : index
    %c0_101 = arith.constant 0 : index
    %393 = vector.load %arg3[%c0_100, %c0_101] : memref<128x384xf32, #tpu.memory_space<vmem>>, vector<128x384xf32>
    %cst_102 = arith.constant dense<0.000000e+00> : vector<1x384xf32>
    %394 = tpu.matmul %346, %393, %cst_102 {dimension_numbers = #tpu.dot_dimension_numbers<[1], [0], [0], [1], [0, 0, 1, 1], [], []>} : vector<1x128xf32>, vector<128x384xf32>, vector<1x384xf32> -> vector<1x384xf32>
    %c0_103 = arith.constant 0 : index
    %c0_104 = arith.constant 0 : index
    %395 = vector.load %arg4[%c0_103, %c0_104] : memref<1x384xf32, #tpu.memory_space<vmem>>, vector<1x384xf32>
    %396 = arith.addf %394, %395 : vector<1x384xf32>
    %397 = vector.extract_strided_slice %392 {offsets = [0, 0], sizes = [1, 128], strides = [1, 1]} : vector<1x384xf32> to vector<1x128xf32>
    %398 = vector.extract_strided_slice %396 {offsets = [0, 0], sizes = [1, 128], strides = [1, 1]} : vector<1x384xf32> to vector<1x128xf32>
    %399 = arith.addf %397, %398 : vector<1x128xf32>
    %400 = arith.negf %399 : vector<1x128xf32>
    %401 = math.exp %400 : vector<1x128xf32>
    %cst_105 = arith.constant 1.000000e+00 : f32
    %402 = vector.broadcast %cst_105 : f32 to vector<1x128xf32>
    %403 = arith.addf %402, %401 : vector<1x128xf32>
    %404 = arith.divf %402, %403 : vector<1x128xf32>
    %405 = vector.extract_strided_slice %392 {offsets = [0, 128], sizes = [1, 128], strides = [1, 1]} : vector<1x384xf32> to vector<1x128xf32>
    %406 = vector.extract_strided_slice %396 {offsets = [0, 128], sizes = [1, 128], strides = [1, 1]} : vector<1x384xf32> to vector<1x128xf32>
    %407 = arith.addf %405, %406 : vector<1x128xf32>
    %408 = arith.negf %407 : vector<1x128xf32>
    %409 = math.exp %408 : vector<1x128xf32>
    %cst_106 = arith.constant 1.000000e+00 : f32
    %410 = vector.broadcast %cst_106 : f32 to vector<1x128xf32>
    %411 = arith.addf %410, %409 : vector<1x128xf32>
    %412 = arith.divf %410, %411 : vector<1x128xf32>
    %413 = vector.extract_strided_slice %392 {offsets = [0, 256], sizes = [1, 128], strides = [1, 1]} : vector<1x384xf32> to vector<1x128xf32>
    %414 = vector.extract_strided_slice %396 {offsets = [0, 256], sizes = [1, 128], strides = [1, 1]} : vector<1x384xf32> to vector<1x128xf32>
    %415 = arith.mulf %404, %414 : vector<1x128xf32>
    %416 = arith.addf %413, %415 : vector<1x128xf32>
    %417 = math.tanh %416 : vector<1x128xf32>
    %cst_107 = arith.constant 1.000000e+00 : f32
    %418 = vector.broadcast %cst_107 : f32 to vector<1x128xf32>
    %419 = arith.subf %418, %412 : vector<1x128xf32>
    %420 = arith.mulf %419, %417 : vector<1x128xf32>
    %421 = arith.mulf %412, %346 : vector<1x128xf32>
    %422 = arith.addf %420, %421 : vector<1x128xf32>
    %423 = vector.extract_strided_slice %7 {offsets = [2, 0], sizes = [1, 384], strides = [1, 1]} : vector<8x384xf32> to vector<1x384xf32>
    %c0_108 = arith.constant 0 : index
    %c0_109 = arith.constant 0 : index
    %424 = vector.load %arg5[%c0_108, %c0_109] : memref<128x384xf32, #tpu.memory_space<vmem>>, vector<128x384xf32>
    %cst_110 = arith.constant dense<0.000000e+00> : vector<1x384xf32>
    %425 = tpu.matmul %377, %424, %cst_110 {dimension_numbers = #tpu.dot_dimension_numbers<[1], [0], [0], [1], [0, 0, 1, 1], [], []>} : vector<1x128xf32>, vector<128x384xf32>, vector<1x384xf32> -> vector<1x384xf32>
    %c0_111 = arith.constant 0 : index
    %c0_112 = arith.constant 0 : index
    %426 = vector.load %arg6[%c0_111, %c0_112] : memref<1x384xf32, #tpu.memory_space<vmem>>, vector<1x384xf32>
    %427 = arith.addf %425, %426 : vector<1x384xf32>
    %428 = vector.extract_strided_slice %423 {offsets = [0, 0], sizes = [1, 128], strides = [1, 1]} : vector<1x384xf32> to vector<1x128xf32>
    %429 = vector.extract_strided_slice %427 {offsets = [0, 0], sizes = [1, 128], strides = [1, 1]} : vector<1x384xf32> to vector<1x128xf32>
    %430 = arith.addf %428, %429 : vector<1x128xf32>
    %431 = arith.negf %430 : vector<1x128xf32>
    %432 = math.exp %431 : vector<1x128xf32>
    %cst_113 = arith.constant 1.000000e+00 : f32
    %433 = vector.broadcast %cst_113 : f32 to vector<1x128xf32>
    %434 = arith.addf %433, %432 : vector<1x128xf32>
    %435 = arith.divf %433, %434 : vector<1x128xf32>
    %436 = vector.extract_strided_slice %423 {offsets = [0, 128], sizes = [1, 128], strides = [1, 1]} : vector<1x384xf32> to vector<1x128xf32>
    %437 = vector.extract_strided_slice %427 {offsets = [0, 128], sizes = [1, 128], strides = [1, 1]} : vector<1x384xf32> to vector<1x128xf32>
    %438 = arith.addf %436, %437 : vector<1x128xf32>
    %439 = arith.negf %438 : vector<1x128xf32>
    %440 = math.exp %439 : vector<1x128xf32>
    %cst_114 = arith.constant 1.000000e+00 : f32
    %441 = vector.broadcast %cst_114 : f32 to vector<1x128xf32>
    %442 = arith.addf %441, %440 : vector<1x128xf32>
    %443 = arith.divf %441, %442 : vector<1x128xf32>
    %444 = vector.extract_strided_slice %423 {offsets = [0, 256], sizes = [1, 128], strides = [1, 1]} : vector<1x384xf32> to vector<1x128xf32>
    %445 = vector.extract_strided_slice %427 {offsets = [0, 256], sizes = [1, 128], strides = [1, 1]} : vector<1x384xf32> to vector<1x128xf32>
    %446 = arith.mulf %435, %445 : vector<1x128xf32>
    %447 = arith.addf %444, %446 : vector<1x128xf32>
    %448 = math.tanh %447 : vector<1x128xf32>
    %cst_115 = arith.constant 1.000000e+00 : f32
    %449 = vector.broadcast %cst_115 : f32 to vector<1x128xf32>
    %450 = arith.subf %449, %443 : vector<1x128xf32>
    %451 = arith.mulf %450, %448 : vector<1x128xf32>
    %452 = arith.mulf %443, %377 : vector<1x128xf32>
    %453 = arith.addf %451, %452 : vector<1x128xf32>
    %c5_i32_116 = arith.constant 5 : i32
    %454 = vector.broadcast %c5_i32_116 : i32 to vector<8x128xi32>
    %455 = arith.cmpi eq, %8, %454 : vector<8x128xi32>
    %cst_117 = arith.constant 0.000000e+00 : f32
    %456 = vector.shape_cast %422 : vector<1x128xf32> to vector<1x128xf32>
    %457 = vector.broadcast %456 : vector<1x128xf32> to vector<8x128xf32>
    %458 = vector.broadcast %cst_117 : f32 to vector<8x128xf32>
    %459 = arith.select %455, %457, %458 : vector<8x128xi1>, vector<8x128xf32>
    %460 = arith.addf %391, %459 : vector<8x128xf32>
    %c2_i32_118 = arith.constant 2 : i32
    %461 = vector.broadcast %c2_i32_118 : i32 to vector<8x128xi32>
    %462 = arith.cmpi eq, %8, %461 : vector<8x128xi32>
    %cst_119 = arith.constant 0.000000e+00 : f32
    %463 = vector.shape_cast %453 : vector<1x128xf32> to vector<1x128xf32>
    %464 = vector.broadcast %463 : vector<1x128xf32> to vector<8x128xf32>
    %465 = vector.broadcast %cst_119 : f32 to vector<8x128xf32>
    %466 = arith.select %462, %464, %465 : vector<8x128xi1>, vector<8x128xf32>
    %467 = arith.addf %460, %466 : vector<8x128xf32>
    %468 = vector.extract_strided_slice %6 {offsets = [6, 0], sizes = [1, 384], strides = [1, 1]} : vector<8x384xf32> to vector<1x384xf32>
    %c0_120 = arith.constant 0 : index
    %c0_121 = arith.constant 0 : index
    %469 = vector.load %arg3[%c0_120, %c0_121] : memref<128x384xf32, #tpu.memory_space<vmem>>, vector<128x384xf32>
    %cst_122 = arith.constant dense<0.000000e+00> : vector<1x384xf32>
    %470 = tpu.matmul %422, %469, %cst_122 {dimension_numbers = #tpu.dot_dimension_numbers<[1], [0], [0], [1], [0, 0, 1, 1], [], []>} : vector<1x128xf32>, vector<128x384xf32>, vector<1x384xf32> -> vector<1x384xf32>
    %c0_123 = arith.constant 0 : index
    %c0_124 = arith.constant 0 : index
    %471 = vector.load %arg4[%c0_123, %c0_124] : memref<1x384xf32, #tpu.memory_space<vmem>>, vector<1x384xf32>
    %472 = arith.addf %470, %471 : vector<1x384xf32>
    %473 = vector.extract_strided_slice %468 {offsets = [0, 0], sizes = [1, 128], strides = [1, 1]} : vector<1x384xf32> to vector<1x128xf32>
    %474 = vector.extract_strided_slice %472 {offsets = [0, 0], sizes = [1, 128], strides = [1, 1]} : vector<1x384xf32> to vector<1x128xf32>
    %475 = arith.addf %473, %474 : vector<1x128xf32>
    %476 = arith.negf %475 : vector<1x128xf32>
    %477 = math.exp %476 : vector<1x128xf32>
    %cst_125 = arith.constant 1.000000e+00 : f32
    %478 = vector.broadcast %cst_125 : f32 to vector<1x128xf32>
    %479 = arith.addf %478, %477 : vector<1x128xf32>
    %480 = arith.divf %478, %479 : vector<1x128xf32>
    %481 = vector.extract_strided_slice %468 {offsets = [0, 128], sizes = [1, 128], strides = [1, 1]} : vector<1x384xf32> to vector<1x128xf32>
    %482 = vector.extract_strided_slice %472 {offsets = [0, 128], sizes = [1, 128], strides = [1, 1]} : vector<1x384xf32> to vector<1x128xf32>
    %483 = arith.addf %481, %482 : vector<1x128xf32>
    %484 = arith.negf %483 : vector<1x128xf32>
    %485 = math.exp %484 : vector<1x128xf32>
    %cst_126 = arith.constant 1.000000e+00 : f32
    %486 = vector.broadcast %cst_126 : f32 to vector<1x128xf32>
    %487 = arith.addf %486, %485 : vector<1x128xf32>
    %488 = arith.divf %486, %487 : vector<1x128xf32>
    %489 = vector.extract_strided_slice %468 {offsets = [0, 256], sizes = [1, 128], strides = [1, 1]} : vector<1x384xf32> to vector<1x128xf32>
    %490 = vector.extract_strided_slice %472 {offsets = [0, 256], sizes = [1, 128], strides = [1, 1]} : vector<1x384xf32> to vector<1x128xf32>
    %491 = arith.mulf %480, %490 : vector<1x128xf32>
    %492 = arith.addf %489, %491 : vector<1x128xf32>
    %493 = math.tanh %492 : vector<1x128xf32>
    %cst_127 = arith.constant 1.000000e+00 : f32
    %494 = vector.broadcast %cst_127 : f32 to vector<1x128xf32>
    %495 = arith.subf %494, %488 : vector<1x128xf32>
    %496 = arith.mulf %495, %493 : vector<1x128xf32>
    %497 = arith.mulf %488, %422 : vector<1x128xf32>
    %498 = arith.addf %496, %497 : vector<1x128xf32>
    %499 = vector.extract_strided_slice %7 {offsets = [1, 0], sizes = [1, 384], strides = [1, 1]} : vector<8x384xf32> to vector<1x384xf32>
    %c0_128 = arith.constant 0 : index
    %c0_129 = arith.constant 0 : index
    %500 = vector.load %arg5[%c0_128, %c0_129] : memref<128x384xf32, #tpu.memory_space<vmem>>, vector<128x384xf32>
    %cst_130 = arith.constant dense<0.000000e+00> : vector<1x384xf32>
    %501 = tpu.matmul %453, %500, %cst_130 {dimension_numbers = #tpu.dot_dimension_numbers<[1], [0], [0], [1], [0, 0, 1, 1], [], []>} : vector<1x128xf32>, vector<128x384xf32>, vector<1x384xf32> -> vector<1x384xf32>
    %c0_131 = arith.constant 0 : index
    %c0_132 = arith.constant 0 : index
    %502 = vector.load %arg6[%c0_131, %c0_132] : memref<1x384xf32, #tpu.memory_space<vmem>>, vector<1x384xf32>
    %503 = arith.addf %501, %502 : vector<1x384xf32>
    %504 = vector.extract_strided_slice %499 {offsets = [0, 0], sizes = [1, 128], strides = [1, 1]} : vector<1x384xf32> to vector<1x128xf32>
    %505 = vector.extract_strided_slice %503 {offsets = [0, 0], sizes = [1, 128], strides = [1, 1]} : vector<1x384xf32> to vector<1x128xf32>
    %506 = arith.addf %504, %505 : vector<1x128xf32>
    %507 = arith.negf %506 : vector<1x128xf32>
    %508 = math.exp %507 : vector<1x128xf32>
    %cst_133 = arith.constant 1.000000e+00 : f32
    %509 = vector.broadcast %cst_133 : f32 to vector<1x128xf32>
    %510 = arith.addf %509, %508 : vector<1x128xf32>
    %511 = arith.divf %509, %510 : vector<1x128xf32>
    %512 = vector.extract_strided_slice %499 {offsets = [0, 128], sizes = [1, 128], strides = [1, 1]} : vector<1x384xf32> to vector<1x128xf32>
    %513 = vector.extract_strided_slice %503 {offsets = [0, 128], sizes = [1, 128], strides = [1, 1]} : vector<1x384xf32> to vector<1x128xf32>
    %514 = arith.addf %512, %513 : vector<1x128xf32>
    %515 = arith.negf %514 : vector<1x128xf32>
    %516 = math.exp %515 : vector<1x128xf32>
    %cst_134 = arith.constant 1.000000e+00 : f32
    %517 = vector.broadcast %cst_134 : f32 to vector<1x128xf32>
    %518 = arith.addf %517, %516 : vector<1x128xf32>
    %519 = arith.divf %517, %518 : vector<1x128xf32>
    %520 = vector.extract_strided_slice %499 {offsets = [0, 256], sizes = [1, 128], strides = [1, 1]} : vector<1x384xf32> to vector<1x128xf32>
    %521 = vector.extract_strided_slice %503 {offsets = [0, 256], sizes = [1, 128], strides = [1, 1]} : vector<1x384xf32> to vector<1x128xf32>
    %522 = arith.mulf %511, %521 : vector<1x128xf32>
    %523 = arith.addf %520, %522 : vector<1x128xf32>
    %524 = math.tanh %523 : vector<1x128xf32>
    %cst_135 = arith.constant 1.000000e+00 : f32
    %525 = vector.broadcast %cst_135 : f32 to vector<1x128xf32>
    %526 = arith.subf %525, %519 : vector<1x128xf32>
    %527 = arith.mulf %526, %524 : vector<1x128xf32>
    %528 = arith.mulf %519, %453 : vector<1x128xf32>
    %529 = arith.addf %527, %528 : vector<1x128xf32>
    %c6_i32_136 = arith.constant 6 : i32
    %530 = vector.broadcast %c6_i32_136 : i32 to vector<8x128xi32>
    %531 = arith.cmpi eq, %8, %530 : vector<8x128xi32>
    %cst_137 = arith.constant 0.000000e+00 : f32
    %532 = vector.shape_cast %498 : vector<1x128xf32> to vector<1x128xf32>
    %533 = vector.broadcast %532 : vector<1x128xf32> to vector<8x128xf32>
    %534 = vector.broadcast %cst_137 : f32 to vector<8x128xf32>
    %535 = arith.select %531, %533, %534 : vector<8x128xi1>, vector<8x128xf32>
    %536 = arith.addf %467, %535 : vector<8x128xf32>
    %c1_i32_138 = arith.constant 1 : i32
    %537 = vector.broadcast %c1_i32_138 : i32 to vector<8x128xi32>
    %538 = arith.cmpi eq, %8, %537 : vector<8x128xi32>
    %cst_139 = arith.constant 0.000000e+00 : f32
    %539 = vector.shape_cast %529 : vector<1x128xf32> to vector<1x128xf32>
    %540 = vector.broadcast %539 : vector<1x128xf32> to vector<8x128xf32>
    %541 = vector.broadcast %cst_139 : f32 to vector<8x128xf32>
    %542 = arith.select %538, %540, %541 : vector<8x128xi1>, vector<8x128xf32>
    %543 = arith.addf %536, %542 : vector<8x128xf32>
    %544 = vector.extract_strided_slice %6 {offsets = [7, 0], sizes = [1, 384], strides = [1, 1]} : vector<8x384xf32> to vector<1x384xf32>
    %c0_140 = arith.constant 0 : index
    %c0_141 = arith.constant 0 : index
    %545 = vector.load %arg3[%c0_140, %c0_141] : memref<128x384xf32, #tpu.memory_space<vmem>>, vector<128x384xf32>
    %cst_142 = arith.constant dense<0.000000e+00> : vector<1x384xf32>
    %546 = tpu.matmul %498, %545, %cst_142 {dimension_numbers = #tpu.dot_dimension_numbers<[1], [0], [0], [1], [0, 0, 1, 1], [], []>} : vector<1x128xf32>, vector<128x384xf32>, vector<1x384xf32> -> vector<1x384xf32>
    %c0_143 = arith.constant 0 : index
    %c0_144 = arith.constant 0 : index
    %547 = vector.load %arg4[%c0_143, %c0_144] : memref<1x384xf32, #tpu.memory_space<vmem>>, vector<1x384xf32>
    %548 = arith.addf %546, %547 : vector<1x384xf32>
    %549 = vector.extract_strided_slice %544 {offsets = [0, 0], sizes = [1, 128], strides = [1, 1]} : vector<1x384xf32> to vector<1x128xf32>
    %550 = vector.extract_strided_slice %548 {offsets = [0, 0], sizes = [1, 128], strides = [1, 1]} : vector<1x384xf32> to vector<1x128xf32>
    %551 = arith.addf %549, %550 : vector<1x128xf32>
    %552 = arith.negf %551 : vector<1x128xf32>
    %553 = math.exp %552 : vector<1x128xf32>
    %cst_145 = arith.constant 1.000000e+00 : f32
    %554 = vector.broadcast %cst_145 : f32 to vector<1x128xf32>
    %555 = arith.addf %554, %553 : vector<1x128xf32>
    %556 = arith.divf %554, %555 : vector<1x128xf32>
    %557 = vector.extract_strided_slice %544 {offsets = [0, 128], sizes = [1, 128], strides = [1, 1]} : vector<1x384xf32> to vector<1x128xf32>
    %558 = vector.extract_strided_slice %548 {offsets = [0, 128], sizes = [1, 128], strides = [1, 1]} : vector<1x384xf32> to vector<1x128xf32>
    %559 = arith.addf %557, %558 : vector<1x128xf32>
    %560 = arith.negf %559 : vector<1x128xf32>
    %561 = math.exp %560 : vector<1x128xf32>
    %cst_146 = arith.constant 1.000000e+00 : f32
    %562 = vector.broadcast %cst_146 : f32 to vector<1x128xf32>
    %563 = arith.addf %562, %561 : vector<1x128xf32>
    %564 = arith.divf %562, %563 : vector<1x128xf32>
    %565 = vector.extract_strided_slice %544 {offsets = [0, 256], sizes = [1, 128], strides = [1, 1]} : vector<1x384xf32> to vector<1x128xf32>
    %566 = vector.extract_strided_slice %548 {offsets = [0, 256], sizes = [1, 128], strides = [1, 1]} : vector<1x384xf32> to vector<1x128xf32>
    %567 = arith.mulf %556, %566 : vector<1x128xf32>
    %568 = arith.addf %565, %567 : vector<1x128xf32>
    %569 = math.tanh %568 : vector<1x128xf32>
    %cst_147 = arith.constant 1.000000e+00 : f32
    %570 = vector.broadcast %cst_147 : f32 to vector<1x128xf32>
    %571 = arith.subf %570, %564 : vector<1x128xf32>
    %572 = arith.mulf %571, %569 : vector<1x128xf32>
    %573 = arith.mulf %564, %498 : vector<1x128xf32>
    %574 = arith.addf %572, %573 : vector<1x128xf32>
    %575 = vector.extract_strided_slice %7 {offsets = [0, 0], sizes = [1, 384], strides = [1, 1]} : vector<8x384xf32> to vector<1x384xf32>
    %c0_148 = arith.constant 0 : index
    %c0_149 = arith.constant 0 : index
    %576 = vector.load %arg5[%c0_148, %c0_149] : memref<128x384xf32, #tpu.memory_space<vmem>>, vector<128x384xf32>
    %cst_150 = arith.constant dense<0.000000e+00> : vector<1x384xf32>
    %577 = tpu.matmul %529, %576, %cst_150 {dimension_numbers = #tpu.dot_dimension_numbers<[1], [0], [0], [1], [0, 0, 1, 1], [], []>} : vector<1x128xf32>, vector<128x384xf32>, vector<1x384xf32> -> vector<1x384xf32>
    %c0_151 = arith.constant 0 : index
    %c0_152 = arith.constant 0 : index
    %578 = vector.load %arg6[%c0_151, %c0_152] : memref<1x384xf32, #tpu.memory_space<vmem>>, vector<1x384xf32>
    %579 = arith.addf %577, %578 : vector<1x384xf32>
    %580 = vector.extract_strided_slice %575 {offsets = [0, 0], sizes = [1, 128], strides = [1, 1]} : vector<1x384xf32> to vector<1x128xf32>
    %581 = vector.extract_strided_slice %579 {offsets = [0, 0], sizes = [1, 128], strides = [1, 1]} : vector<1x384xf32> to vector<1x128xf32>
    %582 = arith.addf %580, %581 : vector<1x128xf32>
    %583 = arith.negf %582 : vector<1x128xf32>
    %584 = math.exp %583 : vector<1x128xf32>
    %cst_153 = arith.constant 1.000000e+00 : f32
    %585 = vector.broadcast %cst_153 : f32 to vector<1x128xf32>
    %586 = arith.addf %585, %584 : vector<1x128xf32>
    %587 = arith.divf %585, %586 : vector<1x128xf32>
    %588 = vector.extract_strided_slice %575 {offsets = [0, 128], sizes = [1, 128], strides = [1, 1]} : vector<1x384xf32> to vector<1x128xf32>
    %589 = vector.extract_strided_slice %579 {offsets = [0, 128], sizes = [1, 128], strides = [1, 1]} : vector<1x384xf32> to vector<1x128xf32>
    %590 = arith.addf %588, %589 : vector<1x128xf32>
    %591 = arith.negf %590 : vector<1x128xf32>
    %592 = math.exp %591 : vector<1x128xf32>
    %cst_154 = arith.constant 1.000000e+00 : f32
    %593 = vector.broadcast %cst_154 : f32 to vector<1x128xf32>
    %594 = arith.addf %593, %592 : vector<1x128xf32>
    %595 = arith.divf %593, %594 : vector<1x128xf32>
    %596 = vector.extract_strided_slice %575 {offsets = [0, 256], sizes = [1, 128], strides = [1, 1]} : vector<1x384xf32> to vector<1x128xf32>
    %597 = vector.extract_strided_slice %579 {offsets = [0, 256], sizes = [1, 128], strides = [1, 1]} : vector<1x384xf32> to vector<1x128xf32>
    %598 = arith.mulf %587, %597 : vector<1x128xf32>
    %599 = arith.addf %596, %598 : vector<1x128xf32>
    %600 = math.tanh %599 : vector<1x128xf32>
    %cst_155 = arith.constant 1.000000e+00 : f32
    %601 = vector.broadcast %cst_155 : f32 to vector<1x128xf32>
    %602 = arith.subf %601, %595 : vector<1x128xf32>
    %603 = arith.mulf %602, %600 : vector<1x128xf32>
    %604 = arith.mulf %595, %529 : vector<1x128xf32>
    %605 = arith.addf %603, %604 : vector<1x128xf32>
    %c7_i32_156 = arith.constant 7 : i32
    %606 = vector.broadcast %c7_i32_156 : i32 to vector<8x128xi32>
    %607 = arith.cmpi eq, %8, %606 : vector<8x128xi32>
    %cst_157 = arith.constant 0.000000e+00 : f32
    %608 = vector.shape_cast %574 : vector<1x128xf32> to vector<1x128xf32>
    %609 = vector.broadcast %608 : vector<1x128xf32> to vector<8x128xf32>
    %610 = vector.broadcast %cst_157 : f32 to vector<8x128xf32>
    %611 = arith.select %607, %609, %610 : vector<8x128xi1>, vector<8x128xf32>
    %612 = arith.addf %543, %611 : vector<8x128xf32>
    %c0_i32_158 = arith.constant 0 : i32
    %613 = vector.broadcast %c0_i32_158 : i32 to vector<8x128xi32>
    %614 = arith.cmpi eq, %8, %613 : vector<8x128xi32>
    %cst_159 = arith.constant 0.000000e+00 : f32
    %615 = vector.shape_cast %605 : vector<1x128xf32> to vector<1x128xf32>
    %616 = vector.broadcast %615 : vector<1x128xf32> to vector<8x128xf32>
    %617 = vector.broadcast %cst_159 : f32 to vector<8x128xf32>
    %618 = arith.select %614, %616, %617 : vector<8x128xi1>, vector<8x128xf32>
    %619 = arith.addf %612, %618 : vector<8x128xf32>
    %c0_160 = arith.constant 0 : index
    %c0_161 = arith.constant 0 : index
    %620 = vector.load %arg7[%c0_160, %c0_161] : memref<8x128xf32, #tpu.memory_space<vmem>>, vector<8x128xf32>
    tpu.vector_store %arg7[%c0_160, %c0_161], %619 {strides = array<i32>} : memref<8x128xf32, #tpu.memory_space<vmem>>, vector<8x128xf32>,
    %c0_162 = arith.constant 0 : index
    %c0_163 = arith.constant 0 : index
    %621 = vector.load %arg8[%c0_162, %c0_163] : memref<1x128xf32, #tpu.memory_space<vmem>>, vector<1x128xf32>
    tpu.vector_store %arg8[%c0_162, %c0_163], %574 {strides = array<i32>} : memref<1x128xf32, #tpu.memory_space<vmem>>, vector<1x128xf32>,
    return
  }
}

module attributes {stable_mosaic.version = 11 : i64} {
  func.func @decode_kernel(%arg0: memref<256x384xf32, #tpu.memory_space<vmem>>, %arg1: memref<8x128xf32, #tpu.memory_space<vmem>>, %arg2: memref<128x8xf32, #tpu.memory_space<vmem>>, %arg3: memref<1x128xf32, #tpu.memory_space<vmem>>, %arg4: memref<128x384xf32, #tpu.memory_space<vmem>>, %arg5: memref<1x384xf32, #tpu.memory_space<vmem>>, %arg6: memref<256x128xf32, #tpu.memory_space<vmem>>, %arg7: memref<1x128xf32, #tpu.memory_space<vmem>>, %arg8: memref<128x256xf32, #tpu.memory_space<vmem>>, %arg9: memref<1x256xf32, #tpu.memory_space<vmem>>, %arg10: memref<1x6xi32, #tpu.memory_space<vmem>>, %arg11: memref<1x6xf32, #tpu.memory_space<vmem>>) attributes {dimension_semantics = [], scalar_prefetch = 0 : i64, scratch_operands = 0 : i64, tpu.core_type = #tpu.core_type<tc>} {
    %c0 = arith.constant 0 : index
    %c0_0 = arith.constant 0 : index
    %0 = vector.load %arg1[%c0, %c0_0] : memref<8x128xf32, #tpu.memory_space<vmem>>, vector<8x128xf32>
    %c0_1 = arith.constant 0 : index
    %c0_2 = arith.constant 0 : index
    %1 = vector.load %arg2[%c0_1, %c0_2] : memref<128x8xf32, #tpu.memory_space<vmem>>, vector<128x8xf32>
    %c0_3 = arith.constant 0 : index
    %c0_4 = arith.constant 0 : index
    %2 = vector.load %arg3[%c0_3, %c0_4] : memref<1x128xf32, #tpu.memory_space<vmem>>, vector<1x128xf32>
    %3 = tpu.iota {dimensions = array<i32: 1>} : vector<1x256xi32>
    %4 = tpu.iota {dimensions = array<i32: 1>} : vector<1x6xi32>
    %c0_i32 = arith.constant 0 : i32
    %5 = vector.broadcast %c0_i32 : i32 to vector<1x6xi32>
    %cst = arith.constant 0.000000e+00 : f32
    %6 = vector.broadcast %cst : f32 to vector<1x6xf32>
    %c1 = arith.constant 1 : index
    %c0_5 = arith.constant 0 : index
    %7 = vector.load %arg0[%c1, %c0_5] : memref<256x384xf32, #tpu.memory_space<vmem>>, vector<1x384xf32>
    %c0_6 = arith.constant 0 : index
    %c0_7 = arith.constant 0 : index
    %8 = vector.load %arg4[%c0_6, %c0_7] : memref<128x384xf32, #tpu.memory_space<vmem>>, vector<128x384xf32>
    %cst_8 = arith.constant dense<0.000000e+00> : vector<1x384xf32>
    %9 = tpu.matmul %2, %8, %cst_8 {dimension_numbers = #tpu.dot_dimension_numbers<[1], [0], [0], [1], [0, 0, 1, 1], [], []>} : vector<1x128xf32>, vector<128x384xf32>, vector<1x384xf32> -> vector<1x384xf32>
    %c0_9 = arith.constant 0 : index
    %c0_10 = arith.constant 0 : index
    %10 = vector.load %arg5[%c0_9, %c0_10] : memref<1x384xf32, #tpu.memory_space<vmem>>, vector<1x384xf32>
    %11 = arith.addf %9, %10 : vector<1x384xf32>
    %12 = vector.extract_strided_slice %7 {offsets = [0, 0], sizes = [1, 128], strides = [1, 1]} : vector<1x384xf32> to vector<1x128xf32>
    %13 = vector.extract_strided_slice %11 {offsets = [0, 0], sizes = [1, 128], strides = [1, 1]} : vector<1x384xf32> to vector<1x128xf32>
    %14 = arith.addf %12, %13 : vector<1x128xf32>
    %15 = arith.negf %14 : vector<1x128xf32>
    %16 = math.exp %15 : vector<1x128xf32>
    %cst_11 = arith.constant 1.000000e+00 : f32
    %17 = vector.broadcast %cst_11 : f32 to vector<1x128xf32>
    %18 = arith.addf %17, %16 : vector<1x128xf32>
    %19 = arith.divf %17, %18 : vector<1x128xf32>
    %20 = vector.extract_strided_slice %7 {offsets = [0, 128], sizes = [1, 128], strides = [1, 1]} : vector<1x384xf32> to vector<1x128xf32>
    %21 = vector.extract_strided_slice %11 {offsets = [0, 128], sizes = [1, 128], strides = [1, 1]} : vector<1x384xf32> to vector<1x128xf32>
    %22 = arith.addf %20, %21 : vector<1x128xf32>
    %23 = arith.negf %22 : vector<1x128xf32>
    %24 = math.exp %23 : vector<1x128xf32>
    %cst_12 = arith.constant 1.000000e+00 : f32
    %25 = vector.broadcast %cst_12 : f32 to vector<1x128xf32>
    %26 = arith.addf %25, %24 : vector<1x128xf32>
    %27 = arith.divf %25, %26 : vector<1x128xf32>
    %28 = vector.extract_strided_slice %7 {offsets = [0, 256], sizes = [1, 128], strides = [1, 1]} : vector<1x384xf32> to vector<1x128xf32>
    %29 = vector.extract_strided_slice %11 {offsets = [0, 256], sizes = [1, 128], strides = [1, 1]} : vector<1x384xf32> to vector<1x128xf32>
    %30 = arith.mulf %19, %29 : vector<1x128xf32>
    %31 = arith.addf %28, %30 : vector<1x128xf32>
    %32 = math.tanh %31 : vector<1x128xf32>
    %cst_13 = arith.constant 1.000000e+00 : f32
    %33 = vector.broadcast %cst_13 : f32 to vector<1x128xf32>
    %34 = arith.subf %33, %27 : vector<1x128xf32>
    %35 = arith.mulf %34, %32 : vector<1x128xf32>
    %36 = arith.mulf %27, %2 : vector<1x128xf32>
    %37 = arith.addf %35, %36 : vector<1x128xf32>
    %cst_14 = arith.constant dense<0.000000e+00> : vector<1x8xf32>
    %38 = tpu.matmul %37, %1, %cst_14 {dimension_numbers = #tpu.dot_dimension_numbers<[1], [0], [0], [1], [0, 0, 1, 1], [], []>} : vector<1x128xf32>, vector<128x8xf32>, vector<1x8xf32> -> vector<1x8xf32>
    %cst_15 = arith.constant dense<0xFF800000> : vector<1xf32>
    %39 = vector.multi_reduction <maximumf>, %38, %cst_15 [1] : vector<1x8xf32> to vector<1xf32>
    %40 = vector.shape_cast %39 : vector<1xf32> to vector<1x1xf32>
    %41 = vector.broadcast %40 : vector<1x1xf32> to vector<1x8xf32>
    %42 = arith.subf %38, %41 : vector<1x8xf32>
    %43 = math.exp %42 : vector<1x8xf32>
    %cst_16 = arith.constant dense<0.000000e+00> : vector<1xf32>
    %44 = vector.multi_reduction <add>, %43, %cst_16 [1] : vector<1x8xf32> to vector<1xf32>
    %45 = vector.shape_cast %44 : vector<1xf32> to vector<1x1xf32>
    %46 = tpu.reciprocal %45 : vector<1x1xf32> -> vector<1x1xf32>
    %47 = vector.broadcast %46 : vector<1x1xf32> to vector<1x8xf32>
    %48 = arith.mulf %43, %47 : vector<1x8xf32>
    %cst_17 = arith.constant dense<0.000000e+00> : vector<1x128xf32>
    %49 = tpu.matmul %48, %0, %cst_17 {dimension_numbers = #tpu.dot_dimension_numbers<[1], [0], [0], [1], [0, 0, 1, 1], [], []>} : vector<1x8xf32>, vector<8x128xf32>, vector<1x128xf32> -> vector<1x128xf32>
    %50 = tpu.concatenate %37, %49 in 1 : vector<1x128xf32>, vector<1x128xf32> -> vector<1x256xf32>
    %c0_18 = arith.constant 0 : index
    %c0_19 = arith.constant 0 : index
    %51 = vector.load %arg6[%c0_18, %c0_19] : memref<256x128xf32, #tpu.memory_space<vmem>>, vector<256x128xf32>
    %cst_20 = arith.constant dense<0.000000e+00> : vector<1x128xf32>
    %52 = tpu.matmul %50, %51, %cst_20 {dimension_numbers = #tpu.dot_dimension_numbers<[1], [0], [0], [1], [0, 0, 1, 1], [], []>} : vector<1x256xf32>, vector<256x128xf32>, vector<1x128xf32> -> vector<1x128xf32>
    %c0_21 = arith.constant 0 : index
    %c0_22 = arith.constant 0 : index
    %53 = vector.load %arg7[%c0_21, %c0_22] : memref<1x128xf32, #tpu.memory_space<vmem>>, vector<1x128xf32>
    %54 = arith.addf %52, %53 : vector<1x128xf32>
    %55 = math.tanh %54 : vector<1x128xf32>
    %c0_23 = arith.constant 0 : index
    %c0_24 = arith.constant 0 : index
    %56 = vector.load %arg8[%c0_23, %c0_24] : memref<128x256xf32, #tpu.memory_space<vmem>>, vector<128x256xf32>
    %cst_25 = arith.constant dense<0.000000e+00> : vector<1x256xf32>
    %57 = tpu.matmul %55, %56, %cst_25 {dimension_numbers = #tpu.dot_dimension_numbers<[1], [0], [0], [1], [0, 0, 1, 1], [], []>} : vector<1x128xf32>, vector<128x256xf32>, vector<1x256xf32> -> vector<1x256xf32>
    %c0_26 = arith.constant 0 : index
    %c0_27 = arith.constant 0 : index
    %58 = vector.load %arg9[%c0_26, %c0_27] : memref<1x256xf32, #tpu.memory_space<vmem>>, vector<1x256xf32>
    %59 = arith.addf %57, %58 : vector<1x256xf32>
    %cst_28 = arith.constant dense<0xFF800000> : vector<1xf32>
    %60 = vector.multi_reduction <maximumf>, %59, %cst_28 [1] : vector<1x256xf32> to vector<1xf32>
    %61 = vector.shape_cast %60 : vector<1xf32> to vector<1x1xf32>
    %62 = vector.broadcast %61 : vector<1x1xf32> to vector<1x256xf32>
    %63 = arith.subf %59, %62 : vector<1x256xf32>
    %64 = math.exp %63 : vector<1x256xf32>
    %cst_29 = arith.constant dense<0.000000e+00> : vector<1xf32>
    %65 = vector.multi_reduction <add>, %64, %cst_29 [1] : vector<1x256xf32> to vector<1xf32>
    %66 = vector.shape_cast %65 : vector<1xf32> to vector<1x1xf32>
    %67 = tpu.reciprocal %66 {approx = true} : vector<1x1xf32> -> vector<1x1xf32>
    %68 = vector.broadcast %61 : vector<1x1xf32> to vector<1x256xf32>
    %69 = arith.cmpf oeq, %59, %68 : vector<1x256xf32>
    %c256_i32 = arith.constant 256 : i32
    %70 = vector.broadcast %c256_i32 : i32 to vector<1x256xi32>
    %71 = arith.select %69, %3, %70 : vector<1x256xi1>, vector<1x256xi32>
    %cst_30 = arith.constant dense<2147483647> : vector<1xi32>
    %72 = vector.multi_reduction <minsi>, %71, %cst_30 [1] : vector<1x256xi32> to vector<1xi32>
    %73 = vector.shape_cast %72 : vector<1xi32> to vector<1x1xi32>
    %c0_i32_31 = arith.constant 0 : i32
    %74 = vector.broadcast %c0_i32_31 : i32 to vector<1x6xi32>
    %75 = arith.cmpi eq, %4, %74 : vector<1x6xi32>
    %76 = vector.shape_cast %73 : vector<1x1xi32> to vector<1x1xi32>
    %77 = vector.broadcast %76 : vector<1x1xi32> to vector<1x6xi32>
    %78 = arith.select %75, %77, %5 : vector<1x6xi1>, vector<1x6xi32>
    %c0_i32_32 = arith.constant 0 : i32
    %79 = vector.broadcast %c0_i32_32 : i32 to vector<1x6xi32>
    %80 = arith.cmpi eq, %4, %79 : vector<1x6xi32>
    %81 = vector.shape_cast %67 : vector<1x1xf32> to vector<1x1xf32>
    %82 = vector.broadcast %81 : vector<1x1xf32> to vector<1x6xf32>
    %83 = arith.select %80, %82, %6 : vector<1x6xi1>, vector<1x6xf32>
    %84 = vector.broadcast %73 : vector<1x1xi32> to vector<1x256xi32>
    %85 = arith.cmpi eq, %3, %84 : vector<1x256xi32>
    %86 = arith.extui %85 : vector<1x256xi1> to vector<1x256xi32>
    %87 = arith.sitofp %86 : vector<1x256xi32> to vector<1x256xf32>
    %c0_33 = arith.constant 0 : index
    %c0_34 = arith.constant 0 : index
    %88 = vector.load %arg0[%c0_33, %c0_34] : memref<256x384xf32, #tpu.memory_space<vmem>>, vector<256x384xf32>
    %cst_35 = arith.constant dense<0.000000e+00> : vector<1x384xf32>
    %89 = tpu.matmul %87, %88, %cst_35 {dimension_numbers = #tpu.dot_dimension_numbers<[1], [0], [0], [1], [0, 0, 1, 1], [], []>} : vector<1x256xf32>, vector<256x384xf32>, vector<1x384xf32> -> vector<1x384xf32>
    %c0_36 = arith.constant 0 : index
    %c0_37 = arith.constant 0 : index
    %90 = vector.load %arg4[%c0_36, %c0_37] : memref<128x384xf32, #tpu.memory_space<vmem>>, vector<128x384xf32>
    %cst_38 = arith.constant dense<0.000000e+00> : vector<1x384xf32>
    %91 = tpu.matmul %37, %90, %cst_38 {dimension_numbers = #tpu.dot_dimension_numbers<[1], [0], [0], [1], [0, 0, 1, 1], [], []>} : vector<1x128xf32>, vector<128x384xf32>, vector<1x384xf32> -> vector<1x384xf32>
    %c0_39 = arith.constant 0 : index
    %c0_40 = arith.constant 0 : index
    %92 = vector.load %arg5[%c0_39, %c0_40] : memref<1x384xf32, #tpu.memory_space<vmem>>, vector<1x384xf32>
    %93 = arith.addf %91, %92 : vector<1x384xf32>
    %94 = vector.extract_strided_slice %89 {offsets = [0, 0], sizes = [1, 128], strides = [1, 1]} : vector<1x384xf32> to vector<1x128xf32>
    %95 = vector.extract_strided_slice %93 {offsets = [0, 0], sizes = [1, 128], strides = [1, 1]} : vector<1x384xf32> to vector<1x128xf32>
    %96 = arith.addf %94, %95 : vector<1x128xf32>
    %97 = arith.negf %96 : vector<1x128xf32>
    %98 = math.exp %97 : vector<1x128xf32>
    %cst_41 = arith.constant 1.000000e+00 : f32
    %99 = vector.broadcast %cst_41 : f32 to vector<1x128xf32>
    %100 = arith.addf %99, %98 : vector<1x128xf32>
    %101 = arith.divf %99, %100 : vector<1x128xf32>
    %102 = vector.extract_strided_slice %89 {offsets = [0, 128], sizes = [1, 128], strides = [1, 1]} : vector<1x384xf32> to vector<1x128xf32>
    %103 = vector.extract_strided_slice %93 {offsets = [0, 128], sizes = [1, 128], strides = [1, 1]} : vector<1x384xf32> to vector<1x128xf32>
    %104 = arith.addf %102, %103 : vector<1x128xf32>
    %105 = arith.negf %104 : vector<1x128xf32>
    %106 = math.exp %105 : vector<1x128xf32>
    %cst_42 = arith.constant 1.000000e+00 : f32
    %107 = vector.broadcast %cst_42 : f32 to vector<1x128xf32>
    %108 = arith.addf %107, %106 : vector<1x128xf32>
    %109 = arith.divf %107, %108 : vector<1x128xf32>
    %110 = vector.extract_strided_slice %89 {offsets = [0, 256], sizes = [1, 128], strides = [1, 1]} : vector<1x384xf32> to vector<1x128xf32>
    %111 = vector.extract_strided_slice %93 {offsets = [0, 256], sizes = [1, 128], strides = [1, 1]} : vector<1x384xf32> to vector<1x128xf32>
    %112 = arith.mulf %101, %111 : vector<1x128xf32>
    %113 = arith.addf %110, %112 : vector<1x128xf32>
    %114 = math.tanh %113 : vector<1x128xf32>
    %cst_43 = arith.constant 1.000000e+00 : f32
    %115 = vector.broadcast %cst_43 : f32 to vector<1x128xf32>
    %116 = arith.subf %115, %109 : vector<1x128xf32>
    %117 = arith.mulf %116, %114 : vector<1x128xf32>
    %118 = arith.mulf %109, %37 : vector<1x128xf32>
    %119 = arith.addf %117, %118 : vector<1x128xf32>
    %cst_44 = arith.constant dense<0.000000e+00> : vector<1x8xf32>
    %120 = tpu.matmul %119, %1, %cst_44 {dimension_numbers = #tpu.dot_dimension_numbers<[1], [0], [0], [1], [0, 0, 1, 1], [], []>} : vector<1x128xf32>, vector<128x8xf32>, vector<1x8xf32> -> vector<1x8xf32>
    %cst_45 = arith.constant dense<0xFF800000> : vector<1xf32>
    %121 = vector.multi_reduction <maximumf>, %120, %cst_45 [1] : vector<1x8xf32> to vector<1xf32>
    %122 = vector.shape_cast %121 : vector<1xf32> to vector<1x1xf32>
    %123 = vector.broadcast %122 : vector<1x1xf32> to vector<1x8xf32>
    %124 = arith.subf %120, %123 : vector<1x8xf32>
    %125 = math.exp %124 : vector<1x8xf32>
    %cst_46 = arith.constant dense<0.000000e+00> : vector<1xf32>
    %126 = vector.multi_reduction <add>, %125, %cst_46 [1] : vector<1x8xf32> to vector<1xf32>
    %127 = vector.shape_cast %126 : vector<1xf32> to vector<1x1xf32>
    %128 = tpu.reciprocal %127 : vector<1x1xf32> -> vector<1x1xf32>
    %129 = vector.broadcast %128 : vector<1x1xf32> to vector<1x8xf32>
    %130 = arith.mulf %125, %129 : vector<1x8xf32>
    %cst_47 = arith.constant dense<0.000000e+00> : vector<1x128xf32>
    %131 = tpu.matmul %130, %0, %cst_47 {dimension_numbers = #tpu.dot_dimension_numbers<[1], [0], [0], [1], [0, 0, 1, 1], [], []>} : vector<1x8xf32>, vector<8x128xf32>, vector<1x128xf32> -> vector<1x128xf32>
    %132 = tpu.concatenate %119, %131 in 1 : vector<1x128xf32>, vector<1x128xf32> -> vector<1x256xf32>
    %c0_48 = arith.constant 0 : index
    %c0_49 = arith.constant 0 : index
    %133 = vector.load %arg6[%c0_48, %c0_49] : memref<256x128xf32, #tpu.memory_space<vmem>>, vector<256x128xf32>
    %cst_50 = arith.constant dense<0.000000e+00> : vector<1x128xf32>
    %134 = tpu.matmul %132, %133, %cst_50 {dimension_numbers = #tpu.dot_dimension_numbers<[1], [0], [0], [1], [0, 0, 1, 1], [], []>} : vector<1x256xf32>, vector<256x128xf32>, vector<1x128xf32> -> vector<1x128xf32>
    %c0_51 = arith.constant 0 : index
    %c0_52 = arith.constant 0 : index
    %135 = vector.load %arg7[%c0_51, %c0_52] : memref<1x128xf32, #tpu.memory_space<vmem>>, vector<1x128xf32>
    %136 = arith.addf %134, %135 : vector<1x128xf32>
    %137 = math.tanh %136 : vector<1x128xf32>
    %c0_53 = arith.constant 0 : index
    %c0_54 = arith.constant 0 : index
    %138 = vector.load %arg8[%c0_53, %c0_54] : memref<128x256xf32, #tpu.memory_space<vmem>>, vector<128x256xf32>
    %cst_55 = arith.constant dense<0.000000e+00> : vector<1x256xf32>
    %139 = tpu.matmul %137, %138, %cst_55 {dimension_numbers = #tpu.dot_dimension_numbers<[1], [0], [0], [1], [0, 0, 1, 1], [], []>} : vector<1x128xf32>, vector<128x256xf32>, vector<1x256xf32> -> vector<1x256xf32>
    %c0_56 = arith.constant 0 : index
    %c0_57 = arith.constant 0 : index
    %140 = vector.load %arg9[%c0_56, %c0_57] : memref<1x256xf32, #tpu.memory_space<vmem>>, vector<1x256xf32>
    %141 = arith.addf %139, %140 : vector<1x256xf32>
    %cst_58 = arith.constant dense<0xFF800000> : vector<1xf32>
    %142 = vector.multi_reduction <maximumf>, %141, %cst_58 [1] : vector<1x256xf32> to vector<1xf32>
    %143 = vector.shape_cast %142 : vector<1xf32> to vector<1x1xf32>
    %144 = vector.broadcast %143 : vector<1x1xf32> to vector<1x256xf32>
    %145 = arith.subf %141, %144 : vector<1x256xf32>
    %146 = math.exp %145 : vector<1x256xf32>
    %cst_59 = arith.constant dense<0.000000e+00> : vector<1xf32>
    %147 = vector.multi_reduction <add>, %146, %cst_59 [1] : vector<1x256xf32> to vector<1xf32>
    %148 = vector.shape_cast %147 : vector<1xf32> to vector<1x1xf32>
    %149 = tpu.reciprocal %148 {approx = true} : vector<1x1xf32> -> vector<1x1xf32>
    %150 = vector.broadcast %143 : vector<1x1xf32> to vector<1x256xf32>
    %151 = arith.cmpf oeq, %141, %150 : vector<1x256xf32>
    %c256_i32_60 = arith.constant 256 : i32
    %152 = vector.broadcast %c256_i32_60 : i32 to vector<1x256xi32>
    %153 = arith.select %151, %3, %152 : vector<1x256xi1>, vector<1x256xi32>
    %cst_61 = arith.constant dense<2147483647> : vector<1xi32>
    %154 = vector.multi_reduction <minsi>, %153, %cst_61 [1] : vector<1x256xi32> to vector<1xi32>
    %155 = vector.shape_cast %154 : vector<1xi32> to vector<1x1xi32>
    %c1_i32 = arith.constant 1 : i32
    %156 = vector.broadcast %c1_i32 : i32 to vector<1x6xi32>
    %157 = arith.cmpi eq, %4, %156 : vector<1x6xi32>
    %158 = vector.shape_cast %155 : vector<1x1xi32> to vector<1x1xi32>
    %159 = vector.broadcast %158 : vector<1x1xi32> to vector<1x6xi32>
    %160 = arith.select %157, %159, %78 : vector<1x6xi1>, vector<1x6xi32>
    %c1_i32_62 = arith.constant 1 : i32
    %161 = vector.broadcast %c1_i32_62 : i32 to vector<1x6xi32>
    %162 = arith.cmpi eq, %4, %161 : vector<1x6xi32>
    %163 = vector.shape_cast %149 : vector<1x1xf32> to vector<1x1xf32>
    %164 = vector.broadcast %163 : vector<1x1xf32> to vector<1x6xf32>
    %165 = arith.select %162, %164, %83 : vector<1x6xi1>, vector<1x6xf32>
    %166 = vector.broadcast %155 : vector<1x1xi32> to vector<1x256xi32>
    %167 = arith.cmpi eq, %3, %166 : vector<1x256xi32>
    %168 = arith.extui %167 : vector<1x256xi1> to vector<1x256xi32>
    %169 = arith.sitofp %168 : vector<1x256xi32> to vector<1x256xf32>
    %c0_63 = arith.constant 0 : index
    %c0_64 = arith.constant 0 : index
    %170 = vector.load %arg0[%c0_63, %c0_64] : memref<256x384xf32, #tpu.memory_space<vmem>>, vector<256x384xf32>
    %cst_65 = arith.constant dense<0.000000e+00> : vector<1x384xf32>
    %171 = tpu.matmul %169, %170, %cst_65 {dimension_numbers = #tpu.dot_dimension_numbers<[1], [0], [0], [1], [0, 0, 1, 1], [], []>} : vector<1x256xf32>, vector<256x384xf32>, vector<1x384xf32> -> vector<1x384xf32>
    %c0_66 = arith.constant 0 : index
    %c0_67 = arith.constant 0 : index
    %172 = vector.load %arg4[%c0_66, %c0_67] : memref<128x384xf32, #tpu.memory_space<vmem>>, vector<128x384xf32>
    %cst_68 = arith.constant dense<0.000000e+00> : vector<1x384xf32>
    %173 = tpu.matmul %119, %172, %cst_68 {dimension_numbers = #tpu.dot_dimension_numbers<[1], [0], [0], [1], [0, 0, 1, 1], [], []>} : vector<1x128xf32>, vector<128x384xf32>, vector<1x384xf32> -> vector<1x384xf32>
    %c0_69 = arith.constant 0 : index
    %c0_70 = arith.constant 0 : index
    %174 = vector.load %arg5[%c0_69, %c0_70] : memref<1x384xf32, #tpu.memory_space<vmem>>, vector<1x384xf32>
    %175 = arith.addf %173, %174 : vector<1x384xf32>
    %176 = vector.extract_strided_slice %171 {offsets = [0, 0], sizes = [1, 128], strides = [1, 1]} : vector<1x384xf32> to vector<1x128xf32>
    %177 = vector.extract_strided_slice %175 {offsets = [0, 0], sizes = [1, 128], strides = [1, 1]} : vector<1x384xf32> to vector<1x128xf32>
    %178 = arith.addf %176, %177 : vector<1x128xf32>
    %179 = arith.negf %178 : vector<1x128xf32>
    %180 = math.exp %179 : vector<1x128xf32>
    %cst_71 = arith.constant 1.000000e+00 : f32
    %181 = vector.broadcast %cst_71 : f32 to vector<1x128xf32>
    %182 = arith.addf %181, %180 : vector<1x128xf32>
    %183 = arith.divf %181, %182 : vector<1x128xf32>
    %184 = vector.extract_strided_slice %171 {offsets = [0, 128], sizes = [1, 128], strides = [1, 1]} : vector<1x384xf32> to vector<1x128xf32>
    %185 = vector.extract_strided_slice %175 {offsets = [0, 128], sizes = [1, 128], strides = [1, 1]} : vector<1x384xf32> to vector<1x128xf32>
    %186 = arith.addf %184, %185 : vector<1x128xf32>
    %187 = arith.negf %186 : vector<1x128xf32>
    %188 = math.exp %187 : vector<1x128xf32>
    %cst_72 = arith.constant 1.000000e+00 : f32
    %189 = vector.broadcast %cst_72 : f32 to vector<1x128xf32>
    %190 = arith.addf %189, %188 : vector<1x128xf32>
    %191 = arith.divf %189, %190 : vector<1x128xf32>
    %192 = vector.extract_strided_slice %171 {offsets = [0, 256], sizes = [1, 128], strides = [1, 1]} : vector<1x384xf32> to vector<1x128xf32>
    %193 = vector.extract_strided_slice %175 {offsets = [0, 256], sizes = [1, 128], strides = [1, 1]} : vector<1x384xf32> to vector<1x128xf32>
    %194 = arith.mulf %183, %193 : vector<1x128xf32>
    %195 = arith.addf %192, %194 : vector<1x128xf32>
    %196 = math.tanh %195 : vector<1x128xf32>
    %cst_73 = arith.constant 1.000000e+00 : f32
    %197 = vector.broadcast %cst_73 : f32 to vector<1x128xf32>
    %198 = arith.subf %197, %191 : vector<1x128xf32>
    %199 = arith.mulf %198, %196 : vector<1x128xf32>
    %200 = arith.mulf %191, %119 : vector<1x128xf32>
    %201 = arith.addf %199, %200 : vector<1x128xf32>
    %cst_74 = arith.constant dense<0.000000e+00> : vector<1x8xf32>
    %202 = tpu.matmul %201, %1, %cst_74 {dimension_numbers = #tpu.dot_dimension_numbers<[1], [0], [0], [1], [0, 0, 1, 1], [], []>} : vector<1x128xf32>, vector<128x8xf32>, vector<1x8xf32> -> vector<1x8xf32>
    %cst_75 = arith.constant dense<0xFF800000> : vector<1xf32>
    %203 = vector.multi_reduction <maximumf>, %202, %cst_75 [1] : vector<1x8xf32> to vector<1xf32>
    %204 = vector.shape_cast %203 : vector<1xf32> to vector<1x1xf32>
    %205 = vector.broadcast %204 : vector<1x1xf32> to vector<1x8xf32>
    %206 = arith.subf %202, %205 : vector<1x8xf32>
    %207 = math.exp %206 : vector<1x8xf32>
    %cst_76 = arith.constant dense<0.000000e+00> : vector<1xf32>
    %208 = vector.multi_reduction <add>, %207, %cst_76 [1] : vector<1x8xf32> to vector<1xf32>
    %209 = vector.shape_cast %208 : vector<1xf32> to vector<1x1xf32>
    %210 = tpu.reciprocal %209 : vector<1x1xf32> -> vector<1x1xf32>
    %211 = vector.broadcast %210 : vector<1x1xf32> to vector<1x8xf32>
    %212 = arith.mulf %207, %211 : vector<1x8xf32>
    %cst_77 = arith.constant dense<0.000000e+00> : vector<1x128xf32>
    %213 = tpu.matmul %212, %0, %cst_77 {dimension_numbers = #tpu.dot_dimension_numbers<[1], [0], [0], [1], [0, 0, 1, 1], [], []>} : vector<1x8xf32>, vector<8x128xf32>, vector<1x128xf32> -> vector<1x128xf32>
    %214 = tpu.concatenate %201, %213 in 1 : vector<1x128xf32>, vector<1x128xf32> -> vector<1x256xf32>
    %c0_78 = arith.constant 0 : index
    %c0_79 = arith.constant 0 : index
    %215 = vector.load %arg6[%c0_78, %c0_79] : memref<256x128xf32, #tpu.memory_space<vmem>>, vector<256x128xf32>
    %cst_80 = arith.constant dense<0.000000e+00> : vector<1x128xf32>
    %216 = tpu.matmul %214, %215, %cst_80 {dimension_numbers = #tpu.dot_dimension_numbers<[1], [0], [0], [1], [0, 0, 1, 1], [], []>} : vector<1x256xf32>, vector<256x128xf32>, vector<1x128xf32> -> vector<1x128xf32>
    %c0_81 = arith.constant 0 : index
    %c0_82 = arith.constant 0 : index
    %217 = vector.load %arg7[%c0_81, %c0_82] : memref<1x128xf32, #tpu.memory_space<vmem>>, vector<1x128xf32>
    %218 = arith.addf %216, %217 : vector<1x128xf32>
    %219 = math.tanh %218 : vector<1x128xf32>
    %c0_83 = arith.constant 0 : index
    %c0_84 = arith.constant 0 : index
    %220 = vector.load %arg8[%c0_83, %c0_84] : memref<128x256xf32, #tpu.memory_space<vmem>>, vector<128x256xf32>
    %cst_85 = arith.constant dense<0.000000e+00> : vector<1x256xf32>
    %221 = tpu.matmul %219, %220, %cst_85 {dimension_numbers = #tpu.dot_dimension_numbers<[1], [0], [0], [1], [0, 0, 1, 1], [], []>} : vector<1x128xf32>, vector<128x256xf32>, vector<1x256xf32> -> vector<1x256xf32>
    %c0_86 = arith.constant 0 : index
    %c0_87 = arith.constant 0 : index
    %222 = vector.load %arg9[%c0_86, %c0_87] : memref<1x256xf32, #tpu.memory_space<vmem>>, vector<1x256xf32>
    %223 = arith.addf %221, %222 : vector<1x256xf32>
    %cst_88 = arith.constant dense<0xFF800000> : vector<1xf32>
    %224 = vector.multi_reduction <maximumf>, %223, %cst_88 [1] : vector<1x256xf32> to vector<1xf32>
    %225 = vector.shape_cast %224 : vector<1xf32> to vector<1x1xf32>
    %226 = vector.broadcast %225 : vector<1x1xf32> to vector<1x256xf32>
    %227 = arith.subf %223, %226 : vector<1x256xf32>
    %228 = math.exp %227 : vector<1x256xf32>
    %cst_89 = arith.constant dense<0.000000e+00> : vector<1xf32>
    %229 = vector.multi_reduction <add>, %228, %cst_89 [1] : vector<1x256xf32> to vector<1xf32>
    %230 = vector.shape_cast %229 : vector<1xf32> to vector<1x1xf32>
    %231 = tpu.reciprocal %230 {approx = true} : vector<1x1xf32> -> vector<1x1xf32>
    %232 = vector.broadcast %225 : vector<1x1xf32> to vector<1x256xf32>
    %233 = arith.cmpf oeq, %223, %232 : vector<1x256xf32>
    %c256_i32_90 = arith.constant 256 : i32
    %234 = vector.broadcast %c256_i32_90 : i32 to vector<1x256xi32>
    %235 = arith.select %233, %3, %234 : vector<1x256xi1>, vector<1x256xi32>
    %cst_91 = arith.constant dense<2147483647> : vector<1xi32>
    %236 = vector.multi_reduction <minsi>, %235, %cst_91 [1] : vector<1x256xi32> to vector<1xi32>
    %237 = vector.shape_cast %236 : vector<1xi32> to vector<1x1xi32>
    %c2_i32 = arith.constant 2 : i32
    %238 = vector.broadcast %c2_i32 : i32 to vector<1x6xi32>
    %239 = arith.cmpi eq, %4, %238 : vector<1x6xi32>
    %240 = vector.shape_cast %237 : vector<1x1xi32> to vector<1x1xi32>
    %241 = vector.broadcast %240 : vector<1x1xi32> to vector<1x6xi32>
    %242 = arith.select %239, %241, %160 : vector<1x6xi1>, vector<1x6xi32>
    %c2_i32_92 = arith.constant 2 : i32
    %243 = vector.broadcast %c2_i32_92 : i32 to vector<1x6xi32>
    %244 = arith.cmpi eq, %4, %243 : vector<1x6xi32>
    %245 = vector.shape_cast %231 : vector<1x1xf32> to vector<1x1xf32>
    %246 = vector.broadcast %245 : vector<1x1xf32> to vector<1x6xf32>
    %247 = arith.select %244, %246, %165 : vector<1x6xi1>, vector<1x6xf32>
    %248 = vector.broadcast %237 : vector<1x1xi32> to vector<1x256xi32>
    %249 = arith.cmpi eq, %3, %248 : vector<1x256xi32>
    %250 = arith.extui %249 : vector<1x256xi1> to vector<1x256xi32>
    %251 = arith.sitofp %250 : vector<1x256xi32> to vector<1x256xf32>
    %c0_93 = arith.constant 0 : index
    %c0_94 = arith.constant 0 : index
    %252 = vector.load %arg0[%c0_93, %c0_94] : memref<256x384xf32, #tpu.memory_space<vmem>>, vector<256x384xf32>
    %cst_95 = arith.constant dense<0.000000e+00> : vector<1x384xf32>
    %253 = tpu.matmul %251, %252, %cst_95 {dimension_numbers = #tpu.dot_dimension_numbers<[1], [0], [0], [1], [0, 0, 1, 1], [], []>} : vector<1x256xf32>, vector<256x384xf32>, vector<1x384xf32> -> vector<1x384xf32>
    %c0_96 = arith.constant 0 : index
    %c0_97 = arith.constant 0 : index
    %254 = vector.load %arg4[%c0_96, %c0_97] : memref<128x384xf32, #tpu.memory_space<vmem>>, vector<128x384xf32>
    %cst_98 = arith.constant dense<0.000000e+00> : vector<1x384xf32>
    %255 = tpu.matmul %201, %254, %cst_98 {dimension_numbers = #tpu.dot_dimension_numbers<[1], [0], [0], [1], [0, 0, 1, 1], [], []>} : vector<1x128xf32>, vector<128x384xf32>, vector<1x384xf32> -> vector<1x384xf32>
    %c0_99 = arith.constant 0 : index
    %c0_100 = arith.constant 0 : index
    %256 = vector.load %arg5[%c0_99, %c0_100] : memref<1x384xf32, #tpu.memory_space<vmem>>, vector<1x384xf32>
    %257 = arith.addf %255, %256 : vector<1x384xf32>
    %258 = vector.extract_strided_slice %253 {offsets = [0, 0], sizes = [1, 128], strides = [1, 1]} : vector<1x384xf32> to vector<1x128xf32>
    %259 = vector.extract_strided_slice %257 {offsets = [0, 0], sizes = [1, 128], strides = [1, 1]} : vector<1x384xf32> to vector<1x128xf32>
    %260 = arith.addf %258, %259 : vector<1x128xf32>
    %261 = arith.negf %260 : vector<1x128xf32>
    %262 = math.exp %261 : vector<1x128xf32>
    %cst_101 = arith.constant 1.000000e+00 : f32
    %263 = vector.broadcast %cst_101 : f32 to vector<1x128xf32>
    %264 = arith.addf %263, %262 : vector<1x128xf32>
    %265 = arith.divf %263, %264 : vector<1x128xf32>
    %266 = vector.extract_strided_slice %253 {offsets = [0, 128], sizes = [1, 128], strides = [1, 1]} : vector<1x384xf32> to vector<1x128xf32>
    %267 = vector.extract_strided_slice %257 {offsets = [0, 128], sizes = [1, 128], strides = [1, 1]} : vector<1x384xf32> to vector<1x128xf32>
    %268 = arith.addf %266, %267 : vector<1x128xf32>
    %269 = arith.negf %268 : vector<1x128xf32>
    %270 = math.exp %269 : vector<1x128xf32>
    %cst_102 = arith.constant 1.000000e+00 : f32
    %271 = vector.broadcast %cst_102 : f32 to vector<1x128xf32>
    %272 = arith.addf %271, %270 : vector<1x128xf32>
    %273 = arith.divf %271, %272 : vector<1x128xf32>
    %274 = vector.extract_strided_slice %253 {offsets = [0, 256], sizes = [1, 128], strides = [1, 1]} : vector<1x384xf32> to vector<1x128xf32>
    %275 = vector.extract_strided_slice %257 {offsets = [0, 256], sizes = [1, 128], strides = [1, 1]} : vector<1x384xf32> to vector<1x128xf32>
    %276 = arith.mulf %265, %275 : vector<1x128xf32>
    %277 = arith.addf %274, %276 : vector<1x128xf32>
    %278 = math.tanh %277 : vector<1x128xf32>
    %cst_103 = arith.constant 1.000000e+00 : f32
    %279 = vector.broadcast %cst_103 : f32 to vector<1x128xf32>
    %280 = arith.subf %279, %273 : vector<1x128xf32>
    %281 = arith.mulf %280, %278 : vector<1x128xf32>
    %282 = arith.mulf %273, %201 : vector<1x128xf32>
    %283 = arith.addf %281, %282 : vector<1x128xf32>
    %cst_104 = arith.constant dense<0.000000e+00> : vector<1x8xf32>
    %284 = tpu.matmul %283, %1, %cst_104 {dimension_numbers = #tpu.dot_dimension_numbers<[1], [0], [0], [1], [0, 0, 1, 1], [], []>} : vector<1x128xf32>, vector<128x8xf32>, vector<1x8xf32> -> vector<1x8xf32>
    %cst_105 = arith.constant dense<0xFF800000> : vector<1xf32>
    %285 = vector.multi_reduction <maximumf>, %284, %cst_105 [1] : vector<1x8xf32> to vector<1xf32>
    %286 = vector.shape_cast %285 : vector<1xf32> to vector<1x1xf32>
    %287 = vector.broadcast %286 : vector<1x1xf32> to vector<1x8xf32>
    %288 = arith.subf %284, %287 : vector<1x8xf32>
    %289 = math.exp %288 : vector<1x8xf32>
    %cst_106 = arith.constant dense<0.000000e+00> : vector<1xf32>
    %290 = vector.multi_reduction <add>, %289, %cst_106 [1] : vector<1x8xf32> to vector<1xf32>
    %291 = vector.shape_cast %290 : vector<1xf32> to vector<1x1xf32>
    %292 = tpu.reciprocal %291 : vector<1x1xf32> -> vector<1x1xf32>
    %293 = vector.broadcast %292 : vector<1x1xf32> to vector<1x8xf32>
    %294 = arith.mulf %289, %293 : vector<1x8xf32>
    %cst_107 = arith.constant dense<0.000000e+00> : vector<1x128xf32>
    %295 = tpu.matmul %294, %0, %cst_107 {dimension_numbers = #tpu.dot_dimension_numbers<[1], [0], [0], [1], [0, 0, 1, 1], [], []>} : vector<1x8xf32>, vector<8x128xf32>, vector<1x128xf32> -> vector<1x128xf32>
    %296 = tpu.concatenate %283, %295 in 1 : vector<1x128xf32>, vector<1x128xf32> -> vector<1x256xf32>
    %c0_108 = arith.constant 0 : index
    %c0_109 = arith.constant 0 : index
    %297 = vector.load %arg6[%c0_108, %c0_109] : memref<256x128xf32, #tpu.memory_space<vmem>>, vector<256x128xf32>
    %cst_110 = arith.constant dense<0.000000e+00> : vector<1x128xf32>
    %298 = tpu.matmul %296, %297, %cst_110 {dimension_numbers = #tpu.dot_dimension_numbers<[1], [0], [0], [1], [0, 0, 1, 1], [], []>} : vector<1x256xf32>, vector<256x128xf32>, vector<1x128xf32> -> vector<1x128xf32>
    %c0_111 = arith.constant 0 : index
    %c0_112 = arith.constant 0 : index
    %299 = vector.load %arg7[%c0_111, %c0_112] : memref<1x128xf32, #tpu.memory_space<vmem>>, vector<1x128xf32>
    %300 = arith.addf %298, %299 : vector<1x128xf32>
    %301 = math.tanh %300 : vector<1x128xf32>
    %c0_113 = arith.constant 0 : index
    %c0_114 = arith.constant 0 : index
    %302 = vector.load %arg8[%c0_113, %c0_114] : memref<128x256xf32, #tpu.memory_space<vmem>>, vector<128x256xf32>
    %cst_115 = arith.constant dense<0.000000e+00> : vector<1x256xf32>
    %303 = tpu.matmul %301, %302, %cst_115 {dimension_numbers = #tpu.dot_dimension_numbers<[1], [0], [0], [1], [0, 0, 1, 1], [], []>} : vector<1x128xf32>, vector<128x256xf32>, vector<1x256xf32> -> vector<1x256xf32>
    %c0_116 = arith.constant 0 : index
    %c0_117 = arith.constant 0 : index
    %304 = vector.load %arg9[%c0_116, %c0_117] : memref<1x256xf32, #tpu.memory_space<vmem>>, vector<1x256xf32>
    %305 = arith.addf %303, %304 : vector<1x256xf32>
    %cst_118 = arith.constant dense<0xFF800000> : vector<1xf32>
    %306 = vector.multi_reduction <maximumf>, %305, %cst_118 [1] : vector<1x256xf32> to vector<1xf32>
    %307 = vector.shape_cast %306 : vector<1xf32> to vector<1x1xf32>
    %308 = vector.broadcast %307 : vector<1x1xf32> to vector<1x256xf32>
    %309 = arith.subf %305, %308 : vector<1x256xf32>
    %310 = math.exp %309 : vector<1x256xf32>
    %cst_119 = arith.constant dense<0.000000e+00> : vector<1xf32>
    %311 = vector.multi_reduction <add>, %310, %cst_119 [1] : vector<1x256xf32> to vector<1xf32>
    %312 = vector.shape_cast %311 : vector<1xf32> to vector<1x1xf32>
    %313 = tpu.reciprocal %312 {approx = true} : vector<1x1xf32> -> vector<1x1xf32>
    %314 = vector.broadcast %307 : vector<1x1xf32> to vector<1x256xf32>
    %315 = arith.cmpf oeq, %305, %314 : vector<1x256xf32>
    %c256_i32_120 = arith.constant 256 : i32
    %316 = vector.broadcast %c256_i32_120 : i32 to vector<1x256xi32>
    %317 = arith.select %315, %3, %316 : vector<1x256xi1>, vector<1x256xi32>
    %cst_121 = arith.constant dense<2147483647> : vector<1xi32>
    %318 = vector.multi_reduction <minsi>, %317, %cst_121 [1] : vector<1x256xi32> to vector<1xi32>
    %319 = vector.shape_cast %318 : vector<1xi32> to vector<1x1xi32>
    %c3_i32 = arith.constant 3 : i32
    %320 = vector.broadcast %c3_i32 : i32 to vector<1x6xi32>
    %321 = arith.cmpi eq, %4, %320 : vector<1x6xi32>
    %322 = vector.shape_cast %319 : vector<1x1xi32> to vector<1x1xi32>
    %323 = vector.broadcast %322 : vector<1x1xi32> to vector<1x6xi32>
    %324 = arith.select %321, %323, %242 : vector<1x6xi1>, vector<1x6xi32>
    %c3_i32_122 = arith.constant 3 : i32
    %325 = vector.broadcast %c3_i32_122 : i32 to vector<1x6xi32>
    %326 = arith.cmpi eq, %4, %325 : vector<1x6xi32>
    %327 = vector.shape_cast %313 : vector<1x1xf32> to vector<1x1xf32>
    %328 = vector.broadcast %327 : vector<1x1xf32> to vector<1x6xf32>
    %329 = arith.select %326, %328, %247 : vector<1x6xi1>, vector<1x6xf32>
    %330 = vector.broadcast %319 : vector<1x1xi32> to vector<1x256xi32>
    %331 = arith.cmpi eq, %3, %330 : vector<1x256xi32>
    %332 = arith.extui %331 : vector<1x256xi1> to vector<1x256xi32>
    %333 = arith.sitofp %332 : vector<1x256xi32> to vector<1x256xf32>
    %c0_123 = arith.constant 0 : index
    %c0_124 = arith.constant 0 : index
    %334 = vector.load %arg0[%c0_123, %c0_124] : memref<256x384xf32, #tpu.memory_space<vmem>>, vector<256x384xf32>
    %cst_125 = arith.constant dense<0.000000e+00> : vector<1x384xf32>
    %335 = tpu.matmul %333, %334, %cst_125 {dimension_numbers = #tpu.dot_dimension_numbers<[1], [0], [0], [1], [0, 0, 1, 1], [], []>} : vector<1x256xf32>, vector<256x384xf32>, vector<1x384xf32> -> vector<1x384xf32>
    %c0_126 = arith.constant 0 : index
    %c0_127 = arith.constant 0 : index
    %336 = vector.load %arg4[%c0_126, %c0_127] : memref<128x384xf32, #tpu.memory_space<vmem>>, vector<128x384xf32>
    %cst_128 = arith.constant dense<0.000000e+00> : vector<1x384xf32>
    %337 = tpu.matmul %283, %336, %cst_128 {dimension_numbers = #tpu.dot_dimension_numbers<[1], [0], [0], [1], [0, 0, 1, 1], [], []>} : vector<1x128xf32>, vector<128x384xf32>, vector<1x384xf32> -> vector<1x384xf32>
    %c0_129 = arith.constant 0 : index
    %c0_130 = arith.constant 0 : index
    %338 = vector.load %arg5[%c0_129, %c0_130] : memref<1x384xf32, #tpu.memory_space<vmem>>, vector<1x384xf32>
    %339 = arith.addf %337, %338 : vector<1x384xf32>
    %340 = vector.extract_strided_slice %335 {offsets = [0, 0], sizes = [1, 128], strides = [1, 1]} : vector<1x384xf32> to vector<1x128xf32>
    %341 = vector.extract_strided_slice %339 {offsets = [0, 0], sizes = [1, 128], strides = [1, 1]} : vector<1x384xf32> to vector<1x128xf32>
    %342 = arith.addf %340, %341 : vector<1x128xf32>
    %343 = arith.negf %342 : vector<1x128xf32>
    %344 = math.exp %343 : vector<1x128xf32>
    %cst_131 = arith.constant 1.000000e+00 : f32
    %345 = vector.broadcast %cst_131 : f32 to vector<1x128xf32>
    %346 = arith.addf %345, %344 : vector<1x128xf32>
    %347 = arith.divf %345, %346 : vector<1x128xf32>
    %348 = vector.extract_strided_slice %335 {offsets = [0, 128], sizes = [1, 128], strides = [1, 1]} : vector<1x384xf32> to vector<1x128xf32>
    %349 = vector.extract_strided_slice %339 {offsets = [0, 128], sizes = [1, 128], strides = [1, 1]} : vector<1x384xf32> to vector<1x128xf32>
    %350 = arith.addf %348, %349 : vector<1x128xf32>
    %351 = arith.negf %350 : vector<1x128xf32>
    %352 = math.exp %351 : vector<1x128xf32>
    %cst_132 = arith.constant 1.000000e+00 : f32
    %353 = vector.broadcast %cst_132 : f32 to vector<1x128xf32>
    %354 = arith.addf %353, %352 : vector<1x128xf32>
    %355 = arith.divf %353, %354 : vector<1x128xf32>
    %356 = vector.extract_strided_slice %335 {offsets = [0, 256], sizes = [1, 128], strides = [1, 1]} : vector<1x384xf32> to vector<1x128xf32>
    %357 = vector.extract_strided_slice %339 {offsets = [0, 256], sizes = [1, 128], strides = [1, 1]} : vector<1x384xf32> to vector<1x128xf32>
    %358 = arith.mulf %347, %357 : vector<1x128xf32>
    %359 = arith.addf %356, %358 : vector<1x128xf32>
    %360 = math.tanh %359 : vector<1x128xf32>
    %cst_133 = arith.constant 1.000000e+00 : f32
    %361 = vector.broadcast %cst_133 : f32 to vector<1x128xf32>
    %362 = arith.subf %361, %355 : vector<1x128xf32>
    %363 = arith.mulf %362, %360 : vector<1x128xf32>
    %364 = arith.mulf %355, %283 : vector<1x128xf32>
    %365 = arith.addf %363, %364 : vector<1x128xf32>
    %cst_134 = arith.constant dense<0.000000e+00> : vector<1x8xf32>
    %366 = tpu.matmul %365, %1, %cst_134 {dimension_numbers = #tpu.dot_dimension_numbers<[1], [0], [0], [1], [0, 0, 1, 1], [], []>} : vector<1x128xf32>, vector<128x8xf32>, vector<1x8xf32> -> vector<1x8xf32>
    %cst_135 = arith.constant dense<0xFF800000> : vector<1xf32>
    %367 = vector.multi_reduction <maximumf>, %366, %cst_135 [1] : vector<1x8xf32> to vector<1xf32>
    %368 = vector.shape_cast %367 : vector<1xf32> to vector<1x1xf32>
    %369 = vector.broadcast %368 : vector<1x1xf32> to vector<1x8xf32>
    %370 = arith.subf %366, %369 : vector<1x8xf32>
    %371 = math.exp %370 : vector<1x8xf32>
    %cst_136 = arith.constant dense<0.000000e+00> : vector<1xf32>
    %372 = vector.multi_reduction <add>, %371, %cst_136 [1] : vector<1x8xf32> to vector<1xf32>
    %373 = vector.shape_cast %372 : vector<1xf32> to vector<1x1xf32>
    %374 = tpu.reciprocal %373 : vector<1x1xf32> -> vector<1x1xf32>
    %375 = vector.broadcast %374 : vector<1x1xf32> to vector<1x8xf32>
    %376 = arith.mulf %371, %375 : vector<1x8xf32>
    %cst_137 = arith.constant dense<0.000000e+00> : vector<1x128xf32>
    %377 = tpu.matmul %376, %0, %cst_137 {dimension_numbers = #tpu.dot_dimension_numbers<[1], [0], [0], [1], [0, 0, 1, 1], [], []>} : vector<1x8xf32>, vector<8x128xf32>, vector<1x128xf32> -> vector<1x128xf32>
    %378 = tpu.concatenate %365, %377 in 1 : vector<1x128xf32>, vector<1x128xf32> -> vector<1x256xf32>
    %c0_138 = arith.constant 0 : index
    %c0_139 = arith.constant 0 : index
    %379 = vector.load %arg6[%c0_138, %c0_139] : memref<256x128xf32, #tpu.memory_space<vmem>>, vector<256x128xf32>
    %cst_140 = arith.constant dense<0.000000e+00> : vector<1x128xf32>
    %380 = tpu.matmul %378, %379, %cst_140 {dimension_numbers = #tpu.dot_dimension_numbers<[1], [0], [0], [1], [0, 0, 1, 1], [], []>} : vector<1x256xf32>, vector<256x128xf32>, vector<1x128xf32> -> vector<1x128xf32>
    %c0_141 = arith.constant 0 : index
    %c0_142 = arith.constant 0 : index
    %381 = vector.load %arg7[%c0_141, %c0_142] : memref<1x128xf32, #tpu.memory_space<vmem>>, vector<1x128xf32>
    %382 = arith.addf %380, %381 : vector<1x128xf32>
    %383 = math.tanh %382 : vector<1x128xf32>
    %c0_143 = arith.constant 0 : index
    %c0_144 = arith.constant 0 : index
    %384 = vector.load %arg8[%c0_143, %c0_144] : memref<128x256xf32, #tpu.memory_space<vmem>>, vector<128x256xf32>
    %cst_145 = arith.constant dense<0.000000e+00> : vector<1x256xf32>
    %385 = tpu.matmul %383, %384, %cst_145 {dimension_numbers = #tpu.dot_dimension_numbers<[1], [0], [0], [1], [0, 0, 1, 1], [], []>} : vector<1x128xf32>, vector<128x256xf32>, vector<1x256xf32> -> vector<1x256xf32>
    %c0_146 = arith.constant 0 : index
    %c0_147 = arith.constant 0 : index
    %386 = vector.load %arg9[%c0_146, %c0_147] : memref<1x256xf32, #tpu.memory_space<vmem>>, vector<1x256xf32>
    %387 = arith.addf %385, %386 : vector<1x256xf32>
    %cst_148 = arith.constant dense<0xFF800000> : vector<1xf32>
    %388 = vector.multi_reduction <maximumf>, %387, %cst_148 [1] : vector<1x256xf32> to vector<1xf32>
    %389 = vector.shape_cast %388 : vector<1xf32> to vector<1x1xf32>
    %390 = vector.broadcast %389 : vector<1x1xf32> to vector<1x256xf32>
    %391 = arith.subf %387, %390 : vector<1x256xf32>
    %392 = math.exp %391 : vector<1x256xf32>
    %cst_149 = arith.constant dense<0.000000e+00> : vector<1xf32>
    %393 = vector.multi_reduction <add>, %392, %cst_149 [1] : vector<1x256xf32> to vector<1xf32>
    %394 = vector.shape_cast %393 : vector<1xf32> to vector<1x1xf32>
    %395 = tpu.reciprocal %394 {approx = true} : vector<1x1xf32> -> vector<1x1xf32>
    %396 = vector.broadcast %389 : vector<1x1xf32> to vector<1x256xf32>
    %397 = arith.cmpf oeq, %387, %396 : vector<1x256xf32>
    %c256_i32_150 = arith.constant 256 : i32
    %398 = vector.broadcast %c256_i32_150 : i32 to vector<1x256xi32>
    %399 = arith.select %397, %3, %398 : vector<1x256xi1>, vector<1x256xi32>
    %cst_151 = arith.constant dense<2147483647> : vector<1xi32>
    %400 = vector.multi_reduction <minsi>, %399, %cst_151 [1] : vector<1x256xi32> to vector<1xi32>
    %401 = vector.shape_cast %400 : vector<1xi32> to vector<1x1xi32>
    %c4_i32 = arith.constant 4 : i32
    %402 = vector.broadcast %c4_i32 : i32 to vector<1x6xi32>
    %403 = arith.cmpi eq, %4, %402 : vector<1x6xi32>
    %404 = vector.shape_cast %401 : vector<1x1xi32> to vector<1x1xi32>
    %405 = vector.broadcast %404 : vector<1x1xi32> to vector<1x6xi32>
    %406 = arith.select %403, %405, %324 : vector<1x6xi1>, vector<1x6xi32>
    %c4_i32_152 = arith.constant 4 : i32
    %407 = vector.broadcast %c4_i32_152 : i32 to vector<1x6xi32>
    %408 = arith.cmpi eq, %4, %407 : vector<1x6xi32>
    %409 = vector.shape_cast %395 : vector<1x1xf32> to vector<1x1xf32>
    %410 = vector.broadcast %409 : vector<1x1xf32> to vector<1x6xf32>
    %411 = arith.select %408, %410, %329 : vector<1x6xi1>, vector<1x6xf32>
    %412 = vector.broadcast %401 : vector<1x1xi32> to vector<1x256xi32>
    %413 = arith.cmpi eq, %3, %412 : vector<1x256xi32>
    %414 = arith.extui %413 : vector<1x256xi1> to vector<1x256xi32>
    %415 = arith.sitofp %414 : vector<1x256xi32> to vector<1x256xf32>
    %c0_153 = arith.constant 0 : index
    %c0_154 = arith.constant 0 : index
    %416 = vector.load %arg0[%c0_153, %c0_154] : memref<256x384xf32, #tpu.memory_space<vmem>>, vector<256x384xf32>
    %cst_155 = arith.constant dense<0.000000e+00> : vector<1x384xf32>
    %417 = tpu.matmul %415, %416, %cst_155 {dimension_numbers = #tpu.dot_dimension_numbers<[1], [0], [0], [1], [0, 0, 1, 1], [], []>} : vector<1x256xf32>, vector<256x384xf32>, vector<1x384xf32> -> vector<1x384xf32>
    %c0_156 = arith.constant 0 : index
    %c0_157 = arith.constant 0 : index
    %418 = vector.load %arg4[%c0_156, %c0_157] : memref<128x384xf32, #tpu.memory_space<vmem>>, vector<128x384xf32>
    %cst_158 = arith.constant dense<0.000000e+00> : vector<1x384xf32>
    %419 = tpu.matmul %365, %418, %cst_158 {dimension_numbers = #tpu.dot_dimension_numbers<[1], [0], [0], [1], [0, 0, 1, 1], [], []>} : vector<1x128xf32>, vector<128x384xf32>, vector<1x384xf32> -> vector<1x384xf32>
    %c0_159 = arith.constant 0 : index
    %c0_160 = arith.constant 0 : index
    %420 = vector.load %arg5[%c0_159, %c0_160] : memref<1x384xf32, #tpu.memory_space<vmem>>, vector<1x384xf32>
    %421 = arith.addf %419, %420 : vector<1x384xf32>
    %422 = vector.extract_strided_slice %417 {offsets = [0, 0], sizes = [1, 128], strides = [1, 1]} : vector<1x384xf32> to vector<1x128xf32>
    %423 = vector.extract_strided_slice %421 {offsets = [0, 0], sizes = [1, 128], strides = [1, 1]} : vector<1x384xf32> to vector<1x128xf32>
    %424 = arith.addf %422, %423 : vector<1x128xf32>
    %425 = arith.negf %424 : vector<1x128xf32>
    %426 = math.exp %425 : vector<1x128xf32>
    %cst_161 = arith.constant 1.000000e+00 : f32
    %427 = vector.broadcast %cst_161 : f32 to vector<1x128xf32>
    %428 = arith.addf %427, %426 : vector<1x128xf32>
    %429 = arith.divf %427, %428 : vector<1x128xf32>
    %430 = vector.extract_strided_slice %417 {offsets = [0, 128], sizes = [1, 128], strides = [1, 1]} : vector<1x384xf32> to vector<1x128xf32>
    %431 = vector.extract_strided_slice %421 {offsets = [0, 128], sizes = [1, 128], strides = [1, 1]} : vector<1x384xf32> to vector<1x128xf32>
    %432 = arith.addf %430, %431 : vector<1x128xf32>
    %433 = arith.negf %432 : vector<1x128xf32>
    %434 = math.exp %433 : vector<1x128xf32>
    %cst_162 = arith.constant 1.000000e+00 : f32
    %435 = vector.broadcast %cst_162 : f32 to vector<1x128xf32>
    %436 = arith.addf %435, %434 : vector<1x128xf32>
    %437 = arith.divf %435, %436 : vector<1x128xf32>
    %438 = vector.extract_strided_slice %417 {offsets = [0, 256], sizes = [1, 128], strides = [1, 1]} : vector<1x384xf32> to vector<1x128xf32>
    %439 = vector.extract_strided_slice %421 {offsets = [0, 256], sizes = [1, 128], strides = [1, 1]} : vector<1x384xf32> to vector<1x128xf32>
    %440 = arith.mulf %429, %439 : vector<1x128xf32>
    %441 = arith.addf %438, %440 : vector<1x128xf32>
    %442 = math.tanh %441 : vector<1x128xf32>
    %cst_163 = arith.constant 1.000000e+00 : f32
    %443 = vector.broadcast %cst_163 : f32 to vector<1x128xf32>
    %444 = arith.subf %443, %437 : vector<1x128xf32>
    %445 = arith.mulf %444, %442 : vector<1x128xf32>
    %446 = arith.mulf %437, %365 : vector<1x128xf32>
    %447 = arith.addf %445, %446 : vector<1x128xf32>
    %cst_164 = arith.constant dense<0.000000e+00> : vector<1x8xf32>
    %448 = tpu.matmul %447, %1, %cst_164 {dimension_numbers = #tpu.dot_dimension_numbers<[1], [0], [0], [1], [0, 0, 1, 1], [], []>} : vector<1x128xf32>, vector<128x8xf32>, vector<1x8xf32> -> vector<1x8xf32>
    %cst_165 = arith.constant dense<0xFF800000> : vector<1xf32>
    %449 = vector.multi_reduction <maximumf>, %448, %cst_165 [1] : vector<1x8xf32> to vector<1xf32>
    %450 = vector.shape_cast %449 : vector<1xf32> to vector<1x1xf32>
    %451 = vector.broadcast %450 : vector<1x1xf32> to vector<1x8xf32>
    %452 = arith.subf %448, %451 : vector<1x8xf32>
    %453 = math.exp %452 : vector<1x8xf32>
    %cst_166 = arith.constant dense<0.000000e+00> : vector<1xf32>
    %454 = vector.multi_reduction <add>, %453, %cst_166 [1] : vector<1x8xf32> to vector<1xf32>
    %455 = vector.shape_cast %454 : vector<1xf32> to vector<1x1xf32>
    %456 = tpu.reciprocal %455 : vector<1x1xf32> -> vector<1x1xf32>
    %457 = vector.broadcast %456 : vector<1x1xf32> to vector<1x8xf32>
    %458 = arith.mulf %453, %457 : vector<1x8xf32>
    %cst_167 = arith.constant dense<0.000000e+00> : vector<1x128xf32>
    %459 = tpu.matmul %458, %0, %cst_167 {dimension_numbers = #tpu.dot_dimension_numbers<[1], [0], [0], [1], [0, 0, 1, 1], [], []>} : vector<1x8xf32>, vector<8x128xf32>, vector<1x128xf32> -> vector<1x128xf32>
    %460 = tpu.concatenate %447, %459 in 1 : vector<1x128xf32>, vector<1x128xf32> -> vector<1x256xf32>
    %c0_168 = arith.constant 0 : index
    %c0_169 = arith.constant 0 : index
    %461 = vector.load %arg6[%c0_168, %c0_169] : memref<256x128xf32, #tpu.memory_space<vmem>>, vector<256x128xf32>
    %cst_170 = arith.constant dense<0.000000e+00> : vector<1x128xf32>
    %462 = tpu.matmul %460, %461, %cst_170 {dimension_numbers = #tpu.dot_dimension_numbers<[1], [0], [0], [1], [0, 0, 1, 1], [], []>} : vector<1x256xf32>, vector<256x128xf32>, vector<1x128xf32> -> vector<1x128xf32>
    %c0_171 = arith.constant 0 : index
    %c0_172 = arith.constant 0 : index
    %463 = vector.load %arg7[%c0_171, %c0_172] : memref<1x128xf32, #tpu.memory_space<vmem>>, vector<1x128xf32>
    %464 = arith.addf %462, %463 : vector<1x128xf32>
    %465 = math.tanh %464 : vector<1x128xf32>
    %c0_173 = arith.constant 0 : index
    %c0_174 = arith.constant 0 : index
    %466 = vector.load %arg8[%c0_173, %c0_174] : memref<128x256xf32, #tpu.memory_space<vmem>>, vector<128x256xf32>
    %cst_175 = arith.constant dense<0.000000e+00> : vector<1x256xf32>
    %467 = tpu.matmul %465, %466, %cst_175 {dimension_numbers = #tpu.dot_dimension_numbers<[1], [0], [0], [1], [0, 0, 1, 1], [], []>} : vector<1x128xf32>, vector<128x256xf32>, vector<1x256xf32> -> vector<1x256xf32>
    %c0_176 = arith.constant 0 : index
    %c0_177 = arith.constant 0 : index
    %468 = vector.load %arg9[%c0_176, %c0_177] : memref<1x256xf32, #tpu.memory_space<vmem>>, vector<1x256xf32>
    %469 = arith.addf %467, %468 : vector<1x256xf32>
    %cst_178 = arith.constant dense<0xFF800000> : vector<1xf32>
    %470 = vector.multi_reduction <maximumf>, %469, %cst_178 [1] : vector<1x256xf32> to vector<1xf32>
    %471 = vector.shape_cast %470 : vector<1xf32> to vector<1x1xf32>
    %472 = vector.broadcast %471 : vector<1x1xf32> to vector<1x256xf32>
    %473 = arith.subf %469, %472 : vector<1x256xf32>
    %474 = math.exp %473 : vector<1x256xf32>
    %cst_179 = arith.constant dense<0.000000e+00> : vector<1xf32>
    %475 = vector.multi_reduction <add>, %474, %cst_179 [1] : vector<1x256xf32> to vector<1xf32>
    %476 = vector.shape_cast %475 : vector<1xf32> to vector<1x1xf32>
    %477 = tpu.reciprocal %476 {approx = true} : vector<1x1xf32> -> vector<1x1xf32>
    %478 = vector.broadcast %471 : vector<1x1xf32> to vector<1x256xf32>
    %479 = arith.cmpf oeq, %469, %478 : vector<1x256xf32>
    %c256_i32_180 = arith.constant 256 : i32
    %480 = vector.broadcast %c256_i32_180 : i32 to vector<1x256xi32>
    %481 = arith.select %479, %3, %480 : vector<1x256xi1>, vector<1x256xi32>
    %cst_181 = arith.constant dense<2147483647> : vector<1xi32>
    %482 = vector.multi_reduction <minsi>, %481, %cst_181 [1] : vector<1x256xi32> to vector<1xi32>
    %483 = vector.shape_cast %482 : vector<1xi32> to vector<1x1xi32>
    %c5_i32 = arith.constant 5 : i32
    %484 = vector.broadcast %c5_i32 : i32 to vector<1x6xi32>
    %485 = arith.cmpi eq, %4, %484 : vector<1x6xi32>
    %486 = vector.shape_cast %483 : vector<1x1xi32> to vector<1x1xi32>
    %487 = vector.broadcast %486 : vector<1x1xi32> to vector<1x6xi32>
    %488 = arith.select %485, %487, %406 : vector<1x6xi1>, vector<1x6xi32>
    %c5_i32_182 = arith.constant 5 : i32
    %489 = vector.broadcast %c5_i32_182 : i32 to vector<1x6xi32>
    %490 = arith.cmpi eq, %4, %489 : vector<1x6xi32>
    %491 = vector.shape_cast %477 : vector<1x1xf32> to vector<1x1xf32>
    %492 = vector.broadcast %491 : vector<1x1xf32> to vector<1x6xf32>
    %493 = arith.select %490, %492, %411 : vector<1x6xi1>, vector<1x6xf32>
    %c0_183 = arith.constant 0 : index
    %c0_184 = arith.constant 0 : index
    %494 = vector.load %arg10[%c0_183, %c0_184] : memref<1x6xi32, #tpu.memory_space<vmem>>, vector<1x6xi32>
    tpu.vector_store %arg10[%c0_183, %c0_184], %488 {strides = array<i32>} : memref<1x6xi32, #tpu.memory_space<vmem>>, vector<1x6xi32>,
    %c0_185 = arith.constant 0 : index
    %c0_186 = arith.constant 0 : index
    %495 = vector.load %arg11[%c0_185, %c0_186] : memref<1x6xf32, #tpu.memory_space<vmem>>, vector<1x6xf32>
    tpu.vector_store %arg11[%c0_185, %c0_186], %493 {strides = array<i32>} : memref<1x6xf32, #tpu.memory_space<vmem>>, vector<1x6xf32>,
    return
  }
}

</mosaic_0001>

<bundles_post_ra>
// kernel: greedy_search_decode.2
= control target key start
LH: loop header
LB: loop body
LE: loop exit
PB: predicated region body
PF: predicated region fallthrough
CT: control target
= control target key end

     0   :  { %v7041_v3 = vmov 0.0   ;;  %vm5421_vm0 = vmmov 0   ;;  %s7032_s1 = inlined_call_operand.vmem [shape: f32[128,768], index: 1, kind: input, shape index: {}]   ;;  %s7033_s3 = inlined_call_operand.vmem [shape: f32[128,384], index: 3, kind: input, shape index: {}]   ;;  %s7034_s0 = inlined_call_operand.vmem [shape: f32[8,128], index: 0, kind: input, shape index: {}]   ;;  %s7035_s5 = inlined_call_operand.vmem [shape: f32[128,384], index: 5, kind: input, shape index: {}]   ;;  %s7036_s2 = inlined_call_operand.vmem [shape: f32[1,768], index: 2, kind: input, shape index: {}]   ;;  %s7037_s4 = inlined_call_operand.vmem [shape: f32[1,384], index: 4, kind: input, shape index: {}]   ;;  %s7038_s6 = inlined_call_operand.vmem [shape: f32[1,384], index: 6, kind: input, shape index: {}]   ;;  %s7039_s8 = inlined_call_operand.vmem [shape: f32[1,128], index: 8, kind: output, shape index: {1}]   ;;  %s7040_s7 = inlined_call_operand.vmem [shape: f32[8,128], index: 7, kind: output, shape index: {0}]  }
   0x1   :  { %v30_v0 = vld [vmem:[%s7032_s1 + $0x8] sm:$0xff]  ;;  %v36_v1 = vld [vmem:[%s7032_s1 + $0x38] sm:$0xff]  ;;  %221 = vmatprep.mubr.f32.mxu0 %v7041_v3  ;;  %292 = vmatprep.mubr.f32.mxu1 %v7041_v3  ;;  %v29_v6 = vld [vmem:[%s7032_s1] sm:$0xff] }
   0x2   :  { %v32_v2 = vld [vmem:[%s7032_s1 + $0x18] sm:$0xff]  ;;  %v4264_v4 = vpack.c.bf16 %v36_v1, %v30_v0  ;;  %v38_v5 = vld [vmem:[%s7032_s1 + $0x48] sm:$0xff]  ;;  %v35_v7 = vld [vmem:[%s7032_s1 + $0x30] sm:$0xff] }
   0x3   :  { %v4296_v8 = vpack.c.bf16 %v38_v5, %v32_v2  ;;  %v4266_v9 = vpack.c.bf16 %v35_v7, %v29_v6  ;;  %v31_v10 = vld [vmem:[%s7032_s1 + $0x10] sm:$0xff]  ;;  %v37_v11 = vld [vmem:[%s7032_s1 + $0x40] sm:$0xff]  ;;  %v42_v12 = vld [vmem:[%s7032_s1 + $0x68] sm:$0xff] }
   0x4   :  { %4265 = vmatprep.subr.bf16.mxu0 %v4264_v4  ;;  %v4298_v13 = vpack.c.bf16 %v37_v11, %v31_v10  ;;  %v48_v14 = vld [vmem:[%s7032_s1 + $0x98] sm:$0xff]  ;;  %v50_v16 = vld [vmem:[%s7032_s1 + $0xa8] sm:$0xff]  ;;  %v41_v19 = vld [vmem:[%s7032_s1 + $0x60] sm:$0xff] }
   0x5   :  { %v44_v15 = vld [vmem:[%s7032_s1 + $0x78] sm:$0xff]  ;;  %4297 = vmatprep.subr.bf16.mxu1 %v4296_v8  ;;  %4267 = vmatpush1.bf16.msra.mxu0 %v4266_v9  ;;  %v4268_v17 = vpack.c.bf16 %v48_v14, %v42_v12  ;;  %v47_v20 = vld [vmem:[%s7032_s1 + $0x90] sm:$0xff]  ;;  %v49_v23 = vld [vmem:[%s7032_s1 + $0xa0] sm:$0xff] }
   0x6   :  { %v4300_v18 = vpack.c.bf16 %v50_v16, %v44_v15  ;;  %v43_v21 = vld [vmem:[%s7032_s1 + $0x70] sm:$0xff]  ;;  %4299 = vmatpush1.bf16.msra.mxu1 %v4298_v13  ;;  %v4270_v22 = vpack.c.bf16 %v47_v20, %v41_v19  ;;  %v54_v24 = vld [vmem:[%s7032_s1 + $0xc8] sm:$0xff]  ;;  %v60_v25 = vld [vmem:[%s7032_s1 + $0xf8] sm:$0xff] }
   0x7   :  { %4269 = vmatprep.subr.bf16.mxu0 %v4268_v17  ;;  %v4302_v26 = vpack.c.bf16 %v49_v23, %v43_v21  ;;  %v4272_v27 = vpack.c.bf16 %v60_v25, %v54_v24  ;;  %v56_v28 = vld [vmem:[%s7032_s1 + $0xd8] sm:$0xff]  ;;  %v62_v29 = vld [vmem:[%s7032_s1 + $0x108] sm:$0xff]  ;;  %v53_v30 = vld [vmem:[%s7032_s1 + $0xc0] sm:$0xff] }
   0x8   :  { %4301 = vmatprep.subr.bf16.mxu1 %v4300_v18  ;;  %v4304_v31 = vpack.c.bf16 %v62_v29, %v56_v28  ;;  %v59_v32 = vld [vmem:[%s7032_s1 + $0xf0] sm:$0xff]  ;;  %v61_v34 = vld [vmem:[%s7032_s1 + $0x100] sm:$0xff]  ;;  %v66_v36 = vld [vmem:[%s7032_s1 + $0x128] sm:$0xff] }
   0x9   :  { %v55_v33 = vld [vmem:[%s7032_s1 + $0xd0] sm:$0xff]  ;;  %4271 = vmatpush1.bf16.msra.mxu0 %v4270_v22  ;;  %v4274_v35 = vpack.c.bf16 %v59_v32, %v53_v30  ;;  %v72_v37 = vld [vmem:[%s7032_s1 + $0x158] sm:$0xff]  ;;  %v74_v41 = vld [vmem:[%s7032_s1 + $0x168] sm:$0xff] }
   0xa   :  { %v68_v38 = vld [vmem:[%s7032_s1 + $0x138] sm:$0xff]  ;;  %4303 = vmatpush1.bf16.msra.mxu1 %v4302_v26  ;;  %4273 = vmatprep.subr.bf16.mxu0 %v4272_v27  ;;  %v4306_v39 = vpack.c.bf16 %v61_v34, %v55_v33  ;;  %v4276_v40 = vpack.c.bf16 %v72_v37, %v66_v36  ;;  %v65_v42 = vld [vmem:[%s7032_s1 + $0x120] sm:$0xff]  ;;  %v71_v43 = vld [vmem:[%s7032_s1 + $0x150] sm:$0xff] }
   0xb   :  { %4305 = vmatprep.subr.bf16.mxu1 %v4304_v31  ;;  %v4308_v44 = vpack.c.bf16 %v74_v41, %v68_v38  ;;  %v67_v45 = vld [vmem:[%s7032_s1 + $0x130] sm:$0xff]  ;;  %v73_v46 = vld [vmem:[%s7032_s1 + $0x160] sm:$0xff]  ;;  %v78_v47 = vld [vmem:[%s7032_s1 + $0x188] sm:$0xff]  ;;  %v4278_v51 = vpack.c.bf16 %v71_v43, %v65_v42 }
   0xc   :  { %v84_v48 = vld [vmem:[%s7032_s1 + $0x1b8] sm:$0xff]  ;;  %v86_v50 = vld [vmem:[%s7032_s1 + $0x1c8] sm:$0xff]  ;;  %v4310_v52 = vpack.c.bf16 %v73_v46, %v67_v45  ;;  %v77_v54 = vld [vmem:[%s7032_s1 + $0x180] sm:$0xff] }
   0xd   :  { %v80_v49 = vld [vmem:[%s7032_s1 + $0x198] sm:$0xff]  ;;  %4275 = vmatpush1.bf16.msra.mxu0 %v4274_v35  ;;  %v4280_v53 = vpack.c.bf16 %v84_v48, %v78_v47  ;;  %v83_v55 = vld [vmem:[%s7032_s1 + $0x1b0] sm:$0xff]  ;;  %v85_v58 = vld [vmem:[%s7032_s1 + $0x1c0] sm:$0xff] }
   0xe   :  { %4307 = vmatpush1.bf16.msra.mxu1 %v4306_v39  ;;  %4277 = vmatprep.subr.bf16.mxu0 %v4276_v40  ;;  %v79_v56 = vld [vmem:[%s7032_s1 + $0x190] sm:$0xff]  ;;  %v4312_v57 = vpack.c.bf16 %v86_v50, %v80_v49  ;;  %v90_v59 = vld [vmem:[%s7032_s1 + $0x1e8] sm:$0xff]  ;;  %v96_v60 = vld [vmem:[%s7032_s1 + $0x218] sm:$0xff]  ;;  %v4282_v63 = vpack.c.bf16 %v83_v55, %v77_v54 }
   0xf   :  { %4309 = vmatprep.subr.bf16.mxu1 %v4308_v44  ;;  %v92_v61 = vld [vmem:[%s7032_s1 + $0x1f8] sm:$0xff]  ;;  %v98_v62 = vld [vmem:[%s7032_s1 + $0x228] sm:$0xff]  ;;  %v4314_v0 = vpack.c.bf16 %v85_v58, %v79_v56  ;;  %v4284_v1 = vpack.c.bf16 %v96_v60, %v90_v59  ;;  %v89_v2 = vld [vmem:[%s7032_s1 + $0x1e0] sm:$0xff] }
  0x10   :  { %v95_v4 = vld [vmem:[%s7032_s1 + $0x210] sm:$0xff]  ;;  %v4316_v6 = vpack.c.bf16 %v98_v62, %v92_v61  ;;  %v97_v7 = vld [vmem:[%s7032_s1 + $0x220] sm:$0xff]  ;;  %v102_v8 = vld [vmem:[%s7032_s1 + $0x248] sm:$0xff] }
  0x11   :  { %4279 = vmatpush1.bf16.msra.mxu0 %v4278_v51  ;;  %v91_v5 = vld [vmem:[%s7032_s1 + $0x1f0] sm:$0xff]  ;;  %v108_v9 = vld [vmem:[%s7032_s1 + $0x278] sm:$0xff]  ;;  %v110_v11 = vld [vmem:[%s7032_s1 + $0x288] sm:$0xff]  ;;  %v4286_v12 = vpack.c.bf16 %v95_v4, %v89_v2 }
  0x12   :  { %4311 = vmatpush1.bf16.msra.mxu1 %v4310_v52  ;;  %4281 = vmatprep.subr.bf16.mxu0 %v4280_v53  ;;  %v104_v10 = vld [vmem:[%s7032_s1 + $0x258] sm:$0xff]  ;;  %v4318_v13 = vpack.c.bf16 %v97_v7, %v91_v5  ;;  %v4288_v14 = vpack.c.bf16 %v108_v9, %v102_v8  ;;  %v101_v15 = vld [vmem:[%s7032_s1 + $0x240] sm:$0xff]  ;;  %v107_v16 = vld [vmem:[%s7032_s1 + $0x270] sm:$0xff] }
  0x13   :  { %4313 = vmatprep.subr.bf16.mxu1 %v4312_v57  ;;  %v103_v17 = vld [vmem:[%s7032_s1 + $0x250] sm:$0xff]  ;;  %v4320_v18 = vpack.c.bf16 %v110_v11, %v104_v10  ;;  %v109_v19 = vld [vmem:[%s7032_s1 + $0x280] sm:$0xff]  ;;  %v114_v20 = vld [vmem:[%s7032_s1 + $0x2a8] sm:$0xff]  ;;  %v4290_v24 = vpack.c.bf16 %v107_v16, %v101_v15 }
  0x14   :  { %v120_v21 = vld [vmem:[%s7032_s1 + $0x2d8] sm:$0xff]  ;;  %v122_v23 = vld [vmem:[%s7032_s1 + $0x2e8] sm:$0xff]  ;;  %v4322_v25 = vpack.c.bf16 %v109_v19, %v103_v17  ;;  %v113_v27 = vld [vmem:[%s7032_s1 + $0x2a0] sm:$0xff] }
  0x15   :  { %4283 = vmatpush1.bf16.msra.mxu0 %v4282_v63  ;;  %v116_v22 = vld [vmem:[%s7032_s1 + $0x2b8] sm:$0xff]  ;;  %v4292_v26 = vpack.c.bf16 %v120_v21, %v114_v20  ;;  %v119_v28 = vld [vmem:[%s7032_s1 + $0x2d0] sm:$0xff]  ;;  %v121_v31 = vld [vmem:[%s7032_s1 + $0x2e0] sm:$0xff] }
  0x16   :  { %4315 = vmatpush1.bf16.msra.mxu1 %v4314_v0  ;;  %4285 = vmatprep.subr.bf16.mxu0 %v4284_v1  ;;  %v115_v29 = vld [vmem:[%s7032_s1 + $0x2b0] sm:$0xff]  ;;  %v4324_v30 = vpack.c.bf16 %v122_v23, %v116_v22  ;;  %v34_v32 = vld [vmem:[%s7032_s1 + $0x28] sm:$0xff]  ;;  %v40_v33 = vld [vmem:[%s7032_s1 + $0x58] sm:$0xff]  ;;  %v4294_v36 = vpack.c.bf16 %v119_v28, %v113_v27 }
  0x17   :  { %4317 = vmatprep.subr.bf16.mxu1 %v4316_v6  ;;  %v373_v34 = vld [vmem:[%s7033_s3 + $0x8] sm:$0xff]  ;;  %v376_v35 = vld [vmem:[%s7033_s3 + $0x20] sm:$0xff]  ;;  %v4326_v37 = vpack.c.bf16 %v121_v31, %v115_v29  ;;  %v4328_v38 = vpack.c.bf16 %v40_v33, %v34_v32  ;;  %v39_v40 = vld [vmem:[%s7032_s1 + $0x50] sm:$0xff] }
  0x18   :  { %v33_v39 = vld [vmem:[%s7032_s1 + $0x20] sm:$0xff]  ;;  %v5682_v42 = vpack.c.bf16 %v376_v35, %v373_v34  ;;  %v375_v43 = vld [vmem:[%s7033_s3 + $0x18] sm:$0xff]  ;;  %v46_v44 = vld [vmem:[%s7032_s1 + $0x88] sm:$0xff] }
  0x19   :  { %4287 = vmatpush1.bf16.msra.mxu0 %v4286_v12  ;;  %v372_v41 = vld [vmem:[%s7033_s3] sm:$0xff]  ;;  %v52_v45 = vld [vmem:[%s7032_s1 + $0xb8] sm:$0xff]  ;;  %v382_v47 = vld [vmem:[%s7033_s3 + $0x50] sm:$0xff]  ;;  %v4330_v49 = vpack.c.bf16 %v39_v40, %v33_v39 }
  0x1a   :  { %4319 = vmatpush1.bf16.msra.mxu1 %v4318_v13  ;;  %4289 = vmatprep.subr.bf16.mxu0 %v4288_v14  ;;  %v379_v46 = vld [vmem:[%s7033_s3 + $0x38] sm:$0xff]  ;;  %v5702_v48 = vld [vmem:[%s7034_s0] sm:$0xff]  ;;  %v5704_v50 = vpack.c.bf16 %v375_v43, %v372_v41  ;;  %v4332_v51 = vpack.c.bf16 %v52_v45, %v46_v44  ;;  %v51_v53 = vld [vmem:[%s7032_s1 + $0xb0] sm:$0xff] }
  0x1b   :  { %4321 = vmatprep.subr.bf16.mxu1 %v4320_v18  ;;  %v45_v52 = vld [vmem:[%s7032_s1 + $0x80] sm:$0xff]  ;;  %v378_v54 = vld [vmem:[%s7033_s3 + $0x30] sm:$0xff]  ;;  %v5716_v55 = vpack.c.bf16 %v382_v47, %v379_v46  ;;  %v381_v56 = vld [vmem:[%s7033_s3 + $0x48] sm:$0xff] }
  0x1c   :  { %v58_v57 = vld [vmem:[%s7032_s1 + $0xe8] sm:$0xff]  ;;  %v64_v58 = vld [vmem:[%s7032_s1 + $0x118] sm:$0xff]  ;;  %v388_v60 = vld [vmem:[%s7033_s3 + $0x80] sm:$0xff]  ;;  %v4334_v61 = vpack.c.bf16 %v51_v53, %v45_v52  ;;  %v5736_v62 = vpack.c.bf16 %v381_v56, %v378_v54 }
  0x1d   :  { %4291 = vmatpush1.bf16.msra.mxu0 %v4290_v24  ;;  %v385_v59 = vld [vmem:[%s7033_s3 + $0x68] sm:$0xff]  ;;  %v4336_v63 = vpack.c.bf16 %v64_v58, %v58_v57  ;;  %v57_v0 = vld [vmem:[%s7032_s1 + $0xe0] sm:$0xff]  ;;  %v63_v1 = vld [vmem:[%s7032_s1 + $0x110] sm:$0xff] }
  0x1e   :  { %4323 = vmatpush1.bf16.msra.mxu1 %v4322_v25  ;;  %4293 = vmatprep.subr.bf16.mxu0 %v4292_v26  ;;  %v384_v2 = vld [vmem:[%s7033_s3 + $0x60] sm:$0xff]  ;;  %v5748_v4 = vpack.c.bf16 %v388_v60, %v385_v59  ;;  %v387_v5 = vld [vmem:[%s7033_s3 + $0x78] sm:$0xff]  ;;  %v70_v6 = vld [vmem:[%s7032_s1 + $0x148] sm:$0xff]  ;;  %v4338_v10 = vpack.c.bf16 %v63_v1, %v57_v0 }
  0x1f   :  { %4325 = vmatprep.subr.bf16.mxu1 %v4324_v30  ;;  %v76_v7 = vld [vmem:[%s7032_s1 + $0x178] sm:$0xff]  ;;  %v394_v9 = vld [vmem:[%s7033_s3 + $0xb0] sm:$0xff]  ;;  %v5768_v11 = vpack.c.bf16 %v387_v5, %v384_v2  ;;  %v69_v13 = vld [vmem:[%s7032_s1 + $0x140] sm:$0xff] }
  0x20   :  { %7108 = vst [vmem:[#allocation2_spill] sm:$0xff] %v5748_v4  ;;  %v391_v8 = vld [vmem:[%s7033_s3 + $0x98] sm:$0xff]  ;;  %v4340_v12 = vpack.c.bf16 %v76_v7, %v70_v6  ;;  %v75_v14 = vld [vmem:[%s7032_s1 + $0x170] sm:$0xff]  ;;  %v393_v17 = vld [vmem:[%s7033_s3 + $0xa8] sm:$0xff] }
  0x21   :  { %4295 = vmatpush1.bf16.msra.mxu0 %v4294_v36  ;;  %7109 = vst [vmem:[#allocation3_spill] sm:$0xff] %v5768_v11  ;;  %v390_v15 = vld [vmem:[%s7033_s3 + $0x90] sm:$0xff]  ;;  %v5780_v16 = vpack.c.bf16 %v394_v9, %v391_v8  ;;  %v82_v18 = vld [vmem:[%s7032_s1 + $0x1a8] sm:$0xff]  ;;  %v88_v19 = vld [vmem:[%s7032_s1 + $0x1d8] sm:$0xff]  ;;  %v4342_v22 = vpack.c.bf16 %v75_v14, %v69_v13 }
  0x22   :  { %4327 = vmatpush1.bf16.msra.mxu1 %v4326_v37  ;;  %4329 = vmatprep.subr.bf16.mxu0 %v4328_v38  ;;  %v397_v20 = vld [vmem:[%s7033_s3 + $0xc8] sm:$0xff]  ;;  %v400_v21 = vld [vmem:[%s7033_s3 + $0xe0] sm:$0xff]  ;;  %v5798_v23 = vpack.c.bf16 %v393_v17, %v390_v15  ;;  %v4344_v24 = vpack.c.bf16 %v88_v19, %v82_v18  ;;  %v87_v26 = vld [vmem:[%s7032_s1 + $0x1d0] sm:$0xff] }
  0x23   :  { %4361 = vmatprep.subr.bf16.mxu1 %v5682_v42  ;;  %7110 = vst [vmem:[#allocation4_spill] sm:$0xff] %v5780_v16  ;;  %v81_v25 = vld [vmem:[%s7032_s1 + $0x1a0] sm:$0xff]  ;;  %v5810_v28 = vpack.c.bf16 %v400_v21, %v397_v20  ;;  %v399_v29 = vld [vmem:[%s7033_s3 + $0xd8] sm:$0xff]  ;;  %v94_v30 = vld [vmem:[%s7032_s1 + $0x208] sm:$0xff] }
  0x24   :  { %222 = vmatmul.mubr.f32.vlgmr.msra.gmra.mrb[0].mxu0 %v5702_v48  ;;  %7111 = vst [vmem:[#allocation5_spill] sm:$0xff] %v5798_v23  ;;  %v396_v27 = vld [vmem:[%s7033_s3 + $0xc0] sm:$0xff]  ;;  %v100_v31 = vld [vmem:[%s7032_s1 + $0x238] sm:$0xff]  ;;  %v406_v33 = vld [vmem:[%s7033_s3 + $0x110] sm:$0xff]  ;;  %v4346_v34 = vpack.c.bf16 %v87_v26, %v81_v25 }
  0x25   :  { %293 = vmatmul.mubr.f32.vlgmr.msra.gmra.mrb[0].mxu1 %v5702_v48  ;;  %4331 = vmatpush1.bf16.msra.mxu0 %v4330_v49  ;;  %7112 = vst [vmem:[#allocation6_spill] sm:$0xff] %v5810_v28  ;;  %v403_v32 = vld [vmem:[%s7033_s3 + $0xf8] sm:$0xff]  ;;  %v5828_v35 = vpack.c.bf16 %v399_v29, %v396_v27  ;;  %v4348_v36 = vpack.c.bf16 %v100_v31, %v94_v30  ;;  %v93_v37 = vld [vmem:[%s7032_s1 + $0x200] sm:$0xff]  ;;  %v99_v38 = vld [vmem:[%s7032_s1 + $0x230] sm:$0xff] }
  0x26   :  { %4363 = vmatpush1.bf16.msra.mxu1 %v5704_v50  ;;  %4333 = vmatprep.subr.bf16.mxu0 %v4332_v51  ;;  %v402_v39 = vld [vmem:[%s7033_s3 + $0xf0] sm:$0xff]  ;;  %v5840_v40 = vpack.c.bf16 %v406_v33, %v403_v32  ;;  %v405_v41 = vld [vmem:[%s7033_s3 + $0x108] sm:$0xff]  ;;  %v112_v44 = vld [vmem:[%s7032_s1 + $0x298] sm:$0xff]  ;;  %v4350_v47 = vpack.c.bf16 %v99_v38, %v93_v37 }
  0x27   :  { %4365 = vmatprep.subr.bf16.mxu1 %v5716_v55  ;;  %363 = vmatprep.mubr.f32.mxu0 %v7041_v3  ;;  %7113 = vst [vmem:[#allocation7_spill] sm:$0xff] %v5828_v35  ;;  %v106_v43 = vld [vmem:[%s7032_s1 + $0x268] sm:$0xff]  ;;  %v412_v46 = vld [vmem:[%s7033_s3 + $0x140] sm:$0xff]  ;;  %v5858_v49 = vpack.c.bf16 %v405_v41, %v402_v39  ;;  %v111_v53 = vld [vmem:[%s7032_s1 + $0x290] sm:$0xff] }
  0x28   :  { %501 = vmatprep.mubr.f32.mxu1 %v7041_v3  ;;  %7114 = vst [vmem:[#allocation8_spill] sm:$0xff] %v5840_v40  ;;  %v409_v45 = vld [vmem:[%s7033_s3 + $0x128] sm:$0xff]  ;;  %v4352_v51 = vpack.c.bf16 %v112_v44, %v106_v43  ;;  %v105_v52 = vld [vmem:[%s7032_s1 + $0x260] sm:$0xff]  ;;  %v411_v57 = vld [vmem:[%s7033_s3 + $0x138] sm:$0xff] }
  0x29   :  { %4335 = vmatpush1.bf16.msra.mxu0 %v4334_v61  ;;  %7115 = vst [vmem:[#allocation9_spill] sm:$0xff] %v5858_v49  ;;  %v408_v54 = vld [vmem:[%s7033_s3 + $0x120] sm:$0xff]  ;;  %v5870_v56 = vpack.c.bf16 %v412_v46, %v409_v45  ;;  %v118_v58 = vld [vmem:[%s7032_s1 + $0x2c8] sm:$0xff]  ;;  %v124_v59 = vld [vmem:[%s7032_s1 + $0x2f8] sm:$0xff] }
  0x2a   :  { %4367 = vmatpush1.bf16.msra.mxu1 %v5736_v62  ;;  %4337 = vmatprep.subr.bf16.mxu0 %v4336_v63  ;;  %v415_v60 = vld [vmem:[%s7033_s3 + $0x158] sm:$0xff]  ;;  %v418_v61 = vld [vmem:[%s7033_s3 + $0x170] sm:$0xff]  ;;  %v4354_v63 = vpack.c.bf16 %v111_v53, %v105_v52  ;;  %v5888_v0 = vpack.c.bf16 %v411_v57, %v408_v54  ;;  %v4356_v1 = vpack.c.bf16 %v124_v59, %v118_v58  ;;  %v117_v2 = vld [vmem:[%s7032_s1 + $0x2c0] sm:$0xff] }
  0x2b   :  { %4369 = vmatprep.subr.bf16.mxu1 %v5748_v4  ;;  %7116 = vst [vmem:[#allocation10_spill] sm:$0xff] %v5870_v56  ;;  %v123_v5 = vld [vmem:[%s7032_s1 + $0x2f0] sm:$0xff]  ;;  %v5897_v6 = vpack.c.bf16 %v418_v61, %v415_v60  ;;  %v417_v8 = vld [vmem:[%s7033_s3 + $0x168] sm:$0xff]  ;;  %v599_v18 = vld [vmem:[%s7035_s5] sm:$0xff] }
  0x2c   :  { %7117 = vst [vmem:[#allocation11_spill] sm:$0xff] %v5888_v0  ;;  %v414_v7 = vld [vmem:[%s7033_s3 + $0x150] sm:$0xff]  ;;  %v600_v9 = vld [vmem:[%s7035_s5 + $0x8] sm:$0xff]  ;;  %v602_v19 = vld [vmem:[%s7035_s5 + $0x18] sm:$0xff] }
  0x2d   :  { %4339 = vmatpush1.bf16.msra.mxu0 %v4338_v10  ;;  %7118 = vst [vmem:[#allocation12_spill] sm:$0xff] %v5897_v6  ;;  %v603_v10 = vld [vmem:[%s7035_s5 + $0x20] sm:$0xff]  ;;  %v5912_v13 = vpack.c.bf16 %v417_v8, %v414_v7  ;;  %v374_v14 = vld [vmem:[%s7033_s3 + $0x10] sm:$0xff]  ;;  %v377_v15 = vld [vmem:[%s7033_s3 + $0x28] sm:$0xff]  ;;  %v5939_v25 = vpack.c.bf16 %v602_v19, %v599_v18 }
  0x2e   :  { %4371 = vmatpush1.bf16.msra.mxu1 %v5768_v11  ;;  %4341 = vmatprep.subr.bf16.mxu0 %v4340_v12  ;;  %v4358_v12 = vpack.c.bf16 %v123_v5, %v117_v2  ;;  %v5921_v17 = vpack.c.bf16 %v603_v10, %v600_v9  ;;  %v606_v20 = vld [vmem:[%s7035_s5 + $0x38] sm:$0xff]  ;;  %v609_v21 = vld [vmem:[%s7035_s5 + $0x50] sm:$0xff]  ;;  %v380_v26 = vld [vmem:[%s7033_s3 + $0x40] sm:$0xff] }
  0x2f   :  { %4373 = vmatprep.subr.bf16.mxu1 %v5780_v16  ;;  %7119 = vst [vmem:[#allocation13_spill] sm:$0xff] %v5912_v13  ;;  %v383_v27 = vld [vmem:[%s7033_s3 + $0x58] sm:$0xff]  ;;  %v5948_v29 = vpack.c.bf16 %v609_v21, %v606_v20  ;;  %v605_v30 = vld [vmem:[%s7035_s5 + $0x30] sm:$0xff]  ;;  %v608_v31 = vld [vmem:[%s7035_s5 + $0x48] sm:$0xff] }
  0x30   :  { %7120 = vst [vmem:[#allocation14_spill] sm:$0xff] %v5921_v17  ;;  %v612_v32 = vld [vmem:[%s7035_s5 + $0x68] sm:$0xff]  ;;  %v615_v33 = vld [vmem:[%s7035_s5 + $0x80] sm:$0xff]  ;;  %v614_v41 = vld [vmem:[%s7035_s5 + $0x78] sm:$0xff] }
  0x31   :  { %4343 = vmatpush1.bf16.msra.mxu0 %v4342_v22  ;;  %v5935_v22 = vpack.c.bf16 %v377_v15, %v374_v14  ;;  %v389_v37 = vld [vmem:[%s7033_s3 + $0x88] sm:$0xff]  ;;  %v5978_v38 = vpack.c.bf16 %v615_v33, %v612_v32  ;;  %v611_v39 = vld [vmem:[%s7035_s5 + $0x60] sm:$0xff]  ;;  %v618_v43 = vld [vmem:[%s7035_s5 + $0x98] sm:$0xff] }
  0x32   :  { %4375 = vmatpush1.bf16.msra.mxu1 %v5798_v23  ;;  %4345 = vmatprep.subr.bf16.mxu0 %v4344_v24  ;;  %v7043_v24 = vmov 0.0|0.0   ;;  %v621_v44 = vld [vmem:[%s7035_s5 + $0xb0] sm:$0xff]  ;;  %v6000_v46 = vpack.c.bf16 %v614_v41, %v611_v39  ;;  %v620_v54 = vld [vmem:[%s7035_s5 + $0xa8] sm:$0xff]  ;;  %v627_v58 = vld [vmem:[%s7035_s5 + $0xe0] sm:$0xff] }
  0x33   :  { %4377 = vmatprep.subr.bf16.mxu1 %v5810_v28  ;;  %v6009_v52 = vpack.c.bf16 %v621_v44, %v618_v43  ;;  %v617_v53 = vld [vmem:[%s7035_s5 + $0x90] sm:$0xff]  ;;  %v624_v57 = vld [vmem:[%s7035_s5 + $0xc8] sm:$0xff]  ;;  %v623_v2 = vld [vmem:[%s7035_s5 + $0xc0] sm:$0xff] }
  0x34   :  { %v6028_v60 = vpack.c.bf16 %v620_v54, %v617_v53  ;;  %v398_v61 = vld [vmem:[%s7033_s3 + $0xd0] sm:$0xff]  ;;  %v626_v5 = vld [vmem:[%s7035_s5 + $0xd8] sm:$0xff]  ;;  %v632_v19 = vld [vmem:[%s7035_s5 + $0x108] sm:$0xff] }
  0x35   :  { %4347 = vmatpush1.bf16.msra.mxu0 %v4346_v34  ;;  %v5965_v34 = vpack.c.bf16 %v383_v27, %v380_v26  ;;  %v630_v7 = vld [vmem:[%s7035_s5 + $0xf8] sm:$0xff]  ;;  %v633_v8 = vld [vmem:[%s7035_s5 + $0x110] sm:$0xff]  ;;  %v6056_v10 = vpack.c.bf16 %v626_v5, %v623_v2  ;;  %v636_v20 = vld [vmem:[%s7035_s5 + $0x128] sm:$0xff] }
  0x36   :  { %4379 = vmatpush1.bf16.msra.mxu1 %v5828_v35  ;;  %4349 = vmatprep.subr.bf16.mxu0 %v4348_v36  ;;  %v5969_v36 = vpack.c.bf16 %v608_v31, %v605_v30  ;;  %v407_v14 = vld [vmem:[%s7033_s3 + $0x118] sm:$0xff]  ;;  %v6065_v15 = vpack.c.bf16 %v633_v8, %v630_v7  ;;  %v629_v18 = vld [vmem:[%s7035_s5 + $0xf0] sm:$0xff]  ;;  %v639_v21 = vld [vmem:[%s7035_s5 + $0x140] sm:$0xff] }
  0x37   :  { %4381 = vmatprep.subr.bf16.mxu1 %v5840_v40  ;;  %7121 = vst [vmem:[#allocation15_spill] sm:$0xff] %v5965_v34  ;;  %v6084_v27 = vpack.c.bf16 %v632_v19, %v629_v18  ;;  %v410_v30 = vld [vmem:[%s7033_s3 + $0x130] sm:$0xff]  ;;  %v413_v31 = vld [vmem:[%s7033_s3 + $0x148] sm:$0xff]  ;;  %v6093_v32 = vpack.c.bf16 %v639_v21, %v636_v20  ;;  %v635_v33 = vld [vmem:[%s7035_s5 + $0x120] sm:$0xff] }
  0x38   :  { %v645_v39 = vld [vmem:[%s7035_s5 + $0x170] sm:$0xff]  ;;  %v6108_v41 = vpack.c.bf16 %v413_v31, %v410_v30  ;;  %v416_v44 = vld [vmem:[%s7033_s3 + $0x160] sm:$0xff]  ;;  %v644_v54 = vld [vmem:[%s7035_s5 + $0x168] sm:$0xff] }
  0x39   :  { %4351 = vmatpush1.bf16.msra.mxu0 %v4350_v47  ;;  %v392_v47 = vld [vmem:[%s7033_s3 + $0xa0] sm:$0xff]  ;;  %v641_v53 = vld [vmem:[%s7035_s5 + $0x150] sm:$0xff]  ;;  %v610_v7 = vld [vmem:[%s7035_s5 + $0x58] sm:$0xff] }
  0x3a   :  { %4383 = vmatpush1.bf16.msra.mxu1 %v5858_v49  ;;  %4353 = vmatprep.subr.bf16.mxu0 %v4352_v51  ;;  %v395_v51 = vld [vmem:[%s7033_s3 + $0xb8] sm:$0xff]  ;;  %7126 = vst [vmem:[#allocation20_spill] sm:$0xff] %v6108_v41  ;;  %v607_v5 = vld [vmem:[%s7035_s5 + $0x40] sm:$0xff]  ;;  %v625_v30 = vld [vmem:[%s7035_s5 + $0xd0] sm:$0xff] }
  0x3b   :  { %4385 = vmatprep.subr.bf16.mxu1 %v5870_v56  ;;  %v6024_v59 = vpack.c.bf16 %v395_v51, %v392_v47  ;;  %v419_v47 = vld [vmem:[%s7033_s3 + $0x178] sm:$0xff]  ;;  %v6158_v8 = vpack.c.bf16 %v610_v7, %v607_v5  ;;  %v619_v19 = vld [vmem:[%s7035_s5 + $0xa0] sm:$0xff]  ;;  %v628_v31 = vld [vmem:[%s7035_s5 + $0xe8] sm:$0xff] }
  0x3c   :  { %v622_v20 = vld [vmem:[%s7035_s5 + $0xb8] sm:$0xff] }
  0x3d   :  { %4355 = vmatpush1.bf16.msra.mxu0 %v4354_v63  ;;  %7123 = vst [vmem:[#allocation17_spill] sm:$0xff] %v6024_v59  ;;  %v401_v63 = vld [vmem:[%s7033_s3 + $0xe8] sm:$0xff]  ;;  %v6185_v21 = vpack.c.bf16 %v622_v20, %v619_v19  ;;  %v127_v19 = vlaneseq }
  0x3e   :  { %4387 = vmatpush1.bf16.msra.mxu1 %v5888_v0  ;;  %4357 = vmatprep.subr.bf16.mxu0 %v4356_v1  ;;  %v6037_v1 = vpack.c.bf16 %v627_v58, %v624_v57  ;;  %v6052_v9 = vpack.c.bf16 %v401_v63, %v398_v61  ;;  %v6130_v57 = vpack.c.bf16 %v419_v47, %v416_v44  ;;  %v601_v61 = vld [vmem:[%s7035_s5 + $0x10] sm:$0xff]  ;;  %v604_v63 = vld [vmem:[%s7035_s5 + $0x28] sm:$0xff] }
  0x3f   :  { %4389 = vmatprep.subr.bf16.mxu1 %v5897_v6  ;;  %v6134_v58 = vpack.c.bf16 %v644_v54, %v641_v53  ;;  %v6144_v2 = vpack.c.bf16 %v604_v63, %v601_v61  ;;  %v637_v44 = vld [vmem:[%s7035_s5 + $0x130] sm:$0xff]  ;;  %v640_v47 = vld [vmem:[%s7035_s5 + $0x148] sm:$0xff]  ;;  %v643_v54 = vld [vmem:[%s7035_s5 + $0x160] sm:$0xff]  ;;  %v6261_v20 = vshrl.u32 %v127_v19, 7 }
  0x40   :  { %7124 = vst [vmem:[#allocation18_spill] sm:$0xff] %v6052_v9  ;;  %7127 = vst [vmem:[#allocation21_spill] sm:$0xff] %v6130_v57  ;;  %v6221_v53 = vpack.c.bf16 %v640_v47, %v637_v44  ;;  %v646_v61 = vld [vmem:[%s7035_s5 + $0x178] sm:$0xff] }
  0x41   :  { %4359 = vmatpush1.bf16.msra.mxu0 %v4358_v12  ;;  %v404_v12 = vld [vmem:[%s7033_s3 + $0x100] sm:$0xff]  ;;  %v6233_v63 = vpack.c.bf16 %v646_v61, %v643_v54  ;;  %v6281_v61 = vsub.s32 1, %v6261_v20  ;;  %vm835_vm1 = vcmp.eq.s32.totalorder %v6261_v20, 0  ;;  %vm842_vm2 = vcmp.eq.s32.totalorder %v6261_v20, 7 }
  0x42   :  { %4391 = vmatpush1.bf16.msra.mxu1 %v5912_v13  ;;  %4392 = vmatprep.subr.bf16.mxu0 %v7043_v24  ;;  %v6080_v26 = vpack.c.bf16 %v407_v14, %v404_v12  ;;  %v613_v12 = vld [vmem:[%s7035_s5 + $0x70] sm:$0xff]  ;;  %v616_v14 = vld [vmem:[%s7035_s5 + $0x88] sm:$0xff]  ;;  %vm1199_vm3 = vcmp.eq.s32.totalorder %v6261_v20, 1  ;;  %vm1206_vm4 = vcmp.eq.s32.totalorder %v6261_v20, 6  ;;  %vm1565_vm5 = vcmp.eq.s32.totalorder %v6261_v20, 2 }
  0x43   :  { %4417 = vmatprep.subr.bf16.mxu1 %v5921_v17  ;;  %v6173_v18 = vpack.c.bf16 %v616_v14, %v613_v12  ;;  %7131 = vst [vmem:[#allocation25_spill] sm:$0xff] %v6281_v61  ;;  %vm1572_vm6 = vcmp.eq.s32.totalorder %v6261_v20, 5  ;;  %vm1931_vm7 = vcmp.eq.s32.totalorder %v6261_v20, 3  ;;  %vm1938_vm8 = vcmp.eq.s32.totalorder %v6261_v20, 4 }
  0x44   :  { %364 = vmatmul.mubr.f32.vlgmr.msra.gmra.mrb[2].mxu0 %v5702_v48  ;;  %v386_v48 = vld [vmem:[%s7033_s3 + $0x70] sm:$0xff]  ;;  %7125 = vst [vmem:[#allocation19_spill] sm:$0xff] %v6080_v26 }
  0x45   :  { %502 = vmatmul.mubr.f32.vlgmr.msra.gmra.mrb[2].mxu1 %v7041_v3  ;;  %4394 = vmatpush3.bf16.msra.mxu0 %v5935_v22  ;;  %v5996_v45 = vpack.c.bf16 %v389_v37, %v386_v48  ;;  %v638_v48 = vld [vmem:[%s7035_s5 + $0x138] sm:$0xff] }
  0x46   :  { %4419 = vmatpush1.bf16.msra.mxu1 %v5939_v25  ;;  %4395 = vmatprep.subr.bf16.mxu0 %v7043_v24  ;;  %v642_v37 = vld [vmem:[%s7035_s5 + $0x158] sm:$0xff]  ;;  %v6112_v43 = vpack.c.bf16 %v638_v48, %v635_v33  ;;  %v6197_v33 = vpack.c.bf16 %v628_v31, %v625_v30  ;;  %v631_v48 = vld [vmem:[%s7035_s5 + $0x100] sm:$0xff]  ;;  %v6264_v30 = vsub.s32 0, %v6261_v20  ;;  %v6267_v31 = vsub.s32 5, %v6261_v20 }
  0x47   :  { %4421 = vmatprep.subr.bf16.mxu1 %v5948_v29  ;;  %3736 = vmatprep.mubr.msk.f32.mxu0 %vm5421_vm0, %v7041_v3  ;;  %7122 = vst [vmem:[#allocation16_spill] sm:$0xff] %v5996_v45  ;;  %v6121_v51 = vpack.c.bf16 %v645_v39, %v642_v37  ;;  %v634_v37 = vld [vmem:[%s7035_s5 + $0x118] sm:$0xff] }
  0x48   :  { %728 = vmatprep.mubr.f32.mxu1 %v7041_v3  ;;  %v6209_v39 = vpack.c.bf16 %v634_v37, %v631_v48  ;;  %7128 = vst [vmem:[#allocation22_spill] sm:$0xff] %v6264_v30  ;;  %7129 = vst [vmem:[#allocation23_spill] sm:$0xff] %v6267_v31  ;;  %v125_v48 = vld [vmem:[%s7036_s2] sm:$0x3f] }
  0x49   :  { %4397 = vmatpush3.bf16.msra.mxu0 %v5965_v34  ;;  %v420_v37 = vld [vmem:[%s7037_s4] sm:$0x7]  ;;  %v130_v44 = vrot.slane %v125_v48, %v6264_v30  ;;  %v150_v54 = vrot.slane %v125_v48, %v6267_v31 }
  0x4a   :  { %4423 = vmatpush1.bf16.msra.mxu1 %v5969_v36  ;;  %4398 = vmatprep.subr.bf16.mxu0 %v7043_v24  ;;  %v6277_v47 = vrot.slane %v420_v37, %v6264_v30 }
  0x4b   :  { %4425 = vmatprep.subr.bf16.mxu1 %v5978_v38 }
  0x4c   :  { %7130 = vst [vmem:[#allocation24_spill] sm:$0xff] %v6277_v47 }
  0x4d   :  { %4400 = vmatpush3.bf16.msra.mxu0 %v5996_v45 }
  0x4e   :  { %4427 = vmatpush1.bf16.msra.mxu1 %v6000_v46  ;;  %4401 = vmatprep.subr.bf16.mxu0 %v7043_v24 }
  0x4f   :  { %4429 = vmatprep.subr.bf16.mxu1 %v6009_v52 }
  0x51   :  { %4403 = vmatpush3.bf16.msra.mxu0 %v6024_v59 }
  0x52   :  { %4431 = vmatpush1.bf16.msra.mxu1 %v6028_v60  ;;  %4404 = vmatprep.subr.bf16.mxu0 %v7043_v24 }
  0x53   :  { %4433 = vmatprep.subr.bf16.mxu1 %v6037_v1 }
  0x55   :  { %4406 = vmatpush3.bf16.msra.mxu0 %v6052_v9 }
  0x56   :  { %4435 = vmatpush1.bf16.msra.mxu1 %v6056_v10  ;;  %4407 = vmatprep.subr.bf16.mxu0 %v7043_v24 }
  0x57   :  { %4437 = vmatprep.subr.bf16.mxu1 %v6065_v15 }
  0x59   :  { %4409 = vmatpush3.bf16.msra.mxu0 %v6080_v26 }
  0x5a   :  { %4439 = vmatpush1.bf16.msra.mxu1 %v6084_v27  ;;  %4410 = vmatprep.subr.bf16.mxu0 %v7043_v24 }
  0x5b   :  { %4441 = vmatprep.subr.bf16.mxu1 %v6093_v32 }
  0x5d   :  { %4412 = vmatpush3.bf16.msra.mxu0 %v6108_v41 }
  0x5e   :  { %4443 = vmatpush1.bf16.msra.mxu1 %v6112_v43  ;;  %4413 = vmatprep.subr.bf16.mxu0 %v7043_v24 }
  0x5f   :  { %4445 = vmatprep.subr.bf16.mxu1 %v6121_v51 }
  0x61   :  { %4415 = vmatpush3.bf16.msra.mxu0 %v6130_v57 }
  0x62   :  { %4447 = vmatpush1.bf16.msra.mxu1 %v6134_v58  ;;  %4448 = vmatprep.subr.bf16.mxu0 %v7043_v24 }
  0x63   :  { %4473 = vmatprep.subr.bf16.mxu1 %v5682_v42 }
  0x64   :  { %3737 = vmatmul.mubr.f32.vlgmr.msra.gmra.mrb[4].mxu0 %v7041_v3 }
  0x65   :  { %729 = vmatmul.mubr.f32.vlgmr.msra.gmra.mrb[4].mxu1 %v7041_v3  ;;  %4450 = vmatpush3.bf16.msra.mxu0 %v6144_v2 }
  0x66   :  { %4451 = vmatprep.subr.bf16.mxu0 %v7043_v24  ;;  %3771 = vmatprep.mubr.msk.f32.mxu0 %vm5421_vm0, %v7041_v3 }
  0x67   :  { %4475 = vmatpush1.bf16.msra.mxu1 %v5704_v50  ;;  %913 = vmatprep.mubr.f32.mxu1 %v7041_v3 }
  0x68   :  { %4477 = vmatprep.subr.bf16.mxu1 %v5716_v55 }
  0x69   :  { %4453 = vmatpush3.bf16.msra.mxu0 %v6158_v8 }
  0x6a   :  { %4454 = vmatprep.subr.bf16.mxu0 %v7043_v24 }
  0x6b   :  { %4479 = vmatpush1.bf16.msra.mxu1 %v5736_v62 }
  0x6c   :  { %4481 = vmatprep.subr.bf16.mxu1 %v5748_v4 }
  0x6d   :  { %4456 = vmatpush3.bf16.msra.mxu0 %v6173_v18 }
  0x6e   :  { %4457 = vmatprep.subr.bf16.mxu0 %v7043_v24 }
  0x6f   :  { %4483 = vmatpush1.bf16.msra.mxu1 %v5768_v11 }
  0x70   :  { %4485 = vmatprep.subr.bf16.mxu1 %v5780_v16 }
  0x71   :  { %4459 = vmatpush3.bf16.msra.mxu0 %v6185_v21 }
  0x72   :  { %4460 = vmatprep.subr.bf16.mxu0 %v7043_v24 }
  0x73   :  { %4487 = vmatpush1.bf16.msra.mxu1 %v5798_v23 }
  0x74   :  { %4489 = vmatprep.subr.bf16.mxu1 %v5810_v28 }
  0x75   :  { %4462 = vmatpush3.bf16.msra.mxu0 %v6197_v33 }
  0x76   :  { %4463 = vmatprep.subr.bf16.mxu0 %v7043_v24 }
  0x77   :  { %4491 = vmatpush1.bf16.msra.mxu1 %v5828_v35 }
  0x78   :  { %4493 = vmatprep.subr.bf16.mxu1 %v5840_v40 }
  0x79   :  { %4465 = vmatpush3.bf16.msra.mxu0 %v6209_v39 }
  0x7a   :  { %4466 = vmatprep.subr.bf16.mxu0 %v7043_v24 }
  0x7b   :  { %4495 = vmatpush1.bf16.msra.mxu1 %v5858_v49 }
  0x7c   :  { %4497 = vmatprep.subr.bf16.mxu1 %v5870_v56 }
  0x7d   :  { %4468 = vmatpush3.bf16.msra.mxu0 %v6221_v53 }
  0x7e   :  { %4469 = vmatprep.subr.bf16.mxu0 %v7043_v24 }
  0x7f   :  { %4499 = vmatpush1.bf16.msra.mxu1 %v5888_v0  ;;  %v134_v0 = vrot.slane %v125_v48, %v6281_v61 }
  0x80   :  { %4501 = vmatprep.subr.bf16.mxu1 %v5897_v6 }
  0x81   :  { %4471 = vmatpush3.bf16.msra.mxu0 %v6233_v63 }
  0x82   :  { %4504 = vmatprep.subr.bf16.mxu0 %v7043_v24 }
  0x83   :  { %4503 = vmatpush1.bf16.msra.mxu1 %v5912_v13 }
  0x84   :  { %3772 = vmatmul.mubr.f32.vlgmr.msra.gmra.mrb[6].mxu0 %v7041_v3  ;;  %4529 = vmatprep.subr.bf16.mxu1 %v5921_v17 }
  0x85   :  { %4506 = vmatpush3.bf16.msra.mxu0 %v5935_v22  ;;  %3806 = vmatprep.mubr.msk.f32.mxu0 %vm5421_vm0, %v7041_v3 }
  0x86   :  { %4507 = vmatprep.subr.bf16.mxu0 %v7043_v24 }
  0x89   :  { %4509 = vmatpush3.bf16.msra.mxu0 %v5965_v34 }
  0x8a   :  { %4510 = vmatprep.subr.bf16.mxu0 %v7043_v24 }
  0x8d   :  { %4512 = vmatpush3.bf16.msra.mxu0 %v5996_v45 }
  0x8e   :  { %4513 = vmatprep.subr.bf16.mxu0 %v7043_v24 }
  0x91   :  { %4515 = vmatpush3.bf16.msra.mxu0 %v6024_v59 }
  0x92   :  { %4516 = vmatprep.subr.bf16.mxu0 %v7043_v24 }
  0x95   :  { %4518 = vmatpush3.bf16.msra.mxu0 %v6052_v9 }
  0x96   :  { %4519 = vmatprep.subr.bf16.mxu0 %v7043_v24 }
  0x99   :  { %4521 = vmatpush3.bf16.msra.mxu0 %v6080_v26 }
  0x9a   :  { %4522 = vmatprep.subr.bf16.mxu0 %v7043_v24 }
  0x9d   :  { %4524 = vmatpush3.bf16.msra.mxu0 %v6108_v41 }
  0x9e   :  { %4525 = vmatprep.subr.bf16.mxu0 %v7043_v24 }
  0xa1   :  { %4527 = vmatpush3.bf16.msra.mxu0 %v6130_v57  ;;  %v6286_v57 = vrot.slane %v420_v37, %v6281_v61 }
  0xa2   :  { %4560 = vmatprep.subr.bf16.mxu0 %v7043_v24 }
  0xa3   :  { %7133 = vst [vmem:[#allocation27_spill] sm:$0xff] %v6286_v57 }
  0xf7   :  { %v223_v5 = vpop.f32.mrb[0].mxu0 }
  0xf8   :  { %v225_v7 = vpop.f32.mrb[1].mxu0  ;;  %v294_v12 = vpop.f32.mrb[0].mxu1  ;;  %v6283_v17 = vadd.f32 %v223_v5, %v130_v44 }
  0xf9   :  { %v296_v14 = vpop.f32.mrb[1].mxu1  ;;  %v6294_v49 = vadd.f32 %v225_v7, %v134_v0 }
  0xfa   :  { %7132 = vst [vmem:[#allocation26_spill] sm:$0xff] %v6283_v17 }
  0xfb   :  { %7134 = vst [vmem:[#allocation28_spill] sm:$0xff] %v6294_v49 }
 0x117   :  { %v365_v19 = vpop.f32.mrb[2].mxu0 }
 0x118   :  { %v503_v3 = vpop.f32.mrb[2].mxu1  ;;  %v367_v24 = vpop.f32.mrb[3].mxu0 }
 0x119   :  { %v504_v13 = vadd.f32 %v503_v3, %v6277_v47  ;;  %v6289_v6 = vadd.f32 %v367_v24, %v150_v54  ;;  %v505_v41 = vpop.f32.mrb[3].mxu1  ;;  %v647_v3 = vld [vmem:[%s7038_s6] sm:$0x7]  ;;  %v6301_v24 = vsub.s32 2, %v6261_v20 }
 0x11a   :  { %v506_v26 = vadd.f32 %v505_v41, %v6286_v57  ;;  %v6304_v41 = vsub.s32 3, %v6261_v20  ;;  %v6310_v0 = vrot.slane %v647_v3, %v6264_v30 }
 0x11b   :  { %v578_v31 = vadd.f32 %v504_v13, %v6283_v17  ;;  %7135 = vst [vmem:[#allocation29_spill] sm:$0xff] %v6301_v24 }
 0x11c   :  { %v585_v5 = vadd.f32 %v506_v26, %v6294_v49  ;;  %7136 = vst [vmem:[#allocation30_spill] sm:$0xff] %v6304_v41  ;;  %v6314_v26 = vrot.slane %v647_v3, %v6281_v61  ;;  %v142_v7 = vrot.slane %v125_v48, %v6304_v41 }
 0x11d   :  { %v3400_v56 = vmul.f32 -1.442695, %v578_v31 }
 0x11e   :  { %v3401_v44 = vmul.f32 -1.442695, %v585_v5  ;;  %v6324_v61 = vadd.f32 %v296_v14, %v142_v7 }
 0x11f   :  { %5259 = vpow2.f32 %v3400_v56  ;;  %v6307_v56 = vrot.slane %v420_v37, %v6301_v24  ;;  %v6319_v37 = vsub.s32 4, %v6261_v20 }
 0x120   :  { %5261 = vpow2.f32 %v3401_v44 }
 0x121   :  { %7137 = vst [vmem:[#allocation31_spill] sm:$0xff] %v6307_v56  ;;  %7138 = vst [vmem:[#allocation32_spill] sm:$0xff] %v6319_v37 }
 0x129   :  { %v5260_v40 = vpop.eup %5259 }
 0x12a   :  { %v582_v9 = vadd.f32 1.0, %v5260_v40  ;;  %v5262_v13 = vpop.eup %5261  ;;  %v138_v40 = vrot.slane %v125_v48, %v6301_v24 }
 0x12c   :  { %5263 = vrcp.f32 %v582_v9  ;;  %v589_v9 = vadd.f32 1.0, %v5262_v13  ;;  %v6322_v47 = vadd.f32 %v294_v12, %v138_v40 }
 0x12e   :  { %5265 = vrcp.f32 %v589_v9 }
 0x136   :  { %v5264_v49 = vpop.eup %5263 }
 0x137   :  { %v574_v31 = vpop.f32.mrb[4].mxu0 }
 0x138   :  { %v575_v54 = vadd.f32 %v574_v31, %v6307_v56  ;;  %v730_v5 = vpop.f32.mrb[4].mxu1  ;;  %v3738_v44 = vpop.f32.mrb[5].mxu0 }
 0x139   :  { %v731_v17 = vadd.f32 %v730_v5, %v6310_v0  ;;  %v732_v57 = vpop.f32.mrb[5].mxu1  ;;  %v146_v44 = vrot.slane %v125_v48, %v6319_v37 }
 0x13a   :  { %v592_v13 = vmul.f32 %v5264_v49, %v575_v54  ;;  %v733_v41 = vadd.f32 %v732_v57, %v6314_v26  ;;  %v5266_v49 = vpop.eup %5265 }
 0x13b   :  { %v806_v35 = vrot.slane %v731_v17, 1  ;;  %v6330_v5 = vadd.f32 %v365_v19, %v146_v44  ;;  %v595_v40 = vsub.f32 1.0, %v5266_v49  ;;  %v597_v57 = vmul.f32 0.0, %v5266_v49 }
 0x13c   :  { %v593_v31 = vadd.f32 %v592_v13, %v6322_v47  ;;  %v816_v59 = vrot.slane %v733_v41, 1 }
 0x13d   :  { %v808_v56 = vadd.f32 %v806_v35, %v6324_v61  ;;  %v7140_v35 = vmov 0.0  }
 0x13e   :  { %5267 = vtanh.f32 %v593_v31  ;;  %v818_v12 = vadd.f32 %v816_v59, %v6330_v5  ;;  %v6349_v59 = vrot.slane %v647_v3, %v6301_v24  ;;  %v7155_v24 = vld [vmem:[#allocation24_spill] sm:$0xff] }
 0x13f   :  { %v3402_v28 = vmul.f32 -1.442695, %v808_v56 }
 0x140   :  { %v3403_v14 = vmul.f32 -1.442695, %v818_v12 }
 0x141   :  { %5269 = vpow2.f32 %v3402_v28  ;;  %v7139_v28 = vmov 0.0|0.0  }
 0x142   :  { %5271 = vpow2.f32 %v3403_v14 }
 0x148   :  { %v5268_v17 = vpop.eup %5267 }
 0x149   :  { %v596_v9 = vmul.f32 %v5268_v17, %v595_v40 }
 0x14b   :  { %v5270_v7 = vpop.eup %5269  ;;  %v6333_v54 = vadd.f32 %v597_v57, %v596_v9 }
 0x14c   :  { %v812_v48 = vadd.f32 1.0, %v5270_v7  ;;  %v5272_v19 = vpop.eup %5271  ;;  %v7089_v7 = vsub.s32 7, %v6261_v20 }
 0x14d   :  { %914 = vmatmul.mubr.f32.vlgmr.msra.gmra.mrb[6].mxu1 %v6333_v54  ;;  %3807 = vmatmul.mubr.f32.vlgmr.msra.gmra.mrb[8].mxu0 %v6333_v54  ;;  %v822_v56 = vadd.f32 1.0, %v5272_v19 }
 0x14e   :  { %4531 = vmatpush1.bf16.msra.mxu1 %v5939_v25  ;;  %4562 = vmatpush3.bf16.msra.mxu0 %v6144_v2  ;;  %5273 = vrcp.f32 %v812_v48  ;;  %v839_v48 = vrot.slane %v6333_v54, %v6264_v30 }
 0x14f   :  { %4533 = vmatprep.subr.bf16.mxu1 %v5948_v29  ;;  %4563 = vmatprep.subr.bf16.mxu0 %v7139_v28  ;;  %5275 = vrcp.f32 %v822_v56 }
 0x150   :  { %1090 = vmatprep.mubr.f32.mxu1 %v7140_v35  ;;  %3841 = vmatprep.mubr.msk.f32.mxu0 %vm5421_vm0, %v7140_v35 }
 0x152   :  { %4535 = vmatpush1.bf16.msra.mxu1 %v5969_v36  ;;  %4565 = vmatpush3.bf16.msra.mxu0 %v6158_v8 }
 0x153   :  { %4537 = vmatprep.subr.bf16.mxu1 %v5978_v38  ;;  %4566 = vmatprep.subr.bf16.mxu0 %v7139_v28 }
 0x156   :  { %4539 = vmatpush1.bf16.msra.mxu1 %v6000_v46  ;;  %4568 = vmatpush3.bf16.msra.mxu0 %v6173_v18 }
 0x157   :  { %v801_v41 = vpop.f32.mrb[6].mxu0  ;;  %4541 = vmatprep.subr.bf16.mxu1 %v6009_v52  ;;  %4569 = vmatprep.subr.bf16.mxu0 %v7139_v28 }
 0x158   :  { %v802_v13 = vadd.f32 %v801_v41, %v6349_v59  ;;  %v3773_v31 = vpop.f32.mrb[7].mxu0  ;;  %v5274_v3 = vpop.eup %5273 }
 0x159   :  { %v5276_v14 = vpop.eup %5275 }
 0x15a   :  { %v826_v44 = vrot.slane %v802_v13, 1  ;;  %4543 = vmatpush1.bf16.msra.mxu1 %v6028_v60  ;;  %4571 = vmatpush3.bf16.msra.mxu0 %v6185_v21  ;;  %v831_v40 = vsub.f32 1.0, %v5276_v14  ;;  %v833_v57 = vmul.f32 0.0, %v5276_v14  ;;  %v840_v13 = vsel %vm835_vm1, %v839_v48, 0.0  ;;  %v7144_v14 = vld [vmem:[#allocation18_spill] sm:$0xff]  ;;  %v7149_v48 = vld [vmem:[#allocation11_spill] sm:$0xff] }
 0x15b   :  { %4545 = vmatprep.subr.bf16.mxu1 %v6037_v1  ;;  %4572 = vmatprep.subr.bf16.mxu0 %v7139_v28 }
 0x15c   :  { %v828_v12 = vmul.f32 %v5274_v3, %v826_v44  ;;  %v7141_v3 = vld [vmem:[#allocation17_spill] sm:$0xff] }
 0x15e   :  { %v829_v49 = vadd.f32 %v828_v12, %v6289_v6  ;;  %4547 = vmatpush1.bf16.msra.mxu1 %v6056_v10  ;;  %4574 = vmatpush3.bf16.msra.mxu0 %v6197_v33  ;;  %v7142_v12 = vld [vmem:[#allocation6_spill] sm:$0xff] }
 0x15f   :  { %4549 = vmatprep.subr.bf16.mxu1 %v6065_v15  ;;  %4575 = vmatprep.subr.bf16.mxu0 %v7139_v28 }
 0x160   :  { %5277 = vtanh.f32 %v829_v49  ;;  %v7143_v49 = vld [vmem:[#allocation7_spill] sm:$0xff] }
 0x162   :  { %4551 = vmatpush1.bf16.msra.mxu1 %v6084_v27  ;;  %4577 = vmatpush3.bf16.msra.mxu0 %v6209_v39 }
 0x163   :  { %4553 = vmatprep.subr.bf16.mxu1 %v6093_v32  ;;  %4578 = vmatprep.subr.bf16.mxu0 %v7139_v28 }
 0x166   :  { %4555 = vmatpush1.bf16.msra.mxu1 %v6112_v43  ;;  %4580 = vmatpush3.bf16.msra.mxu0 %v6221_v53 }
 0x167   :  { %4557 = vmatprep.subr.bf16.mxu1 %v6121_v51  ;;  %4581 = vmatprep.subr.bf16.mxu0 %v7139_v28 }
 0x16a   :  { %v5278_v17 = vpop.eup %5277  ;;  %4559 = vmatpush1.bf16.msra.mxu1 %v6134_v58  ;;  %4583 = vmatpush3.bf16.msra.mxu0 %v6233_v63 }
 0x16b   :  { %v832_v9 = vmul.f32 %v5278_v17, %v831_v40  ;;  %4585 = vmatprep.subr.bf16.mxu1 %v5682_v42  ;;  %4616 = vmatprep.subr.bf16.mxu0 %v7139_v28  ;;  %v7145_v40 = vld [vmem:[#allocation8_spill] sm:$0xff]  ;;  %v7146_v17 = vld [vmem:[#allocation9_spill] sm:$0xff] }
 0x16d   :  { %v6380_v19 = vadd.f32 %v833_v57, %v832_v9  ;;  %v7147_v9 = vld [vmem:[#allocation19_spill] sm:$0xff]  ;;  %v7148_v57 = vld [vmem:[#allocation10_spill] sm:$0xff] }
 0x16f   :  { %v846_v41 = vrot.slane %v6380_v19, %v7089_v7  ;;  %v1024_v56 = vrot.slane %v6380_v19, 7  ;;  %v7154_v7 = vld [vmem:[#allocation14_spill] sm:$0xff] }
 0x171   :  { %v847_v31 = vsel %vm842_vm2, %v846_v41, 0.0  ;;  %1091 = vmatmul.mubr.f32.vlgmr.msra.gmra.mrb[8].mxu1 %v1024_v56  ;;  %3842 = vmatmul.mubr.f32.vlgmr.msra.gmra.mrb[10].mxu0 %v1024_v56  ;;  %v7150_v41 = vld [vmem:[#allocation20_spill] sm:$0xff] }
 0x172   :  { %4587 = vmatpush1.bf16.msra.mxu1 %v5704_v50  ;;  %4618 = vmatpush3.bf16.msra.mxu0 %v5935_v22  ;;  %v6394_v44 = vadd.f32 %v847_v31, %v840_v13  ;;  %v7151_v56 = vld [vmem:[#allocation12_spill] sm:$0xff]  ;;  %v7152_v13 = vld [vmem:[#allocation13_spill] sm:$0xff] }
 0x173   :  { %4589 = vmatprep.subr.bf16.mxu1 %v5716_v55  ;;  %4619 = vmatprep.subr.bf16.mxu0 %v7139_v28  ;;  %v7153_v31 = vld [vmem:[#allocation21_spill] sm:$0xff] }
 0x174   :  { %1280 = vmatprep.mubr.f32.mxu1 %v7140_v35  ;;  %3876 = vmatprep.mubr.msk.f32.mxu0 %vm5421_vm0, %v7140_v35 }
 0x176   :  { %4591 = vmatpush1.bf16.msra.mxu1 %v5736_v62  ;;  %4621 = vmatpush3.bf16.msra.mxu0 %v5965_v34 }
 0x177   :  { %4593 = vmatprep.subr.bf16.mxu1 %v5748_v4  ;;  %4622 = vmatprep.subr.bf16.mxu0 %v7139_v28 }
 0x17a   :  { %4595 = vmatpush1.bf16.msra.mxu1 %v5768_v11  ;;  %4624 = vmatpush3.bf16.msra.mxu0 %v5996_v45 }
 0x17b   :  { %4597 = vmatprep.subr.bf16.mxu1 %v5780_v16  ;;  %4625 = vmatprep.subr.bf16.mxu0 %v7139_v28 }
 0x17e   :  { %4599 = vmatpush1.bf16.msra.mxu1 %v5798_v23  ;;  %4627 = vmatpush3.bf16.msra.mxu0 %v7141_v3 }
 0x17f   :  { %4601 = vmatprep.subr.bf16.mxu1 %v7142_v12  ;;  %4628 = vmatprep.subr.bf16.mxu0 %v7139_v28  ;;  %v7158_v12 = vld [vmem:[#allocation28_spill] sm:$0xff] }
 0x182   :  { %4603 = vmatpush1.bf16.msra.mxu1 %v7143_v49  ;;  %4630 = vmatpush3.bf16.msra.mxu0 %v7144_v14  ;;  %v7157_v14 = vld [vmem:[#allocation26_spill] sm:$0xff] }
 0x183   :  { %4605 = vmatprep.subr.bf16.mxu1 %v7145_v40  ;;  %4631 = vmatprep.subr.bf16.mxu0 %v7139_v28 }
 0x186   :  { %4607 = vmatpush1.bf16.msra.mxu1 %v7146_v17  ;;  %4633 = vmatpush3.bf16.msra.mxu0 %v7147_v9  ;;  %v7156_v17 = vld [vmem:[#allocation27_spill] sm:$0xff] }
 0x187   :  { %4609 = vmatprep.subr.bf16.mxu1 %v7148_v57  ;;  %4634 = vmatprep.subr.bf16.mxu0 %v7139_v28 }
 0x18a   :  { %4611 = vmatpush1.bf16.msra.mxu1 %v7149_v48  ;;  %4636 = vmatpush3.bf16.msra.mxu0 %v7150_v41 }
 0x18b   :  { %4613 = vmatprep.subr.bf16.mxu1 %v7151_v56  ;;  %4637 = vmatprep.subr.bf16.mxu0 %v7139_v28 }
 0x18e   :  { %4615 = vmatpush1.bf16.msra.mxu1 %v7152_v13  ;;  %4639 = vmatpush3.bf16.msra.mxu0 %v7153_v31 }
 0x18f   :  { %4641 = vmatprep.subr.bf16.mxu1 %v7154_v7  ;;  %4672 = vmatprep.subr.bf16.mxu0 %v7139_v28 }
 0x220   :  { %v915_v30 = vpop.f32.mrb[6].mxu1  ;;  %v986_v37 = vpop.f32.mrb[8].mxu0 }
 0x221   :  { %v916_v57 = vadd.f32 %v915_v30, %v7155_v24  ;;  %v917_v9 = vpop.f32.mrb[7].mxu1  ;;  %v3808_v48 = vpop.f32.mrb[9].mxu0  ;;  %v7159_v30 = vld [vmem:[#allocation31_spill] sm:$0xff] }
 0x222   :  { %v918_v41 = vadd.f32 %v917_v9, %v7156_v17  ;;  %v987_v48 = vadd.f32 %v986_v37, %v7159_v30 }
 0x223   :  { %v991_v40 = vrot.slane %v916_v57, 7  ;;  %v1019_v57 = vrot.slane %v6333_v54, 7 }
 0x224   :  { %v1001_v56 = vrot.slane %v918_v41, 7  ;;  %v1011_v24 = vrot.slane %v987_v48, 7 }
 0x225   :  { %v993_v49 = vadd.f32 %v991_v40, %v7157_v14 }
 0x226   :  { %v1003_v13 = vadd.f32 %v1001_v56, %v7158_v12 }
 0x227   :  { %v3404_v3 = vmul.f32 -1.442695, %v993_v49 }
 0x228   :  { %v3405_v31 = vmul.f32 -1.442695, %v1003_v13 }
 0x229   :  { %5279 = vpow2.f32 %v3404_v3 }
 0x22a   :  { %5281 = vpow2.f32 %v3405_v31 }
 0x233   :  { %v5280_v7 = vpop.eup %5279 }
 0x234   :  { %v5282_v23 = vpop.eup %5281  ;;  %v997_v16 = vadd.f32 1.0, %v5280_v7 }
 0x235   :  { %v1007_v45 = vadd.f32 1.0, %v5282_v23 }
 0x236   :  { %5283 = vrcp.f32 %v997_v16 }
 0x237   :  { %5285 = vrcp.f32 %v1007_v45 }
 0x240   :  { %v5284_v9 = vpop.eup %5283 }
 0x241   :  { %v5286_v41 = vpop.eup %5285  ;;  %v1013_v40 = vmul.f32 %v5284_v9, %v1011_v24 }
 0x242   :  { %v1021_v14 = vmul.f32 %v5286_v41, %v1019_v57  ;;  %v1016_v9 = vsub.f32 1.0, %v5286_v41 }
 0x243   :  { %v1014_v49 = vadd.f32 %v1013_v40, %v6322_v47 }
 0x244   :  { %v1092_v56 = vpop.f32.mrb[8].mxu1  ;;  %v1163_v3 = vpop.f32.mrb[10].mxu0 }
 0x245   :  { %5287 = vtanh.f32 %v1014_v49  ;;  %v1093_v13 = vadd.f32 %v1092_v56, %v6310_v0  ;;  %v1094_v7 = vpop.f32.mrb[9].mxu1  ;;  %v3843_v23 = vpop.f32.mrb[11].mxu0  ;;  %v7160_v56 = vld [vmem:[#allocation25_spill] sm:$0xff] }
 0x246   :  { %v1095_v16 = vadd.f32 %v1094_v7, %v6314_v26 }
 0x247   :  { %v1168_v45 = vrot.slane %v1093_v13, 2 }
 0x248   :  { %v1178_v37 = vrot.slane %v1095_v16, 2 }
 0x249   :  { %v1170_v31 = vadd.f32 %v1168_v45, %v6324_v61 }
 0x24a   :  { %v1180_v54 = vadd.f32 %v1178_v37, %v6330_v5 }
 0x24b   :  { %v3406_v48 = vmul.f32 -1.442695, %v1170_v31 }
 0x24c   :  { %v3407_v24 = vmul.f32 -1.442695, %v1180_v54 }
 0x24d   :  { %5289 = vpow2.f32 %v3406_v48 }
 0x24e   :  { %5291 = vpow2.f32 %v3407_v24 }
 0x24f   :  { %v5288_v57 = vpop.eup %5287 }
 0x250   :  { %v1017_v40 = vmul.f32 %v5288_v57, %v1016_v9 }
 0x252   :  { %v6440_v49 = vadd.f32 %v1021_v14, %v1017_v40 }
 0x254   :  { %v1203_v7 = vrot.slane %v6440_v49, %v7160_v56  ;;  %v1214_v13 = vrot.slane %v6440_v49, 1  ;;  %v7177_v56 = vld [vmem:[#allocation14_spill] sm:$0xff] }
 0x256   :  { %1281 = vmatmul.mubr.f32.vlgmr.msra.gmra.mrb[10].mxu1 %v1214_v13  ;;  %3877 = vmatmul.mubr.f32.vlgmr.msra.gmra.mrb[12].mxu0 %v1214_v13  ;;  %v1204_v23 = vsel %vm1199_vm3, %v1203_v7, 0.0  ;;  %v7101_v13 = vsub.s32 6, %v6261_v20 }
 0x257   :  { %v5290_v16 = vpop.eup %5289  ;;  %4643 = vmatpush1.bf16.msra.mxu1 %v5939_v25  ;;  %4674 = vmatpush3.bf16.msra.mxu0 %v6144_v2  ;;  %v1205_v14 = vadd.f32 %v1204_v23, %v6394_v44  ;;  %v1164_v44 = vadd.f32 %v1163_v3, %v6349_v59  ;;  %v1195_v3 = vrot.slane %v6380_v19, 1 }
 0x258   :  { %v5292_v41 = vpop.eup %5291  ;;  %v1174_v45 = vadd.f32 1.0, %v5290_v16  ;;  %4645 = vmatprep.subr.bf16.mxu1 %v5948_v29  ;;  %4675 = vmatprep.subr.bf16.mxu0 %v7139_v28 }
 0x259   :  { %v1184_v37 = vadd.f32 1.0, %v5292_v41  ;;  %1456 = vmatprep.mubr.f32.mxu1 %v7140_v35  ;;  %3911 = vmatprep.mubr.msk.f32.mxu0 %vm5421_vm0, %v7140_v35  ;;  %v1188_v31 = vrot.slane %v1164_v44, 2  ;;  %v7162_v44 = vld [vmem:[#allocation4_spill] sm:$0xff] }
 0x25a   :  { %5293 = vrcp.f32 %v1174_v45 }
 0x25b   :  { %5295 = vrcp.f32 %v1184_v37  ;;  %4647 = vmatpush1.bf16.msra.mxu1 %v5969_v36  ;;  %4677 = vmatpush3.bf16.msra.mxu0 %v6158_v8 }
 0x25c   :  { %4649 = vmatprep.subr.bf16.mxu1 %v5978_v38  ;;  %4678 = vmatprep.subr.bf16.mxu0 %v7139_v28 }
 0x25f   :  { %4651 = vmatpush1.bf16.msra.mxu1 %v6000_v46  ;;  %4680 = vmatpush3.bf16.msra.mxu0 %v6173_v18 }
 0x260   :  { %4653 = vmatprep.subr.bf16.mxu1 %v6009_v52  ;;  %4681 = vmatprep.subr.bf16.mxu0 %v7139_v28 }
 0x263   :  { %4655 = vmatpush1.bf16.msra.mxu1 %v6028_v60  ;;  %4683 = vmatpush3.bf16.msra.mxu0 %v6185_v21 }
 0x264   :  { %v5294_v54 = vpop.eup %5293  ;;  %4657 = vmatprep.subr.bf16.mxu1 %v6037_v1  ;;  %4684 = vmatprep.subr.bf16.mxu0 %v7139_v28 }
 0x265   :  { %v5296_v48 = vpop.eup %5295  ;;  %v1190_v24 = vmul.f32 %v5294_v54, %v1188_v31  ;;  %v7163_v31 = vld [vmem:[#allocation5_spill] sm:$0xff] }
 0x266   :  { %v1197_v9 = vmul.f32 %v5296_v48, %v1195_v3  ;;  %v1193_v19 = vsub.f32 1.0, %v5296_v48  ;;  %v7164_v54 = vld [vmem:[#allocation17_spill] sm:$0xff]  ;;  %v7165_v3 = vld [vmem:[#allocation6_spill] sm:$0xff]  ;;  %v7166_v48 = vld [vmem:[#allocation7_spill] sm:$0xff] }
 0x267   :  { %v1191_v57 = vadd.f32 %v1190_v24, %v6289_v6  ;;  %4659 = vmatpush1.bf16.msra.mxu1 %v6056_v10  ;;  %4686 = vmatpush3.bf16.msra.mxu0 %v6197_v33  ;;  %v7167_v24 = vld [vmem:[#allocation18_spill] sm:$0xff] }
 0x268   :  { %4661 = vmatprep.subr.bf16.mxu1 %v6065_v15  ;;  %4687 = vmatprep.subr.bf16.mxu0 %v7139_v28 }
 0x269   :  { %5297 = vtanh.f32 %v1191_v57  ;;  %v7169_v57 = vld [vmem:[#allocation9_spill] sm:$0xff] }
 0x26b   :  { %4663 = vmatpush1.bf16.msra.mxu1 %v6084_v27  ;;  %4689 = vmatpush3.bf16.msra.mxu0 %v6209_v39 }
 0x26c   :  { %4665 = vmatprep.subr.bf16.mxu1 %v6093_v32  ;;  %4690 = vmatprep.subr.bf16.mxu0 %v7139_v28 }
 0x26f   :  { %4667 = vmatpush1.bf16.msra.mxu1 %v6112_v43  ;;  %4692 = vmatpush3.bf16.msra.mxu0 %v6221_v53 }
 0x270   :  { %4669 = vmatprep.subr.bf16.mxu1 %v6121_v51  ;;  %4693 = vmatprep.subr.bf16.mxu0 %v7139_v28 }
 0x273   :  { %v5298_v40 = vpop.eup %5297  ;;  %4671 = vmatpush1.bf16.msra.mxu1 %v6134_v58  ;;  %4695 = vmatpush3.bf16.msra.mxu0 %v6233_v63 }
 0x274   :  { %v1194_v7 = vmul.f32 %v5298_v40, %v1193_v19  ;;  %4697 = vmatprep.subr.bf16.mxu1 %v5682_v42  ;;  %4728 = vmatprep.subr.bf16.mxu0 %v7139_v28  ;;  %v7170_v19 = vld [vmem:[#allocation19_spill] sm:$0xff]  ;;  %v7171_v40 = vld [vmem:[#allocation10_spill] sm:$0xff] }
 0x276   :  { %v6488_v23 = vadd.f32 %v1197_v9, %v1194_v7  ;;  %v7168_v9 = vld [vmem:[#allocation8_spill] sm:$0xff]  ;;  %v7172_v7 = vld [vmem:[#allocation11_spill] sm:$0xff] }
 0x278   :  { %v1210_v16 = vrot.slane %v6488_v23, %v7101_v13  ;;  %v1390_v41 = vrot.slane %v6488_v23, 6  ;;  %v7176_v13 = vld [vmem:[#allocation21_spill] sm:$0xff] }
 0x27a   :  { %v1211_v45 = vsel %vm1206_vm4, %v1210_v16, 0.0  ;;  %1457 = vmatmul.mubr.f32.vlgmr.msra.gmra.mrb[12].mxu1 %v1390_v41  ;;  %3912 = vmatmul.mubr.f32.vlgmr.msra.gmra.mrb[14].mxu0 %v1390_v41  ;;  %v7173_v16 = vld [vmem:[#allocation20_spill] sm:$0xff] }
 0x27b   :  { %4699 = vmatpush1.bf16.msra.mxu1 %v5704_v50  ;;  %4730 = vmatpush3.bf16.msra.mxu0 %v5935_v22  ;;  %v6499_v37 = vadd.f32 %v1211_v45, %v1205_v14  ;;  %v7161_v14 = vld [vmem:[#allocation16_spill] sm:$0xff]  ;;  %v7175_v45 = vld [vmem:[#allocation13_spill] sm:$0xff] }
 0x27c   :  { %4701 = vmatprep.subr.bf16.mxu1 %v5716_v55  ;;  %4731 = vmatprep.subr.bf16.mxu0 %v7139_v28  ;;  %v7174_v41 = vld [vmem:[#allocation12_spill] sm:$0xff] }
 0x27d   :  { %1646 = vmatprep.mubr.f32.mxu1 %v7140_v35  ;;  %3946 = vmatprep.mubr.msk.f32.mxu0 %vm5421_vm0, %v7140_v35 }
 0x27f   :  { %4703 = vmatpush1.bf16.msra.mxu1 %v5736_v62  ;;  %4733 = vmatpush3.bf16.msra.mxu0 %v5965_v34 }
 0x280   :  { %4705 = vmatprep.subr.bf16.mxu1 %v5748_v4  ;;  %4734 = vmatprep.subr.bf16.mxu0 %v7139_v28 }
 0x283   :  { %4707 = vmatpush1.bf16.msra.mxu1 %v5768_v11  ;;  %4736 = vmatpush3.bf16.msra.mxu0 %v7161_v14 }
 0x284   :  { %4709 = vmatprep.subr.bf16.mxu1 %v7162_v44  ;;  %4737 = vmatprep.subr.bf16.mxu0 %v7139_v28 }
 0x287   :  { %4711 = vmatpush1.bf16.msra.mxu1 %v7163_v31  ;;  %4739 = vmatpush3.bf16.msra.mxu0 %v7164_v54 }
 0x288   :  { %4713 = vmatprep.subr.bf16.mxu1 %v7165_v3  ;;  %4740 = vmatprep.subr.bf16.mxu0 %v7139_v28  ;;  %v7179_v3 = vld [vmem:[#allocation26_spill] sm:$0xff] }
 0x28b   :  { %4715 = vmatpush1.bf16.msra.mxu1 %v7166_v48  ;;  %4742 = vmatpush3.bf16.msra.mxu0 %v7167_v24 }
 0x28c   :  { %4717 = vmatprep.subr.bf16.mxu1 %v7168_v9  ;;  %4743 = vmatprep.subr.bf16.mxu0 %v7139_v28 }
 0x28f   :  { %4719 = vmatpush1.bf16.msra.mxu1 %v7169_v57  ;;  %4745 = vmatpush3.bf16.msra.mxu0 %v7170_v19  ;;  %v7178_v57 = vld [vmem:[#allocation24_spill] sm:$0xff] }
 0x290   :  { %4721 = vmatprep.subr.bf16.mxu1 %v7171_v40  ;;  %4746 = vmatprep.subr.bf16.mxu0 %v7139_v28 }
 0x293   :  { %4723 = vmatpush1.bf16.msra.mxu1 %v7172_v7  ;;  %4748 = vmatpush3.bf16.msra.mxu0 %v7173_v16 }
 0x294   :  { %4725 = vmatprep.subr.bf16.mxu1 %v7174_v41  ;;  %4749 = vmatprep.subr.bf16.mxu0 %v7139_v28 }
 0x297   :  { %4727 = vmatpush1.bf16.msra.mxu1 %v7175_v45  ;;  %4751 = vmatpush3.bf16.msra.mxu0 %v7176_v13 }
 0x298   :  { %4753 = vmatprep.subr.bf16.mxu1 %v7177_v56  ;;  %4784 = vmatprep.subr.bf16.mxu0 %v7139_v28 }
 0x329   :  { %v1282_v19 = vpop.f32.mrb[10].mxu1  ;;  %v1353_v40 = vpop.f32.mrb[12].mxu0 }
 0x32a   :  { %v1283_v9 = vadd.f32 %v1282_v19, %v7178_v57  ;;  %v1284_v24 = vpop.f32.mrb[11].mxu1  ;;  %v3878_v7 = vpop.f32.mrb[13].mxu0  ;;  %v1354_v19 = vadd.f32 %v1353_v40, %v7159_v30 }
 0x32b   :  { %v1285_v16 = vadd.f32 %v1284_v24, %v7156_v17 }
 0x32c   :  { %v1358_v48 = vrot.slane %v1283_v9, 6  ;;  %v1378_v7 = vrot.slane %v1354_v19, 6  ;;  %v1385_v9 = vrot.slane %v6440_v49, 7 }
 0x32d   :  { %v1368_v41 = vrot.slane %v1285_v16, 6 }
 0x32e   :  { %v1360_v54 = vadd.f32 %v1358_v48, %v7179_v3 }
 0x32f   :  { %v1370_v45 = vadd.f32 %v1368_v41, %v7158_v12 }
 0x330   :  { %v3408_v31 = vmul.f32 -1.442695, %v1360_v54 }
 0x331   :  { %v3409_v13 = vmul.f32 -1.442695, %v1370_v45 }
 0x332   :  { %5299 = vpow2.f32 %v3408_v31 }
 0x333   :  { %5301 = vpow2.f32 %v3409_v13 }
 0x33c   :  { %v5300_v56 = vpop.eup %5299 }
 0x33d   :  { %v5302_v44 = vpop.eup %5301  ;;  %v1364_v14 = vadd.f32 1.0, %v5300_v56 }
 0x33e   :  { %v1374_v11 = vadd.f32 1.0, %v5302_v44 }
 0x33f   :  { %5303 = vrcp.f32 %v1364_v14 }
 0x340   :  { %5305 = vrcp.f32 %v1374_v11 }
 0x349   :  { %v5304_v24 = vpop.eup %5303 }
 0x34a   :  { %v5306_v16 = vpop.eup %5305  ;;  %v1380_v48 = vmul.f32 %v5304_v24, %v1378_v7 }
 0x34b   :  { %v1387_v3 = vmul.f32 %v5306_v16, %v1385_v9  ;;  %v1383_v24 = vsub.f32 1.0, %v5306_v16 }
 0x34c   :  { %v1381_v54 = vadd.f32 %v1380_v48, %v6322_v47 }
 0x34d   :  { %v1458_v41 = vpop.f32.mrb[12].mxu1  ;;  %v1529_v31 = vpop.f32.mrb[14].mxu0 }
 0x34e   :  { %5307 = vtanh.f32 %v1381_v54  ;;  %v1459_v13 = vadd.f32 %v1458_v41, %v6310_v0  ;;  %v1460_v56 = vpop.f32.mrb[13].mxu1  ;;  %v3913_v44 = vpop.f32.mrb[15].mxu0  ;;  %v7180_v41 = vld [vmem:[#allocation29_spill] sm:$0xff] }
 0x34f   :  { %v1461_v11 = vadd.f32 %v1460_v56, %v6314_v26 }
 0x350   :  { %v1534_v14 = vrot.slane %v1459_v13, 3 }
 0x351   :  { %v1544_v40 = vrot.slane %v1461_v11, 3 }
 0x352   :  { %v1536_v45 = vadd.f32 %v1534_v14, %v6324_v61 }
 0x353   :  { %v1546_v49 = vadd.f32 %v1544_v40, %v6330_v5 }
 0x354   :  { %v3410_v19 = vmul.f32 -1.442695, %v1536_v45 }
 0x355   :  { %v3411_v7 = vmul.f32 -1.442695, %v1546_v49 }
 0x356   :  { %5309 = vpow2.f32 %v3410_v19 }
 0x357   :  { %5311 = vpow2.f32 %v3411_v7 }
 0x358   :  { %v5308_v9 = vpop.eup %5307 }
 0x359   :  { %v1384_v48 = vmul.f32 %v5308_v9, %v1383_v24 }
 0x35b   :  { %v6545_v54 = vadd.f32 %v1387_v3, %v1384_v48 }
 0x35d   :  { %v1569_v56 = vrot.slane %v6545_v54, %v7180_v41  ;;  %v1580_v13 = vrot.slane %v6545_v54, 2  ;;  %v7197_v41 = vld [vmem:[#allocation13_spill] sm:$0xff] }
 0x35f   :  { %v1570_v44 = vsel %vm1565_vm5, %v1569_v56, 0.0  ;;  %1647 = vmatmul.mubr.f32.vlgmr.msra.gmra.mrb[14].mxu1 %v1580_v13  ;;  %3947 = vmatmul.mubr.f32.vlgmr.msra.gmra.mrb[16].mxu0 %v1580_v13 }
 0x360   :  { %v5310_v11 = vpop.eup %5309  ;;  %4755 = vmatpush1.bf16.msra.mxu1 %v5939_v25  ;;  %4786 = vmatpush3.bf16.msra.mxu0 %v6144_v2  ;;  %v1571_v3 = vadd.f32 %v1570_v44, %v6499_v37  ;;  %v1530_v37 = vadd.f32 %v1529_v31, %v6349_v59  ;;  %v1561_v31 = vrot.slane %v6488_v23, 1  ;;  %v7181_v44 = vld [vmem:[#allocation23_spill] sm:$0xff] }
 0x361   :  { %v5312_v16 = vpop.eup %5311  ;;  %v1540_v14 = vadd.f32 1.0, %v5310_v11  ;;  %4757 = vmatprep.subr.bf16.mxu1 %v5948_v29  ;;  %4787 = vmatprep.subr.bf16.mxu0 %v7139_v28 }
 0x362   :  { %v1550_v40 = vadd.f32 1.0, %v5312_v16  ;;  %1822 = vmatprep.mubr.f32.mxu1 %v7140_v35  ;;  %3981 = vmatprep.mubr.msk.f32.mxu0 %vm5421_vm0, %v7140_v35  ;;  %v1554_v45 = vrot.slane %v1530_v37, 3  ;;  %v7182_v37 = vld [vmem:[#allocation3_spill] sm:$0xff] }
 0x363   :  { %5313 = vrcp.f32 %v1540_v14 }
 0x364   :  { %5315 = vrcp.f32 %v1550_v40  ;;  %4759 = vmatpush1.bf16.msra.mxu1 %v5969_v36  ;;  %4789 = vmatpush3.bf16.msra.mxu0 %v6158_v8 }
 0x365   :  { %4761 = vmatprep.subr.bf16.mxu1 %v5978_v38  ;;  %4790 = vmatprep.subr.bf16.mxu0 %v7139_v28 }
 0x368   :  { %4763 = vmatpush1.bf16.msra.mxu1 %v6000_v46  ;;  %4792 = vmatpush3.bf16.msra.mxu0 %v6173_v18 }
 0x369   :  { %4765 = vmatprep.subr.bf16.mxu1 %v6009_v52  ;;  %4793 = vmatprep.subr.bf16.mxu0 %v7139_v28 }
 0x36c   :  { %4767 = vmatpush1.bf16.msra.mxu1 %v6028_v60  ;;  %4795 = vmatpush3.bf16.msra.mxu0 %v6185_v21 }
 0x36d   :  { %v5314_v49 = vpop.eup %5313  ;;  %4769 = vmatprep.subr.bf16.mxu1 %v6037_v1  ;;  %4796 = vmatprep.subr.bf16.mxu0 %v7139_v28 }
 0x36e   :  { %v5316_v19 = vpop.eup %5315  ;;  %v1556_v7 = vmul.f32 %v5314_v49, %v1554_v45  ;;  %v7184_v45 = vld [vmem:[#allocation4_spill] sm:$0xff]  ;;  %v7185_v49 = vld [vmem:[#allocation5_spill] sm:$0xff] }
 0x36f   :  { %v1563_v24 = vmul.f32 %v5316_v19, %v1561_v31  ;;  %v1559_v23 = vsub.f32 1.0, %v5316_v19  ;;  %v7186_v31 = vld [vmem:[#allocation17_spill] sm:$0xff]  ;;  %v7187_v19 = vld [vmem:[#allocation6_spill] sm:$0xff] }
 0x370   :  { %v1557_v9 = vadd.f32 %v1556_v7, %v6289_v6  ;;  %4771 = vmatpush1.bf16.msra.mxu1 %v6056_v10  ;;  %4798 = vmatpush3.bf16.msra.mxu0 %v6197_v33  ;;  %v7188_v7 = vld [vmem:[#allocation7_spill] sm:$0xff] }
 0x371   :  { %4773 = vmatprep.subr.bf16.mxu1 %v6065_v15  ;;  %4799 = vmatprep.subr.bf16.mxu0 %v7139_v28 }
 0x372   :  { %5317 = vtanh.f32 %v1557_v9  ;;  %v7190_v9 = vld [vmem:[#allocation8_spill] sm:$0xff] }
 0x374   :  { %4775 = vmatpush1.bf16.msra.mxu1 %v6084_v27  ;;  %4801 = vmatpush3.bf16.msra.mxu0 %v6209_v39 }
 0x375   :  { %4777 = vmatprep.subr.bf16.mxu1 %v6093_v32  ;;  %4802 = vmatprep.subr.bf16.mxu0 %v7139_v28 }
 0x378   :  { %4779 = vmatpush1.bf16.msra.mxu1 %v6112_v43  ;;  %4804 = vmatpush3.bf16.msra.mxu0 %v6221_v53 }
 0x379   :  { %4781 = vmatprep.subr.bf16.mxu1 %v6121_v51  ;;  %4805 = vmatprep.subr.bf16.mxu0 %v7139_v28 }
 0x37c   :  { %v5318_v48 = vpop.eup %5317  ;;  %4783 = vmatpush1.bf16.msra.mxu1 %v6134_v58  ;;  %4807 = vmatpush3.bf16.msra.mxu0 %v6233_v63 }
 0x37d   :  { %v1560_v56 = vmul.f32 %v5318_v48, %v1559_v23  ;;  %4809 = vmatprep.subr.bf16.mxu1 %v5682_v42  ;;  %4840 = vmatprep.subr.bf16.mxu0 %v7139_v28  ;;  %v7191_v23 = vld [vmem:[#allocation9_spill] sm:$0xff]  ;;  %v7192_v48 = vld [vmem:[#allocation19_spill] sm:$0xff] }
 0x37f   :  { %v6592_v13 = vadd.f32 %v1563_v24, %v1560_v56  ;;  %v7189_v24 = vld [vmem:[#allocation18_spill] sm:$0xff] }
 0x380   :  { %v7193_v56 = vld [vmem:[#allocation10_spill] sm:$0xff] }
 0x381   :  { %v1576_v11 = vrot.slane %v6592_v13, %v7181_v44  ;;  %v1756_v16 = vrot.slane %v6592_v13, 5  ;;  %v7198_v44 = vld [vmem:[#allocation21_spill] sm:$0xff] }
 0x383   :  { %v1577_v14 = vsel %vm1572_vm6, %v1576_v11, 0.0  ;;  %1823 = vmatmul.mubr.f32.vlgmr.msra.gmra.mrb[16].mxu1 %v1756_v16  ;;  %3982 = vmatmul.mubr.f32.vlgmr.msra.gmra.mrb[18].mxu0 %v1756_v16  ;;  %v7194_v11 = vld [vmem:[#allocation11_spill] sm:$0xff]  ;;  %v7195_v16 = vld [vmem:[#allocation20_spill] sm:$0xff] }
 0x384   :  { %4811 = vmatpush1.bf16.msra.mxu1 %v5704_v50  ;;  %4842 = vmatpush3.bf16.msra.mxu0 %v5935_v22  ;;  %v6602_v40 = vadd.f32 %v1577_v14, %v1571_v3  ;;  %v7183_v3 = vld [vmem:[#allocation16_spill] sm:$0xff] }
 0x385   :  { %4813 = vmatprep.subr.bf16.mxu1 %v5716_v55  ;;  %4843 = vmatprep.subr.bf16.mxu0 %v7139_v28  ;;  %v7196_v14 = vld [vmem:[#allocation12_spill] sm:$0xff] }
 0x386   :  { %2012 = vmatprep.mubr.f32.mxu1 %v7140_v35  ;;  %4016 = vmatprep.mubr.msk.f32.mxu0 %vm5421_vm0, %v7140_v35 }
 0x388   :  { %4815 = vmatpush1.bf16.msra.mxu1 %v5736_v62  ;;  %4845 = vmatpush3.bf16.msra.mxu0 %v5965_v34 }
 0x389   :  { %4817 = vmatprep.subr.bf16.mxu1 %v5748_v4  ;;  %4846 = vmatprep.subr.bf16.mxu0 %v7139_v28 }
 0x38c   :  { %4819 = vmatpush1.bf16.msra.mxu1 %v7182_v37  ;;  %4848 = vmatpush3.bf16.msra.mxu0 %v7183_v3 }
 0x38d   :  { %4821 = vmatprep.subr.bf16.mxu1 %v7184_v45  ;;  %4849 = vmatprep.subr.bf16.mxu0 %v7139_v28 }
 0x390   :  { %4823 = vmatpush1.bf16.msra.mxu1 %v7185_v49  ;;  %4851 = vmatpush3.bf16.msra.mxu0 %v7186_v31 }
 0x391   :  { %4825 = vmatprep.subr.bf16.mxu1 %v7187_v19  ;;  %4852 = vmatprep.subr.bf16.mxu0 %v7139_v28  ;;  %v7200_v19 = vld [vmem:[#allocation26_spill] sm:$0xff] }
 0x394   :  { %4827 = vmatpush1.bf16.msra.mxu1 %v7188_v7  ;;  %4854 = vmatpush3.bf16.msra.mxu0 %v7189_v24 }
 0x395   :  { %4829 = vmatprep.subr.bf16.mxu1 %v7190_v9  ;;  %4855 = vmatprep.subr.bf16.mxu0 %v7139_v28  ;;  %v7199_v9 = vld [vmem:[#allocation14_spill] sm:$0xff] }
 0x398   :  { %4831 = vmatpush1.bf16.msra.mxu1 %v7191_v23  ;;  %4857 = vmatpush3.bf16.msra.mxu0 %v7192_v48 }
 0x399   :  { %4833 = vmatprep.subr.bf16.mxu1 %v7193_v56  ;;  %4858 = vmatprep.subr.bf16.mxu0 %v7139_v28 }
 0x39c   :  { %4835 = vmatpush1.bf16.msra.mxu1 %v7194_v11  ;;  %4860 = vmatpush3.bf16.msra.mxu0 %v7195_v16 }
 0x39d   :  { %4837 = vmatprep.subr.bf16.mxu1 %v7196_v14  ;;  %4861 = vmatprep.subr.bf16.mxu0 %v7139_v28 }
 0x3a0   :  { %4839 = vmatpush1.bf16.msra.mxu1 %v7197_v41  ;;  %4863 = vmatpush3.bf16.msra.mxu0 %v7198_v44 }
 0x3a1   :  { %4865 = vmatprep.subr.bf16.mxu1 %v7199_v9  ;;  %4896 = vmatprep.subr.bf16.mxu0 %v7139_v28 }
 0x432   :  { %v1648_v48 = vpop.f32.mrb[14].mxu1  ;;  %v1719_v56 = vpop.f32.mrb[16].mxu0 }
 0x433   :  { %v1649_v23 = vadd.f32 %v1648_v48, %v7178_v57  ;;  %v1650_v24 = vpop.f32.mrb[15].mxu1  ;;  %v3948_v11 = vpop.f32.mrb[17].mxu0  ;;  %v1720_v48 = vadd.f32 %v1719_v56, %v7159_v30 }
 0x434   :  { %v1651_v16 = vadd.f32 %v1650_v24, %v7156_v17 }
 0x435   :  { %v1724_v7 = vrot.slane %v1649_v23, 5  ;;  %v1744_v11 = vrot.slane %v1720_v48, 5  ;;  %v1751_v23 = vrot.slane %v6545_v54, 7 }
 0x436   :  { %v1734_v14 = vrot.slane %v1651_v16, 5 }
 0x437   :  { %v1726_v31 = vadd.f32 %v1724_v7, %v7200_v19 }
 0x438   :  { %v1736_v41 = vadd.f32 %v1734_v14, %v7158_v12 }
 0x439   :  { %v3412_v49 = vmul.f32 -1.442695, %v1726_v31 }
 0x43a   :  { %v3413_v44 = vmul.f32 -1.442695, %v1736_v41 }
 0x43b   :  { %5319 = vpow2.f32 %v3412_v49 }
 0x43c   :  { %5321 = vpow2.f32 %v3413_v44 }
 0x445   :  { %v5320_v9 = vpop.eup %5319 }
 0x446   :  { %v5322_v45 = vpop.eup %5321  ;;  %v1730_v3 = vadd.f32 1.0, %v5320_v9 }
 0x447   :  { %v1740_v37 = vadd.f32 1.0, %v5322_v45 }
 0x448   :  { %5323 = vrcp.f32 %v1730_v3 }
 0x449   :  { %5325 = vrcp.f32 %v1740_v37 }
 0x452   :  { %v5324_v24 = vpop.eup %5323 }
 0x453   :  { %v5326_v16 = vpop.eup %5325  ;;  %v1746_v7 = vmul.f32 %v5324_v24, %v1744_v11 }
 0x454   :  { %v1753_v19 = vmul.f32 %v5326_v16, %v1751_v23  ;;  %v1749_v24 = vsub.f32 1.0, %v5326_v16 }
 0x455   :  { %v1747_v31 = vadd.f32 %v1746_v7, %v6322_v47 }
 0x456   :  { %v1824_v41 = vpop.f32.mrb[16].mxu1  ;;  %v1895_v49 = vpop.f32.mrb[18].mxu0 }
 0x457   :  { %5327 = vtanh.f32 %v1747_v31  ;;  %v1825_v44 = vadd.f32 %v1824_v41, %v6310_v0  ;;  %v1826_v9 = vpop.f32.mrb[17].mxu1  ;;  %v3983_v45 = vpop.f32.mrb[19].mxu0  ;;  %v7201_v41 = vld [vmem:[#allocation30_spill] sm:$0xff] }
 0x458   :  { %v1827_v37 = vadd.f32 %v1826_v9, %v6314_v26 }
 0x459   :  { %v1900_v3 = vrot.slane %v1825_v44, 4 }
 0x45a   :  { %v1910_v56 = vrot.slane %v1827_v37, 4 }
 0x45b   :  { %v1902_v14 = vadd.f32 %v1900_v3, %v6324_v61 }
 0x45c   :  { %v1912_v54 = vadd.f32 %v1910_v56, %v6330_v5 }
 0x45d   :  { %v3414_v48 = vmul.f32 -1.442695, %v1902_v14 }
 0x45e   :  { %v3415_v11 = vmul.f32 -1.442695, %v1912_v54 }
 0x45f   :  { %5329 = vpow2.f32 %v3414_v48 }
 0x460   :  { %5331 = vpow2.f32 %v3415_v11 }
 0x461   :  { %v5328_v23 = vpop.eup %5327 }
 0x462   :  { %v1750_v7 = vmul.f32 %v5328_v23, %v1749_v24 }
 0x464   :  { %v6648_v31 = vadd.f32 %v1753_v19, %v1750_v7 }
 0x466   :  { %v1935_v9 = vrot.slane %v6648_v31, %v7201_v41  ;;  %v1946_v44 = vrot.slane %v6648_v31, 3 }
 0x468   :  { %v1936_v45 = vsel %vm1931_vm7, %v1935_v9, 0.0  ;;  %2013 = vmatmul.mubr.f32.vlgmr.msra.gmra.mrb[18].mxu1 %v1946_v44  ;;  %4017 = vmatmul.mubr.f32.vlgmr.msra.gmra.mrb[20].mxu0 %v1946_v44 }
 0x469   :  { %v5330_v37 = vpop.eup %5329  ;;  %4867 = vmatpush1.bf16.msra.mxu1 %v5939_v25  ;;  %4898 = vmatpush3.bf16.msra.mxu0 %v6144_v2  ;;  %v1937_v19 = vadd.f32 %v1936_v45, %v6602_v40  ;;  %v1896_v40 = vadd.f32 %v1895_v49, %v6349_v59  ;;  %v1927_v49 = vrot.slane %v6592_v13, 1  ;;  %v7202_v45 = vld [vmem:[#allocation32_spill] sm:$0xff] }
 0x46a   :  { %v5332_v16 = vpop.eup %5331  ;;  %v1906_v3 = vadd.f32 1.0, %v5330_v37  ;;  %4869 = vmatprep.subr.bf16.mxu1 %v5948_v29  ;;  %4899 = vmatprep.subr.bf16.mxu0 %v7139_v28 }
 0x46b   :  { %v1916_v56 = vadd.f32 1.0, %v5332_v16  ;;  %2188 = vmatprep.mubr.f32.mxu1 %v7140_v35  ;;  %4051 = vmatprep.mubr.msk.f32.mxu0 %vm5421_vm0, %v7140_v35  ;;  %v1920_v14 = vrot.slane %v1896_v40, 4  ;;  %v7203_v40 = vld [vmem:[#allocation3_spill] sm:$0xff] }
 0x46c   :  { %5333 = vrcp.f32 %v1906_v3 }
 0x46d   :  { %5335 = vrcp.f32 %v1916_v56  ;;  %4871 = vmatpush1.bf16.msra.mxu1 %v5969_v36  ;;  %4901 = vmatpush3.bf16.msra.mxu0 %v6158_v8 }
 0x46e   :  { %4873 = vmatprep.subr.bf16.mxu1 %v5978_v38  ;;  %4902 = vmatprep.subr.bf16.mxu0 %v7139_v28 }
 0x471   :  { %4875 = vmatpush1.bf16.msra.mxu1 %v6000_v46  ;;  %4904 = vmatpush3.bf16.msra.mxu0 %v6173_v18 }
 0x472   :  { %4877 = vmatprep.subr.bf16.mxu1 %v6009_v52  ;;  %4905 = vmatprep.subr.bf16.mxu0 %v7139_v28 }
 0x475   :  { %4879 = vmatpush1.bf16.msra.mxu1 %v6028_v60  ;;  %4907 = vmatpush3.bf16.msra.mxu0 %v6185_v21 }
 0x476   :  { %v5334_v54 = vpop.eup %5333  ;;  %4881 = vmatprep.subr.bf16.mxu1 %v6037_v1  ;;  %4908 = vmatprep.subr.bf16.mxu0 %v7139_v28 }
 0x477   :  { %v5336_v48 = vpop.eup %5335  ;;  %v1922_v11 = vmul.f32 %v5334_v54, %v1920_v14  ;;  %v7205_v14 = vld [vmem:[#allocation4_spill] sm:$0xff]  ;;  %v7206_v54 = vld [vmem:[#allocation5_spill] sm:$0xff] }
 0x478   :  { %v1929_v24 = vmul.f32 %v5336_v48, %v1927_v49  ;;  %v1925_v13 = vsub.f32 1.0, %v5336_v48  ;;  %v7207_v49 = vld [vmem:[#allocation17_spill] sm:$0xff]  ;;  %v7208_v48 = vld [vmem:[#allocation6_spill] sm:$0xff] }
 0x479   :  { %v1923_v23 = vadd.f32 %v1922_v11, %v6289_v6  ;;  %4883 = vmatpush1.bf16.msra.mxu1 %v6056_v10  ;;  %4910 = vmatpush3.bf16.msra.mxu0 %v6197_v33  ;;  %v7209_v11 = vld [vmem:[#allocation7_spill] sm:$0xff] }
 0x47a   :  { %4885 = vmatprep.subr.bf16.mxu1 %v6065_v15  ;;  %4911 = vmatprep.subr.bf16.mxu0 %v7139_v28 }
 0x47b   :  { %5337 = vtanh.f32 %v1923_v23  ;;  %v7211_v23 = vld [vmem:[#allocation8_spill] sm:$0xff] }
 0x47d   :  { %4887 = vmatpush1.bf16.msra.mxu1 %v6084_v27  ;;  %4913 = vmatpush3.bf16.msra.mxu0 %v6209_v39 }
 0x47e   :  { %4889 = vmatprep.subr.bf16.mxu1 %v6093_v32  ;;  %4914 = vmatprep.subr.bf16.mxu0 %v7139_v28 }
 0x481   :  { %4891 = vmatpush1.bf16.msra.mxu1 %v6112_v43  ;;  %4916 = vmatpush3.bf16.msra.mxu0 %v6221_v53 }
 0x482   :  { %4893 = vmatprep.subr.bf16.mxu1 %v6121_v51  ;;  %4917 = vmatprep.subr.bf16.mxu0 %v7139_v28 }
 0x485   :  { %v5338_v7 = vpop.eup %5337  ;;  %4895 = vmatpush1.bf16.msra.mxu1 %v6134_v58  ;;  %4919 = vmatpush3.bf16.msra.mxu0 %v6233_v63 }
 0x486   :  { %v1926_v9 = vmul.f32 %v5338_v7, %v1925_v13  ;;  %4921 = vmatprep.subr.bf16.mxu1 %v5682_v42  ;;  %4952 = vmatprep.subr.bf16.mxu0 %v7139_v28  ;;  %v7212_v13 = vld [vmem:[#allocation9_spill] sm:$0xff]  ;;  %v7213_v7 = vld [vmem:[#allocation19_spill] sm:$0xff] }
 0x488   :  { %v6695_v44 = vadd.f32 %v1929_v24, %v1926_v9  ;;  %v7210_v24 = vld [vmem:[#allocation18_spill] sm:$0xff] }
 0x489   :  { %v7214_v9 = vld [vmem:[#allocation10_spill] sm:$0xff] }
 0x48a   :  { %v1942_v37 = vrot.slane %v6695_v44, %v7202_v45  ;;  %v2122_v16 = vrot.slane %v6695_v44, 4 }
 0x48c   :  { %v1943_v3 = vsel %vm1938_vm8, %v1942_v37, 0.0  ;;  %2189 = vmatmul.mubr.f32.vlgmr.msra.gmra.mrb[20].mxu1 %v2122_v16  ;;  %4052 = vmatmul.mubr.f32.vlgmr.msra.gmra.mrb[22].mxu0 %v2122_v16  ;;  %v7215_v37 = vld [vmem:[#allocation11_spill] sm:$0xff]  ;;  %v7216_v16 = vld [vmem:[#allocation20_spill] sm:$0xff] }
 0x48d   :  { %4923 = vmatpush1.bf16.msra.mxu1 %v5704_v50  ;;  %4954 = vmatpush3.bf16.msra.mxu0 %v5935_v22  ;;  %v6705_v56 = vadd.f32 %v1943_v3, %v1937_v19  ;;  %v7204_v19 = vld [vmem:[#allocation16_spill] sm:$0xff] }
 0x48e   :  { %4925 = vmatprep.subr.bf16.mxu1 %v5716_v55  ;;  %4955 = vmatprep.subr.bf16.mxu0 %v7139_v28  ;;  %v7217_v3 = vld [vmem:[#allocation12_spill] sm:$0xff] }
 0x48f   :  { %2376 = vmatprep.mubr.f32.mxu1 %v7140_v35  ;;  %4086 = vmatprep.mubr.msk.f32.mxu0 %vm5421_vm0, %v7140_v35 }
 0x491   :  { %4927 = vmatpush1.bf16.msra.mxu1 %v5736_v62  ;;  %4957 = vmatpush3.bf16.msra.mxu0 %v5965_v34 }
 0x492   :  { %4929 = vmatprep.subr.bf16.mxu1 %v5748_v4  ;;  %4958 = vmatprep.subr.bf16.mxu0 %v7139_v28 }
 0x495   :  { %4931 = vmatpush1.bf16.msra.mxu1 %v7203_v40  ;;  %4960 = vmatpush3.bf16.msra.mxu0 %v7204_v19 }
 0x496   :  { %4933 = vmatprep.subr.bf16.mxu1 %v7205_v14  ;;  %4961 = vmatprep.subr.bf16.mxu0 %v7139_v28 }
 0x499   :  { %4935 = vmatpush1.bf16.msra.mxu1 %v7206_v54  ;;  %4963 = vmatpush3.bf16.msra.mxu0 %v7207_v49  ;;  %v7221_v54 = vld [vmem:[#allocation26_spill] sm:$0xff] }
 0x49a   :  { %4937 = vmatprep.subr.bf16.mxu1 %v7208_v48  ;;  %4964 = vmatprep.subr.bf16.mxu0 %v7139_v28 }
 0x49d   :  { %4939 = vmatpush1.bf16.msra.mxu1 %v7209_v11  ;;  %4966 = vmatpush3.bf16.msra.mxu0 %v7210_v24  ;;  %v7218_v24 = vld [vmem:[#allocation13_spill] sm:$0xff]  ;;  %v7220_v11 = vld [vmem:[#allocation14_spill] sm:$0xff] }
 0x49e   :  { %4941 = vmatprep.subr.bf16.mxu1 %v7211_v23  ;;  %4967 = vmatprep.subr.bf16.mxu0 %v7139_v28  ;;  %v7219_v23 = vld [vmem:[#allocation21_spill] sm:$0xff] }
 0x4a1   :  { %4943 = vmatpush1.bf16.msra.mxu1 %v7212_v13  ;;  %4969 = vmatpush3.bf16.msra.mxu0 %v7213_v7 }
 0x4a2   :  { %4945 = vmatprep.subr.bf16.mxu1 %v7214_v9  ;;  %4970 = vmatprep.subr.bf16.mxu0 %v7139_v28 }
 0x4a5   :  { %4947 = vmatpush1.bf16.msra.mxu1 %v7215_v37  ;;  %4972 = vmatpush3.bf16.msra.mxu0 %v7216_v16 }
 0x4a6   :  { %4949 = vmatprep.subr.bf16.mxu1 %v7217_v3  ;;  %4973 = vmatprep.subr.bf16.mxu0 %v7139_v28 }
 0x4a9   :  { %4951 = vmatpush1.bf16.msra.mxu1 %v7218_v24  ;;  %4975 = vmatpush3.bf16.msra.mxu0 %v7219_v23 }
 0x4aa   :  { %4977 = vmatprep.subr.bf16.mxu1 %v7220_v11  ;;  %5008 = vmatprep.subr.bf16.mxu0 %v7139_v28 }
 0x53b   :  { %v2014_v7 = vpop.f32.mrb[18].mxu1  ;;  %v2085_v9 = vpop.f32.mrb[20].mxu0 }
 0x53c   :  { %v2015_v13 = vadd.f32 %v2014_v7, %v7178_v57  ;;  %v2016_v48 = vpop.f32.mrb[19].mxu1  ;;  %v4018_v37 = vpop.f32.mrb[21].mxu0  ;;  %v2086_v7 = vadd.f32 %v2085_v9, %v7159_v30 }
 0x53d   :  { %v2017_v16 = vadd.f32 %v2016_v48, %v7156_v17 }
 0x53e   :  { %v2090_v49 = vrot.slane %v2015_v13, 4  ;;  %v2110_v37 = vrot.slane %v2086_v7, 4  ;;  %v2117_v13 = vrot.slane %v6648_v31, 7 }
 0x53f   :  { %v2100_v3 = vrot.slane %v2017_v16, 4 }
 0x540   :  { %v2092_v14 = vadd.f32 %v2090_v49, %v7221_v54 }
 0x541   :  { %v2102_v24 = vadd.f32 %v2100_v3, %v7158_v12 }
 0x542   :  { %v3416_v19 = vmul.f32 -1.442695, %v2092_v14 }
 0x543   :  { %v3417_v23 = vmul.f32 -1.442695, %v2102_v24 }
 0x544   :  { %5339 = vpow2.f32 %v3416_v19 }
 0x545   :  { %5341 = vpow2.f32 %v3417_v23 }
 0x54e   :  { %v5340_v11 = vpop.eup %5339 }
 0x54f   :  { %v5342_v40 = vpop.eup %5341  ;;  %v2096_v4 = vadd.f32 1.0, %v5340_v11 }
 0x550   :  { %v2106_v34 = vadd.f32 1.0, %v5342_v40 }
 0x551   :  { %5343 = vrcp.f32 %v2096_v4 }
 0x552   :  { %5345 = vrcp.f32 %v2106_v34 }
 0x55b   :  { %v5344_v48 = vpop.eup %5343 }
 0x55c   :  { %v5346_v16 = vpop.eup %5345  ;;  %v2112_v49 = vmul.f32 %v5344_v48, %v2110_v37 }
 0x55d   :  { %v2119_v54 = vmul.f32 %v5346_v16, %v2117_v13  ;;  %v2115_v48 = vsub.f32 1.0, %v5346_v16 }
 0x55e   :  { %v2113_v14 = vadd.f32 %v2112_v49, %v6322_v47 }
 0x55f   :  { %v2190_v24 = vpop.f32.mrb[20].mxu1  ;;  %v2261_v19 = vpop.f32.mrb[22].mxu0 }
 0x560   :  { %5347 = vtanh.f32 %v2113_v14  ;;  %v2191_v23 = vadd.f32 %v2190_v24, %v6310_v0  ;;  %v2192_v11 = vpop.f32.mrb[21].mxu1  ;;  %v4053_v40 = vpop.f32.mrb[23].mxu0 }
 0x561   :  { %v2193_v4 = vadd.f32 %v2192_v11, %v6314_v26 }
 0x562   :  { %v2266_v34 = vrot.slane %v2191_v23, 5 }
 0x563   :  { %v2276_v9 = vrot.slane %v2193_v4, 5 }
 0x564   :  { %v2268_v3 = vadd.f32 %v2266_v34, %v6324_v61 }
 0x565   :  { %v2278_v31 = vadd.f32 %v2276_v9, %v6330_v5 }
 0x566   :  { %v3418_v7 = vmul.f32 -1.442695, %v2268_v3 }
 0x567   :  { %v3419_v37 = vmul.f32 -1.442695, %v2278_v31 }
 0x568   :  { %5349 = vpow2.f32 %v3418_v7 }
 0x569   :  { %5351 = vpow2.f32 %v3419_v37 }
 0x56a   :  { %v5348_v13 = vpop.eup %5347 }
 0x56b   :  { %v2116_v49 = vmul.f32 %v5348_v13, %v2115_v48 }
 0x56d   :  { %v6751_v14 = vadd.f32 %v2119_v54, %v2116_v49 }
 0x56f   :  { %v2300_v24 = vrot.slane %v6751_v14, %v7202_v45  ;;  %v2310_v11 = vrot.slane %v6751_v14, 4 }
 0x571   :  { %v2301_v23 = vsel %vm1938_vm8, %v2300_v24, 0.0  ;;  %2377 = vmatmul.mubr.f32.vlgmr.msra.gmra.mrb[22].mxu1 %v2310_v11  ;;  %4087 = vmatmul.mubr.f32.vlgmr.msra.gmra.mrb[24].mxu0 %v2310_v11 }
 0x572   :  { %v5350_v40 = vpop.eup %5349  ;;  %4979 = vmatpush1.bf16.msra.mxu1 %v5939_v25  ;;  %5010 = vmatpush3.bf16.msra.mxu0 %v6144_v2  ;;  %v2302_v16 = vadd.f32 %v2301_v23, %v6705_v56  ;;  %v2262_v56 = vadd.f32 %v2261_v19, %v6349_v59  ;;  %v2293_v19 = vrot.slane %v6695_v44, 1 }
 0x573   :  { %v5352_v4 = vpop.eup %5351  ;;  %v2272_v54 = vadd.f32 1.0, %v5350_v40  ;;  %4981 = vmatprep.subr.bf16.mxu1 %v5948_v29  ;;  %5011 = vmatprep.subr.bf16.mxu0 %v7139_v28 }
 0x574   :  { %v2282_v45 = vadd.f32 1.0, %v5352_v4  ;;  %2552 = vmatprep.mubr.f32.mxu1 %v7140_v35  ;;  %4121 = vmatprep.mubr.msk.f32.mxu0 %vm5421_vm0, %v7140_v35  ;;  %v2286_v34 = vrot.slane %v2262_v56, 5  ;;  %v7223_v4 = vld [vmem:[#allocation2_spill] sm:$0xff]  ;;  %v7227_v56 = vld [vmem:[#allocation5_spill] sm:$0xff] }
 0x575   :  { %5353 = vrcp.f32 %v2272_v54  ;;  %v7224_v54 = vld [vmem:[#allocation3_spill] sm:$0xff] }
 0x576   :  { %5355 = vrcp.f32 %v2282_v45  ;;  %4983 = vmatpush1.bf16.msra.mxu1 %v5969_v36  ;;  %5013 = vmatpush3.bf16.msra.mxu0 %v6158_v8  ;;  %v7226_v45 = vld [vmem:[#allocation4_spill] sm:$0xff] }
 0x577   :  { %4985 = vmatprep.subr.bf16.mxu1 %v5978_v38  ;;  %5014 = vmatprep.subr.bf16.mxu0 %v7139_v28 }
 0x57a   :  { %4987 = vmatpush1.bf16.msra.mxu1 %v6000_v46  ;;  %5016 = vmatpush3.bf16.msra.mxu0 %v6173_v18 }
 0x57b   :  { %4989 = vmatprep.subr.bf16.mxu1 %v6009_v52  ;;  %5017 = vmatprep.subr.bf16.mxu0 %v7139_v28 }
 0x57e   :  { %4991 = vmatpush1.bf16.msra.mxu1 %v6028_v60  ;;  %5019 = vmatpush3.bf16.msra.mxu0 %v6185_v21 }
 0x57f   :  { %v5354_v9 = vpop.eup %5353  ;;  %4993 = vmatprep.subr.bf16.mxu1 %v6037_v1  ;;  %5020 = vmatprep.subr.bf16.mxu0 %v7139_v28 }
 0x580   :  { %v5356_v3 = vpop.eup %5355  ;;  %v2288_v31 = vmul.f32 %v5354_v9, %v2286_v34  ;;  %v7228_v34 = vld [vmem:[#allocation17_spill] sm:$0xff]  ;;  %v7229_v9 = vld [vmem:[#allocation6_spill] sm:$0xff] }
 0x581   :  { %v2295_v7 = vmul.f32 %v5356_v3, %v2293_v19  ;;  %v2291_v44 = vsub.f32 1.0, %v5356_v3  ;;  %v7230_v19 = vld [vmem:[#allocation7_spill] sm:$0xff]  ;;  %v7231_v3 = vld [vmem:[#allocation18_spill] sm:$0xff] }
 0x582   :  { %v2289_v37 = vadd.f32 %v2288_v31, %v6289_v6  ;;  %4995 = vmatpush1.bf16.msra.mxu1 %v6056_v10  ;;  %5022 = vmatpush3.bf16.msra.mxu0 %v6197_v33  ;;  %v7232_v31 = vld [vmem:[#allocation8_spill] sm:$0xff] }
 0x583   :  { %4997 = vmatprep.subr.bf16.mxu1 %v6065_v15  ;;  %5023 = vmatprep.subr.bf16.mxu0 %v7139_v28 }
 0x584   :  { %5357 = vtanh.f32 %v2289_v37  ;;  %v7234_v37 = vld [vmem:[#allocation19_spill] sm:$0xff] }
 0x586   :  { %4999 = vmatpush1.bf16.msra.mxu1 %v6084_v27  ;;  %5025 = vmatpush3.bf16.msra.mxu0 %v6209_v39 }
 0x587   :  { %5001 = vmatprep.subr.bf16.mxu1 %v6093_v32  ;;  %5026 = vmatprep.subr.bf16.mxu0 %v7139_v28 }
 0x58a   :  { %5003 = vmatpush1.bf16.msra.mxu1 %v6112_v43  ;;  %5028 = vmatpush3.bf16.msra.mxu0 %v6221_v53 }
 0x58b   :  { %5005 = vmatprep.subr.bf16.mxu1 %v6121_v51  ;;  %5029 = vmatprep.subr.bf16.mxu0 %v7139_v28 }
 0x58e   :  { %v5358_v48 = vpop.eup %5357  ;;  %5007 = vmatpush1.bf16.msra.mxu1 %v6134_v58  ;;  %5031 = vmatpush3.bf16.msra.mxu0 %v6233_v63 }
 0x58f   :  { %v2292_v13 = vmul.f32 %v5358_v48, %v2291_v44  ;;  %5033 = vmatprep.subr.bf16.mxu1 %v5682_v42  ;;  %5064 = vmatprep.subr.bf16.mxu0 %v7139_v28  ;;  %v7235_v44 = vld [vmem:[#allocation10_spill] sm:$0xff]  ;;  %v7236_v48 = vld [vmem:[#allocation11_spill] sm:$0xff] }
 0x591   :  { %v6797_v49 = vadd.f32 %v2295_v7, %v2292_v13  ;;  %v7233_v7 = vld [vmem:[#allocation9_spill] sm:$0xff]  ;;  %v7237_v13 = vld [vmem:[#allocation20_spill] sm:$0xff] }
 0x593   :  { %v2306_v24 = vrot.slane %v6797_v49, %v7201_v41  ;;  %v2486_v11 = vrot.slane %v6797_v49, 3  ;;  %v7222_v41 = vld [vmem:[#allocation15_spill] sm:$0xff] }
 0x595   :  { %v2307_v23 = vsel %vm1931_vm7, %v2306_v24, 0.0  ;;  %2553 = vmatmul.mubr.f32.vlgmr.msra.gmra.mrb[24].mxu1 %v2486_v11  ;;  %4122 = vmatmul.mubr.f32.vlgmr.msra.gmra.mrb[26].mxu0 %v2486_v11  ;;  %v7238_v24 = vld [vmem:[#allocation12_spill] sm:$0xff]  ;;  %v7239_v11 = vld [vmem:[#allocation13_spill] sm:$0xff] }
 0x596   :  { %5035 = vmatpush1.bf16.msra.mxu1 %v5704_v50  ;;  %5066 = vmatpush3.bf16.msra.mxu0 %v5935_v22  ;;  %v6806_v40 = vadd.f32 %v2307_v23, %v2302_v16  ;;  %v7225_v16 = vld [vmem:[#allocation16_spill] sm:$0xff]  ;;  %v7240_v23 = vld [vmem:[#allocation21_spill] sm:$0xff] }
 0x597   :  { %5037 = vmatprep.subr.bf16.mxu1 %v5716_v55  ;;  %5067 = vmatprep.subr.bf16.mxu0 %v7139_v28 }
 0x598   :  { %2740 = vmatprep.mubr.f32.mxu1 %v7140_v35  ;;  %4156 = vmatprep.mubr.msk.f32.mxu0 %vm5421_vm0, %v7140_v35 }
 0x59a   :  { %5039 = vmatpush1.bf16.msra.mxu1 %v5736_v62  ;;  %5069 = vmatpush3.bf16.msra.mxu0 %v7222_v41 }
 0x59b   :  { %5041 = vmatprep.subr.bf16.mxu1 %v7223_v4  ;;  %5070 = vmatprep.subr.bf16.mxu0 %v7139_v28 }
 0x59e   :  { %5043 = vmatpush1.bf16.msra.mxu1 %v7224_v54  ;;  %5072 = vmatpush3.bf16.msra.mxu0 %v7225_v16 }
 0x59f   :  { %5045 = vmatprep.subr.bf16.mxu1 %v7226_v45  ;;  %5073 = vmatprep.subr.bf16.mxu0 %v7139_v28 }
 0x5a2   :  { %5047 = vmatpush1.bf16.msra.mxu1 %v7227_v56  ;;  %5075 = vmatpush3.bf16.msra.mxu0 %v7228_v34 }
 0x5a3   :  { %5049 = vmatprep.subr.bf16.mxu1 %v7229_v9  ;;  %5076 = vmatprep.subr.bf16.mxu0 %v7139_v28  ;;  %v7242_v9 = vld [vmem:[#allocation26_spill] sm:$0xff] }
 0x5a6   :  { %5051 = vmatpush1.bf16.msra.mxu1 %v7230_v19  ;;  %5078 = vmatpush3.bf16.msra.mxu0 %v7231_v3 }
 0x5a7   :  { %5053 = vmatprep.subr.bf16.mxu1 %v7232_v31  ;;  %5079 = vmatprep.subr.bf16.mxu0 %v7139_v28  ;;  %v7241_v31 = vld [vmem:[#allocation14_spill] sm:$0xff] }
 0x5aa   :  { %5055 = vmatpush1.bf16.msra.mxu1 %v7233_v7  ;;  %5081 = vmatpush3.bf16.msra.mxu0 %v7234_v37 }
 0x5ab   :  { %5057 = vmatprep.subr.bf16.mxu1 %v7235_v44  ;;  %5082 = vmatprep.subr.bf16.mxu0 %v7139_v28 }
 0x5ae   :  { %5059 = vmatpush1.bf16.msra.mxu1 %v7236_v48  ;;  %5084 = vmatpush3.bf16.msra.mxu0 %v7237_v13 }
 0x5af   :  { %5061 = vmatprep.subr.bf16.mxu1 %v7238_v24  ;;  %5085 = vmatprep.subr.bf16.mxu0 %v7139_v28 }
 0x5b2   :  { %5063 = vmatpush1.bf16.msra.mxu1 %v7239_v11  ;;  %5087 = vmatpush3.bf16.msra.mxu0 %v7240_v23 }
 0x5b3   :  { %5089 = vmatprep.subr.bf16.mxu1 %v7241_v31  ;;  %5120 = vmatprep.subr.bf16.mxu0 %v7139_v28 }
 0x644   :  { %v2378_v37 = vpop.f32.mrb[22].mxu1  ;;  %v2449_v44 = vpop.f32.mrb[24].mxu0 }
 0x645   :  { %v2379_v7 = vadd.f32 %v2378_v37, %v7178_v57  ;;  %v2380_v3 = vpop.f32.mrb[23].mxu1  ;;  %v4088_v48 = vpop.f32.mrb[25].mxu0  ;;  %v2450_v37 = vadd.f32 %v2449_v44, %v7159_v30 }
 0x646   :  { %v2381_v13 = vadd.f32 %v2380_v3, %v7156_v17 }
 0x647   :  { %v2454_v19 = vrot.slane %v2379_v7, 3  ;;  %v2474_v48 = vrot.slane %v2450_v37, 3  ;;  %v2481_v7 = vrot.slane %v6751_v14, 7 }
 0x648   :  { %v2464_v24 = vrot.slane %v2381_v13, 3 }
 0x649   :  { %v2456_v34 = vadd.f32 %v2454_v19, %v7242_v9 }
 0x64a   :  { %v2466_v11 = vadd.f32 %v2464_v24, %v7158_v12 }
 0x64b   :  { %v3420_v56 = vmul.f32 -1.442695, %v2456_v34 }
 0x64c   :  { %v3421_v23 = vmul.f32 -1.442695, %v2466_v11 }
 0x64d   :  { %5359 = vpow2.f32 %v3420_v56 }
 0x64e   :  { %5361 = vpow2.f32 %v3421_v23 }
 0x657   :  { %v5360_v31 = vpop.eup %5359 }
 0x658   :  { %v5362_v45 = vpop.eup %5361  ;;  %v2460_v16 = vadd.f32 1.0, %v5360_v31 }
 0x659   :  { %v2470_v54 = vadd.f32 1.0, %v5362_v45 }
 0x65a   :  { %5363 = vrcp.f32 %v2460_v16 }
 0x65b   :  { %5365 = vrcp.f32 %v2470_v54 }
 0x664   :  { %v5364_v3 = vpop.eup %5363 }
 0x665   :  { %v5366_v13 = vpop.eup %5365  ;;  %v2476_v19 = vmul.f32 %v5364_v3, %v2474_v48 }
 0x666   :  { %v2483_v9 = vmul.f32 %v5366_v13, %v2481_v7  ;;  %v2479_v3 = vsub.f32 1.0, %v5366_v13 }
 0x667   :  { %v2477_v34 = vadd.f32 %v2476_v19, %v6322_v47 }
 0x668   :  { %v2554_v24 = vpop.f32.mrb[24].mxu1  ;;  %v2625_v56 = vpop.f32.mrb[26].mxu0 }
 0x669   :  { %5367 = vtanh.f32 %v2477_v34  ;;  %v2555_v11 = vadd.f32 %v2554_v24, %v6310_v0  ;;  %v2556_v31 = vpop.f32.mrb[25].mxu1  ;;  %v4123_v45 = vpop.f32.mrb[27].mxu0  ;;  %v7243_v24 = vld [vmem:[#allocation23_spill] sm:$0xff] }
 0x66a   :  { %v2557_v54 = vadd.f32 %v2556_v31, %v6314_v26 }
 0x66b   :  { %v2630_v16 = vrot.slane %v2555_v11, 6 }
 0x66c   :  { %v2640_v44 = vrot.slane %v2557_v54, 6 }
 0x66d   :  { %v2632_v23 = vadd.f32 %v2630_v16, %v6324_v61 }
 0x66e   :  { %v2642_v14 = vadd.f32 %v2640_v44, %v6330_v5 }
 0x66f   :  { %v3422_v37 = vmul.f32 -1.442695, %v2632_v23 }
 0x670   :  { %v3423_v48 = vmul.f32 -1.442695, %v2642_v14 }
 0x671   :  { %5369 = vpow2.f32 %v3422_v37 }
 0x672   :  { %5371 = vpow2.f32 %v3423_v48 }
 0x673   :  { %v5368_v7 = vpop.eup %5367 }
 0x674   :  { %v2480_v19 = vmul.f32 %v5368_v7, %v2479_v3 }
 0x676   :  { %v6852_v34 = vadd.f32 %v2483_v9, %v2480_v19 }
 0x678   :  { %v2664_v45 = vrot.slane %v6852_v34, %v7243_v24  ;;  %v2674_v31 = vrot.slane %v6852_v34, 5 }
 0x67a   :  { %v2665_v11 = vsel %vm1572_vm6, %v2664_v45, 0.0  ;;  %2741 = vmatmul.mubr.f32.vlgmr.msra.gmra.mrb[26].mxu1 %v2674_v31  ;;  %4157 = vmatmul.mubr.f32.vlgmr.msra.gmra.mrb[28].mxu0 %v2674_v31  ;;  %v7244_v31 = vld [vmem:[#allocation29_spill] sm:$0xff] }
 0x67b   :  { %v5370_v54 = vpop.eup %5369  ;;  %5091 = vmatpush1.bf16.msra.mxu1 %v5939_v25  ;;  %5122 = vmatpush3.bf16.msra.mxu0 %v6144_v2  ;;  %v2666_v13 = vadd.f32 %v2665_v11, %v6806_v40  ;;  %v2626_v40 = vadd.f32 %v2625_v56, %v6349_v59  ;;  %v2657_v56 = vrot.slane %v6797_v49, 1 }
 0x67c   :  { %v5372_v16 = vpop.eup %5371  ;;  %v2636_v9 = vadd.f32 1.0, %v5370_v54  ;;  %5093 = vmatprep.subr.bf16.mxu1 %v5948_v29  ;;  %5123 = vmatprep.subr.bf16.mxu0 %v7139_v28 }
 0x67d   :  { %v2646_v44 = vadd.f32 1.0, %v5372_v16  ;;  %2916 = vmatprep.mubr.f32.mxu1 %v7140_v35  ;;  %4191 = vmatprep.mubr.msk.f32.mxu0 %vm5421_vm0, %v7140_v35  ;;  %v2650_v23 = vrot.slane %v2626_v40, 6  ;;  %v7254_v40 = vld [vmem:[#allocation9_spill] sm:$0xff] }
 0x67e   :  { %5373 = vrcp.f32 %v2636_v9 }
 0x67f   :  { %5375 = vrcp.f32 %v2646_v44  ;;  %5095 = vmatpush1.bf16.msra.mxu1 %v5969_v36  ;;  %5125 = vmatpush3.bf16.msra.mxu0 %v6158_v8  ;;  %v7250_v44 = vld [vmem:[#allocation6_spill] sm:$0xff] }
 0x680   :  { %5097 = vmatprep.subr.bf16.mxu1 %v5978_v38  ;;  %5126 = vmatprep.subr.bf16.mxu0 %v7139_v28 }
 0x683   :  { %5099 = vmatpush1.bf16.msra.mxu1 %v6000_v46  ;;  %5128 = vmatpush3.bf16.msra.mxu0 %v6173_v18 }
 0x684   :  { %5101 = vmatprep.subr.bf16.mxu1 %v6009_v52  ;;  %5129 = vmatprep.subr.bf16.mxu0 %v7139_v28 }
 0x687   :  { %5103 = vmatpush1.bf16.msra.mxu1 %v6028_v60  ;;  %5131 = vmatpush3.bf16.msra.mxu0 %v6185_v21 }
 0x688   :  { %v5374_v14 = vpop.eup %5373  ;;  %5105 = vmatprep.subr.bf16.mxu1 %v6037_v1  ;;  %5132 = vmatprep.subr.bf16.mxu0 %v7139_v28 }
 0x689   :  { %v5376_v37 = vpop.eup %5375  ;;  %v2652_v48 = vmul.f32 %v5374_v14, %v2650_v23  ;;  %v7255_v23 = vld [vmem:[#allocation19_spill] sm:$0xff]  ;;  %v7256_v14 = vld [vmem:[#allocation10_spill] sm:$0xff] }
 0x68a   :  { %v2659_v3 = vmul.f32 %v5376_v37, %v2657_v56  ;;  %v2655_v49 = vsub.f32 1.0, %v5376_v37  ;;  %v7257_v56 = vld [vmem:[#allocation11_spill] sm:$0xff]  ;;  %v7258_v37 = vld [vmem:[#allocation20_spill] sm:$0xff] }
 0x68b   :  { %v2653_v7 = vadd.f32 %v2652_v48, %v6289_v6  ;;  %5107 = vmatpush1.bf16.msra.mxu1 %v6056_v10  ;;  %5134 = vmatpush3.bf16.msra.mxu0 %v6197_v33  ;;  %v7259_v48 = vld [vmem:[#allocation12_spill] sm:$0xff] }
 0x68c   :  { %5109 = vmatprep.subr.bf16.mxu1 %v6065_v15  ;;  %5135 = vmatprep.subr.bf16.mxu0 %v7139_v28 }
 0x68d   :  { %5377 = vtanh.f32 %v2653_v7  ;;  %v7261_v7 = vld [vmem:[#allocation21_spill] sm:$0xff] }
 0x68f   :  { %5111 = vmatpush1.bf16.msra.mxu1 %v6084_v27  ;;  %5137 = vmatpush3.bf16.msra.mxu0 %v6209_v39 }
 0x690   :  { %5113 = vmatprep.subr.bf16.mxu1 %v6093_v32  ;;  %5138 = vmatprep.subr.bf16.mxu0 %v7139_v28 }
 0x693   :  { %5115 = vmatpush1.bf16.msra.mxu1 %v6112_v43  ;;  %5140 = vmatpush3.bf16.msra.mxu0 %v6221_v53 }
 0x694   :  { %5117 = vmatprep.subr.bf16.mxu1 %v6121_v51  ;;  %5141 = vmatprep.subr.bf16.mxu0 %v7139_v28 }
 0x697   :  { %v5378_v19 = vpop.eup %5377  ;;  %5119 = vmatpush1.bf16.msra.mxu1 %v6134_v58  ;;  %5143 = vmatpush3.bf16.msra.mxu0 %v6233_v63 }
 0x698   :  { %v2656_v24 = vmul.f32 %v5378_v19, %v2655_v49  ;;  %5145 = vmatprep.subr.bf16.mxu1 %v5682_v42  ;;  %5176 = vmatprep.subr.bf16.mxu0 %v7139_v28  ;;  %v7245_v42 = vld [vmem:[#allocation3_spill] sm:$0xff]  ;;  %v7262_v49 = vld [vmem:[#allocation14_spill] sm:$0xff] }
 0x69a   :  { %v6898_v45 = vadd.f32 %v2659_v3, %v2656_v24  ;;  %v7260_v3 = vld [vmem:[#allocation13_spill] sm:$0xff] }
 0x69c   :  { %v2670_v11 = vrot.slane %v6898_v45, %v7244_v31  ;;  %v2850_v54 = vrot.slane %v6898_v45, 2 }
 0x69e   :  { %v2671_v16 = vsel %vm1565_vm5, %v2670_v11, 0.0  ;;  %2917 = vmatmul.mubr.f32.vlgmr.msra.gmra.mrb[28].mxu1 %v2850_v54  ;;  %4192 = vmatmul.mubr.f32.vlgmr.msra.gmra.mrb[30].mxu0 %v2850_v54 }
 0x69f   :  { %5147 = vmatpush1.bf16.msra.mxu1 %v5704_v50  ;;  %5178 = vmatpush3.bf16.msra.mxu0 %v5935_v22  ;;  %v6907_v9 = vadd.f32 %v2671_v16, %v2666_v13  ;;  %v7246_v50 = vld [vmem:[#allocation16_spill] sm:$0xff]  ;;  %v7248_v22 = vld [vmem:[#allocation5_spill] sm:$0xff] }
 0x6a0   :  { %5149 = vmatprep.subr.bf16.mxu1 %v5716_v55  ;;  %5179 = vmatprep.subr.bf16.mxu0 %v7139_v28  ;;  %v7247_v55 = vld [vmem:[#allocation4_spill] sm:$0xff]  ;;  %v7249_v13 = vld [vmem:[#allocation17_spill] sm:$0xff] }
 0x6a1   :  { %3104 = vmatprep.mubr.f32.mxu1 %v7140_v35  ;;  %4226 = vmatprep.mubr.msk.f32.mxu0 %vm5421_vm0, %v7140_v35 }
 0x6a3   :  { %5151 = vmatpush1.bf16.msra.mxu1 %v5736_v62  ;;  %5181 = vmatpush3.bf16.msra.mxu0 %v7222_v41  ;;  %v7251_v62 = vld [vmem:[#allocation7_spill] sm:$0xff]  ;;  %v7252_v41 = vld [vmem:[#allocation18_spill] sm:$0xff] }
 0x6a4   :  { %5153 = vmatprep.subr.bf16.mxu1 %v7223_v4  ;;  %5182 = vmatprep.subr.bf16.mxu0 %v7139_v28  ;;  %v7253_v4 = vld [vmem:[#allocation8_spill] sm:$0xff] }
 0x6a7   :  { %5155 = vmatpush1.bf16.msra.mxu1 %v7245_v42  ;;  %5184 = vmatpush3.bf16.msra.mxu0 %v7246_v50 }
 0x6a8   :  { %5157 = vmatprep.subr.bf16.mxu1 %v7247_v55  ;;  %5185 = vmatprep.subr.bf16.mxu0 %v7139_v28  ;;  %v7263_v55 = vld [vmem:[#allocation26_spill] sm:$0xff] }
 0x6ab   :  { %5159 = vmatpush1.bf16.msra.mxu1 %v7248_v22  ;;  %5187 = vmatpush3.bf16.msra.mxu0 %v7249_v13 }
 0x6ac   :  { %5161 = vmatprep.subr.bf16.mxu1 %v7250_v44  ;;  %5188 = vmatprep.subr.bf16.mxu0 %v7139_v28 }
 0x6af   :  { %5163 = vmatpush1.bf16.msra.mxu1 %v7251_v62  ;;  %5190 = vmatpush3.bf16.msra.mxu0 %v7252_v41 }
 0x6b0   :  { %5165 = vmatprep.subr.bf16.mxu1 %v7253_v4  ;;  %5191 = vmatprep.subr.bf16.mxu0 %v7139_v28 }
 0x6b3   :  { %5167 = vmatpush1.bf16.msra.mxu1 %v7254_v40  ;;  %5193 = vmatpush3.bf16.msra.mxu0 %v7255_v23 }
 0x6b4   :  { %5169 = vmatprep.subr.bf16.mxu1 %v7256_v14  ;;  %5194 = vmatprep.subr.bf16.mxu0 %v7139_v28 }
 0x6b7   :  { %5171 = vmatpush1.bf16.msra.mxu1 %v7257_v56  ;;  %5196 = vmatpush3.bf16.msra.mxu0 %v7258_v37 }
 0x6b8   :  { %5173 = vmatprep.subr.bf16.mxu1 %v7259_v48  ;;  %5197 = vmatprep.subr.bf16.mxu0 %v7139_v28  ;;  %v2845_v48 = vrot.slane %v6852_v34, 7 }
 0x6bb   :  { %5175 = vmatpush1.bf16.msra.mxu1 %v7260_v3  ;;  %5199 = vmatpush3.bf16.msra.mxu0 %v7261_v7 }
 0x6bc   :  { %5201 = vmatprep.subr.bf16.mxu1 %v7262_v49  ;;  %5232 = vmatprep.subr.bf16.mxu0 %v7139_v28 }
 0x74d   :  { %v2742_v19 = vpop.f32.mrb[26].mxu1  ;;  %v2813_v24 = vpop.f32.mrb[28].mxu0 }
 0x74e   :  { %v2743_v31 = vadd.f32 %v2742_v19, %v7178_v57  ;;  %v2744_v11 = vpop.f32.mrb[27].mxu1  ;;  %v4158_v54 = vpop.f32.mrb[29].mxu0  ;;  %v2814_v14 = vadd.f32 %v2813_v24, %v7159_v30 }
 0x74f   :  { %v2745_v16 = vadd.f32 %v2744_v11, %v7156_v17 }
 0x750   :  { %v2818_v42 = vrot.slane %v2743_v31, 2  ;;  %v2838_v56 = vrot.slane %v2814_v14, 2  ;;  %v7264_v14 = vsub.s32 6, %v6261_v20 }
 0x751   :  { %v2828_v50 = vrot.slane %v2745_v16, 2 }
 0x752   :  { %v2820_v22 = vadd.f32 %v2818_v42, %v7263_v55 }
 0x753   :  { %v2830_v13 = vadd.f32 %v2828_v50, %v7158_v12 }
 0x754   :  { %v3424_v44 = vmul.f32 -1.442695, %v2820_v22 }
 0x755   :  { %v3425_v62 = vmul.f32 -1.442695, %v2830_v13 }
 0x756   :  { %5379 = vpow2.f32 %v3424_v44 }
 0x757   :  { %5381 = vpow2.f32 %v3425_v62 }
 0x760   :  { %v5380_v41 = vpop.eup %5379 }
 0x761   :  { %v5382_v4 = vpop.eup %5381  ;;  %v2824_v40 = vadd.f32 1.0, %v5380_v41 }
 0x762   :  { %v2834_v23 = vadd.f32 1.0, %v5382_v4 }
 0x763   :  { %5383 = vrcp.f32 %v2824_v40 }
 0x764   :  { %5385 = vrcp.f32 %v2834_v23 }
 0x76d   :  { %v5384_v37 = vpop.eup %5383 }
 0x76e   :  { %v5386_v3 = vpop.eup %5385  ;;  %v2840_v7 = vmul.f32 %v5384_v37, %v2838_v56 }
 0x76f   :  { %v2847_v49 = vmul.f32 %v5386_v3, %v2845_v48  ;;  %v2843_v41 = vsub.f32 1.0, %v5386_v3 }
 0x770   :  { %v2841_v19 = vadd.f32 %v2840_v7, %v6322_v47 }
 0x771   :  { %v2918_v31 = vpop.f32.mrb[28].mxu1  ;;  %v2989_v11 = vpop.f32.mrb[30].mxu0 }
 0x772   :  { %5387 = vtanh.f32 %v2841_v19  ;;  %v2919_v54 = vadd.f32 %v2918_v31, %v6310_v0  ;;  %v2920_v16 = vpop.f32.mrb[29].mxu1  ;;  %v4193_v42 = vpop.f32.mrb[31].mxu0 }
 0x773   :  { %v2921_v50 = vadd.f32 %v2920_v16, %v6314_v26 }
 0x774   :  { %v2994_v22 = vrot.slane %v2919_v54, 7 }
 0x775   :  { %v3004_v24 = vrot.slane %v2921_v50, 7 }
 0x776   :  { %v2996_v13 = vadd.f32 %v2994_v22, %v6324_v61 }
 0x777   :  { %v3006_v34 = vadd.f32 %v3004_v24, %v6330_v5 }
 0x778   :  { %v3426_v44 = vmul.f32 -1.442695, %v2996_v13 }
 0x779   :  { %v3427_v62 = vmul.f32 -1.442695, %v3006_v34 }
 0x77a   :  { %5389 = vpow2.f32 %v3426_v44 }
 0x77b   :  { %5391 = vpow2.f32 %v3427_v62 }
 0x77c   :  { %v5388_v4 = vpop.eup %5387 }
 0x77d   :  { %v2844_v40 = vmul.f32 %v5388_v4, %v2843_v41 }
 0x77f   :  { %v6953_v23 = vadd.f32 %v2847_v49, %v2844_v40 }
 0x781   :  { %v3028_v56 = vrot.slane %v6953_v23, %v7264_v14  ;;  %v3038_v37 = vrot.slane %v6953_v23, 6  ;;  %v3209_v13 = vrot.slane %v6953_v23, 7 }
 0x783   :  { %3105 = vmatmul.mubr.f32.vlgmr.msra.gmra.mrb[30].mxu1 %v3038_v37  ;;  %4227 = vmatmul.mubr.f32.vlgmr.msra.gmra.mrb[32].mxu0 %v3038_v37  ;;  %v3029_v48 = vsel %vm1206_vm4, %v3028_v56, 0.0 }
 0x784   :  { %v5390_v7 = vpop.eup %5389  ;;  %5203 = vmatpush1.bf16.msra.mxu1 %v5939_v25  ;;  %5234 = vmatpush3.bf16.msra.mxu0 %v6144_v2  ;;  %v3030_v3 = vadd.f32 %v3029_v48, %v6907_v9  ;;  %v2990_v25 = vadd.f32 %v2989_v11, %v6349_v59 }
 0x785   :  { %v5392_v49 = vpop.eup %5391  ;;  %v3000_v19 = vadd.f32 1.0, %v5390_v7  ;;  %5205 = vmatprep.subr.bf16.mxu1 %v5948_v29  ;;  %5235 = vmatprep.subr.bf16.mxu0 %v7139_v28 }
 0x786   :  { %v3010_v31 = vadd.f32 1.0, %v5392_v49  ;;  %3280 = vmatprep.mubr.f32.mxu1 %v7140_v35  ;;  %4261 = vmatprep.mubr.msk.f32.mxu0 %vm5421_vm0, %v7140_v35  ;;  %v3014_v29 = vrot.slane %v2990_v25, 7 }
 0x787   :  { %5393 = vrcp.f32 %v3000_v19  ;;  %v7266_v19 = vsub.s32 7, %v6261_v20 }
 0x788   :  { %5395 = vrcp.f32 %v3010_v31  ;;  %5207 = vmatpush1.bf16.msra.mxu1 %v5969_v36  ;;  %5237 = vmatpush3.bf16.msra.mxu0 %v6158_v8 }
 0x789   :  { %5209 = vmatprep.subr.bf16.mxu1 %v5978_v38  ;;  %5238 = vmatprep.subr.bf16.mxu0 %v7139_v28  ;;  %v3021_v38 = vrot.slane %v6898_v45, 1 }
 0x78c   :  { %5211 = vmatpush1.bf16.msra.mxu1 %v6000_v46  ;;  %5240 = vmatpush3.bf16.msra.mxu0 %v6173_v18 }
 0x78d   :  { %5213 = vmatprep.subr.bf16.mxu1 %v6009_v52  ;;  %5241 = vmatprep.subr.bf16.mxu0 %v7139_v28 }
 0x790   :  { %5215 = vmatpush1.bf16.msra.mxu1 %v6028_v60  ;;  %5243 = vmatpush3.bf16.msra.mxu0 %v6185_v21 }
 0x791   :  { %v5394_v36 = vpop.eup %5393  ;;  %5217 = vmatprep.subr.bf16.mxu1 %v6037_v1  ;;  %5244 = vmatprep.subr.bf16.mxu0 %v7139_v28 }
 0x792   :  { %v5396_v2 = vpop.eup %5395  ;;  %v3016_v46 = vmul.f32 %v5394_v36, %v3014_v29 }
 0x793   :  { %v3023_v8 = vmul.f32 %v5396_v2, %v3021_v38  ;;  %v3019_v52 = vsub.f32 1.0, %v5396_v2 }
 0x794   :  { %v3017_v18 = vadd.f32 %v3016_v46, %v6289_v6  ;;  %5219 = vmatpush1.bf16.msra.mxu1 %v6056_v10  ;;  %5246 = vmatpush3.bf16.msra.mxu0 %v6197_v33 }
 0x795   :  { %5221 = vmatprep.subr.bf16.mxu1 %v6065_v15  ;;  %5247 = vmatprep.subr.bf16.mxu0 %v7139_v28  ;;  %v7265_v15 = vld [vmem:[#allocation25_spill] sm:$0xff] }
 0x796   :  { %5397 = vtanh.f32 %v3017_v18 }
 0x798   :  { %5223 = vmatpush1.bf16.msra.mxu1 %v6084_v27  ;;  %5249 = vmatpush3.bf16.msra.mxu0 %v6209_v39 }
 0x799   :  { %5225 = vmatprep.subr.bf16.mxu1 %v6093_v32  ;;  %5250 = vmatprep.subr.bf16.mxu0 %v7139_v28 }
 0x79c   :  { %5227 = vmatpush1.bf16.msra.mxu1 %v6112_v43  ;;  %5252 = vmatpush3.bf16.msra.mxu0 %v6221_v53 }
 0x79d   :  { %5229 = vmatprep.subr.bf16.mxu1 %v6121_v51  ;;  %5253 = vmatprep.subr.bf16.mxu0 %v7139_v28 }
 0x7a0   :  { %v5398_v60 = vpop.eup %5397  ;;  %5231 = vmatpush1.bf16.msra.mxu1 %v6134_v58  ;;  %5255 = vmatpush3.bf16.msra.mxu0 %v6233_v63 }
 0x7a1   :  { %v3020_v1 = vmul.f32 %v5398_v60, %v3019_v52 }
 0x7a3   :  { %v3024_v10 = vadd.f32 %v3023_v8, %v3020_v1 }
 0x7a5   :  { %v3034_v27 = vrot.slane %v3024_v10, %v7265_v15  ;;  %v6999_v32 = vrot.slane %v3024_v10, 1  ;;  %v7267_v15 = vld [vmem:[#allocation22_spill] sm:$0xff] }
 0x7a7   :  { %v3035_v43 = vsel %vm1199_vm3, %v3034_v27, 0.0  ;;  %3281 = vmatmul.mubr.f32.vlgmr.msra.gmra.mrb[32].mxu1 %v6999_v32  ;;  %4262 = vmatmul.mubr.f32.vlgmr.msra.gmra.mrb[34].mxu0 %v6999_v32 }
 0x7a8   :  { %v3036_v51 = vadd.f32 %v3035_v43, %v3030_v3 }
 0x856   :  { %v3106_v21 = vpop.f32.mrb[30].mxu1  ;;  %v3177_v33 = vpop.f32.mrb[32].mxu0 }
 0x857   :  { %v3107_v58 = vadd.f32 %v3106_v21, %v7178_v57  ;;  %v3108_v39 = vpop.f32.mrb[31].mxu1  ;;  %v4228_v53 = vpop.f32.mrb[33].mxu0  ;;  %v3178_v57 = vadd.f32 %v3177_v33, %v7159_v30 }
 0x858   :  { %v3109_v63 = vadd.f32 %v3108_v39, %v7156_v17 }
 0x859   :  { %v3182_v28 = vrot.slane %v3107_v58, 1  ;;  %v3202_v24 = vrot.slane %v3178_v57, 1 }
 0x85a   :  { %v3192_v35 = vrot.slane %v3109_v63, 1 }
 0x85b   :  { %v3184_v45 = vadd.f32 %v3182_v28, %v7263_v55 }
 0x85c   :  { %v3194_v9 = vadd.f32 %v3192_v35, %v7158_v12 }
 0x85d   :  { %v3428_v11 = vmul.f32 -1.442695, %v3184_v45 }
 0x85e   :  { %v3429_v54 = vmul.f32 -1.442695, %v3194_v9 }
 0x85f   :  { %5399 = vpow2.f32 %v3428_v11 }
 0x860   :  { %5401 = vpow2.f32 %v3429_v54 }
 0x869   :  { %v5400_v16 = vpop.eup %5399 }
 0x86a   :  { %v5402_v42 = vpop.eup %5401  ;;  %v3188_v50 = vadd.f32 1.0, %v5400_v16 }
 0x86b   :  { %v3198_v22 = vadd.f32 1.0, %v5402_v42 }
 0x86c   :  { %5403 = vrcp.f32 %v3188_v50 }
 0x86d   :  { %5405 = vrcp.f32 %v3198_v22 }
 0x876   :  { %v5404_v17 = vpop.eup %5403 }
 0x877   :  { %v5406_v34 = vpop.eup %5405  ;;  %v3204_v55 = vmul.f32 %v5404_v17, %v3202_v24 }
 0x878   :  { %v3211_v44 = vmul.f32 %v5406_v34, %v3209_v13  ;;  %v3207_v23 = vsub.f32 1.0, %v5406_v34 }
 0x879   :  { %v3205_v12 = vadd.f32 %v3204_v55, %v6322_v47 }
 0x87a   :  { %v3282_v62 = vpop.f32.mrb[32].mxu1  ;;  %v3353_v41 = vpop.f32.mrb[34].mxu0 }
 0x87b   :  { %5407 = vtanh.f32 %v3205_v12  ;;  %v3283_v4 = vadd.f32 %v3282_v62, %v6310_v0  ;;  %v3284_v40 = vpop.f32.mrb[33].mxu1  ;;  %v4263_v14 = vpop.f32.mrb[35].mxu0  ;;  %v3354_v36 = vadd.f32 %v3353_v41, %v6349_v59 }
 0x87c   :  { %v3285_v56 = vadd.f32 %v3284_v40, %v6314_v26 }
 0x87d   :  { %v3357_v30 = vadd.f32 %v3283_v4, %v6324_v61 }
 0x87e   :  { %v3364_v48 = vadd.f32 %v3285_v56, %v6330_v5 }
 0x87f   :  { %v3430_v37 = vmul.f32 -1.442695, %v3357_v30 }
 0x880   :  { %v3431_v7 = vmul.f32 -1.442695, %v3364_v48 }
 0x881   :  { %5409 = vpow2.f32 %v3430_v37 }
 0x882   :  { %5411 = vpow2.f32 %v3431_v7 }
 0x885   :  { %v5408_v3 = vpop.eup %5407 }
 0x886   :  { %v3208_v49 = vmul.f32 %v5408_v3, %v3207_v23 }
 0x888   :  { %v3212_v47 = vadd.f32 %v3211_v44, %v3208_v49 }
 0x88a   :  { %v3381_v31 = vrot.slane %v3212_v47, %v7266_v19  ;;  %3391 = vst [vmem:[%s7039_s8 - $0x7] sm:$0x80] %v3212_v47 }
 0x88b   :  { %v5410_v0 = vpop.eup %5409 }
 0x88c   :  { %v3382_v61 = vsel %vm842_vm2, %v3381_v31, 0.0  ;;  %v3361_v26 = vadd.f32 1.0, %v5410_v0  ;;  %v5412_v25 = vpop.eup %5411 }
 0x88d   :  { %v3383_v5 = vadd.f32 %v3382_v61, %v3036_v51  ;;  %v3368_v29 = vadd.f32 1.0, %v5412_v25 }
 0x88e   :  { %5413 = vrcp.f32 %v3361_v26 }
 0x88f   :  { %5415 = vrcp.f32 %v3368_v29 }
 0x898   :  { %v5414_v38 = vpop.eup %5413 }
 0x899   :  { %v3371_v2 = vmul.f32 %v5414_v38, %v3354_v36  ;;  %v5416_v8 = vpop.eup %5415 }
 0x89a   :  { %v3374_v18 = vsub.f32 1.0, %v5416_v8  ;;  %v3376_v1 = vmul.f32 %v5416_v8, %v6999_v32 }
 0x89b   :  { %v3372_v46 = vadd.f32 %v3371_v2, %v6289_v6 }
 0x89d   :  { %5417 = vtanh.f32 %v3372_v46 }
 0x8a7   :  { %v5418_v52 = vpop.eup %5417 }
 0x8a8   :  { %v3375_v60 = vmul.f32 %v5418_v52, %v3374_v18 }
 0x8aa   :  { %v3377_v10 = vadd.f32 %v3376_v1, %v3375_v60 }
 0x8ac   :  { %v3387_v27 = vrot.slane %v3377_v10, %v7267_v15 }
 0x8ae   :  { %v3388_v43 = vsel %vm835_vm1, %v3387_v27, 0.0 }
 0x8af   :  { %v3389_v51 = vadd.f32 %v3388_v43, %v3383_v5 }
 0x8b1   :  { %3390 = vst [vmem:[%s7040_s7] sm:$0xff] %v3389_v51 }

// kernel: greedy_search_decode.3
= control target key start
LH: loop header
LB: loop body
LE: loop exit
PB: predicated region body
PF: predicated region fallthrough
CT: control target
= control target key end

     0   :  { %17 = vsyncpa [#allocation3], 0  ;;  %v8883_v7 = vmov 0.0|0.0   ;;  %v8881_v8 = vmov 0.0   ;;  %vm6730_vm0 = vmmov 0   ;;  %s8869_s0 = inlined_call_operand.vmem [shape: f32[256,384], index: 0, kind: input, shape index: {}]   ;;  %s8870_s1 = inlined_call_operand.vmem [shape: f32[8,128], index: 1, kind: input, shape index: {}]   ;;  %s8871_s2 = inlined_call_operand.vmem [shape: f32[128,8], index: 2, kind: input, shape index: {}]   ;;  %s8872_s3 = inlined_call_operand.vmem [shape: f32[1,128], index: 3, kind: input, shape index: {}]   ;;  %s8873_s4 = inlined_call_operand.vmem [shape: f32[128,384], index: 4, kind: input, shape index: {}]   ;;  %s8874_s5 = inlined_call_operand.vmem [shape: f32[1,384], index: 5, kind: input, shape index: {}]   ;;  %s8875_s6 = inlined_call_operand.vmem [shape: f32[256,128], index: 6, kind: input, shape index: {}]   ;;  %s8876_s7 = inlined_call_operand.vmem [shape: f32[1,128], index: 7, kind: input, shape index: {}]   ;;  %s8877_s8 = inlined_call_operand.vmem [shape: f32[128,256], index: 8, kind: input, shape index: {}]   ;;  %s8878_s9 = inlined_call_operand.vmem [shape: f32[1,256], index: 9, kind: input, shape index: {}]   ;;  %s8879_s10 = inlined_call_operand.hbm [shape: s32[1,6], index: 10, kind: output, shape index: {0}]   ;;  %s8880_s11 = inlined_call_operand.hbm [shape: f32[1,6], index: 11, kind: output, shape index: {1}]  }
   0x1   :  { %v63_v0 = vld [vmem:[%s8873_s4 + $0x8] sm:$0xff]  ;;  %v66_v1 = vld [vmem:[%s8873_s4 + $0x20] sm:$0xff]  ;;  %v65_v4 = vld [vmem:[%s8873_s4 + $0x18] sm:$0xff]  ;;  %5206 = vmatprep.subr.bf16.mxu1 %v8883_v7  ;;  %191 = vmatprep.mubr.f32.mxu0 %v8881_v8 }
   0x2   :  { %v62_v2 = vld [vmem:[%s8873_s4] sm:$0xff]  ;;  %v6803_v3 = vpack.c.bf16 %v66_v1, %v63_v0  ;;  %v69_v5 = vld [vmem:[%s8873_s4 + $0x38] sm:$0xff]  ;;  %v72_v6 = vld [vmem:[%s8873_s4 + $0x50] sm:$0xff]  ;;  %4756 = vmatprep.mubr.msk.f32.mxu1 %vm6730_vm0, %v8881_v8 }
   0x3   :  { %v6816_v9 = vpack.c.bf16 %v65_v4, %v62_v2  ;;  %v6818_v10 = vpack.c.bf16 %v72_v6, %v69_v5  ;;  %v68_v11 = vld [vmem:[%s8873_s4 + $0x30] sm:$0xff]  ;;  %v71_v12 = vld [vmem:[%s8873_s4 + $0x48] sm:$0xff]  ;;  %v78_v14 = vld [vmem:[%s8873_s4 + $0x80] sm:$0xff] }
   0x4   :  { %9116 = vst [vmem:[#allocation8_spill] sm:$0xff] %v6803_v3  ;;  %v75_v13 = vld [vmem:[%s8873_s4 + $0x68] sm:$0xff]  ;;  %5175 = vmatprep.subr.bf16.mxu0 %v6803_v3  ;;  %v6836_v15 = vpack.c.bf16 %v71_v12, %v68_v11  ;;  %v74_v17 = vld [vmem:[%s8873_s4 + $0x60] sm:$0xff]  ;;  %v77_v18 = vld [vmem:[%s8873_s4 + $0x78] sm:$0xff] }
   0x5   :  { %5177 = vmatpush1.bf16.msra.mxu0 %v6816_v9  ;;  %v6839_v16 = vpack.c.bf16 %v78_v14, %v75_v13  ;;  %v81_v19 = vld [vmem:[%s8873_s4 + $0x98] sm:$0xff]  ;;  %v84_v20 = vld [vmem:[%s8873_s4 + $0xb0] sm:$0xff]  ;;  %v6854_v21 = vpack.c.bf16 %v77_v18, %v74_v17  ;;  %v83_v24 = vld [vmem:[%s8873_s4 + $0xa8] sm:$0xff] }
   0x6   :  { %5179 = vmatprep.subr.bf16.mxu0 %v6818_v10  ;;  %v6857_v22 = vpack.c.bf16 %v84_v20, %v81_v19  ;;  %v80_v23 = vld [vmem:[%s8873_s4 + $0x90] sm:$0xff]  ;;  %v87_v25 = vld [vmem:[%s8873_s4 + $0xc8] sm:$0xff]  ;;  %v90_v26 = vld [vmem:[%s8873_s4 + $0xe0] sm:$0xff] }
   0x7   :  { %v64_v27 = vld [vmem:[%s8873_s4 + $0x10] sm:$0xff]  ;;  %v67_v28 = vld [vmem:[%s8873_s4 + $0x28] sm:$0xff]  ;;  %v70_v30 = vld [vmem:[%s8873_s4 + $0x40] sm:$0xff]  ;;  %v6883_v31 = vpack.c.bf16 %v83_v24, %v80_v23  ;;  %v6889_v33 = vpack.c.bf16 %v90_v26, %v87_v25 }
   0x8   :  { %v6877_v29 = vpack.c.bf16 %v67_v28, %v64_v27  ;;  %v73_v32 = vld [vmem:[%s8873_s4 + $0x58] sm:$0xff]  ;;  %v86_v34 = vld [vmem:[%s8873_s4 + $0xc0] sm:$0xff]  ;;  %v96_v38 = vld [vmem:[%s8873_s4 + $0x110] sm:$0xff] }
   0x9   :  { %5181 = vmatpush1.bf16.msra.mxu0 %v6836_v15  ;;  %v89_v35 = vld [vmem:[%s8873_s4 + $0xd8] sm:$0xff]  ;;  %v6901_v37 = vpack.c.bf16 %v73_v32, %v70_v30  ;;  %v76_v39 = vld [vmem:[%s8873_s4 + $0x70] sm:$0xff]  ;;  %v79_v40 = vld [vmem:[%s8873_s4 + $0x88] sm:$0xff] }
   0xa   :  { %5183 = vmatprep.subr.bf16.mxu0 %v6839_v16  ;;  %v93_v36 = vld [vmem:[%s8873_s4 + $0xf8] sm:$0xff]  ;;  %5208 = vmatpush3.bf16.msra.mxu1 %v6877_v29  ;;  %v6914_v41 = vpack.c.bf16 %v89_v35, %v86_v34  ;;  %v92_v42 = vld [vmem:[%s8873_s4 + $0xf0] sm:$0xff]  ;;  %v95_v44 = vld [vmem:[%s8873_s4 + $0x108] sm:$0xff]  ;;  %v6929_v46 = vpack.c.bf16 %v79_v40, %v76_v39 }
   0xb   :  { %5209 = vmatprep.subr.bf16.mxu1 %v8883_v7  ;;  %v6920_v43 = vpack.c.bf16 %v96_v38, %v93_v36  ;;  %v99_v45 = vld [vmem:[%s8873_s4 + $0x128] sm:$0xff] }
   0xd   :  { %5185 = vmatpush1.bf16.msra.mxu0 %v6854_v21  ;;  %9117 = vst [vmem:[#allocation9_spill] sm:$0xff] %v6920_v43 }
   0xe   :  { %5187 = vmatprep.subr.bf16.mxu0 %v6857_v22  ;;  %5211 = vmatpush3.bf16.msra.mxu1 %v6901_v37 }
  0x11   :  { %5189 = vmatpush1.bf16.msra.mxu0 %v6883_v31 }
  0x12   :  { %5191 = vmatprep.subr.bf16.mxu0 %v6889_v33 }
  0x13   :  { %18 = vsyncpa [#allocation5], 0  ;;  %v102_v47 = vld [vmem:[%s8873_s4 + $0x140] sm:$0xff]  ;;  %5212 = vmatprep.subr.bf16.mxu1 %v8883_v7  ;;  %v85_v49 = vld [vmem:[%s8873_s4 + $0xb8] sm:$0xff]  ;;  %v6942_v50 = vpack.c.bf16 %v95_v44, %v92_v42  ;;  %vm364_vm1 = vcmask 57344   ;;  %vm376_vm2 = vcmask 64512  }
  0x14   :  { %v82_v48 = vld [vmem:[%s8873_s4 + $0xa0] sm:$0xff]  ;;  %v6945_v51 = vpack.c.bf16 %v102_v47, %v99_v45  ;;  %v101_v53 = vld [vmem:[%s8873_s4 + $0x138] sm:$0xff]  ;;  %5214 = vmatpush3.bf16.msra.mxu1 %v6929_v46  ;;  %v108_v56 = vld [vmem:[%s8873_s4 + $0x170] sm:$0xff]  ;;  %vm669_vm3 = vcmask 1040384  }
  0x15   :  { %5193 = vmatpush1.bf16.msra.mxu0 %v6914_v41  ;;  %9118 = vst [vmem:[#allocation10_spill] sm:$0xff] %v6942_v50  ;;  %v98_v52 = vld [vmem:[%s8873_s4 + $0x120] sm:$0xff]  ;;  %v105_v54 = vld [vmem:[%s8873_s4 + $0x158] sm:$0xff]  ;;  %v6957_v55 = vpack.c.bf16 %v85_v49, %v82_v48  ;;  %5215 = vmatprep.subr.bf16.mxu1 %v8883_v7  ;;  %v88_v57 = vld [vmem:[%s8873_s4 + $0xd0] sm:$0xff] }
  0x16   :  { %5195 = vmatprep.subr.bf16.mxu0 %v6920_v43  ;;  %9119 = vst [vmem:[#allocation11_spill] sm:$0xff] %v6945_v51  ;;  %v91_v58 = vld [vmem:[%s8873_s4 + $0xe8] sm:$0xff]  ;;  %v6970_v59 = vpack.c.bf16 %v101_v53, %v98_v52  ;;  %v6973_v60 = vpack.c.bf16 %v108_v56, %v105_v54  ;;  %v104_v61 = vld [vmem:[%s8873_s4 + $0x150] sm:$0xff]  ;;  %v94_v0 = vld [vmem:[%s8873_s4 + $0x100] sm:$0xff]  ;;  %v8885_v53 = vlaneseq }
  0x17   :  { %v107_v62 = vld [vmem:[%s8873_s4 + $0x168] sm:$0xff]  ;;  %v6982_v63 = vpack.c.bf16 %v91_v58, %v88_v57  ;;  %v97_v1 = vld [vmem:[%s8873_s4 + $0x118] sm:$0xff]  ;;  %v100_v5 = vld [vmem:[%s8873_s4 + $0x130] sm:$0xff] }
  0x18   :  { %9120 = vst [vmem:[#allocation12_spill] sm:$0xff] %v6970_v59  ;;  %9121 = vst [vmem:[#allocation13_spill] sm:$0xff] %v6973_v60  ;;  %5217 = vmatpush3.bf16.msra.mxu1 %v6957_v55  ;;  %v6992_v2 = vpack.c.bf16 %v107_v62, %v104_v61  ;;  %v6996_v4 = vpack.c.bf16 %v97_v1, %v94_v0  ;;  %v103_v6 = vld [vmem:[%s8873_s4 + $0x148] sm:$0xff]  ;;  %v7009_v11 = vld [vmem:[%s8872_s3] sm:$0x1]  ;;  %v7114_v54 = vshrl.u32 %v8885_v53, 7 }
  0x19   :  { %5197 = vmatpush1.bf16.msra.mxu0 %v6942_v50  ;;  %9122 = vst [vmem:[#allocation14_spill] sm:$0xff] %v6982_v63  ;;  %5218 = vmatprep.subr.bf16.mxu1 %v8883_v7  ;;  %v7012_v12 = vpack.c.bf16 %v103_v6, %v100_v5  ;;  %v106_v13 = vld [vmem:[%s8873_s4 + $0x160] sm:$0xff]  ;;  %v109_v14 = vld [vmem:[%s8873_s4 + $0x178] sm:$0xff]  ;;  %v41_v19 = vld [vmem:[%s8871_s2 + $0x8] sm:$0xff] }
  0x1a   :  { %5199 = vmatprep.subr.bf16.mxu0 %v6945_v51  ;;  %9123 = vst [vmem:[#allocation15_spill] sm:$0xff] %v6992_v2  ;;  %9124 = vst [vmem:[#allocation16_spill] sm:$0xff] %v6996_v4  ;;  %v7026_v17 = vpack.c.bf16 %v109_v14, %v106_v13  ;;  %v40_v18 = vld [vmem:[%s8871_s2] sm:$0xff]  ;;  %v42_v23 = vld [vmem:[%s8871_s2 + $0x10] sm:$0xff]  ;;  %v8887_v56 = vsub.s32 0, %v7114_v54  ;;  %v8886_v58 = vsub.s32 1, %v7114_v54 }
  0x1b   :  { %9125 = vst [vmem:[#allocation17_spill] sm:$0xff] %v7012_v12  ;;  %v7040_v20 = vpack.c.bf16 %v41_v19, %v40_v18  ;;  %v43_v24 = vld [vmem:[%s8871_s2 + $0x18] sm:$0xff]  ;;  %v44_v26 = vld [vmem:[%s8871_s2 + $0x20] sm:$0xff]  ;;  %v45_v27 = vld [vmem:[%s8871_s2 + $0x28] sm:$0xff] }
  0x1c   :  { %5220 = vmatpush3.bf16.msra.mxu1 %v6982_v63  ;;  %9126 = vst [vmem:[#allocation18_spill] sm:$0xff] %v7026_v17  ;;  %v7050_v25 = vpack.c.bf16 %v43_v24, %v42_v23  ;;  %v7060_v28 = vpack.c.bf16 %v45_v27, %v44_v26  ;;  %v46_v30 = vld [vmem:[%s8871_s2 + $0x30] sm:$0xff]  ;;  %v47_v32 = vld [vmem:[%s8871_s2 + $0x38] sm:$0xff]  ;;  %v48_v35 = vld [vmem:[%s8871_s2 + $0x40] sm:$0xff] }
  0x1d   :  { %5201 = vmatpush1.bf16.msra.mxu0 %v6970_v59  ;;  %5221 = vmatprep.subr.bf16.mxu1 %v8883_v7  ;;  %9127 = vst [vmem:[#allocation19_spill] sm:$0xff] %v7040_v20  ;;  %v7070_v34 = vpack.c.bf16 %v47_v32, %v46_v30  ;;  %v49_v36 = vld [vmem:[%s8871_s2 + $0x48] sm:$0xff]  ;;  %v50_v39 = vld [vmem:[%s8871_s2 + $0x50] sm:$0xff]  ;;  %v51_v40 = vld [vmem:[%s8871_s2 + $0x58] sm:$0xff] }
  0x1e   :  { %5203 = vmatprep.subr.bf16.mxu0 %v6973_v60  ;;  %9128 = vst [vmem:[#allocation20_spill] sm:$0xff] %v7050_v25  ;;  %9129 = vst [vmem:[#allocation21_spill] sm:$0xff] %v7060_v28  ;;  %v7080_v38 = vpack.c.bf16 %v49_v36, %v48_v35  ;;  %v7090_v42 = vpack.c.bf16 %v51_v40, %v50_v39  ;;  %v52_v44 = vld [vmem:[%s8871_s2 + $0x60] sm:$0xff]  ;;  %v53_v45 = vld [vmem:[%s8871_s2 + $0x68] sm:$0xff]  ;;  %v122_v35 = vsub.s32 2, %v7114_v54 }
  0x1f   :  { %9130 = vst [vmem:[#allocation22_spill] sm:$0xff] %v7070_v34  ;;  %v7099_v47 = vpack.c.bf16 %v53_v45, %v52_v44  ;;  %v54_v48 = vld [vmem:[%s8871_s2 + $0x70] sm:$0xff]  ;;  %v55_v49 = vld [vmem:[%s8871_s2 + $0x78] sm:$0xff]  ;;  %v110_v57 = vld [vmem:[%s8874_s5] sm:$0x7] }
  0x20   :  { %5223 = vmatpush3.bf16.msra.mxu1 %v6996_v4  ;;  %9131 = vst [vmem:[#allocation23_spill] sm:$0xff] %v7080_v38  ;;  %9132 = vst [vmem:[#allocation24_spill] sm:$0xff] %v7090_v42  ;;  %v7109_v52 = vpack.c.bf16 %v55_v49, %v54_v48  ;;  %v7123_v61 = vrot.slane %v110_v57, %v8887_v56  ;;  %v7127_v62 = vrot.slane %v110_v57, %v8886_v58  ;;  %v4074_v0 = vld [vmem:[%s8869_s0 + $0x1] ss:$8 sm:$0x7] }
  0x21   :  { %5205 = vmatpush1.bf16.msra.mxu0 %v6992_v2  ;;  %5224 = vmatprep.subr.bf16.mxu1 %v8883_v7  ;;  %9133 = vst [vmem:[#allocation25_spill] sm:$0xff] %v7099_v47  ;;  %v276_v14 = vrot.slane %v4074_v0, 1  ;;  %v7135_v36 = vrot.slane %v110_v57, %v122_v35  ;;  %v286_v45 = vrot.slane %v4074_v0, 2  ;;  %v466_v35 = vld [vmem:[%s8875_s6 + $0x80] sm:$0xff]  ;;  %v563_v56 = vld [vmem:[%s8877_s8 + $0x48] sm:$0xff] }
  0x22   :  { %5230 = vmatprep.subr.bf16.mxu0 %v8883_v7  ;;  %9134 = vst [vmem:[#allocation26_spill] sm:$0xff] %v7109_v52  ;;  %9135 = vst [vmem:[#allocation27_spill] sm:$0xff] %v7123_v61 }
  0x24   :  { %192 = vmatmul.mubr.f32.vlgmr.msra.gmra.mrb[0].mxu0 %v7009_v11  ;;  %5226 = vmatpush3.bf16.msra.mxu1 %v7012_v12 }
  0x25   :  { %4791 = vmatprep.mubr.msk.f32.mxu0 %vm6730_vm0, %v8881_v8  ;;  %5227 = vmatprep.subr.bf16.mxu1 %v8883_v7 }
  0x26   :  { %5232 = vmatpush3.bf16.msra.mxu0 %v7040_v20 }
  0x27   :  { %5233 = vmatprep.subr.bf16.mxu0 %v8883_v7 }
  0x28   :  { %5229 = vmatpush3.bf16.msra.mxu1 %v7026_v17 }
  0x29   :  { %4794 = vmatprep.subr.mxu1 %v8881_v8 }
  0x2a   :  { %5235 = vmatpush3.bf16.msra.mxu0 %v7050_v25 }
  0x2b   :  { %4757 = vmatmul.mubr.f32.vlgmr.msra.gmra.mrb[0].mxu1 %v7009_v11  ;;  %5236 = vmatprep.subr.bf16.mxu0 %v8883_v7 }
  0x2c   :  { %4796 = vmatprep.mubr.msk.f32.mxu1 %vm6730_vm0, %v8881_v8 }
  0x2e   :  { %5238 = vmatpush3.bf16.msra.mxu0 %v7060_v28 }
  0x2f   :  { %5239 = vmatprep.subr.bf16.mxu0 %v8883_v7 }
  0x32   :  { %5241 = vmatpush3.bf16.msra.mxu0 %v7070_v34 }
  0x33   :  { %5242 = vmatprep.subr.bf16.mxu0 %v8883_v7 }
  0x36   :  { %5244 = vmatpush3.bf16.msra.mxu0 %v7080_v38 }
  0x37   :  { %5245 = vmatprep.subr.bf16.mxu0 %v8883_v7 }
  0x3a   :  { %5247 = vmatpush3.bf16.msra.mxu0 %v7090_v42 }
  0x3b   :  { %5248 = vmatprep.subr.bf16.mxu0 %v8883_v7 }
  0x3e   :  { %5250 = vmatpush3.bf16.msra.mxu0 %v7099_v47 }
  0x3f   :  { %5251 = vmatprep.subr.bf16.mxu0 %v8883_v7  ;;  %v561_v7 = vld [vmem:[%s8877_s8 + $0x38] sm:$0xff] }
  0x42   :  { %5253 = vmatpush3.bf16.msra.mxu0 %v7109_v52 }
  0xf7   :  { %v193_v1 = vpop.f32.mrb[0].mxu0 }
  0xf8   :  { %v194_v5 = vadd.f32 %v193_v1, %v7123_v61  ;;  %v195_v6 = vpop.f32.mrb[1].mxu0 }
  0xf9   :  { %v196_v13 = vadd.f32 %v195_v6, %v7127_v62 }
  0xfa   :  { %v268_v18 = vadd.f32 %v4074_v0, %v194_v5 }
  0xfb   :  { %v278_v23 = vadd.f32 %v276_v14, %v196_v13 }
  0xfc   :  { %v4075_v19 = vmul.f32 -1.442695, %v268_v18 }
  0xfd   :  { %v4076_v26 = vmul.f32 -1.442695, %v278_v23 }
  0xfe   :  { %6544 = vpow2.f32 %v4075_v19  ;;  %v264_v24 = vpop.f32.mrb[0].mxu1 }
  0xff   :  { %v4758_v27 = vpop.f32.mrb[1].mxu1  ;;  %6546 = vpow2.f32 %v4076_v26  ;;  %v265_v44 = vadd.f32 %v264_v24, %v7135_v36 }
 0x108   :  { %v6545_v30 = vpop.eup %6544 }
 0x109   :  { %v272_v32 = vadd.f32 1.0, %v6545_v30  ;;  %v6547_v39 = vpop.eup %6546 }
 0x10a   :  { %v282_v40 = vadd.f32 1.0, %v6547_v39  ;;  %v467_v39 = vld [vmem:[%s8875_s6 + $0x88] sm:$0xff] }
 0x10b   :  { %6548 = vrcp.f32 %v272_v32 }
 0x10c   :  { %6550 = vrcp.f32 %v282_v40  ;;  %v7157_v40 = vpack.c.bf16 %v467_v39, %v466_v35  ;;  %v473_v35 = vld [vmem:[%s8875_s6 + $0xb8] sm:$0xff] }
 0x10e   :  { %9136 = vst [vmem:[#allocation28_spill] sm:$0xff] %v7157_v40 }
 0x115   :  { %v6549_v48 = vpop.eup %6548 }
 0x116   :  { %v285_v49 = vmul.f32 %v6549_v48, %v265_v44  ;;  %v6551_v5 = vpop.eup %6550  ;;  %v451_v48 = vld [vmem:[%s8875_s6 + $0x8] sm:$0xff] }
 0x117   :  { %v290_v6 = vsub.f32 1.0, %v6551_v5  ;;  %v292_v18 = vmul.f32 %v6551_v5, %v7009_v11  ;;  %v7148_v11 = vld [vmem:[%s8870_s1] sm:$0xff] }
 0x118   :  { %v288_v1 = vadd.f32 %v286_v45, %v285_v49  ;;  %4795 = vmatpush3.msra.mxu1 %v7148_v11  ;;  %v450_v45 = vld [vmem:[%s8875_s6] sm:$0xff]  ;;  %v468_v49 = vld [vmem:[%s8875_s6 + $0x90] sm:$0xff] }
 0x119   :  { %5255 = vmatprep.subr.bf16.mxu1 %v7157_v40 }
 0x11a   :  { %6552 = vtanh.f32 %v288_v1  ;;  %v469_v1 = vld [vmem:[%s8875_s6 + $0x98] sm:$0xff] }
 0x124   :  { %v6553_v13 = vpop.eup %6552 }
 0x125   :  { %v291_v14 = vmul.f32 %v6553_v13, %v290_v6  ;;  %v7172_v6 = vpack.c.bf16 %v451_v48, %v450_v45  ;;  %v456_v45 = vld [vmem:[%s8875_s6 + $0x30] sm:$0xff]  ;;  %v457_v48 = vld [vmem:[%s8875_s6 + $0x38] sm:$0xff] }
 0x127   :  { %v7139_v19 = vadd.f32 %v292_v18, %v291_v14  ;;  %9137 = vst [vmem:[#allocation29_spill] sm:$0xff] %v7172_v6  ;;  %v7174_v14 = vpack.c.bf16 %v469_v1, %v468_v49  ;;  %v452_v18 = vld [vmem:[%s8875_s6 + $0x10] sm:$0xff]  ;;  %v474_v49 = vld [vmem:[%s8875_s6 + $0xc0] sm:$0xff]  ;;  %v475_v1 = vld [vmem:[%s8875_s6 + $0xc8] sm:$0xff] }
 0x129   :  { %4792 = vmatmul.mubr.f32.vlgmr.msra.gmra.mrb[2].mxu0 %v7139_v19  ;;  %9138 = vst [vmem:[#allocation30_spill] sm:$0xff] %v7174_v14 }
 0x12a   :  { %662 = vmatprep.mubr.f32.mxu0 %v8881_v8 }
 0x1fc   :  { %v360_v57 = vpop.f32.mrb[2].mxu0 }
 0x1fd   :  { %v4793_v0 = vpop.f32.mrb[3].mxu0  ;;  %v365_v23 = vsel %vm364_vm1, %v360_v57, -inf }
 0x1fe   :  { %366 = vmax.xlane.f32.xlu0 %v365_v23  ;;  %v470_v0 = vld [vmem:[%s8875_s6 + $0xa0] sm:$0xff]  ;;  %v471_v23 = vld [vmem:[%s8875_s6 + $0xa8] sm:$0xff] }
 0x28b   :  { %v367_v24 = vpop.xlane.xlu0 %366 }
 0x28c   :  { %v368_v26 = vsub.f32 %v360_v57, %v367_v24  ;;  %v453_v57 = vld [vmem:[%s8875_s6 + $0x18] sm:$0xff] }
 0x28d   :  { %v7190_v24 = vpack.c.bf16 %v453_v57, %v452_v18  ;;  %v458_v18 = vld [vmem:[%s8875_s6 + $0x40] sm:$0xff]  ;;  %v459_v57 = vld [vmem:[%s8875_s6 + $0x48] sm:$0xff] }
 0x28e   :  { %v369_v27 = vmul.f32 1.442695, %v368_v26  ;;  %v7193_v26 = vpack.c.bf16 %v471_v23, %v470_v0  ;;  %v476_v0 = vld [vmem:[%s8875_s6 + $0xd0] sm:$0xff]  ;;  %v477_v23 = vld [vmem:[%s8875_s6 + $0xd8] sm:$0xff] }
 0x28f   :  { %9139 = vst [vmem:[#allocation31_spill] sm:$0xff] %v7190_v24 }
 0x290   :  { %6554 = vpow2.f32 %v369_v27  ;;  %9140 = vst [vmem:[#allocation32_spill] sm:$0xff] %v7193_v26  ;;  %v454_v27 = vld [vmem:[%s8875_s6 + $0x20] sm:$0xff] }
 0x29a   :  { %v6555_v30 = vpop.eup %6554 }
 0x29b   :  { %v371_v32 = vsel %vm364_vm1, %v6555_v30, 0.0 }
 0x29c   :  { %372 = vadd.xlane.f32.xlu0 %v371_v32  ;;  %v472_v32 = vld [vmem:[%s8875_s6 + $0xb0] sm:$0xff] }
 0x329   :  { %v373_v44 = vpop.xlane.xlu0 %372 }
 0x32a   :  { %6556 = vrcp.f32 %v373_v44  ;;  %v7211_v44 = vpack.c.bf16 %v473_v35, %v472_v32  ;;  %v460_v32 = vld [vmem:[%s8875_s6 + $0x50] sm:$0xff]  ;;  %v461_v35 = vld [vmem:[%s8875_s6 + $0x58] sm:$0xff] }
 0x32c   :  { %9142 = vst [vmem:[#allocation34_spill] sm:$0xff] %v7211_v44 }
 0x334   :  { %v6557_v5 = vpop.eup %6556 }
 0x335   :  { %v375_v13 = vmul.f32 %v6557_v5, %v6555_v30  ;;  %v455_v30 = vld [vmem:[%s8875_s6 + $0x28] sm:$0xff]  ;;  %v7226_v5 = vpack.c.bf16 %v457_v48, %v456_v45  ;;  %v478_v45 = vld [vmem:[%s8875_s6 + $0xe0] sm:$0xff] }
 0x336   :  { %v7208_v39 = vpack.c.bf16 %v455_v30, %v454_v27  ;;  %v7244_v27 = vpack.c.bf16 %v459_v57, %v458_v18  ;;  %v7247_v30 = vpack.c.bf16 %v477_v23, %v476_v0  ;;  %v479_v48 = vld [vmem:[%s8875_s6 + $0xe8] sm:$0xff]  ;;  %v462_v18 = vld [vmem:[%s8875_s6 + $0x60] sm:$0xff]  ;;  %v480_v0 = vld [vmem:[%s8875_s6 + $0xf0] sm:$0xff] }
 0x337   :  { %4797 = vmatmul.mubr.msk.f32.vlgmr.msra.gmra.mrb[2].mxu1 %vm376_vm2, %v375_v13  ;;  %9143 = vst [vmem:[#allocation35_spill] sm:$0xff] %v7226_v5  ;;  %v7229_v13 = vpack.c.bf16 %v475_v1, %v474_v49  ;;  %v7262_v49 = vpack.c.bf16 %v461_v35, %v460_v32  ;;  %v7265_v1 = vpack.c.bf16 %v479_v48, %v478_v45  ;;  %v463_v57 = vld [vmem:[%s8875_s6 + $0x68] sm:$0xff]  ;;  %v481_v23 = vld [vmem:[%s8875_s6 + $0xf8] sm:$0xff]  ;;  %v464_v45 = vld [vmem:[%s8875_s6 + $0x70] sm:$0xff] }
 0x338   :  { %5257 = vmatpush3.bf16.msra.mxu1 %v7172_v6  ;;  %9141 = vst [vmem:[#allocation33_spill] sm:$0xff] %v7208_v39  ;;  %9145 = vst [vmem:[#allocation37_spill] sm:$0xff] %v7244_v27  ;;  %v7280_v32 = vpack.c.bf16 %v463_v57, %v462_v18  ;;  %v7283_v35 = vpack.c.bf16 %v481_v23, %v480_v0  ;;  %v465_v48 = vld [vmem:[%s8875_s6 + $0x78] sm:$0xff]  ;;  %v555_v18 = vld [vmem:[%s8877_s8 + $0x8] sm:$0xff] }
 0x339   :  { %5259 = vmatprep.subr.bf16.mxu1 %v7174_v14  ;;  %9144 = vst [vmem:[#allocation36_spill] sm:$0xff] %v7229_v13  ;;  %9146 = vst [vmem:[#allocation38_spill] sm:$0xff] %v7247_v30  ;;  %v7292_v8 = vpack.c.bf16 %v465_v48, %v464_v45  ;;  %v557_v57 = vld [vmem:[%s8877_s8 + $0x18] sm:$0xff]  ;;  %v554_v0 = vld [vmem:[%s8877_s8] sm:$0xff] }
 0x33a   :  { %9147 = vst [vmem:[#allocation39_spill] sm:$0xff] %v7262_v49  ;;  %9148 = vst [vmem:[#allocation40_spill] sm:$0xff] %v7265_v1  ;;  %v7305_v23 = vpack.c.bf16 %v557_v57, %v555_v18  ;;  %v556_v45 = vld [vmem:[%s8877_s8 + $0x10] sm:$0xff]  ;;  %v559_v48 = vld [vmem:[%s8877_s8 + $0x28] sm:$0xff] }
 0x33b   :  { %9149 = vst [vmem:[#allocation41_spill] sm:$0xff] %v7280_v32  ;;  %9150 = vst [vmem:[#allocation42_spill] sm:$0xff] %v7283_v35  ;;  %v7316_v53 = vpack.c.bf16 %v556_v45, %v554_v0  ;;  %v7318_v58 = vpack.c.bf16 %v561_v7, %v559_v48  ;;  %v558_v18 = vld [vmem:[%s8877_s8 + $0x20] sm:$0xff]  ;;  %v560_v57 = vld [vmem:[%s8877_s8 + $0x30] sm:$0xff] }
 0x33c   :  { %5261 = vmatpush3.bf16.msra.mxu1 %v7190_v24  ;;  %9151 = vst [vmem:[#allocation43_spill] sm:$0xff] %v7292_v8  ;;  %9152 = vst [vmem:[#allocation44_spill] sm:$0xff] %v7305_v23  ;;  %5287 = vmatprep.subr.bf16.mxu0 %v7305_v23  ;;  %v565_v0 = vld [vmem:[%s8877_s8 + $0x58] sm:$0xff]  ;;  %v7334_v7 = vpack.c.bf16 %v560_v57, %v558_v18  ;;  %v562_v48 = vld [vmem:[%s8877_s8 + $0x40] sm:$0xff] }
 0x33d   :  { %5263 = vmatprep.subr.bf16.mxu1 %v7193_v26  ;;  %5289 = vmatpush1.bf16.msra.mxu0 %v7316_v53  ;;  %v7337_v45 = vpack.c.bf16 %v565_v0, %v563_v56  ;;  %v569_v18 = vld [vmem:[%s8877_s8 + $0x78] sm:$0xff]  ;;  %v566_v0 = vld [vmem:[%s8877_s8 + $0x60] sm:$0xff] }
 0x33e   :  { %5291 = vmatprep.subr.bf16.mxu0 %v7318_v58 }
 0x340   :  { %5265 = vmatpush3.bf16.msra.mxu1 %v7208_v39 }
 0x341   :  { %5267 = vmatprep.subr.bf16.mxu1 %v7211_v44  ;;  %5293 = vmatpush1.bf16.msra.mxu0 %v7334_v7 }
 0x342   :  { %5295 = vmatprep.subr.bf16.mxu0 %v7337_v45 }
 0x344   :  { %5269 = vmatpush3.bf16.msra.mxu1 %v7226_v5  ;;  %v585_v5 = vld [vmem:[%s8877_s8 + $0xf8] sm:$0xff] }
 0x345   :  { %5271 = vmatprep.subr.bf16.mxu1 %v7229_v13 }
 0x348   :  { %5273 = vmatpush3.bf16.msra.mxu1 %v7244_v27  ;;  %v579_v27 = vld [vmem:[%s8877_s8 + $0xc8] sm:$0xff] }
 0x349   :  { %5275 = vmatprep.subr.bf16.mxu1 %v7247_v30  ;;  %v574_v30 = vld [vmem:[%s8877_s8 + $0xa0] sm:$0xff] }
 0x34c   :  { %5277 = vmatpush3.bf16.msra.mxu1 %v7262_v49 }
 0x34d   :  { %5279 = vmatprep.subr.bf16.mxu1 %v7265_v1 }
 0x350   :  { %5281 = vmatpush3.bf16.msra.mxu1 %v7280_v32  ;;  %v568_v32 = vld [vmem:[%s8877_s8 + $0x70] sm:$0xff] }
 0x351   :  { %5283 = vmatprep.subr.bf16.mxu1 %v7283_v35  ;;  %v567_v35 = vld [vmem:[%s8877_s8 + $0x68] sm:$0xff]  ;;  %v7364_v1 = vpack.c.bf16 %v568_v32, %v566_v0  ;;  %v570_v32 = vld [vmem:[%s8877_s8 + $0x80] sm:$0xff]  ;;  %v572_v0 = vld [vmem:[%s8877_s8 + $0x90] sm:$0xff] }
 0x352   :  { %v7355_v57 = vpack.c.bf16 %v569_v18, %v567_v35  ;;  %v571_v35 = vld [vmem:[%s8877_s8 + $0x88] sm:$0xff]  ;;  %v573_v18 = vld [vmem:[%s8877_s8 + $0x98] sm:$0xff] }
 0x353   :  { %9155 = vst [vmem:[#allocation47_spill] sm:$0xff] %v7364_v1  ;;  %v7375_v49 = vpack.c.bf16 %v573_v18, %v571_v35  ;;  %v577_v35 = vld [vmem:[%s8877_s8 + $0xb8] sm:$0xff] }
 0x354   :  { %5285 = vmatpush3.bf16.msra.mxu1 %v7292_v8  ;;  %v564_v8 = vld [vmem:[%s8877_s8 + $0x50] sm:$0xff]  ;;  %9154 = vst [vmem:[#allocation46_spill] sm:$0xff] %v7355_v57 }
 0x355   :  { %v7352_v56 = vpack.c.bf16 %v564_v8, %v562_v48  ;;  %9156 = vst [vmem:[#allocation48_spill] sm:$0xff] %v7375_v49 }
 0x357   :  { %9153 = vst [vmem:[#allocation45_spill] sm:$0xff] %v7352_v56  ;;  %5297 = vmatpush1.bf16.msra.mxu0 %v7352_v56 }
 0x358   :  { %5299 = vmatprep.subr.bf16.mxu0 %v7355_v57 }
 0x35b   :  { %5301 = vmatpush1.bf16.msra.mxu0 %v7364_v1 }
 0x35c   :  { %5303 = vmatprep.subr.bf16.mxu0 %v7375_v49  ;;  %v726_v49 = vld [vmem:[%s8869_s0 + $0x40] sm:$0xff] }
 0x40a   :  { %v446_v8 = vpop.f32.mrb[2].mxu1 }
 0x40b   :  { %v4798_v48 = vpop.f32.mrb[3].mxu1  ;;  %547 = vmatprep.mubr.f32.mxu1 %v446_v8  ;;  %v7383_v8 = vpack.c.bf16 %v572_v0, %v570_v32  ;;  %v576_v32 = vld [vmem:[%s8877_s8 + $0xb0] sm:$0xff] }
 0x40c   :  { %548 = vmatmul.mubr.f32.vlgmr.msra.gmra.mrb[4].mxu1 %v7139_v19  ;;  %v575_v48 = vld [vmem:[%s8877_s8 + $0xa8] sm:$0xff]  ;;  %v7401_v0 = vpack.c.bf16 %v576_v32, %v574_v30  ;;  %v580_v30 = vld [vmem:[%s8877_s8 + $0xd0] sm:$0xff] }
 0x40d   :  { %9157 = vst [vmem:[#allocation49_spill] sm:$0xff] %v7383_v8  ;;  %5305 = vmatpush1.bf16.msra.mxu0 %v7383_v8  ;;  %v7393_v18 = vpack.c.bf16 %v577_v35, %v575_v48  ;;  %v581_v48 = vld [vmem:[%s8877_s8 + $0xd8] sm:$0xff]  ;;  %v578_v35 = vld [vmem:[%s8877_s8 + $0xc0] sm:$0xff]  ;;  %v583_v32 = vld [vmem:[%s8877_s8 + $0xe8] sm:$0xff] }
 0x40e   :  { %9159 = vst [vmem:[#allocation51_spill] sm:$0xff] %v7401_v0  ;;  %v7414_v13 = vpack.c.bf16 %v581_v48, %v579_v27  ;;  %v7425_v44 = vpack.c.bf16 %v580_v30, %v578_v35  ;;  %v7427_v39 = vpack.c.bf16 %v585_v5, %v583_v32  ;;  %v582_v27 = vld [vmem:[%s8877_s8 + $0xe0] sm:$0xff]  ;;  %v584_v48 = vld [vmem:[%s8877_s8 + $0xf0] sm:$0xff] }
 0x40f   :  { %9158 = vst [vmem:[#allocation50_spill] sm:$0xff] %v7393_v18  ;;  %5307 = vmatprep.subr.bf16.mxu0 %v7393_v18  ;;  %v7437_v26 = vpack.c.bf16 %v584_v48, %v582_v27  ;;  %v7444_v35 = vld [vmem:[%s8876_s7] sm:$0x1]  ;;  %v9165_v48 = vsub.s32 0, %v7114_v54  ;;  %v720_v18 = vld [vmem:[%s8869_s0 + $0x10] sm:$0xff] }
 0x410   :  { %9160 = vst [vmem:[#allocation52_spill] sm:$0xff] %v7414_v13  ;;  %9161 = vst [vmem:[#allocation53_spill] sm:$0xff] %v7425_v44  ;;  %v586_v27 = vld [vmem:[%s8878_s9] sm:$0x3] }
 0x411   :  { %5309 = vmatpush1.bf16.msra.mxu0 %v7401_v0  ;;  %9162 = vst [vmem:[#allocation54_spill] sm:$0xff] %v7427_v39  ;;  %9163 = vst [vmem:[#allocation55_spill] sm:$0xff] %v7437_v26  ;;  %v7452_v6 = vrot.slane %v586_v27, %v9165_v48  ;;  %v737_v0 = vld [vmem:[%s8869_s0 + $0x98] sm:$0xff] }
 0x412   :  { %5311 = vmatprep.subr.bf16.mxu0 %v7414_v13  ;;  %9164 = vst [vmem:[#allocation56_spill] sm:$0xff] %v7444_v35  ;;  %v731_v13 = vld [vmem:[%s8869_s0 + $0x68] sm:$0xff] }
 0x413   :  { %9166 = vst [vmem:[#allocation57_spill] sm:$0xff] %v7452_v6 }
 0x415   :  { %5313 = vmatpush1.bf16.msra.mxu0 %v7425_v44 }
 0x416   :  { %5315 = vmatprep.subr.bf16.mxu0 %v7427_v39 }
 0x419   :  { %5317 = vmatpush1.bf16.msra.mxu0 %v7437_v26  ;;  %v9167_v26 = vsub.s32 1, %v7114_v54  ;;  %v9171_v54 = vlaneseq }
 0x41b   :  { %v7456_v39 = vrot.slane %v586_v27, %v9167_v26  ;;  %v7469_v26 = vand.u32 127, %v9171_v54 }
 0x41d   :  { %9168 = vst [vmem:[#allocation58_spill] sm:$0xff] %v7456_v39  ;;  %v7472_v27 = vadd.s32 128, %v7469_v26  ;;  %vm709_vm14 = vcmp.eq.s32.totalorder %v7469_v26, 0  ;;  %vm1452_vm15 = vcmp.eq.s32.totalorder %v7469_v26, 1 }
 0x4df   :  { %v4191_v5 = vpop.f32.mrb[4].mxu1 }
 0x4e0   :  { %v4192_v30 = vpop.f32.mrb[5].mxu1 }
 0x4e1   :  { %v4193_v32 = vadd.f32 %v4192_v30, %v4191_v5 }
 0x4e3   :  { %v550_v24 = vadd.f32 %v4193_v32, %v7444_v35 }
 0x4e5   :  { %6558 = vtanh.f32 %v550_v24 }
 0x4ef   :  { %v6559_v14 = vpop.eup %6558 }
 0x4f0   :  { %663 = vmatmul.mubr.f32.vlgmr.msra.gmra.mrb[4].mxu0 %v6559_v14 }
 0x5c3   :  { %v664_v44 = vpop.f32.mrb[4].mxu0 }
 0x5c4   :  { %v7459_v5 = vadd.f32 %v664_v44, %v7452_v6  ;;  %v666_v24 = vpop.f32.mrb[5].mxu0 }
 0x5c5   :  { %v7462_v14 = vadd.f32 %v666_v24, %v7456_v39 }
 0x5c6   :  { %9169 = vst [vmem:[#allocation59_spill] sm:$0xff] %v7459_v5  ;;  %v670_v30 = vsel %vm669_vm3, %v7459_v5, -inf }
 0x5c7   :  { %9170 = vst [vmem:[#allocation60_spill] sm:$0xff] %v7462_v14  ;;  %v671_v32 = vsel %vm669_vm3, %v7462_v14, -inf }
 0x5c8   :  { %v672_v48 = vmax.f32 %v670_v30, %v671_v32 }
 0x5ca   :  { %673 = vmax.xlane.f32.xlu1 %v672_v48 }
 0x657   :  { %v7474_v44 = vpop.xlane.xlu1 %673 }
 0x658   :  { %9172 = vst [vmem:[#allocation61_spill] sm:$0xff] %v7474_v44  ;;  %vm687_vm4 = vcmp.eq.f32.partialorder %v7459_v5, %v7474_v44  ;;  %vm688_vm5 = vcmp.eq.f32.partialorder %v7462_v14, %v7474_v44  ;;  %v719_v14 = vld [vmem:[%s8869_s0 + $0x8] sm:$0xff]  ;;  %v722_v5 = vld [vmem:[%s8869_s0 + $0x20] sm:$0xff] }
 0x659   :  { %v689_v24 = vsel %vm687_vm4, %v7469_v26, 256  ;;  %v690_v39 = vsel %vm688_vm5, %v7472_v27, 256 }
 0x65a   :  { %v691_v30 = vsel %vm669_vm3, %v689_v24, 2147483647  ;;  %v692_v32 = vsel %vm669_vm3, %v690_v39, 2147483647  ;;  %v718_v39 = vld [vmem:[%s8869_s0] sm:$0xff]  ;;  %v7499_v24 = vpack.c.bf16 %v722_v5, %v719_v14  ;;  %v724_v5 = vld [vmem:[%s8869_s0 + $0x30] sm:$0xff] }
 0x65b   :  { %vm693_vm6 = vcmp.lt.s32.totalorder %v691_v30, %v692_v32  ;;  %v727_v14 = vld [vmem:[%s8869_s0 + $0x48] sm:$0xff] }
 0x65c   :  { %v7484_v48 = vsel %vm693_vm6, %v691_v30, %v692_v32  ;;  %9173 = vst [vmem:[#allocation62_spill] sm:$0xff] %v7499_v24  ;;  %v721_v30 = vld [vmem:[%s8869_s0 + $0x18] sm:$0xff]  ;;  %5319 = vmatprep.subr.bf16.mxu1 %v7499_v24 }
 0x65d   :  { %v696_v54 = vshra.s32 %v7484_v48, 16  ;;  %v725_v32 = vld [vmem:[%s8869_s0 + $0x38] sm:$0xff]  ;;  %v7510_v44 = vpack.c.bf16 %v721_v30, %v718_v39  ;;  %v734_v39 = vld [vmem:[%s8869_s0 + $0x80] sm:$0xff]  ;;  %v7528_v30 = vpack.c.bf16 %v727_v14, %v724_v5  ;;  %v740_v5 = vld [vmem:[%s8869_s0 + $0xb0] sm:$0xff] }
 0x65e   :  { %v733_v24 = vld [vmem:[%s8869_s0 + $0x78] sm:$0xff]  ;;  %v7549_v14 = vpack.c.bf16 %v740_v5, %v737_v0  ;;  %v768_v0 = vld [vmem:[%s8869_s0 + $0x190] sm:$0xff] }
 0x65f   :  { %v7487_v6 = vcvt.s32.f32 %v696_v54  ;;  %v728_v54 = vld [vmem:[%s8869_s0 + $0x50] sm:$0xff]  ;;  %9174 = vst [vmem:[#allocation63_spill] sm:$0xff] %v7510_v44  ;;  %5321 = vmatpush1.bf16.msra.mxu1 %v7510_v44  ;;  %9176 = vst [vmem:[#allocation65_spill] sm:$0xff] %v7528_v30  ;;  %v743_v44 = vld [vmem:[%s8869_s0 + $0xc8] sm:$0xff] }
 0x660   :  { %v7512_v35 = vpack.c.bf16 %v728_v54, %v725_v32  ;;  %v7531_v32 = vpack.c.bf16 %v734_v39, %v731_v13  ;;  %v730_v54 = vld [vmem:[%s8869_s0 + $0x60] sm:$0xff]  ;;  %9179 = vst [vmem:[#allocation68_spill] sm:$0xff] %v7549_v14  ;;  %v736_v39 = vld [vmem:[%s8869_s0 + $0x90] sm:$0xff] }
 0x661   :  { %699 = vmin.xlane.f32.xlu1 %v7487_v6  ;;  %v7546_v13 = vpack.c.bf16 %v733_v24, %v730_v54  ;;  %v746_v24 = vld [vmem:[%s8869_s0 + $0xe0] sm:$0xff]  ;;  %v771_v54 = vld [vmem:[%s8869_s0 + $0x1a8] sm:$0xff] }
 0x662   :  { %9175 = vst [vmem:[#allocation64_spill] sm:$0xff] %v7512_v35  ;;  %5323 = vmatprep.subr.bf16.mxu1 %v7512_v35  ;;  %9177 = vst [vmem:[#allocation66_spill] sm:$0xff] %v7531_v32  ;;  %v739_v35 = vld [vmem:[%s8869_s0 + $0xa8] sm:$0xff]  ;;  %v7581_v8 = vpack.c.bf16 %v746_v24, %v743_v44  ;;  %v774_v24 = vld [vmem:[%s8869_s0 + $0x1c0] sm:$0xff] }
 0x663   :  { %5325 = vmatpush1.bf16.msra.mxu1 %v7528_v30  ;;  %9178 = vst [vmem:[#allocation67_spill] sm:$0xff] %v7546_v13  ;;  %v7570_v5 = vpack.c.bf16 %v739_v35, %v736_v39  ;;  %v7575_v30 = vpack.c.bf16 %v771_v54, %v768_v0  ;;  %v749_v35 = vld [vmem:[%s8869_s0 + $0xf8] sm:$0xff]  ;;  %v723_v39 = vld [vmem:[%s8869_s0 + $0x28] sm:$0xff]  ;;  %v752_v0 = vld [vmem:[%s8869_s0 + $0x110] sm:$0xff] }
 0x664   :  { %5327 = vmatprep.subr.bf16.mxu1 %v7531_v32  ;;  %v742_v32 = vld [vmem:[%s8869_s0 + $0xc0] sm:$0xff]  ;;  %9182 = vst [vmem:[#allocation71_spill] sm:$0xff] %v7581_v8  ;;  %v7596_v44 = vpack.c.bf16 %v723_v39, %v720_v18  ;;  %v777_v54 = vld [vmem:[%s8869_s0 + $0x1d8] sm:$0xff]  ;;  %v748_v39 = vld [vmem:[%s8869_s0 + $0xf0] sm:$0xff]  ;;  %v7625_v1 = vpack.c.bf16 %v752_v0, %v749_v35 }
 0x665   :  { %9180 = vst [vmem:[#allocation69_spill] sm:$0xff] %v7570_v5  ;;  %9181 = vst [vmem:[#allocation70_spill] sm:$0xff] %v7575_v30  ;;  %5383 = vmatprep.subr.bf16.mxu0 %v7575_v30  ;;  %v729_v30 = vld [vmem:[%s8869_s0 + $0x58] sm:$0xff]  ;;  %v732_v0 = vld [vmem:[%s8869_s0 + $0x70] sm:$0xff] }
 0x666   :  { %9183 = vst [vmem:[#allocation72_spill] sm:$0xff] %v7596_v44  ;;  %5385 = vmatpush3.bf16.msra.mxu0 %v7596_v44  ;;  %9187 = vst [vmem:[#allocation76_spill] sm:$0xff] %v7625_v1  ;;  %v735_v44 = vld [vmem:[%s8869_s0 + $0x88] sm:$0xff] }
 0x667   :  { %5329 = vmatpush1.bf16.msra.mxu1 %v7546_v13  ;;  %v745_v13 = vld [vmem:[%s8869_s0 + $0xd8] sm:$0xff]  ;;  %v7664_v57 = vpack.c.bf16 %v735_v44, %v732_v0  ;;  %v760_v0 = vld [vmem:[%s8869_s0 + $0x150] sm:$0xff] }
 0x668   :  { %5331 = vmatprep.subr.bf16.mxu1 %v7549_v14  ;;  %v7604_v14 = vpack.c.bf16 %v777_v54, %v774_v24  ;;  %v7613_v18 = vpack.c.bf16 %v745_v13, %v742_v32  ;;  %v7619_v24 = vpack.c.bf16 %v729_v30, %v726_v49  ;;  %v780_v54 = vld [vmem:[%s8869_s0 + $0x1f0] sm:$0xff]  ;;  %v751_v32 = vld [vmem:[%s8869_s0 + $0x108] sm:$0xff]  ;;  %v758_v30 = vld [vmem:[%s8869_s0 + $0x140] sm:$0xff] }
 0x669   :  { %v755_v13 = vld [vmem:[%s8869_s0 + $0x128] sm:$0xff]  ;;  %9190 = vst [vmem:[#allocation79_spill] sm:$0xff] %v7664_v57  ;;  %v741_v44 = vld [vmem:[%s8869_s0 + $0xb8] sm:$0xff] }
 0x66a   :  { %9184 = vst [vmem:[#allocation73_spill] sm:$0xff] %v7604_v14  ;;  %9185 = vst [vmem:[#allocation74_spill] sm:$0xff] %v7613_v18  ;;  %5387 = vmatprep.subr.bf16.mxu0 %v7604_v14  ;;  %v783_v49 = vld [vmem:[%s8869_s0 + $0x208] sm:$0xff]  ;;  %v786_v14 = vld [vmem:[%s8869_s0 + $0x220] sm:$0xff]  ;;  %v7667_v56 = vpack.c.bf16 %v758_v30, %v755_v13 }
 0x66b   :  { %5333 = vmatpush1.bf16.msra.mxu1 %v7570_v5  ;;  %9186 = vst [vmem:[#allocation75_spill] sm:$0xff] %v7619_v24  ;;  %v7640_v35 = vpack.c.bf16 %v783_v49, %v780_v54  ;;  %v7655_v54 = vpack.c.bf16 %v751_v32, %v748_v39  ;;  %v754_v49 = vld [vmem:[%s8869_s0 + $0x120] sm:$0xff]  ;;  %v757_v5 = vld [vmem:[%s8869_s0 + $0x138] sm:$0xff]  ;;  %5389 = vmatpush3.bf16.msra.mxu0 %v7619_v24  ;;  %v764_v13 = vld [vmem:[%s8869_s0 + $0x170] sm:$0xff] }
 0x66c   :  { %5335 = vmatprep.subr.bf16.mxu1 %v7581_v8  ;;  %v789_v8 = vld [vmem:[%s8869_s0 + $0x238] sm:$0xff]  ;;  %9191 = vst [vmem:[#allocation80_spill] sm:$0xff] %v7667_v56  ;;  %v792_v30 = vld [vmem:[%s8869_s0 + $0x250] sm:$0xff] }
 0x66d   :  { %9188 = vst [vmem:[#allocation77_spill] sm:$0xff] %v7640_v35  ;;  %9189 = vst [vmem:[#allocation78_spill] sm:$0xff] %v7655_v54  ;;  %v761_v39 = vld [vmem:[%s8869_s0 + $0x158] sm:$0xff]  ;;  %5391 = vmatprep.subr.bf16.mxu0 %v7640_v35  ;;  %v7673_v32 = vpack.c.bf16 %v789_v8, %v786_v14  ;;  %v795_v8 = vld [vmem:[%s8869_s0 + $0x268] sm:$0xff]  ;;  %v7691_v14 = vpack.c.bf16 %v757_v5, %v754_v49 }
 0x66e   :  { %v763_v35 = vld [vmem:[%s8869_s0 + $0x168] sm:$0xff]  ;;  %v7709_v49 = vpack.c.bf16 %v795_v8, %v792_v30  ;;  %v766_v8 = vld [vmem:[%s8869_s0 + $0x180] sm:$0xff] }
 0x66f   :  { %5337 = vmatpush1.bf16.msra.mxu1 %v7613_v18  ;;  %9192 = vst [vmem:[#allocation81_spill] sm:$0xff] %v7673_v32  ;;  %v738_v18 = vld [vmem:[%s8869_s0 + $0xa0] sm:$0xff]  ;;  %9193 = vst [vmem:[#allocation82_spill] sm:$0xff] %v7691_v14  ;;  %5393 = vmatpush3.bf16.msra.mxu0 %v7664_v57  ;;  %v767_v5 = vld [vmem:[%s8869_s0 + $0x188] sm:$0xff]  ;;  %v7727_v30 = vpack.c.bf16 %v763_v35, %v760_v0 }
 0x670   :  { %5339 = vmatprep.subr.bf16.mxu1 %v7625_v1  ;;  %v7700_v24 = vpack.c.bf16 %v741_v44, %v738_v18  ;;  %v7703_v1 = vpack.c.bf16 %v764_v13, %v761_v39  ;;  %5395 = vmatprep.subr.bf16.mxu0 %v7673_v32  ;;  %9196 = vst [vmem:[#allocation85_spill] sm:$0xff] %v7709_v49  ;;  %v747_v18 = vld [vmem:[%s8869_s0 + $0xe8] sm:$0xff]  ;;  %v770_v39 = vld [vmem:[%s8869_s0 + $0x1a0] sm:$0xff]  ;;  %v801_v13 = vld [vmem:[%s8869_s0 + $0x298] sm:$0xff] }
 0x671   :  { %v798_v44 = vld [vmem:[%s8869_s0 + $0x280] sm:$0xff]  ;;  %9197 = vst [vmem:[#allocation86_spill] sm:$0xff] %v7727_v30  ;;  %v769_v32 = vld [vmem:[%s8869_s0 + $0x198] sm:$0xff] }
 0x672   :  { %9194 = vst [vmem:[#allocation83_spill] sm:$0xff] %v7700_v24  ;;  %9195 = vst [vmem:[#allocation84_spill] sm:$0xff] %v7703_v1  ;;  %v773_v35 = vld [vmem:[%s8869_s0 + $0x1b8] sm:$0xff]  ;;  %v7745_v0 = vpack.c.bf16 %v801_v13, %v798_v44  ;;  %v7763_v44 = vpack.c.bf16 %v769_v32, %v766_v8  ;;  %v772_v13 = vld [vmem:[%s8869_s0 + $0x1b0] sm:$0xff] }
 0x673   :  { %5341 = vmatpush1.bf16.msra.mxu1 %v7655_v54  ;;  %v744_v54 = vld [vmem:[%s8869_s0 + $0xd0] sm:$0xff]  ;;  %5397 = vmatpush3.bf16.msra.mxu0 %v7700_v24 }
 0x674   :  { %5343 = vmatprep.subr.bf16.mxu1 %v7667_v56  ;;  %v7736_v57 = vpack.c.bf16 %v747_v18, %v744_v54  ;;  %v7739_v56 = vpack.c.bf16 %v770_v39, %v767_v5  ;;  %5399 = vmatprep.subr.bf16.mxu0 %v7709_v49  ;;  %9200 = vst [vmem:[#allocation89_spill] sm:$0xff] %v7745_v0  ;;  %v753_v54 = vld [vmem:[%s8869_s0 + $0x118] sm:$0xff]  ;;  %v776_v5 = vld [vmem:[%s8869_s0 + $0x1d0] sm:$0xff]  ;;  %v807_v39 = vld [vmem:[%s8869_s0 + $0x2c8] sm:$0xff] }
 0x675   :  { %v804_v18 = vld [vmem:[%s8869_s0 + $0x2b0] sm:$0xff]  ;;  %9201 = vst [vmem:[#allocation90_spill] sm:$0xff] %v7763_v44  ;;  %v7772_v24 = vpack.c.bf16 %v776_v5, %v773_v35  ;;  %v779_v35 = vld [vmem:[%s8869_s0 + $0x1e8] sm:$0xff] }
 0x676   :  { %9198 = vst [vmem:[#allocation87_spill] sm:$0xff] %v7736_v57  ;;  %9199 = vst [vmem:[#allocation88_spill] sm:$0xff] %v7739_v56  ;;  %v7778_v32 = vpack.c.bf16 %v807_v39, %v804_v18  ;;  %v756_v8 = vld [vmem:[%s8869_s0 + $0x130] sm:$0xff] }
 0x677   :  { %5345 = vmatpush1.bf16.msra.mxu1 %v7691_v14  ;;  %v750_v14 = vld [vmem:[%s8869_s0 + $0x100] sm:$0xff]  ;;  %5401 = vmatpush3.bf16.msra.mxu0 %v7736_v57  ;;  %9203 = vst [vmem:[#allocation92_spill] sm:$0xff] %v7772_v24  ;;  %v781_v57 = vld [vmem:[%s8869_s0 + $0x1f8] sm:$0xff] }
 0x678   :  { %5347 = vmatprep.subr.bf16.mxu1 %v7703_v1  ;;  %v7769_v49 = vpack.c.bf16 %v753_v54, %v750_v14  ;;  %v775_v1 = vld [vmem:[%s8869_s0 + $0x1c8] sm:$0xff]  ;;  %5403 = vmatprep.subr.bf16.mxu0 %v7745_v0  ;;  %9204 = vst [vmem:[#allocation93_spill] sm:$0xff] %v7778_v32  ;;  %v782_v54 = vld [vmem:[%s8869_s0 + $0x200] sm:$0xff] }
 0x679   :  { %v759_v14 = vld [vmem:[%s8869_s0 + $0x148] sm:$0xff]  ;;  %v7793_v5 = vpack.c.bf16 %v775_v1, %v772_v13  ;;  %v7799_v39 = vpack.c.bf16 %v782_v54, %v779_v35  ;;  %v778_v0 = vld [vmem:[%s8869_s0 + $0x1e0] sm:$0xff]  ;;  %v785_v1 = vld [vmem:[%s8869_s0 + $0x218] sm:$0xff] }
 0x67a   :  { %9202 = vst [vmem:[#allocation91_spill] sm:$0xff] %v7769_v49  ;;  %v7796_v18 = vpack.c.bf16 %v759_v14, %v756_v8  ;;  %v788_v13 = vld [vmem:[%s8869_s0 + $0x230] sm:$0xff]  ;;  %v7815_v8 = vpack.c.bf16 %v781_v57, %v778_v0  ;;  %v787_v54 = vld [vmem:[%s8869_s0 + $0x228] sm:$0xff]  ;;  %v794_v57 = vld [vmem:[%s8869_s0 + $0x260] sm:$0xff] }
 0x67b   :  { %5349 = vmatpush1.bf16.msra.mxu1 %v7727_v30  ;;  %9205 = vst [vmem:[#allocation94_spill] sm:$0xff] %v7793_v5  ;;  %5405 = vmatpush3.bf16.msra.mxu0 %v7769_v49  ;;  %9207 = vst [vmem:[#allocation96_spill] sm:$0xff] %v7799_v39  ;;  %v7819_v14 = vpack.c.bf16 %v788_v13, %v785_v1  ;;  %v784_v35 = vld [vmem:[%s8869_s0 + $0x210] sm:$0xff]  ;;  %v790_v13 = vld [vmem:[%s8869_s0 + $0x240] sm:$0xff] }
 0x67c   :  { %5351 = vmatprep.subr.bf16.mxu1 %v7739_v56  ;;  %9206 = vst [vmem:[#allocation95_spill] sm:$0xff] %v7796_v18  ;;  %5407 = vmatprep.subr.bf16.mxu0 %v7778_v32  ;;  %9208 = vst [vmem:[#allocation97_spill] sm:$0xff] %v7815_v8  ;;  %v791_v32 = vld [vmem:[%s8869_s0 + $0x248] sm:$0xff]  ;;  %v7834_v0 = vpack.c.bf16 %v787_v54, %v784_v35  ;;  %v797_v49 = vld [vmem:[%s8869_s0 + $0x278] sm:$0xff] }
 0x67d   :  { %9209 = vst [vmem:[#allocation98_spill] sm:$0xff] %v7819_v14  ;;  %v7837_v1 = vpack.c.bf16 %v794_v57, %v791_v32  ;;  %v800_v35 = vld [vmem:[%s8869_s0 + $0x290] sm:$0xff] }
 0x67e   :  { %9210 = vst [vmem:[#allocation99_spill] sm:$0xff] %v7834_v0  ;;  %v7855_v54 = vpack.c.bf16 %v800_v35, %v797_v49  ;;  %v796_v57 = vld [vmem:[%s8869_s0 + $0x270] sm:$0xff]  ;;  %v802_v35 = vld [vmem:[%s8869_s0 + $0x2a0] sm:$0xff] }
 0x67f   :  { %5353 = vmatpush1.bf16.msra.mxu1 %v7763_v44  ;;  %5409 = vmatpush3.bf16.msra.mxu0 %v7796_v18  ;;  %9211 = vst [vmem:[#allocation100_spill] sm:$0xff] %v7837_v1  ;;  %v793_v18 = vld [vmem:[%s8869_s0 + $0x258] sm:$0xff] }
 0x680   :  { %5355 = vmatprep.subr.bf16.mxu1 %v7772_v24  ;;  %v7852_v32 = vpack.c.bf16 %v793_v18, %v790_v13  ;;  %9213 = vst [vmem:[#allocation102_spill] sm:$0xff] %v7855_v54  ;;  %v806_v18 = vld [vmem:[%s8869_s0 + $0x2c0] sm:$0xff] }
 0x682   :  { %9212 = vst [vmem:[#allocation101_spill] sm:$0xff] %v7852_v32 }
 0x683   :  { %5357 = vmatpush1.bf16.msra.mxu1 %v7793_v5 }
 0x684   :  { %5359 = vmatprep.subr.bf16.mxu1 %v7799_v39 }
 0x687   :  { %5361 = vmatpush1.bf16.msra.mxu1 %v7815_v8  ;;  %v803_v8 = vld [vmem:[%s8869_s0 + $0x2a8] sm:$0xff] }
 0x688   :  { %5363 = vmatprep.subr.bf16.mxu1 %v7819_v14  ;;  %v799_v14 = vld [vmem:[%s8869_s0 + $0x288] sm:$0xff]  ;;  %v7873_v13 = vpack.c.bf16 %v806_v18, %v803_v8 }
 0x689   :  { %v7870_v49 = vpack.c.bf16 %v799_v14, %v796_v57  ;;  %v695_v14 = vand.u32 65535, %v7484_v48  ;;  %v808_v48 = vld [vmem:[%s8869_s0 + $0x2d0] sm:$0xff] }
 0x68a   :  { %9215 = vst [vmem:[#allocation104_spill] sm:$0xff] %v7873_v13 }
 0x68b   :  { %5365 = vmatpush1.bf16.msra.mxu1 %v7834_v0  ;;  %9214 = vst [vmem:[#allocation103_spill] sm:$0xff] %v7870_v49  ;;  %v697_v57 = vcvt.s32.f32 %v695_v14  ;;  %v811_v14 = vld [vmem:[%s8869_s0 + $0x2e8] sm:$0xff] }
 0x68c   :  { %5367 = vmatprep.subr.bf16.mxu1 %v7837_v1  ;;  %v805_v1 = vld [vmem:[%s8869_s0 + $0x2b8] sm:$0xff] }
 0x68d   :  { %v7882_v0 = vpack.c.bf16 %v805_v1, %v802_v35  ;;  %v812_v1 = vld [vmem:[%s8869_s0 + $0x2f0] sm:$0xff]  ;;  %v810_v35 = vld [vmem:[%s8869_s0 + $0x2e0] sm:$0xff] }
 0x68f   :  { %5369 = vmatpush1.bf16.msra.mxu1 %v7852_v32  ;;  %9216 = vst [vmem:[#allocation105_spill] sm:$0xff] %v7882_v0 }
 0x690   :  { %5371 = vmatprep.subr.bf16.mxu1 %v7855_v54  ;;  %v809_v54 = vld [vmem:[%s8869_s0 + $0x2d8] sm:$0xff] }
 0x693   :  { %5373 = vmatpush1.bf16.msra.mxu1 %v7870_v49 }
 0x694   :  { %5375 = vmatprep.subr.bf16.mxu1 %v7873_v13 }
 0x697   :  { %5377 = vmatpush1.bf16.msra.mxu1 %v7882_v0  ;;  %v7897_v0 = vpack.c.bf16 %v812_v1, %v809_v54  ;;  %v762_v54 = vld [vmem:[%s8869_s0 + $0x160] sm:$0xff]  ;;  %v765_v1 = vld [vmem:[%s8869_s0 + $0x178] sm:$0xff] }
 0x698   :  { %v7919_v13 = vpack.c.bf16 %v765_v1, %v762_v54  ;;  %v9025_v54 = vmov 1.0  }
 0x699   :  { %9217 = vst [vmem:[#allocation106_spill] sm:$0xff] %v7897_v0  ;;  %5379 = vmatprep.subr.bf16.mxu1 %v7897_v0 }
 0x69a   :  { %9220 = vst [vmem:[#allocation109_spill] sm:$0xff] %v7919_v13 }
 0x6ee   :  { %v700_v8 = vpop.xlane.xlu1 %699 }
 0x6ef   :  { %vm701_vm7 = vcmp.eq.f32.partialorder %v7487_v6, %v700_v8  ;;  %v813_v6 = vld [vmem:[%s8869_s0 + $0x2f8] sm:$0xff] }
 0x6f0   :  { %v702_v18 = vsel %vm701_vm7, %v697_v57, inf  ;;  %v7908_v57 = vpack.c.bf16 %v813_v6, %v810_v35  ;;  %v9221_v35 = vmov 0.0|0.0   ;;  %v706_v6 = vcvt.f32.s32 %v700_v8 }
 0x6f1   :  { %703 = vmin.xlane.f32.xlu0 %v702_v18  ;;  %v7910_v18 = vpack.c.bf16 %v811_v14, %v808_v48 }
 0x6f2   :  { %9218 = vst [vmem:[#allocation107_spill] sm:$0xff] %v7908_v57  ;;  %5411 = vmatprep.subr.bf16.mxu0 %v7908_v57  ;;  %v707_v14 = vshll.u32 %v706_v6, 16 }
 0x6f3   :  { %9219 = vst [vmem:[#allocation108_spill] sm:$0xff] %v7910_v18  ;;  %5381 = vmatpush1.bf16.msra.mxu1 %v7910_v18  ;;  %5413 = vmatpush3.bf16.msra.mxu0 %v7919_v13 }
 0x6f4   :  { %5415 = vmatprep.subr.bf16.mxu1 %v6803_v3  ;;  %5446 = vmatprep.subr.bf16.mxu0 %v9221_v35 }
 0x77e   :  { %v704_v48 = vpop.xlane.xlu0 %703 }
 0x77f   :  { %v705_v49 = vcvt.f32.s32 %v704_v48 }
 0x781   :  { %v7926_v32 = vadd.s32 %v707_v14, %v705_v49  ;;  %v9222_v49 = vmov 0.0  }
 0x783   :  { %vm713_vm8 = vcmp.eq.s32.totalorder %v7472_v27, %v7926_v32  ;;  %vm712_vm9 = vcmp.eq.s32.totalorder %v7469_v26, %v7926_v32 }
 0x784   :  { %4080 = vmatprep.mubr.msk.f32.mxu1 %vm713_vm8, %v9025_v54  ;;  %4082 = vmatprep.mubr.msk.f32.mxu0 %vm713_vm8, %v9025_v54 }
 0x785   :  { %4081 = vmatmul.mubr.msk.f32.vlgmr.msra.gmra.mrb[6].mxu1 %vm712_vm9, %v9025_v54  ;;  %4083 = vmatmul.mubr.msk.f32.vlgmr.msra.gmra.mrb[6].mxu0 %vm712_vm9, %v9025_v54 }
 0x786   :  { %5417 = vmatpush1.bf16.msra.mxu1 %v6816_v9  ;;  %5448 = vmatpush3.bf16.msra.mxu0 %v6877_v29 }
 0x787   :  { %5419 = vmatprep.subr.bf16.mxu1 %v6818_v10  ;;  %5449 = vmatprep.subr.bf16.mxu0 %v9221_v35 }
 0x788   :  { %1019 = vmatprep.mubr.f32.mxu1 %v9222_v49  ;;  %4831 = vmatprep.mubr.msk.f32.mxu0 %vm6730_vm0, %v9222_v49 }
 0x78a   :  { %5421 = vmatpush1.bf16.msra.mxu1 %v6836_v15  ;;  %5451 = vmatpush3.bf16.msra.mxu0 %v6901_v37 }
 0x78b   :  { %5423 = vmatprep.subr.bf16.mxu1 %v6839_v16  ;;  %5452 = vmatprep.subr.bf16.mxu0 %v9221_v35 }
 0x78e   :  { %5425 = vmatpush1.bf16.msra.mxu1 %v6854_v21  ;;  %5454 = vmatpush3.bf16.msra.mxu0 %v6929_v46 }
 0x78f   :  { %5427 = vmatprep.subr.bf16.mxu1 %v6857_v22  ;;  %5455 = vmatprep.subr.bf16.mxu0 %v9221_v35 }
 0x792   :  { %5429 = vmatpush1.bf16.msra.mxu1 %v6883_v31  ;;  %5457 = vmatpush3.bf16.msra.mxu0 %v6957_v55 }
 0x793   :  { %5431 = vmatprep.subr.bf16.mxu1 %v6889_v33  ;;  %5458 = vmatprep.subr.bf16.mxu0 %v9221_v35 }
 0x796   :  { %5433 = vmatpush1.bf16.msra.mxu1 %v6914_v41  ;;  %5460 = vmatpush3.bf16.msra.mxu0 %v6982_v63 }
 0x797   :  { %5435 = vmatprep.subr.bf16.mxu1 %v6920_v43  ;;  %5461 = vmatprep.subr.bf16.mxu0 %v9221_v35 }
 0x79a   :  { %5437 = vmatpush1.bf16.msra.mxu1 %v6942_v50  ;;  %5463 = vmatpush3.bf16.msra.mxu0 %v6996_v4 }
 0x79b   :  { %5439 = vmatprep.subr.bf16.mxu1 %v6945_v51  ;;  %5464 = vmatprep.subr.bf16.mxu0 %v9221_v35 }
 0x79e   :  { %5441 = vmatpush1.bf16.msra.mxu1 %v6970_v59  ;;  %5466 = vmatpush3.bf16.msra.mxu0 %v7012_v12 }
 0x79f   :  { %5443 = vmatprep.subr.bf16.mxu1 %v6973_v60  ;;  %5467 = vmatprep.subr.bf16.mxu0 %v9221_v35 }
 0x7a2   :  { %5445 = vmatpush1.bf16.msra.mxu1 %v6992_v2  ;;  %5469 = vmatpush3.bf16.msra.mxu0 %v7026_v17 }
 0x7a3   :  { %5470 = vmatprep.subr.bf16.mxu0 %v9221_v35  ;;  %4869 = vmatprep.subr.mxu1 %v9222_v49 }
 0x7a5   :  { %1020 = vmatmul.mubr.f32.vlgmr.msra.gmra.mrb[6].mxu1 %v7139_v19  ;;  %4832 = vmatmul.mubr.f32.vlgmr.msra.gmra.mrb[8].mxu0 %v7139_v19 }
 0x7a6   :  { %5472 = vmatpush3.bf16.msra.mxu0 %v7040_v20  ;;  %4866 = vmatprep.mubr.msk.f32.mxu0 %vm6730_vm0, %v9222_v49 }
 0x7a7   :  { %5473 = vmatprep.subr.bf16.mxu0 %v9221_v35  ;;  %4870 = vmatpush3.msra.mxu1 %v7148_v11 }
 0x7a8   :  { %4871 = vmatprep.mubr.msk.f32.mxu1 %vm6730_vm0, %v9222_v49  ;;  %5495 = vmatprep.subr.bf16.mxu1 %v7157_v40 }
 0x7aa   :  { %5475 = vmatpush3.bf16.msra.mxu0 %v7050_v25 }
 0x7ab   :  { %5476 = vmatprep.subr.bf16.mxu0 %v9221_v35 }
 0x7ae   :  { %5478 = vmatpush3.bf16.msra.mxu0 %v7060_v28 }
 0x7af   :  { %5479 = vmatprep.subr.bf16.mxu0 %v9221_v35 }
 0x7b2   :  { %5481 = vmatpush3.bf16.msra.mxu0 %v7070_v34 }
 0x7b3   :  { %5482 = vmatprep.subr.bf16.mxu0 %v9221_v35 }
 0x7b6   :  { %5484 = vmatpush3.bf16.msra.mxu0 %v7080_v38 }
 0x7b7   :  { %5485 = vmatprep.subr.bf16.mxu0 %v9221_v35 }
 0x7ba   :  { %5487 = vmatpush3.bf16.msra.mxu0 %v7090_v42 }
 0x7bb   :  { %5488 = vmatprep.subr.bf16.mxu0 %v9221_v35 }
 0x7be   :  { %5490 = vmatpush3.bf16.msra.mxu0 %v7099_v47 }
 0x7bf   :  { %5491 = vmatprep.subr.bf16.mxu0 %v9221_v35 }
 0x7c2   :  { %5493 = vmatpush3.bf16.msra.mxu0 %v7109_v52 }
 0x7c3   :  { %5527 = vmatprep.subr.bf16.mxu0 %v7305_v23 }
 0x858   :  { %v4226_v11 = vpop.f32.mrb[6].mxu0 }
 0x859   :  { %v4227_v8 = vpop.f32.mrb[7].mxu0 }
 0x85a   :  { %v4228_v1 = vadd.f32 %v4227_v8, %v4226_v11 }
 0x878   :  { %v1021_v6 = vpop.f32.mrb[6].mxu1  ;;  %v1092_v48 = vpop.f32.mrb[8].mxu0 }
 0x879   :  { %v1022_v14 = vadd.f32 %v1021_v6, %v7123_v61  ;;  %v1023_v54 = vpop.f32.mrb[7].mxu1  ;;  %v4833_v38 = vpop.f32.mrb[9].mxu0  ;;  %v1093_v40 = vadd.f32 %v1092_v48, %v7135_v36  ;;  %v9234_v48 = vld [vmem:[#allocation70_spill] sm:$0xff] }
 0x87a   :  { %v1024_v34 = vadd.f32 %v1023_v54, %v7127_v62  ;;  %v9232_v54 = vld [vmem:[#allocation54_spill] sm:$0xff] }
 0x87b   :  { %v4084_v42 = vmul.f32 -1.442695, %v1022_v14 }
 0x87c   :  { %v4085_v47 = vmul.f32 -1.442695, %v1024_v34 }
 0x87d   :  { %6560 = vpow2.f32 %v4084_v42 }
 0x87e   :  { %6562 = vpow2.f32 %v4085_v47  ;;  %v9226_v47 = vld [vmem:[#allocation48_spill] sm:$0xff] }
 0x887   :  { %v6561_v28 = vpop.eup %6560 }
 0x888   :  { %v1100_v25 = vadd.f32 1.0, %v6561_v28  ;;  %v6563_v52 = vpop.eup %6562  ;;  %v9225_v28 = vld [vmem:[#allocation47_spill] sm:$0xff] }
 0x889   :  { %v1107_v23 = vadd.f32 1.0, %v6563_v52  ;;  %v9227_v52 = vld [vmem:[#allocation49_spill] sm:$0xff] }
 0x88a   :  { %6564 = vrcp.f32 %v1100_v25  ;;  %v9224_v25 = vld [vmem:[#allocation46_spill] sm:$0xff] }
 0x88b   :  { %6566 = vrcp.f32 %v1107_v23  ;;  %v9231_v23 = vld [vmem:[#allocation53_spill] sm:$0xff] }
 0x894   :  { %v6565_v11 = vpop.eup %6564 }
 0x895   :  { %v1110_v8 = vmul.f32 %v6565_v11, %v1093_v40  ;;  %v6567_v6 = vpop.eup %6566  ;;  %v9230_v40 = vld [vmem:[#allocation52_spill] sm:$0xff] }
 0x896   :  { %v1113_v38 = vsub.f32 1.0, %v6567_v6  ;;  %v1115_v42 = vmul.f32 %v6567_v6, %v7139_v19  ;;  %v9229_v19 = vld [vmem:[#allocation51_spill] sm:$0xff] }
 0x897   :  { %v1111_v20 = vadd.f32 %v4228_v1, %v1110_v8  ;;  %v9233_v1 = vld [vmem:[#allocation55_spill] sm:$0xff] }
 0x899   :  { %6568 = vtanh.f32 %v1111_v20  ;;  %v9223_v20 = vld [vmem:[#allocation45_spill] sm:$0xff] }
 0x8a3   :  { %v6569_v14 = vpop.eup %6568 }
 0x8a4   :  { %v1114_v61 = vmul.f32 %v6569_v14, %v1113_v38 }
 0x8a6   :  { %v7999_v34 = vadd.f32 %v1115_v42, %v1114_v61  ;;  %v9228_v61 = vld [vmem:[#allocation50_spill] sm:$0xff] }
 0x8a8   :  { %4867 = vmatmul.mubr.f32.vlgmr.msra.gmra.mrb[10].mxu0 %v7999_v34 }
 0x8a9   :  { %5529 = vmatpush1.bf16.msra.mxu0 %v7316_v53  ;;  %1406 = vmatprep.mubr.f32.mxu0 %v9222_v49 }
 0x8aa   :  { %5531 = vmatprep.subr.bf16.mxu0 %v7318_v58 }
 0x8ad   :  { %5533 = vmatpush1.bf16.msra.mxu0 %v7334_v7 }
 0x8ae   :  { %5535 = vmatprep.subr.bf16.mxu0 %v7337_v45 }
 0x8b1   :  { %5537 = vmatpush1.bf16.msra.mxu0 %v9223_v20 }
 0x8b2   :  { %5539 = vmatprep.subr.bf16.mxu0 %v9224_v25 }
 0x8b5   :  { %5541 = vmatpush1.bf16.msra.mxu0 %v9225_v28 }
 0x8b6   :  { %5543 = vmatprep.subr.bf16.mxu0 %v9226_v47 }
 0x8b9   :  { %5545 = vmatpush1.bf16.msra.mxu0 %v9227_v52 }
 0x8ba   :  { %5547 = vmatprep.subr.bf16.mxu0 %v9228_v61 }
 0x8bd   :  { %5549 = vmatpush1.bf16.msra.mxu0 %v9229_v19 }
 0x8be   :  { %5551 = vmatprep.subr.bf16.mxu0 %v9230_v40 }
 0x8c1   :  { %5553 = vmatpush1.bf16.msra.mxu0 %v9231_v23 }
 0x8c2   :  { %5555 = vmatprep.subr.bf16.mxu0 %v9232_v54 }
 0x8c5   :  { %5557 = vmatpush1.bf16.msra.mxu0 %v9233_v1  ;;  %v9237_v1 = vld [vmem:[#allocation31_spill] sm:$0xff] }
 0x8c6   :  { %5623 = vmatprep.subr.bf16.mxu0 %v9234_v48  ;;  %v9235_v48 = vld [vmem:[#allocation29_spill] sm:$0xff] }
 0x97b   :  { %v1183_v11 = vpop.f32.mrb[10].mxu0 }
 0x97c   :  { %v4868_v8 = vpop.f32.mrb[11].mxu0  ;;  %v1187_v6 = vsel %vm364_vm1, %v1183_v11, -inf }
 0x97d   :  { %1188 = vmax.xlane.f32.xlu1 %v1187_v6  ;;  %v9236_v8 = vld [vmem:[#allocation30_spill] sm:$0xff]  ;;  %v9238_v6 = vld [vmem:[#allocation32_spill] sm:$0xff] }
 0xa0a   :  { %v1189_v38 = vpop.xlane.xlu1 %1188 }
 0xa0b   :  { %v1190_v14 = vsub.f32 %v1183_v11, %v1189_v38  ;;  %v9239_v11 = vld [vmem:[#allocation33_spill] sm:$0xff]  ;;  %v9240_v38 = vld [vmem:[#allocation34_spill] sm:$0xff] }
 0xa0d   :  { %v1191_v42 = vmul.f32 1.442695, %v1190_v14  ;;  %v9241_v14 = vld [vmem:[#allocation35_spill] sm:$0xff] }
 0xa0f   :  { %6570 = vpow2.f32 %v1191_v42  ;;  %v9247_v42 = vld [vmem:[#allocation41_spill] sm:$0xff] }
 0xa19   :  { %v6571_v19 = vpop.eup %6570 }
 0xa1a   :  { %v1193_v40 = vsel %vm364_vm1, %v6571_v19, 0.0 }
 0xa1b   :  { %1194 = vadd.xlane.f32.xlu0 %v1193_v40  ;;  %v9242_v40 = vld [vmem:[#allocation36_spill] sm:$0xff] }
 0xaa8   :  { %v1195_v23 = vpop.xlane.xlu0 %1194 }
 0xaa9   :  { %6572 = vrcp.f32 %v1195_v23  ;;  %v9243_v23 = vld [vmem:[#allocation37_spill] sm:$0xff] }
 0xab3   :  { %v6573_v54 = vpop.eup %6572 }
 0xab4   :  { %v1197_v61 = vmul.f32 %v6573_v54, %v6571_v19  ;;  %v9244_v19 = vld [vmem:[#allocation38_spill] sm:$0xff]  ;;  %v9246_v54 = vld [vmem:[#allocation40_spill] sm:$0xff] }
 0xab6   :  { %4872 = vmatmul.mubr.msk.f32.vlgmr.msra.gmra.mrb[8].mxu1 %vm376_vm2, %v1197_v61  ;;  %v9245_v61 = vld [vmem:[#allocation39_spill] sm:$0xff] }
 0xab7   :  { %5497 = vmatpush3.bf16.msra.mxu1 %v9235_v48 }
 0xab8   :  { %5499 = vmatprep.subr.bf16.mxu1 %v9236_v8 }
 0xabb   :  { %5501 = vmatpush3.bf16.msra.mxu1 %v9237_v1  ;;  %v9248_v1 = vld [vmem:[#allocation42_spill] sm:$0xff] }
 0xabc   :  { %5503 = vmatprep.subr.bf16.mxu1 %v9238_v6  ;;  %v9249_v6 = vld [vmem:[#allocation43_spill] sm:$0xff] }
 0xabf   :  { %5505 = vmatpush3.bf16.msra.mxu1 %v9239_v11  ;;  %v9250_v11 = vld [vmem:[#allocation62_spill] sm:$0xff] }
 0xac0   :  { %5507 = vmatprep.subr.bf16.mxu1 %v9240_v38 }
 0xac3   :  { %5509 = vmatpush3.bf16.msra.mxu1 %v9241_v14 }
 0xac4   :  { %5511 = vmatprep.subr.bf16.mxu1 %v9242_v40  ;;  %v9261_v40 = vld [vmem:[#allocation78_spill] sm:$0xff] }
 0xac7   :  { %5513 = vmatpush3.bf16.msra.mxu1 %v9243_v23  ;;  %v9251_v23 = vld [vmem:[#allocation63_spill] sm:$0xff] }
 0xac8   :  { %5515 = vmatprep.subr.bf16.mxu1 %v9244_v19  ;;  %v9252_v19 = vld [vmem:[#allocation64_spill] sm:$0xff] }
 0xacb   :  { %5517 = vmatpush3.bf16.msra.mxu1 %v9245_v61  ;;  %v9253_v61 = vld [vmem:[#allocation65_spill] sm:$0xff] }
 0xacc   :  { %5519 = vmatprep.subr.bf16.mxu1 %v9246_v54  ;;  %v9254_v54 = vld [vmem:[#allocation66_spill] sm:$0xff] }
 0xacf   :  { %5521 = vmatpush3.bf16.msra.mxu1 %v9247_v42  ;;  %v9255_v42 = vld [vmem:[#allocation67_spill] sm:$0xff] }
 0xad0   :  { %5523 = vmatprep.subr.bf16.mxu1 %v9248_v1  ;;  %v9256_v1 = vld [vmem:[#allocation68_spill] sm:$0xff] }
 0xad3   :  { %5525 = vmatpush3.bf16.msra.mxu1 %v9249_v6  ;;  %v9257_v6 = vld [vmem:[#allocation69_spill] sm:$0xff] }
 0xad4   :  { %5559 = vmatprep.subr.bf16.mxu1 %v9250_v11  ;;  %v9258_v11 = vld [vmem:[#allocation71_spill] sm:$0xff] }
 0xb89   :  { %v1267_v38 = vpop.f32.mrb[8].mxu1 }
 0xb8a   :  { %v4873_v14 = vpop.f32.mrb[9].mxu1  ;;  %1335 = vmatprep.mubr.f32.mxu1 %v1267_v38  ;;  %v9260_v38 = vld [vmem:[#allocation76_spill] sm:$0xff] }
 0xb8b   :  { %1336 = vmatmul.mubr.f32.vlgmr.msra.gmra.mrb[10].mxu1 %v7999_v34  ;;  %v9259_v14 = vld [vmem:[#allocation74_spill] sm:$0xff] }
 0xb8c   :  { %5561 = vmatpush1.bf16.msra.mxu1 %v9251_v23  ;;  %v9262_v23 = vld [vmem:[#allocation80_spill] sm:$0xff] }
 0xb8d   :  { %5563 = vmatprep.subr.bf16.mxu1 %v9252_v19  ;;  %v9263_v19 = vld [vmem:[#allocation82_spill] sm:$0xff] }
 0xb90   :  { %5565 = vmatpush1.bf16.msra.mxu1 %v9253_v61  ;;  %v9264_v61 = vld [vmem:[#allocation84_spill] sm:$0xff] }
 0xb91   :  { %5567 = vmatprep.subr.bf16.mxu1 %v9254_v54 }
 0xb94   :  { %5569 = vmatpush1.bf16.msra.mxu1 %v9255_v42 }
 0xb95   :  { %5571 = vmatprep.subr.bf16.mxu1 %v9256_v1 }
 0xb98   :  { %5573 = vmatpush1.bf16.msra.mxu1 %v9257_v6 }
 0xb99   :  { %5575 = vmatprep.subr.bf16.mxu1 %v9258_v11 }
 0xb9c   :  { %5577 = vmatpush1.bf16.msra.mxu1 %v9259_v14 }
 0xb9d   :  { %5579 = vmatprep.subr.bf16.mxu1 %v9260_v38  ;;  %v9265_v38 = vld [vmem:[#allocation97_spill] sm:$0xff] }
 0xba0   :  { %5581 = vmatpush1.bf16.msra.mxu1 %v9261_v40  ;;  %v9266_v40 = vld [vmem:[#allocation98_spill] sm:$0xff] }
 0xba1   :  { %5583 = vmatprep.subr.bf16.mxu1 %v9262_v23  ;;  %v9267_v23 = vld [vmem:[#allocation99_spill] sm:$0xff] }
 0xba4   :  { %5585 = vmatpush1.bf16.msra.mxu1 %v9263_v19  ;;  %v9268_v19 = vld [vmem:[#allocation100_spill] sm:$0xff] }
 0xba5   :  { %5587 = vmatprep.subr.bf16.mxu1 %v9264_v61  ;;  %v9269_v61 = vld [vmem:[#allocation101_spill] sm:$0xff] }
 0xba8   :  { %5589 = vmatpush1.bf16.msra.mxu1 %v7727_v30  ;;  %v9270_v30 = vld [vmem:[#allocation102_spill] sm:$0xff] }
 0xba9   :  { %5591 = vmatprep.subr.bf16.mxu1 %v7739_v56  ;;  %v9271_v56 = vld [vmem:[#allocation103_spill] sm:$0xff] }
 0xbac   :  { %5593 = vmatpush1.bf16.msra.mxu1 %v7763_v44  ;;  %v9272_v44 = vld [vmem:[#allocation104_spill] sm:$0xff] }
 0xbad   :  { %5595 = vmatprep.subr.bf16.mxu1 %v7772_v24  ;;  %v9273_v24 = vld [vmem:[#allocation105_spill] sm:$0xff] }
 0xbb0   :  { %5597 = vmatpush1.bf16.msra.mxu1 %v7793_v5 }
 0xbb1   :  { %5599 = vmatprep.subr.bf16.mxu1 %v7799_v39 }
 0xbb4   :  { %5601 = vmatpush1.bf16.msra.mxu1 %v9265_v38 }
 0xbb5   :  { %5603 = vmatprep.subr.bf16.mxu1 %v9266_v40 }
 0xbb8   :  { %5605 = vmatpush1.bf16.msra.mxu1 %v9267_v23 }
 0xbb9   :  { %5607 = vmatprep.subr.bf16.mxu1 %v9268_v19  ;;  %v9274_v19 = vld [vmem:[#allocation56_spill] sm:$0xff] }
 0xbbc   :  { %5609 = vmatpush1.bf16.msra.mxu1 %v9269_v61 }
 0xbbd   :  { %5611 = vmatprep.subr.bf16.mxu1 %v9270_v30  ;;  %v9275_v30 = vld [vmem:[#allocation72_spill] sm:$0xff] }
 0xbc0   :  { %5613 = vmatpush1.bf16.msra.mxu1 %v9271_v56  ;;  %v9276_v56 = vld [vmem:[#allocation73_spill] sm:$0xff] }
 0xbc1   :  { %5615 = vmatprep.subr.bf16.mxu1 %v9272_v44  ;;  %v9277_v44 = vld [vmem:[#allocation75_spill] sm:$0xff] }
 0xbc4   :  { %5617 = vmatpush1.bf16.msra.mxu1 %v9273_v24  ;;  %v9278_v24 = vld [vmem:[#allocation77_spill] sm:$0xff] }
 0xbc5   :  { %5619 = vmatprep.subr.bf16.mxu1 %v7897_v0  ;;  %v9279_v0 = vld [vmem:[#allocation79_spill] sm:$0xff] }
 0xbc8   :  { %5621 = vmatpush1.bf16.msra.mxu1 %v7910_v18  ;;  %v9280_v18 = vld [vmem:[#allocation81_spill] sm:$0xff] }
 0xbc9   :  { %5655 = vmatprep.subr.bf16.mxu1 %v6803_v3  ;;  %v9281_v3 = vld [vmem:[#allocation83_spill] sm:$0xff] }
 0xc5e   :  { %v4297_v40 = vpop.f32.mrb[10].mxu1 }
 0xc5f   :  { %v4298_v23 = vpop.f32.mrb[11].mxu1 }
 0xc60   :  { %v4299_v38 = vadd.f32 %v4298_v23, %v4297_v40  ;;  %v9282_v40 = vld [vmem:[#allocation85_spill] sm:$0xff]  ;;  %v9283_v23 = vld [vmem:[#allocation87_spill] sm:$0xff] }
 0xc62   :  { %v1338_v39 = vadd.f32 %v4299_v38, %v9274_v19  ;;  %v9285_v19 = vld [vmem:[#allocation91_spill] sm:$0xff] }
 0xc63   :  { %v9287_v38 = vld [vmem:[#allocation95_spill] sm:$0xff] }
 0xc64   :  { %6574 = vtanh.f32 %v1338_v39  ;;  %v9284_v39 = vld [vmem:[#allocation89_spill] sm:$0xff] }
 0xc6e   :  { %v6575_v61 = vpop.eup %6574 }
 0xc6f   :  { %1407 = vmatmul.mubr.f32.vlgmr.msra.gmra.mrb[12].mxu0 %v6575_v61  ;;  %v9286_v61 = vld [vmem:[#allocation93_spill] sm:$0xff] }
 0xc70   :  { %5625 = vmatpush3.bf16.msra.mxu0 %v9275_v30 }
 0xc71   :  { %5627 = vmatprep.subr.bf16.mxu0 %v9276_v56 }
 0xc74   :  { %5629 = vmatpush3.bf16.msra.mxu0 %v9277_v44 }
 0xc75   :  { %5631 = vmatprep.subr.bf16.mxu0 %v9278_v24 }
 0xc78   :  { %5633 = vmatpush3.bf16.msra.mxu0 %v9279_v0 }
 0xc79   :  { %5635 = vmatprep.subr.bf16.mxu0 %v9280_v18 }
 0xc7c   :  { %5637 = vmatpush3.bf16.msra.mxu0 %v9281_v3  ;;  %v9288_v3 = vld [vmem:[#allocation57_spill] sm:$0xff] }
 0xc7d   :  { %5639 = vmatprep.subr.bf16.mxu0 %v9282_v40 }
 0xc80   :  { %5641 = vmatpush3.bf16.msra.mxu0 %v9283_v23  ;;  %v9290_v23 = vld [vmem:[#allocation58_spill] sm:$0xff] }
 0xc81   :  { %5643 = vmatprep.subr.bf16.mxu0 %v9284_v39 }
 0xc84   :  { %5645 = vmatpush3.bf16.msra.mxu0 %v9285_v19 }
 0xc85   :  { %5647 = vmatprep.subr.bf16.mxu0 %v9286_v61 }
 0xc88   :  { %5649 = vmatpush3.bf16.msra.mxu0 %v9287_v38 }
 0xc89   :  { %5651 = vmatprep.subr.bf16.mxu0 %v7908_v57 }
 0xc8c   :  { %5653 = vmatpush3.bf16.msra.mxu0 %v7919_v13 }
 0xc8d   :  { %5686 = vmatprep.subr.bf16.mxu0 %v9221_v35 }
 0xd42   :  { %v1408_v18 = vpop.f32.mrb[12].mxu0 }
 0xd43   :  { %v8089_v0 = vadd.f32 %v1408_v18, %v9288_v3  ;;  %v1410_v40 = vpop.f32.mrb[13].mxu0 }
 0xd44   :  { %v8092_v24 = vadd.f32 %v1410_v40, %v9290_v23 }
 0xd45   :  { %9289 = vst [vmem:[#allocation45_spill] sm:$0xff] %v8089_v0  ;;  %v1413_v19 = vsel %vm669_vm3, %v8089_v0, -inf }
 0xd46   :  { %9291 = vst [vmem:[#allocation46_spill] sm:$0xff] %v8092_v24  ;;  %v1414_v38 = vsel %vm669_vm3, %v8092_v24, -inf }
 0xd47   :  { %v1415_v61 = vmax.f32 %v1413_v19, %v1414_v38 }
 0xd49   :  { %1416 = vmax.xlane.f32.xlu1 %v1415_v61 }
 0xdd6   :  { %v8098_v57 = vpop.xlane.xlu1 %1416 }
 0xdd7   :  { %9292 = vst [vmem:[#allocation47_spill] sm:$0xff] %v8098_v57  ;;  %vm1430_vm10 = vcmp.eq.f32.partialorder %v8089_v0, %v8098_v57  ;;  %vm1431_vm11 = vcmp.eq.f32.partialorder %v8092_v24, %v8098_v57 }
 0xdd8   :  { %v1432_v18 = vsel %vm1430_vm10, %v7469_v26, 256  ;;  %v1433_v40 = vsel %vm1431_vm11, %v7472_v27, 256  ;;  %vm2099_vm10 = vcmp.eq.s32.totalorder %v7469_v26, 2 }
 0xdd9   :  { %v1434_v23 = vsel %vm669_vm3, %v1432_v18, 2147483647  ;;  %v1435_v3 = vsel %vm669_vm3, %v1433_v40, 2147483647  ;;  %v9302_v40 = vld [vmem:[#allocation25_spill] sm:$0xff] }
 0xdda   :  { %vm1436_vm12 = vcmp.lt.s32.totalorder %v1434_v23, %v1435_v3 }
 0xddb   :  { %v1437_v13 = vsel %vm1436_vm12, %v1434_v23, %v1435_v3  ;;  %v710_v3 = vsel %vm709_vm14, %v7926_v32, 0  ;;  %v9298_v32 = vld [vmem:[#allocation21_spill] sm:$0xff]  ;;  %v9300_v23 = vld [vmem:[#allocation23_spill] sm:$0xff] }
 0xddc   :  { %v1439_v19 = vshra.s32 %v1437_v13, 16  ;;  %v1438_v38 = vand.u32 65535, %v1437_v13 }
 0xdde   :  { %v1441_v61 = vcvt.s32.f32 %v1439_v19  ;;  %v1440_v44 = vcvt.s32.f32 %v1438_v38  ;;  %v9303_v19 = vld [vmem:[#allocation26_spill] sm:$0xff] }
 0xde0   :  { %1442 = vmin.xlane.f32.xlu0 %v1441_v61 }
 0xe6d   :  { %v1443_v39 = vpop.xlane.xlu0 %1442 }
 0xe6e   :  { %vm1444_vm13 = vcmp.eq.f32.partialorder %v1441_v61, %v1443_v39  ;;  %v1449_v24 = vcvt.f32.s32 %v1443_v39  ;;  %v9301_v39 = vld [vmem:[#allocation24_spill] sm:$0xff] }
 0xe6f   :  { %v1445_v0 = vsel %vm1444_vm13, %v1440_v44, inf  ;;  %v9293_v44 = vmov 1.0   ;;  %v9304_v61 = vld [vmem:[#allocation44_spill] sm:$0xff] }
 0xe70   :  { %1446 = vmin.xlane.f32.xlu1 %v1445_v0  ;;  %v1450_v56 = vshll.u32 %v1449_v24, 16  ;;  %v8167_v24 = vld [vmem:[%s8870_s1] sm:$0xff] }
 0xe71   :  { %9295 = vst [vmem:[#allocation48_spill] sm:$0xff] %v8167_v24  ;;  %v9297_v0 = vld [vmem:[#allocation20_spill] sm:$0xff] }
 0xefd   :  { %v1447_v57 = vpop.xlane.xlu1 %1446 }
 0xefe   :  { %v1448_v30 = vcvt.f32.s32 %v1447_v57  ;;  %v9299_v57 = vld [vmem:[#allocation22_spill] sm:$0xff] }
 0xf00   :  { %v1451_v18 = vadd.s32 %v1450_v56, %v1448_v30  ;;  %v9294_v56 = vld [vmem:[#allocation19_spill] sm:$0xff]  ;;  %v9296_v30 = vld [vmem:[#allocation28_spill] sm:$0xff] }
 0xf02   :  { %v8115_v13 = vsel %vm1452_vm15, %v1451_v18, %v710_v3  ;;  %vm1456_vm4 = vcmp.eq.s32.totalorder %v7472_v27, %v1451_v18  ;;  %vm1455_vm5 = vcmp.eq.s32.totalorder %v7469_v26, %v1451_v18 }
 0xf03   :  { %4089 = vmatprep.mubr.msk.f32.mxu1 %vm1456_vm4, %v9293_v44  ;;  %4091 = vmatprep.mubr.msk.f32.mxu0 %vm1456_vm4, %v9293_v44 }
 0xf04   :  { %4090 = vmatmul.mubr.msk.f32.vlgmr.msra.gmra.mrb[12].mxu1 %vm1455_vm5, %v9293_v44  ;;  %4092 = vmatmul.mubr.msk.f32.vlgmr.msra.gmra.mrb[14].mxu0 %vm1455_vm5, %v9293_v44 }
 0xf05   :  { %5657 = vmatpush1.bf16.msra.mxu1 %v6816_v9  ;;  %5688 = vmatpush3.bf16.msra.mxu0 %v6877_v29 }
 0xf06   :  { %5659 = vmatprep.subr.bf16.mxu1 %v6818_v10  ;;  %5689 = vmatprep.subr.bf16.mxu0 %v9221_v35 }
 0xf07   :  { %1666 = vmatprep.mubr.f32.mxu1 %v9222_v49  ;;  %4906 = vmatprep.mubr.msk.f32.mxu0 %vm6730_vm0, %v9222_v49 }
 0xf09   :  { %5661 = vmatpush1.bf16.msra.mxu1 %v6836_v15  ;;  %5691 = vmatpush3.bf16.msra.mxu0 %v6901_v37 }
 0xf0a   :  { %5663 = vmatprep.subr.bf16.mxu1 %v6839_v16  ;;  %5692 = vmatprep.subr.bf16.mxu0 %v9221_v35 }
 0xf0d   :  { %5665 = vmatpush1.bf16.msra.mxu1 %v6854_v21  ;;  %5694 = vmatpush3.bf16.msra.mxu0 %v6929_v46 }
 0xf0e   :  { %5667 = vmatprep.subr.bf16.mxu1 %v6857_v22  ;;  %5695 = vmatprep.subr.bf16.mxu0 %v9221_v35 }
 0xf11   :  { %5669 = vmatpush1.bf16.msra.mxu1 %v6883_v31  ;;  %5697 = vmatpush3.bf16.msra.mxu0 %v6957_v55 }
 0xf12   :  { %5671 = vmatprep.subr.bf16.mxu1 %v6889_v33  ;;  %5698 = vmatprep.subr.bf16.mxu0 %v9221_v35 }
 0xf15   :  { %5673 = vmatpush1.bf16.msra.mxu1 %v6914_v41  ;;  %5700 = vmatpush3.bf16.msra.mxu0 %v6982_v63 }
 0xf16   :  { %5675 = vmatprep.subr.bf16.mxu1 %v6920_v43  ;;  %5701 = vmatprep.subr.bf16.mxu0 %v9221_v35 }
 0xf19   :  { %5677 = vmatpush1.bf16.msra.mxu1 %v6942_v50  ;;  %5703 = vmatpush3.bf16.msra.mxu0 %v6996_v4 }
 0xf1a   :  { %5679 = vmatprep.subr.bf16.mxu1 %v6945_v51  ;;  %5704 = vmatprep.subr.bf16.mxu0 %v9221_v35 }
 0xf1d   :  { %5681 = vmatpush1.bf16.msra.mxu1 %v6970_v59  ;;  %5706 = vmatpush3.bf16.msra.mxu0 %v7012_v12 }
 0xf1e   :  { %5683 = vmatprep.subr.bf16.mxu1 %v6973_v60  ;;  %5707 = vmatprep.subr.bf16.mxu0 %v9221_v35 }
 0xf21   :  { %5685 = vmatpush1.bf16.msra.mxu1 %v6992_v2  ;;  %5709 = vmatpush3.bf16.msra.mxu0 %v7026_v17 }
 0xf22   :  { %5710 = vmatprep.subr.bf16.mxu0 %v9221_v35  ;;  %4944 = vmatprep.subr.mxu1 %v9222_v49 }
 0xf24   :  { %1667 = vmatmul.mubr.f32.vlgmr.msra.gmra.mrb[12].mxu1 %v7999_v34  ;;  %4907 = vmatmul.mubr.f32.vlgmr.msra.gmra.mrb[16].mxu0 %v7999_v34 }
 0xf25   :  { %5712 = vmatpush3.bf16.msra.mxu0 %v9294_v56  ;;  %4941 = vmatprep.mubr.msk.f32.mxu0 %vm6730_vm0, %v9222_v49 }
 0xf26   :  { %5713 = vmatprep.subr.bf16.mxu0 %v9221_v35  ;;  %4945 = vmatpush3.msra.mxu1 %v8167_v24 }
 0xf27   :  { %4946 = vmatprep.mubr.msk.f32.mxu1 %vm6730_vm0, %v9222_v49  ;;  %5735 = vmatprep.subr.bf16.mxu1 %v9296_v30 }
 0xf29   :  { %5715 = vmatpush3.bf16.msra.mxu0 %v9297_v0 }
 0xf2a   :  { %5716 = vmatprep.subr.bf16.mxu0 %v9221_v35 }
 0xf2d   :  { %5718 = vmatpush3.bf16.msra.mxu0 %v9298_v32 }
 0xf2e   :  { %5719 = vmatprep.subr.bf16.mxu0 %v9221_v35 }
 0xf31   :  { %5721 = vmatpush3.bf16.msra.mxu0 %v9299_v57 }
 0xf32   :  { %5722 = vmatprep.subr.bf16.mxu0 %v9221_v35 }
 0xf35   :  { %5724 = vmatpush3.bf16.msra.mxu0 %v9300_v23  ;;  %v9305_v23 = vld [vmem:[#allocation27_spill] sm:$0xff] }
 0xf36   :  { %5725 = vmatprep.subr.bf16.mxu0 %v9221_v35 }
 0xf39   :  { %5727 = vmatpush3.bf16.msra.mxu0 %v9301_v39 }
 0xf3a   :  { %5728 = vmatprep.subr.bf16.mxu0 %v9221_v35 }
 0xf3d   :  { %5730 = vmatpush3.bf16.msra.mxu0 %v9302_v40 }
 0xf3e   :  { %5731 = vmatprep.subr.bf16.mxu0 %v9221_v35 }
 0xf41   :  { %5733 = vmatpush3.bf16.msra.mxu0 %v9303_v19 }
 0xf42   :  { %5767 = vmatprep.subr.bf16.mxu0 %v9304_v61 }
 0xfd7   :  { %v4332_v38 = vpop.f32.mrb[14].mxu0 }
 0xfd8   :  { %v4333_v18 = vpop.f32.mrb[15].mxu0 }
 0xfd9   :  { %v4334_v3 = vadd.f32 %v4333_v18, %v4332_v38 }
 0xff7   :  { %v1668_v57 = vpop.f32.mrb[12].mxu1  ;;  %v1739_v32 = vpop.f32.mrb[16].mxu0 }
 0xff8   :  { %v1669_v0 = vadd.f32 %v1668_v57, %v9305_v23  ;;  %v1670_v30 = vpop.f32.mrb[13].mxu1  ;;  %v4908_v24 = vpop.f32.mrb[17].mxu0  ;;  %v1740_v60 = vadd.f32 %v1739_v32, %v7135_v36  ;;  %v9311_v32 = vld [vmem:[#allocation55_spill] sm:$0xff] }
 0xff9   :  { %v1671_v56 = vadd.f32 %v1670_v30, %v7127_v62 }
 0xffa   :  { %v4093_v39 = vmul.f32 -1.442695, %v1669_v0 }
 0xffb   :  { %v4094_v40 = vmul.f32 -1.442695, %v1671_v56 }
 0xffc   :  { %6576 = vpow2.f32 %v4093_v39 }
 0xffd   :  { %6578 = vpow2.f32 %v4094_v40 }
0x1006   :  { %v6577_v17 = vpop.eup %6576 }
0x1007   :  { %v1747_v2 = vadd.f32 1.0, %v6577_v17  ;;  %v6579_v19 = vpop.eup %6578  ;;  %v9309_v17 = vld [vmem:[#allocation53_spill] sm:$0xff] }
0x1008   :  { %v1754_v61 = vadd.f32 1.0, %v6579_v19 }
0x1009   :  { %6580 = vrcp.f32 %v1747_v2  ;;  %v9307_v2 = vld [vmem:[#allocation51_spill] sm:$0xff] }
0x100a   :  { %6582 = vrcp.f32 %v1754_v61 }
0x1013   :  { %v6581_v38 = vpop.eup %6580 }
0x1014   :  { %v1757_v18 = vmul.f32 %v6581_v38, %v1740_v60  ;;  %v6583_v57 = vpop.eup %6582  ;;  %v9306_v60 = vld [vmem:[#allocation50_spill] sm:$0xff] }
0x1015   :  { %v1760_v24 = vsub.f32 1.0, %v6583_v57  ;;  %v1762_v30 = vmul.f32 %v6583_v57, %v7999_v34  ;;  %v9310_v34 = vld [vmem:[#allocation54_spill] sm:$0xff] }
0x1016   :  { %v1758_v12 = vadd.f32 %v4334_v3, %v1757_v18 }
0x1018   :  { %6584 = vtanh.f32 %v1758_v12  ;;  %v9308_v12 = vld [vmem:[#allocation52_spill] sm:$0xff] }
0x1022   :  { %v6585_v0 = vpop.eup %6584 }
0x1023   :  { %v1761_v23 = vmul.f32 %v6585_v0, %v1760_v24 }
0x1025   :  { %v8191_v56 = vadd.f32 %v1762_v30, %v1761_v23  ;;  %v9312_v23 = vld [vmem:[#allocation70_spill] sm:$0xff] }
0x1027   :  { %4942 = vmatmul.mubr.f32.vlgmr.msra.gmra.mrb[18].mxu0 %v8191_v56 }
0x1028   :  { %5769 = vmatpush1.bf16.msra.mxu0 %v7316_v53  ;;  %2053 = vmatprep.mubr.f32.mxu0 %v9222_v49 }
0x1029   :  { %5771 = vmatprep.subr.bf16.mxu0 %v7318_v58 }
0x102c   :  { %5773 = vmatpush1.bf16.msra.mxu0 %v7334_v7 }
0x102d   :  { %5775 = vmatprep.subr.bf16.mxu0 %v7337_v45 }
0x1030   :  { %5777 = vmatpush1.bf16.msra.mxu0 %v9223_v20 }
0x1031   :  { %5779 = vmatprep.subr.bf16.mxu0 %v9224_v25 }
0x1034   :  { %5781 = vmatpush1.bf16.msra.mxu0 %v9225_v28 }
0x1035   :  { %5783 = vmatprep.subr.bf16.mxu0 %v9226_v47 }
0x1038   :  { %5785 = vmatpush1.bf16.msra.mxu0 %v9227_v52 }
0x1039   :  { %5787 = vmatprep.subr.bf16.mxu0 %v9306_v60 }
0x103c   :  { %5789 = vmatpush1.bf16.msra.mxu0 %v9307_v2 }
0x103d   :  { %5791 = vmatprep.subr.bf16.mxu0 %v9308_v12 }
0x1040   :  { %5793 = vmatpush1.bf16.msra.mxu0 %v9309_v17 }
0x1041   :  { %5795 = vmatprep.subr.bf16.mxu0 %v9310_v34 }
0x1044   :  { %5797 = vmatpush1.bf16.msra.mxu0 %v9311_v32 }
0x1045   :  { %5863 = vmatprep.subr.bf16.mxu0 %v9312_v23 }
0x10fa   :  { %v1830_v39 = vpop.f32.mrb[18].mxu0 }
0x10fb   :  { %v4943_v40 = vpop.f32.mrb[19].mxu0  ;;  %v1834_v19 = vsel %vm364_vm1, %v1830_v39, -inf }
0x10fc   :  { %1835 = vmax.xlane.f32.xlu0 %v1834_v19  ;;  %v9313_v40 = vld [vmem:[#allocation31_spill] sm:$0xff]  ;;  %v9314_v19 = vld [vmem:[#allocation32_spill] sm:$0xff] }
0x1189   :  { %v1836_v61 = vpop.xlane.xlu0 %1835 }
0x118a   :  { %v1837_v3 = vsub.f32 %v1830_v39, %v1836_v61  ;;  %v9315_v39 = vld [vmem:[#allocation33_spill] sm:$0xff]  ;;  %v9316_v61 = vld [vmem:[#allocation34_spill] sm:$0xff] }
0x118c   :  { %v1838_v38 = vmul.f32 1.442695, %v1837_v3  ;;  %v9317_v3 = vld [vmem:[#allocation35_spill] sm:$0xff] }
0x118e   :  { %6586 = vpow2.f32 %v1838_v38  ;;  %v9318_v38 = vld [vmem:[#allocation36_spill] sm:$0xff] }
0x1198   :  { %v6587_v18 = vpop.eup %6586 }
0x1199   :  { %v1840_v57 = vsel %vm364_vm1, %v6587_v18, 0.0 }
0x119a   :  { %1841 = vadd.xlane.f32.xlu1 %v1840_v57  ;;  %v9319_v57 = vld [vmem:[#allocation37_spill] sm:$0xff] }
0x1227   :  { %v1842_v24 = vpop.xlane.xlu1 %1841 }
0x1228   :  { %6588 = vrcp.f32 %v1842_v24  ;;  %v9321_v24 = vld [vmem:[#allocation39_spill] sm:$0xff] }
0x1232   :  { %v6589_v0 = vpop.eup %6588 }
0x1233   :  { %v1844_v30 = vmul.f32 %v6589_v0, %v6587_v18  ;;  %v9320_v18 = vld [vmem:[#allocation38_spill] sm:$0xff]  ;;  %v9322_v0 = vld [vmem:[#allocation40_spill] sm:$0xff] }
0x1235   :  { %4947 = vmatmul.mubr.msk.f32.vlgmr.msra.gmra.mrb[14].mxu1 %vm376_vm2, %v1844_v30  ;;  %v9323_v30 = vld [vmem:[#allocation41_spill] sm:$0xff] }
0x1236   :  { %5737 = vmatpush3.bf16.msra.mxu1 %v9235_v48 }
0x1237   :  { %5739 = vmatprep.subr.bf16.mxu1 %v9236_v8 }
0x123a   :  { %5741 = vmatpush3.bf16.msra.mxu1 %v9313_v40  ;;  %v9324_v40 = vld [vmem:[#allocation42_spill] sm:$0xff] }
0x123b   :  { %5743 = vmatprep.subr.bf16.mxu1 %v9314_v19  ;;  %v9325_v19 = vld [vmem:[#allocation43_spill] sm:$0xff] }
0x123e   :  { %5745 = vmatpush3.bf16.msra.mxu1 %v9315_v39  ;;  %v9326_v39 = vld [vmem:[#allocation62_spill] sm:$0xff] }
0x123f   :  { %5747 = vmatprep.subr.bf16.mxu1 %v9316_v61 }
0x1242   :  { %5749 = vmatpush3.bf16.msra.mxu1 %v9317_v3 }
0x1243   :  { %5751 = vmatprep.subr.bf16.mxu1 %v9318_v38 }
0x1246   :  { %5753 = vmatpush3.bf16.msra.mxu1 %v9319_v57  ;;  %v9327_v57 = vld [vmem:[#allocation63_spill] sm:$0xff] }
0x1247   :  { %5755 = vmatprep.subr.bf16.mxu1 %v9320_v18  ;;  %v9328_v18 = vld [vmem:[#allocation64_spill] sm:$0xff] }
0x124a   :  { %5757 = vmatpush3.bf16.msra.mxu1 %v9321_v24  ;;  %v9329_v24 = vld [vmem:[#allocation65_spill] sm:$0xff] }
0x124b   :  { %5759 = vmatprep.subr.bf16.mxu1 %v9322_v0 }
0x124e   :  { %5761 = vmatpush3.bf16.msra.mxu1 %v9323_v30 }
0x124f   :  { %5763 = vmatprep.subr.bf16.mxu1 %v9324_v40 }
0x1252   :  { %5765 = vmatpush3.bf16.msra.mxu1 %v9325_v19 }
0x1253   :  { %5799 = vmatprep.subr.bf16.mxu1 %v9326_v39 }
0x1308   :  { %v1914_v61 = vpop.f32.mrb[14].mxu1 }
0x1309   :  { %v4948_v3 = vpop.f32.mrb[15].mxu1  ;;  %1982 = vmatprep.mubr.f32.mxu1 %v1914_v61  ;;  %v9330_v61 = vld [vmem:[#allocation76_spill] sm:$0xff] }
0x130a   :  { %1983 = vmatmul.mubr.f32.vlgmr.msra.gmra.mrb[16].mxu1 %v8191_v56  ;;  %v9331_v3 = vld [vmem:[#allocation78_spill] sm:$0xff] }
0x130b   :  { %5801 = vmatpush1.bf16.msra.mxu1 %v9327_v57  ;;  %v9332_v57 = vld [vmem:[#allocation80_spill] sm:$0xff] }
0x130c   :  { %5803 = vmatprep.subr.bf16.mxu1 %v9328_v18  ;;  %v9333_v18 = vld [vmem:[#allocation82_spill] sm:$0xff] }
0x130f   :  { %5805 = vmatpush1.bf16.msra.mxu1 %v9329_v24  ;;  %v9334_v24 = vld [vmem:[#allocation84_spill] sm:$0xff] }
0x1310   :  { %5807 = vmatprep.subr.bf16.mxu1 %v9254_v54  ;;  %v9335_v54 = vld [vmem:[#allocation86_spill] sm:$0xff] }
0x1313   :  { %5809 = vmatpush1.bf16.msra.mxu1 %v9255_v42  ;;  %v9336_v42 = vld [vmem:[#allocation88_spill] sm:$0xff] }
0x1314   :  { %5811 = vmatprep.subr.bf16.mxu1 %v9256_v1  ;;  %v9337_v1 = vld [vmem:[#allocation90_spill] sm:$0xff] }
0x1317   :  { %5813 = vmatpush1.bf16.msra.mxu1 %v9257_v6  ;;  %v9338_v6 = vld [vmem:[#allocation92_spill] sm:$0xff] }
0x1318   :  { %5815 = vmatprep.subr.bf16.mxu1 %v9258_v11 }
0x131b   :  { %5817 = vmatpush1.bf16.msra.mxu1 %v9259_v14  ;;  %v9339_v14 = vld [vmem:[#allocation96_spill] sm:$0xff] }
0x131c   :  { %5819 = vmatprep.subr.bf16.mxu1 %v9330_v61  ;;  %v9340_v61 = vld [vmem:[#allocation97_spill] sm:$0xff] }
0x131f   :  { %5821 = vmatpush1.bf16.msra.mxu1 %v9331_v3  ;;  %v9341_v3 = vld [vmem:[#allocation98_spill] sm:$0xff] }
0x1320   :  { %5823 = vmatprep.subr.bf16.mxu1 %v9332_v57  ;;  %v9342_v57 = vld [vmem:[#allocation99_spill] sm:$0xff] }
0x1323   :  { %5825 = vmatpush1.bf16.msra.mxu1 %v9333_v18  ;;  %v9343_v18 = vld [vmem:[#allocation100_spill] sm:$0xff] }
0x1324   :  { %5827 = vmatprep.subr.bf16.mxu1 %v9334_v24  ;;  %v9344_v24 = vld [vmem:[#allocation101_spill] sm:$0xff] }
0x1327   :  { %5829 = vmatpush1.bf16.msra.mxu1 %v9335_v54  ;;  %v9345_v54 = vld [vmem:[#allocation102_spill] sm:$0xff] }
0x1328   :  { %5831 = vmatprep.subr.bf16.mxu1 %v9336_v42  ;;  %v9346_v42 = vld [vmem:[#allocation103_spill] sm:$0xff] }
0x132b   :  { %5833 = vmatpush1.bf16.msra.mxu1 %v9337_v1  ;;  %v9347_v1 = vld [vmem:[#allocation104_spill] sm:$0xff] }
0x132c   :  { %5835 = vmatprep.subr.bf16.mxu1 %v9338_v6  ;;  %v9348_v6 = vld [vmem:[#allocation105_spill] sm:$0xff] }
0x132f   :  { %5837 = vmatpush1.bf16.msra.mxu1 %v7793_v5  ;;  %v9349_v5 = vld [vmem:[#allocation106_spill] sm:$0xff] }
0x1330   :  { %5839 = vmatprep.subr.bf16.mxu1 %v9339_v14  ;;  %v9350_v14 = vld [vmem:[#allocation108_spill] sm:$0xff] }
0x1333   :  { %5841 = vmatpush1.bf16.msra.mxu1 %v9340_v61  ;;  %v9351_v61 = vld [vmem:[#allocation8_spill] sm:$0xff] }
0x1334   :  { %5843 = vmatprep.subr.bf16.mxu1 %v9341_v3 }
0x1337   :  { %5845 = vmatpush1.bf16.msra.mxu1 %v9342_v57 }
0x1338   :  { %5847 = vmatprep.subr.bf16.mxu1 %v9343_v18  ;;  %v9360_v18 = vld [vmem:[#allocation85_spill] sm:$0xff] }
0x133b   :  { %5849 = vmatpush1.bf16.msra.mxu1 %v9344_v24  ;;  %v8266_v24 = vld [vmem:[%s8876_s7] sm:$0x1] }
0x133c   :  { %5851 = vmatprep.subr.bf16.mxu1 %v9345_v54  ;;  %9352 = vst [vmem:[#allocation49_spill] sm:$0xff] %v8266_v24  ;;  %v9357_v54 = vld [vmem:[#allocation79_spill] sm:$0xff] }
0x133f   :  { %5853 = vmatpush1.bf16.msra.mxu1 %v9346_v42 }
0x1340   :  { %5855 = vmatprep.subr.bf16.mxu1 %v9347_v1 }
0x1343   :  { %5857 = vmatpush1.bf16.msra.mxu1 %v9348_v6  ;;  %v9353_v6 = vld [vmem:[#allocation72_spill] sm:$0xff] }
0x1344   :  { %5859 = vmatprep.subr.bf16.mxu1 %v9349_v5  ;;  %v9354_v5 = vld [vmem:[#allocation73_spill] sm:$0xff] }
0x1347   :  { %5861 = vmatpush1.bf16.msra.mxu1 %v9350_v14  ;;  %v9355_v14 = vld [vmem:[#allocation75_spill] sm:$0xff] }
0x1348   :  { %5895 = vmatprep.subr.bf16.mxu1 %v9351_v61  ;;  %v9356_v61 = vld [vmem:[#allocation77_spill] sm:$0xff] }
0x13dd   :  { %v4403_v3 = vpop.f32.mrb[16].mxu1 }
0x13de   :  { %v4404_v57 = vpop.f32.mrb[17].mxu1 }
0x13df   :  { %v4405_v11 = vadd.f32 %v4404_v57, %v4403_v3  ;;  %v9358_v57 = vld [vmem:[#allocation81_spill] sm:$0xff]  ;;  %v9359_v3 = vld [vmem:[#allocation83_spill] sm:$0xff] }
0x13e1   :  { %v1985_v42 = vadd.f32 %v8266_v24, %v4405_v11  ;;  %v9361_v11 = vld [vmem:[#allocation87_spill] sm:$0xff] }
0x13e3   :  { %6590 = vtanh.f32 %v1985_v42  ;;  %v9362_v42 = vld [vmem:[#allocation89_spill] sm:$0xff] }
0x13ed   :  { %v6591_v1 = vpop.eup %6590 }
0x13ee   :  { %2054 = vmatmul.mubr.f32.vlgmr.msra.gmra.mrb[20].mxu0 %v6591_v1  ;;  %v9363_v1 = vld [vmem:[#allocation91_spill] sm:$0xff] }
0x13ef   :  { %5865 = vmatpush3.bf16.msra.mxu0 %v9353_v6  ;;  %v9364_v6 = vld [vmem:[#allocation93_spill] sm:$0xff] }
0x13f0   :  { %5867 = vmatprep.subr.bf16.mxu0 %v9354_v5  ;;  %v9365_v5 = vld [vmem:[#allocation95_spill] sm:$0xff] }
0x13f3   :  { %5869 = vmatpush3.bf16.msra.mxu0 %v9355_v14  ;;  %v9366_v14 = vld [vmem:[#allocation107_spill] sm:$0xff] }
0x13f4   :  { %5871 = vmatprep.subr.bf16.mxu0 %v9356_v61  ;;  %v9367_v61 = vld [vmem:[#allocation109_spill] sm:$0xff] }
0x13f7   :  { %5873 = vmatpush3.bf16.msra.mxu0 %v9357_v54 }
0x13f8   :  { %5875 = vmatprep.subr.bf16.mxu0 %v9358_v57 }
0x13fb   :  { %5877 = vmatpush3.bf16.msra.mxu0 %v9359_v3  ;;  %v9368_v3 = vld [vmem:[#allocation57_spill] sm:$0xff] }
0x13fc   :  { %5879 = vmatprep.subr.bf16.mxu0 %v9360_v18 }
0x13ff   :  { %5881 = vmatpush3.bf16.msra.mxu0 %v9361_v11  ;;  %v9370_v11 = vld [vmem:[#allocation58_spill] sm:$0xff] }
0x1400   :  { %5883 = vmatprep.subr.bf16.mxu0 %v9362_v42 }
0x1403   :  { %5885 = vmatpush3.bf16.msra.mxu0 %v9363_v1 }
0x1404   :  { %5887 = vmatprep.subr.bf16.mxu0 %v9364_v6 }
0x1407   :  { %5889 = vmatpush3.bf16.msra.mxu0 %v9365_v5 }
0x1408   :  { %5891 = vmatprep.subr.bf16.mxu0 %v9366_v14 }
0x140b   :  { %5893 = vmatpush3.bf16.msra.mxu0 %v9367_v61 }
0x140c   :  { %5926 = vmatprep.subr.bf16.mxu0 %v9221_v35 }
0x14c1   :  { %v2055_v57 = vpop.f32.mrb[20].mxu0 }
0x14c2   :  { %v8286_v54 = vadd.f32 %v2055_v57, %v9368_v3  ;;  %v2057_v18 = vpop.f32.mrb[21].mxu0 }
0x14c3   :  { %v8289_v24 = vadd.f32 %v2057_v18, %v9370_v11 }
0x14c4   :  { %9369 = vst [vmem:[#allocation29_spill] sm:$0xff] %v8286_v54  ;;  %v2060_v1 = vsel %vm669_vm3, %v8286_v54, -inf }
0x14c5   :  { %9371 = vst [vmem:[#allocation30_spill] sm:$0xff] %v8289_v24  ;;  %v2061_v5 = vsel %vm669_vm3, %v8289_v24, -inf }
0x14c6   :  { %v2062_v6 = vmax.f32 %v2060_v1, %v2061_v5 }
0x14c8   :  { %2063 = vmax.xlane.f32.xlu0 %v2062_v6 }
0x1555   :  { %v8295_v14 = vpop.xlane.xlu0 %2063 }
0x1556   :  { %9372 = vst [vmem:[#allocation56_spill] sm:$0xff] %v8295_v14  ;;  %vm2077_vm6 = vcmp.eq.f32.partialorder %v8286_v54, %v8295_v14  ;;  %vm2078_vm7 = vcmp.eq.f32.partialorder %v8289_v24, %v8295_v14 }
0x1557   :  { %v2079_v57 = vsel %vm2077_vm6, %v7469_v26, 256  ;;  %v2080_v18 = vsel %vm2078_vm7, %v7472_v27, 256  ;;  %vm2746_vm7 = vcmp.eq.s32.totalorder %v7469_v26, 3 }
0x1558   :  { %v2081_v11 = vsel %vm669_vm3, %v2079_v57, 2147483647  ;;  %v2082_v3 = vsel %vm669_vm3, %v2080_v18, 2147483647  ;;  %v9383_v18 = vld [vmem:[#allocation23_spill] sm:$0xff] }
0x1559   :  { %vm2083_vm8 = vcmp.lt.s32.totalorder %v2081_v11, %v2082_v3 }
0x155a   :  { %v2084_v61 = vsel %vm2083_vm8, %v2081_v11, %v2082_v3  ;;  %v9381_v11 = vld [vmem:[#allocation21_spill] sm:$0xff] }
0x155b   :  { %v2086_v5 = vshra.s32 %v2084_v61, 16  ;;  %v2085_v1 = vand.u32 65535, %v2084_v61  ;;  %v9380_v61 = vld [vmem:[#allocation20_spill] sm:$0xff] }
0x155d   :  { %v2088_v6 = vcvt.s32.f32 %v2086_v5  ;;  %v2087_v39 = vcvt.s32.f32 %v2085_v1  ;;  %v9384_v5 = vld [vmem:[#allocation24_spill] sm:$0xff]  ;;  %v9386_v1 = vld [vmem:[#allocation26_spill] sm:$0xff] }
0x155f   :  { %2089 = vmin.xlane.f32.xlu1 %v2088_v6 }
0x15ec   :  { %v2090_v42 = vpop.xlane.xlu1 %2089 }
0x15ed   :  { %vm2091_vm9 = vcmp.eq.f32.partialorder %v2088_v6, %v2090_v42  ;;  %v2096_v24 = vcvt.f32.s32 %v2090_v42  ;;  %v9382_v42 = vld [vmem:[#allocation22_spill] sm:$0xff]  ;;  %v9385_v6 = vld [vmem:[#allocation25_spill] sm:$0xff] }
0x15ee   :  { %v2092_v54 = vsel %vm2091_vm9, %v2087_v39, inf  ;;  %v9378_v39 = vld [vmem:[#allocation48_spill] sm:$0xff] }
0x15ef   :  { %2093 = vmin.xlane.f32.xlu0 %v2092_v54  ;;  %v2097_v19 = vshll.u32 %v2096_v24, 16  ;;  %v9373_v54 = vld [vmem:[#allocation17_spill] sm:$0xff]  ;;  %v9379_v24 = vld [vmem:[#allocation28_spill] sm:$0xff] }
0x167c   :  { %v2094_v14 = vpop.xlane.xlu0 %2093 }
0x167d   :  { %v2095_v40 = vcvt.f32.s32 %v2094_v14  ;;  %v9374_v14 = vld [vmem:[#allocation13_spill] sm:$0xff] }
0x167f   :  { %v2098_v57 = vadd.s32 %v2097_v19, %v2095_v40  ;;  %v9376_v40 = vld [vmem:[#allocation18_spill] sm:$0xff]  ;;  %v9377_v19 = vld [vmem:[#allocation19_spill] sm:$0xff] }
0x1681   :  { %v8309_v3 = vsel %vm2099_vm10, %v2098_v57, %v8115_v13  ;;  %vm2103_vm11 = vcmp.eq.s32.totalorder %v7472_v27, %v2098_v57  ;;  %vm2102_vm12 = vcmp.eq.s32.totalorder %v7469_v26, %v2098_v57  ;;  %v9375_v13 = vld [vmem:[#allocation15_spill] sm:$0xff]  ;;  %v9387_v57 = vld [vmem:[#allocation44_spill] sm:$0xff] }
0x1682   :  { %4098 = vmatprep.mubr.msk.f32.mxu1 %vm2103_vm11, %v9293_v44  ;;  %4100 = vmatprep.mubr.msk.f32.mxu0 %vm2103_vm11, %v9293_v44 }
0x1683   :  { %4099 = vmatmul.mubr.msk.f32.vlgmr.msra.gmra.mrb[18].mxu1 %vm2102_vm12, %v9293_v44  ;;  %4101 = vmatmul.mubr.msk.f32.vlgmr.msra.gmra.mrb[22].mxu0 %vm2102_vm12, %v9293_v44 }
0x1684   :  { %5897 = vmatpush1.bf16.msra.mxu1 %v6816_v9  ;;  %5928 = vmatpush3.bf16.msra.mxu0 %v6877_v29 }
0x1685   :  { %5899 = vmatprep.subr.bf16.mxu1 %v6818_v10  ;;  %5929 = vmatprep.subr.bf16.mxu0 %v9221_v35 }
0x1686   :  { %2313 = vmatprep.mubr.f32.mxu1 %v9222_v49  ;;  %4981 = vmatprep.mubr.msk.f32.mxu0 %vm6730_vm0, %v9222_v49 }
0x1688   :  { %5901 = vmatpush1.bf16.msra.mxu1 %v6836_v15  ;;  %5931 = vmatpush3.bf16.msra.mxu0 %v6901_v37 }
0x1689   :  { %5903 = vmatprep.subr.bf16.mxu1 %v6839_v16  ;;  %5932 = vmatprep.subr.bf16.mxu0 %v9221_v35 }
0x168c   :  { %5905 = vmatpush1.bf16.msra.mxu1 %v6854_v21  ;;  %5934 = vmatpush3.bf16.msra.mxu0 %v6929_v46 }
0x168d   :  { %5907 = vmatprep.subr.bf16.mxu1 %v6857_v22  ;;  %5935 = vmatprep.subr.bf16.mxu0 %v9221_v35 }
0x1690   :  { %5909 = vmatpush1.bf16.msra.mxu1 %v6883_v31  ;;  %5937 = vmatpush3.bf16.msra.mxu0 %v6957_v55 }
0x1691   :  { %5911 = vmatprep.subr.bf16.mxu1 %v6889_v33  ;;  %5938 = vmatprep.subr.bf16.mxu0 %v9221_v35 }
0x1694   :  { %5913 = vmatpush1.bf16.msra.mxu1 %v6914_v41  ;;  %5940 = vmatpush3.bf16.msra.mxu0 %v6982_v63 }
0x1695   :  { %5915 = vmatprep.subr.bf16.mxu1 %v6920_v43  ;;  %5941 = vmatprep.subr.bf16.mxu0 %v9221_v35 }
0x1698   :  { %5917 = vmatpush1.bf16.msra.mxu1 %v6942_v50  ;;  %5943 = vmatpush3.bf16.msra.mxu0 %v6996_v4 }
0x1699   :  { %5919 = vmatprep.subr.bf16.mxu1 %v6945_v51  ;;  %5944 = vmatprep.subr.bf16.mxu0 %v9221_v35 }
0x169c   :  { %5921 = vmatpush1.bf16.msra.mxu1 %v6970_v59  ;;  %5946 = vmatpush3.bf16.msra.mxu0 %v9373_v54 }
0x169d   :  { %5923 = vmatprep.subr.bf16.mxu1 %v9374_v14  ;;  %5947 = vmatprep.subr.bf16.mxu0 %v9221_v35 }
0x16a0   :  { %5925 = vmatpush1.bf16.msra.mxu1 %v9375_v13  ;;  %5949 = vmatpush3.bf16.msra.mxu0 %v9376_v40 }
0x16a1   :  { %5950 = vmatprep.subr.bf16.mxu0 %v9221_v35  ;;  %5019 = vmatprep.subr.mxu1 %v9222_v49 }
0x16a3   :  { %2314 = vmatmul.mubr.f32.vlgmr.msra.gmra.mrb[18].mxu1 %v8191_v56  ;;  %4982 = vmatmul.mubr.f32.vlgmr.msra.gmra.mrb[24].mxu0 %v8191_v56 }
0x16a4   :  { %5952 = vmatpush3.bf16.msra.mxu0 %v9377_v19  ;;  %5016 = vmatprep.mubr.msk.f32.mxu0 %vm6730_vm0, %v9222_v49 }
0x16a5   :  { %5953 = vmatprep.subr.bf16.mxu0 %v9221_v35  ;;  %5020 = vmatpush3.msra.mxu1 %v9378_v39 }
0x16a6   :  { %5021 = vmatprep.mubr.msk.f32.mxu1 %vm6730_vm0, %v9222_v49  ;;  %5975 = vmatprep.subr.bf16.mxu1 %v9379_v24 }
0x16a8   :  { %5955 = vmatpush3.bf16.msra.mxu0 %v9380_v61 }
0x16a9   :  { %5956 = vmatprep.subr.bf16.mxu0 %v9221_v35 }
0x16ac   :  { %5958 = vmatpush3.bf16.msra.mxu0 %v9381_v11 }
0x16ad   :  { %5959 = vmatprep.subr.bf16.mxu0 %v9221_v35 }
0x16b0   :  { %5961 = vmatpush3.bf16.msra.mxu0 %v9382_v42 }
0x16b1   :  { %5962 = vmatprep.subr.bf16.mxu0 %v9221_v35 }
0x16b4   :  { %5964 = vmatpush3.bf16.msra.mxu0 %v9383_v18  ;;  %v9388_v18 = vld [vmem:[#allocation27_spill] sm:$0xff] }
0x16b5   :  { %5965 = vmatprep.subr.bf16.mxu0 %v9221_v35 }
0x16b8   :  { %5967 = vmatpush3.bf16.msra.mxu0 %v9384_v5 }
0x16b9   :  { %5968 = vmatprep.subr.bf16.mxu0 %v9221_v35 }
0x16bc   :  { %5970 = vmatpush3.bf16.msra.mxu0 %v9385_v6 }
0x16bd   :  { %5971 = vmatprep.subr.bf16.mxu0 %v9221_v35 }
0x16c0   :  { %5973 = vmatpush3.bf16.msra.mxu0 %v9386_v1 }
0x16c1   :  { %6007 = vmatprep.subr.bf16.mxu0 %v9387_v57 }
0x1756   :  { %v4438_v11 = vpop.f32.mrb[22].mxu0 }
0x1757   :  { %v4439_v42 = vpop.f32.mrb[23].mxu0 }
0x1758   :  { %v4440_v61 = vadd.f32 %v4439_v42, %v4438_v11 }
0x1776   :  { %v2315_v24 = vpop.f32.mrb[18].mxu1  ;;  %v2386_v39 = vpop.f32.mrb[24].mxu0 }
0x1777   :  { %v2316_v19 = vadd.f32 %v2315_v24, %v9388_v18  ;;  %v2317_v40 = vpop.f32.mrb[19].mxu1  ;;  %v4983_v13 = vpop.f32.mrb[25].mxu0  ;;  %v2387_v51 = vadd.f32 %v2386_v39, %v7135_v36 }
0x1778   :  { %v2318_v14 = vadd.f32 %v2317_v40, %v7127_v62 }
0x1779   :  { %v4102_v5 = vmul.f32 -1.442695, %v2316_v19 }
0x177a   :  { %v4103_v6 = vmul.f32 -1.442695, %v2318_v14 }
0x177b   :  { %6592 = vpow2.f32 %v4102_v5 }
0x177c   :  { %6594 = vpow2.f32 %v4103_v6 }
0x1785   :  { %v6593_v54 = vpop.eup %6592 }
0x1786   :  { %v2394_v59 = vadd.f32 1.0, %v6593_v54  ;;  %v6595_v1 = vpop.eup %6594 }
0x1787   :  { %v2401_v57 = vadd.f32 1.0, %v6595_v1 }
0x1788   :  { %6596 = vrcp.f32 %v2394_v59 }
0x1789   :  { %6598 = vrcp.f32 %v2401_v57  ;;  %v9389_v57 = vld [vmem:[#allocation31_spill] sm:$0xff] }
0x1792   :  { %v6597_v11 = vpop.eup %6596 }
0x1793   :  { %v2404_v42 = vmul.f32 %v6597_v11, %v2387_v51  ;;  %v6599_v24 = vpop.eup %6598  ;;  %v9390_v11 = vld [vmem:[#allocation32_spill] sm:$0xff] }
0x1794   :  { %v2407_v13 = vsub.f32 1.0, %v6599_v24  ;;  %v2409_v40 = vmul.f32 %v6599_v24, %v8191_v56  ;;  %v9392_v24 = vld [vmem:[#allocation34_spill] sm:$0xff] }
0x1795   :  { %v2405_v4 = vadd.f32 %v4440_v61, %v2404_v42  ;;  %v9391_v42 = vld [vmem:[#allocation33_spill] sm:$0xff] }
0x1797   :  { %6600 = vtanh.f32 %v2405_v4 }
0x17a1   :  { %v6601_v19 = vpop.eup %6600 }
0x17a2   :  { %v2408_v18 = vmul.f32 %v6601_v19, %v2407_v13  ;;  %v9393_v13 = vld [vmem:[#allocation35_spill] sm:$0xff]  ;;  %v9394_v19 = vld [vmem:[#allocation37_spill] sm:$0xff] }
0x17a4   :  { %v8380_v14 = vadd.f32 %v2409_v40, %v2408_v18  ;;  %v9395_v40 = vld [vmem:[#allocation38_spill] sm:$0xff] }
0x17a6   :  { %5017 = vmatmul.mubr.f32.vlgmr.msra.gmra.mrb[26].mxu0 %v8380_v14 }
0x17a7   :  { %6009 = vmatpush1.bf16.msra.mxu0 %v7316_v53  ;;  %2700 = vmatprep.mubr.f32.mxu0 %v9222_v49 }
0x17a8   :  { %6011 = vmatprep.subr.bf16.mxu0 %v7318_v58 }
0x17ab   :  { %6013 = vmatpush1.bf16.msra.mxu0 %v7334_v7 }
0x17ac   :  { %6015 = vmatprep.subr.bf16.mxu0 %v7337_v45 }
0x17af   :  { %6017 = vmatpush1.bf16.msra.mxu0 %v9223_v20 }
0x17b0   :  { %6019 = vmatprep.subr.bf16.mxu0 %v9224_v25 }
0x17b3   :  { %6021 = vmatpush1.bf16.msra.mxu0 %v9225_v28 }
0x17b4   :  { %6023 = vmatprep.subr.bf16.mxu0 %v9226_v47 }
0x17b7   :  { %6025 = vmatpush1.bf16.msra.mxu0 %v9227_v52 }
0x17b8   :  { %6027 = vmatprep.subr.bf16.mxu0 %v9306_v60 }
0x17bb   :  { %6029 = vmatpush1.bf16.msra.mxu0 %v9307_v2 }
0x17bc   :  { %6031 = vmatprep.subr.bf16.mxu0 %v9308_v12 }
0x17bf   :  { %6033 = vmatpush1.bf16.msra.mxu0 %v9309_v17 }
0x17c0   :  { %6035 = vmatprep.subr.bf16.mxu0 %v9310_v34 }
0x17c3   :  { %6037 = vmatpush1.bf16.msra.mxu0 %v9311_v32 }
0x17c4   :  { %6103 = vmatprep.subr.bf16.mxu0 %v9312_v23 }
0x1879   :  { %v2477_v51 = vpop.f32.mrb[26].mxu0 }
0x187a   :  { %v5018_v59 = vpop.f32.mrb[27].mxu0  ;;  %v2481_v4 = vsel %vm364_vm1, %v2477_v51, -inf }
0x187b   :  { %2482 = vmax.xlane.f32.xlu1 %v2481_v4  ;;  %v9397_v59 = vld [vmem:[#allocation42_spill] sm:$0xff]  ;;  %v9398_v4 = vld [vmem:[#allocation43_spill] sm:$0xff] }
0x1908   :  { %v2483_v56 = vpop.xlane.xlu1 %2482 }
0x1909   :  { %v2484_v54 = vsub.f32 %v2477_v51, %v2483_v56  ;;  %v9396_v51 = vld [vmem:[#allocation39_spill] sm:$0xff]  ;;  %v9399_v56 = vld [vmem:[#allocation62_spill] sm:$0xff] }
0x190b   :  { %v2485_v39 = vmul.f32 1.442695, %v2484_v54 }
0x190d   :  { %6602 = vpow2.f32 %v2485_v39 }
0x1917   :  { %v6603_v61 = vpop.eup %6602 }
0x1918   :  { %v2487_v18 = vsel %vm364_vm1, %v6603_v61, 0.0 }
0x1919   :  { %2488 = vadd.xlane.f32.xlu0 %v2487_v18  ;;  %v9401_v18 = vld [vmem:[#allocation64_spill] sm:$0xff] }
0x19a6   :  { %v2489_v5 = vpop.xlane.xlu0 %2488 }
0x19a7   :  { %6604 = vrcp.f32 %v2489_v5  ;;  %v9402_v5 = vld [vmem:[#allocation65_spill] sm:$0xff] }
0x19b1   :  { %v6605_v6 = vpop.eup %6604 }
0x19b2   :  { %v2491_v1 = vmul.f32 %v6605_v6, %v6603_v61  ;;  %v9400_v61 = vld [vmem:[#allocation63_spill] sm:$0xff]  ;;  %v9403_v6 = vld [vmem:[#allocation66_spill] sm:$0xff] }
0x19b4   :  { %5022 = vmatmul.mubr.msk.f32.vlgmr.msra.gmra.mrb[20].mxu1 %vm376_vm2, %v2491_v1  ;;  %v9404_v1 = vld [vmem:[#allocation67_spill] sm:$0xff] }
0x19b5   :  { %5977 = vmatpush3.bf16.msra.mxu1 %v9235_v48 }
0x19b6   :  { %5979 = vmatprep.subr.bf16.mxu1 %v9236_v8 }
0x19b9   :  { %5981 = vmatpush3.bf16.msra.mxu1 %v9389_v57 }
0x19ba   :  { %5983 = vmatprep.subr.bf16.mxu1 %v9390_v11 }
0x19bd   :  { %5985 = vmatpush3.bf16.msra.mxu1 %v9391_v42 }
0x19be   :  { %5987 = vmatprep.subr.bf16.mxu1 %v9392_v24 }
0x19c1   :  { %5989 = vmatpush3.bf16.msra.mxu1 %v9393_v13 }
0x19c2   :  { %5991 = vmatprep.subr.bf16.mxu1 %v9318_v38 }
0x19c5   :  { %5993 = vmatpush3.bf16.msra.mxu1 %v9394_v19 }
0x19c6   :  { %5995 = vmatprep.subr.bf16.mxu1 %v9395_v40 }
0x19c9   :  { %5997 = vmatpush3.bf16.msra.mxu1 %v9396_v51 }
0x19ca   :  { %5999 = vmatprep.subr.bf16.mxu1 %v9322_v0 }
0x19cd   :  { %6001 = vmatpush3.bf16.msra.mxu1 %v9323_v30  ;;  %v9410_v30 = vld [vmem:[#allocation78_spill] sm:$0xff] }
0x19ce   :  { %6003 = vmatprep.subr.bf16.mxu1 %v9397_v59  ;;  %v9405_v59 = vld [vmem:[#allocation68_spill] sm:$0xff] }
0x19d1   :  { %6005 = vmatpush3.bf16.msra.mxu1 %v9398_v4  ;;  %v9406_v4 = vld [vmem:[#allocation69_spill] sm:$0xff] }
0x19d2   :  { %6039 = vmatprep.subr.bf16.mxu1 %v9399_v56  ;;  %v9407_v56 = vld [vmem:[#allocation71_spill] sm:$0xff] }
0x1a87   :  { %v2561_v54 = vpop.f32.mrb[20].mxu1 }
0x1a88   :  { %v5023_v39 = vpop.f32.mrb[21].mxu1  ;;  %2629 = vmatprep.mubr.f32.mxu1 %v2561_v54  ;;  %v9409_v54 = vld [vmem:[#allocation76_spill] sm:$0xff] }
0x1a89   :  { %2630 = vmatmul.mubr.f32.vlgmr.msra.gmra.mrb[22].mxu1 %v8380_v14  ;;  %v9408_v39 = vld [vmem:[#allocation74_spill] sm:$0xff] }
0x1a8a   :  { %6041 = vmatpush1.bf16.msra.mxu1 %v9400_v61  ;;  %v9411_v61 = vld [vmem:[#allocation80_spill] sm:$0xff] }
0x1a8b   :  { %6043 = vmatprep.subr.bf16.mxu1 %v9401_v18  ;;  %v9412_v18 = vld [vmem:[#allocation82_spill] sm:$0xff] }
0x1a8e   :  { %6045 = vmatpush1.bf16.msra.mxu1 %v9402_v5  ;;  %v9413_v5 = vld [vmem:[#allocation84_spill] sm:$0xff] }
0x1a8f   :  { %6047 = vmatprep.subr.bf16.mxu1 %v9403_v6  ;;  %v9414_v6 = vld [vmem:[#allocation86_spill] sm:$0xff] }
0x1a92   :  { %6049 = vmatpush1.bf16.msra.mxu1 %v9404_v1  ;;  %v9415_v1 = vld [vmem:[#allocation88_spill] sm:$0xff] }
0x1a93   :  { %6051 = vmatprep.subr.bf16.mxu1 %v9405_v59  ;;  %v9416_v59 = vld [vmem:[#allocation90_spill] sm:$0xff] }
0x1a96   :  { %6053 = vmatpush1.bf16.msra.mxu1 %v9406_v4  ;;  %v9417_v4 = vld [vmem:[#allocation92_spill] sm:$0xff] }
0x1a97   :  { %6055 = vmatprep.subr.bf16.mxu1 %v9407_v56  ;;  %v9418_v56 = vld [vmem:[#allocation94_spill] sm:$0xff] }
0x1a9a   :  { %6057 = vmatpush1.bf16.msra.mxu1 %v9408_v39  ;;  %v9419_v39 = vld [vmem:[#allocation96_spill] sm:$0xff] }
0x1a9b   :  { %6059 = vmatprep.subr.bf16.mxu1 %v9409_v54  ;;  %v9420_v54 = vld [vmem:[#allocation97_spill] sm:$0xff] }
0x1a9e   :  { %6061 = vmatpush1.bf16.msra.mxu1 %v9410_v30  ;;  %v9421_v30 = vld [vmem:[#allocation98_spill] sm:$0xff] }
0x1a9f   :  { %6063 = vmatprep.subr.bf16.mxu1 %v9411_v61  ;;  %v9422_v61 = vld [vmem:[#allocation99_spill] sm:$0xff] }
0x1aa2   :  { %6065 = vmatpush1.bf16.msra.mxu1 %v9412_v18  ;;  %v9423_v18 = vld [vmem:[#allocation100_spill] sm:$0xff] }
0x1aa3   :  { %6067 = vmatprep.subr.bf16.mxu1 %v9413_v5  ;;  %v9424_v5 = vld [vmem:[#allocation101_spill] sm:$0xff] }
0x1aa6   :  { %6069 = vmatpush1.bf16.msra.mxu1 %v9414_v6  ;;  %v9425_v6 = vld [vmem:[#allocation102_spill] sm:$0xff] }
0x1aa7   :  { %6071 = vmatprep.subr.bf16.mxu1 %v9415_v1  ;;  %v9426_v1 = vld [vmem:[#allocation103_spill] sm:$0xff] }
0x1aaa   :  { %6073 = vmatpush1.bf16.msra.mxu1 %v9416_v59  ;;  %v9427_v59 = vld [vmem:[#allocation104_spill] sm:$0xff] }
0x1aab   :  { %6075 = vmatprep.subr.bf16.mxu1 %v9417_v4  ;;  %v9428_v4 = vld [vmem:[#allocation105_spill] sm:$0xff] }
0x1aae   :  { %6077 = vmatpush1.bf16.msra.mxu1 %v9418_v56  ;;  %v9429_v56 = vld [vmem:[#allocation106_spill] sm:$0xff] }
0x1aaf   :  { %6079 = vmatprep.subr.bf16.mxu1 %v9419_v39  ;;  %v9430_v39 = vld [vmem:[#allocation108_spill] sm:$0xff] }
0x1ab2   :  { %6081 = vmatpush1.bf16.msra.mxu1 %v9420_v54  ;;  %v9431_v54 = vld [vmem:[#allocation8_spill] sm:$0xff] }
0x1ab3   :  { %6083 = vmatprep.subr.bf16.mxu1 %v9421_v30 }
0x1ab6   :  { %6085 = vmatpush1.bf16.msra.mxu1 %v9422_v61 }
0x1ab7   :  { %6087 = vmatprep.subr.bf16.mxu1 %v9423_v18  ;;  %v9432_v18 = vld [vmem:[#allocation49_spill] sm:$0xff] }
0x1aba   :  { %6089 = vmatpush1.bf16.msra.mxu1 %v9424_v5 }
0x1abb   :  { %6091 = vmatprep.subr.bf16.mxu1 %v9425_v6  ;;  %v9433_v6 = vld [vmem:[#allocation72_spill] sm:$0xff] }
0x1abe   :  { %6093 = vmatpush1.bf16.msra.mxu1 %v9426_v1  ;;  %v9434_v1 = vld [vmem:[#allocation73_spill] sm:$0xff] }
0x1abf   :  { %6095 = vmatprep.subr.bf16.mxu1 %v9427_v59  ;;  %v9435_v59 = vld [vmem:[#allocation75_spill] sm:$0xff] }
0x1ac2   :  { %6097 = vmatpush1.bf16.msra.mxu1 %v9428_v4  ;;  %v9436_v4 = vld [vmem:[#allocation77_spill] sm:$0xff] }
0x1ac3   :  { %6099 = vmatprep.subr.bf16.mxu1 %v9429_v56  ;;  %v9437_v56 = vld [vmem:[#allocation79_spill] sm:$0xff] }
0x1ac6   :  { %6101 = vmatpush1.bf16.msra.mxu1 %v9430_v39  ;;  %v9438_v39 = vld [vmem:[#allocation81_spill] sm:$0xff] }
0x1ac7   :  { %6135 = vmatprep.subr.bf16.mxu1 %v9431_v54  ;;  %v9439_v54 = vld [vmem:[#allocation83_spill] sm:$0xff] }
0x1b5c   :  { %v4509_v30 = vpop.f32.mrb[22].mxu1 }
0x1b5d   :  { %v4510_v61 = vpop.f32.mrb[23].mxu1 }
0x1b5e   :  { %v4511_v0 = vadd.f32 %v4510_v61, %v4509_v30  ;;  %v9440_v30 = vld [vmem:[#allocation85_spill] sm:$0xff]  ;;  %v9443_v61 = vld [vmem:[#allocation91_spill] sm:$0xff] }
0x1b60   :  { %v2632_v51 = vadd.f32 %v9432_v18, %v4511_v0  ;;  %v9441_v0 = vld [vmem:[#allocation87_spill] sm:$0xff] }
0x1b62   :  { %6606 = vtanh.f32 %v2632_v51  ;;  %v9442_v51 = vld [vmem:[#allocation89_spill] sm:$0xff] }
0x1b6c   :  { %v6607_v5 = vpop.eup %6606 }
0x1b6d   :  { %2701 = vmatmul.mubr.f32.vlgmr.msra.gmra.mrb[28].mxu0 %v6607_v5  ;;  %v9444_v5 = vld [vmem:[#allocation93_spill] sm:$0xff] }
0x1b6e   :  { %6105 = vmatpush3.bf16.msra.mxu0 %v9433_v6 }
0x1b6f   :  { %6107 = vmatprep.subr.bf16.mxu0 %v9434_v1  ;;  %v9445_v1 = vld [vmem:[#allocation95_spill] sm:$0xff] }
0x1b72   :  { %6109 = vmatpush3.bf16.msra.mxu0 %v9435_v59  ;;  %v9446_v59 = vld [vmem:[#allocation107_spill] sm:$0xff] }
0x1b73   :  { %6111 = vmatprep.subr.bf16.mxu0 %v9436_v4  ;;  %v9447_v4 = vld [vmem:[#allocation109_spill] sm:$0xff] }
0x1b76   :  { %6113 = vmatpush3.bf16.msra.mxu0 %v9437_v56 }
0x1b77   :  { %6115 = vmatprep.subr.bf16.mxu0 %v9438_v39 }
0x1b7a   :  { %6117 = vmatpush3.bf16.msra.mxu0 %v9439_v54  ;;  %v9448_v54 = vld [vmem:[#allocation57_spill] sm:$0xff] }
0x1b7b   :  { %6119 = vmatprep.subr.bf16.mxu0 %v9440_v30 }
0x1b7e   :  { %6121 = vmatpush3.bf16.msra.mxu0 %v9441_v0  ;;  %v9450_v0 = vld [vmem:[#allocation58_spill] sm:$0xff] }
0x1b7f   :  { %6123 = vmatprep.subr.bf16.mxu0 %v9442_v51 }
0x1b82   :  { %6125 = vmatpush3.bf16.msra.mxu0 %v9443_v61 }
0x1b83   :  { %6127 = vmatprep.subr.bf16.mxu0 %v9444_v5 }
0x1b86   :  { %6129 = vmatpush3.bf16.msra.mxu0 %v9445_v1 }
0x1b87   :  { %6131 = vmatprep.subr.bf16.mxu0 %v9446_v59 }
0x1b8a   :  { %6133 = vmatpush3.bf16.msra.mxu0 %v9447_v4 }
0x1b8b   :  { %6166 = vmatprep.subr.bf16.mxu0 %v9221_v35 }
0x1c40   :  { %v2702_v39 = vpop.f32.mrb[28].mxu0 }
0x1c41   :  { %v8470_v56 = vadd.f32 %v2702_v39, %v9448_v54  ;;  %v2704_v30 = vpop.f32.mrb[29].mxu0 }
0x1c42   :  { %v8473_v6 = vadd.f32 %v2704_v30, %v9450_v0 }
0x1c43   :  { %9449 = vst [vmem:[#allocation50_spill] sm:$0xff] %v8470_v56  ;;  %v2707_v61 = vsel %vm669_vm3, %v8470_v56, -inf }
0x1c44   :  { %9451 = vst [vmem:[#allocation51_spill] sm:$0xff] %v8473_v6  ;;  %v2708_v1 = vsel %vm669_vm3, %v8473_v6, -inf }
0x1c45   :  { %v2709_v5 = vmax.f32 %v2707_v61, %v2708_v1 }
0x1c47   :  { %2710 = vmax.xlane.f32.xlu1 %v2709_v5 }
0x1cd4   :  { %v8479_v59 = vpop.xlane.xlu1 %2710 }
0x1cd5   :  { %9452 = vst [vmem:[#allocation52_spill] sm:$0xff] %v8479_v59  ;;  %vm2724_vm13 = vcmp.eq.f32.partialorder %v8470_v56, %v8479_v59  ;;  %vm2725_vm4 = vcmp.eq.f32.partialorder %v8473_v6, %v8479_v59 }
0x1cd6   :  { %v2726_v39 = vsel %vm2724_vm13, %v7469_v26, 256  ;;  %v2727_v30 = vsel %vm2725_vm4, %v7472_v27, 256 }
0x1cd7   :  { %v2728_v0 = vsel %vm669_vm3, %v2726_v39, 2147483647  ;;  %v2729_v54 = vsel %vm669_vm3, %v2727_v30, 2147483647  ;;  %v9463_v30 = vld [vmem:[#allocation20_spill] sm:$0xff] }
0x1cd8   :  { %vm2730_vm5 = vcmp.lt.s32.totalorder %v2728_v0, %v2729_v54 }
0x1cd9   :  { %v2731_v4 = vsel %vm2730_vm5, %v2728_v0, %v2729_v54  ;;  %v9460_v54 = vld [vmem:[#allocation19_spill] sm:$0xff]  ;;  %v9461_v0 = vld [vmem:[#allocation48_spill] sm:$0xff]  ;;  %vm3393_vm5 = vcmp.eq.s32.totalorder %v7469_v26, 4 }
0x1cda   :  { %v2733_v1 = vshra.s32 %v2731_v4, 16  ;;  %v2732_v5 = vand.u32 65535, %v2731_v4 }
0x1cdc   :  { %v2735_v61 = vcvt.s32.f32 %v2733_v1  ;;  %v2734_v18 = vcvt.s32.f32 %v2732_v5  ;;  %v9464_v1 = vld [vmem:[#allocation21_spill] sm:$0xff]  ;;  %v9466_v5 = vld [vmem:[#allocation23_spill] sm:$0xff] }
0x1cde   :  { %2736 = vmin.xlane.f32.xlu0 %v2735_v61 }
0x1d6b   :  { %v2737_v51 = vpop.xlane.xlu0 %2736 }
0x1d6c   :  { %vm2738_vm6 = vcmp.eq.f32.partialorder %v2735_v61, %v2737_v51  ;;  %v2743_v6 = vcvt.f32.s32 %v2737_v51  ;;  %v9462_v51 = vld [vmem:[#allocation28_spill] sm:$0xff]  ;;  %v9465_v61 = vld [vmem:[#allocation22_spill] sm:$0xff] }
0x1d6d   :  { %v2739_v56 = vsel %vm2738_vm6, %v2734_v18, inf  ;;  %v9458_v18 = vld [vmem:[#allocation15_spill] sm:$0xff] }
0x1d6e   :  { %2740 = vmin.xlane.f32.xlu1 %v2739_v56  ;;  %v2744_v40 = vshll.u32 %v2743_v6, 16  ;;  %v9457_v56 = vld [vmem:[#allocation13_spill] sm:$0xff]  ;;  %v9459_v6 = vld [vmem:[#allocation18_spill] sm:$0xff] }
0x1dfb   :  { %v2741_v59 = vpop.xlane.xlu1 %2740 }
0x1dfc   :  { %v2742_v19 = vcvt.f32.s32 %v2741_v59  ;;  %v9456_v59 = vld [vmem:[#allocation17_spill] sm:$0xff] }
0x1dfe   :  { %v2745_v39 = vadd.s32 %v2744_v40, %v2742_v19  ;;  %v9454_v19 = vld [vmem:[#allocation11_spill] sm:$0xff]  ;;  %v9455_v40 = vld [vmem:[#allocation12_spill] sm:$0xff] }
0x1e00   :  { %vm2750_vm8 = vcmp.eq.s32.totalorder %v7472_v27, %v2745_v39  ;;  %vm2749_vm9 = vcmp.eq.s32.totalorder %v7469_v26, %v2745_v39  ;;  %v8495_v4 = vsel %vm2746_vm7, %v2745_v39, %v8309_v3  ;;  %v9453_v3 = vld [vmem:[#allocation16_spill] sm:$0xff] }
0x1e01   :  { %4107 = vmatprep.mubr.msk.f32.mxu1 %vm2750_vm8, %v9293_v44  ;;  %4109 = vmatprep.mubr.msk.f32.mxu0 %vm2750_vm8, %v9293_v44  ;;  %v9467_v39 = vld [vmem:[#allocation24_spill] sm:$0xff] }
0x1e02   :  { %4108 = vmatmul.mubr.msk.f32.vlgmr.msra.gmra.mrb[24].mxu1 %vm2749_vm9, %v9293_v44  ;;  %4110 = vmatmul.mubr.msk.f32.vlgmr.msra.gmra.mrb[30].mxu0 %vm2749_vm9, %v9293_v44 }
0x1e03   :  { %6137 = vmatpush1.bf16.msra.mxu1 %v6816_v9  ;;  %6168 = vmatpush3.bf16.msra.mxu0 %v6877_v29 }
0x1e04   :  { %6139 = vmatprep.subr.bf16.mxu1 %v6818_v10  ;;  %6169 = vmatprep.subr.bf16.mxu0 %v9221_v35 }
0x1e05   :  { %2960 = vmatprep.mubr.f32.mxu1 %v9222_v49  ;;  %5056 = vmatprep.mubr.msk.f32.mxu0 %vm6730_vm0, %v9222_v49 }
0x1e07   :  { %6141 = vmatpush1.bf16.msra.mxu1 %v6836_v15  ;;  %6171 = vmatpush3.bf16.msra.mxu0 %v6901_v37 }
0x1e08   :  { %6143 = vmatprep.subr.bf16.mxu1 %v6839_v16  ;;  %6172 = vmatprep.subr.bf16.mxu0 %v9221_v35 }
0x1e0b   :  { %6145 = vmatpush1.bf16.msra.mxu1 %v6854_v21  ;;  %6174 = vmatpush3.bf16.msra.mxu0 %v6929_v46 }
0x1e0c   :  { %6147 = vmatprep.subr.bf16.mxu1 %v6857_v22  ;;  %6175 = vmatprep.subr.bf16.mxu0 %v9221_v35 }
0x1e0f   :  { %6149 = vmatpush1.bf16.msra.mxu1 %v6883_v31  ;;  %6177 = vmatpush3.bf16.msra.mxu0 %v6957_v55 }
0x1e10   :  { %6151 = vmatprep.subr.bf16.mxu1 %v6889_v33  ;;  %6178 = vmatprep.subr.bf16.mxu0 %v9221_v35 }
0x1e13   :  { %6153 = vmatpush1.bf16.msra.mxu1 %v6914_v41  ;;  %6180 = vmatpush3.bf16.msra.mxu0 %v6982_v63 }
0x1e14   :  { %6155 = vmatprep.subr.bf16.mxu1 %v6920_v43  ;;  %6181 = vmatprep.subr.bf16.mxu0 %v9221_v35 }
0x1e17   :  { %6157 = vmatpush1.bf16.msra.mxu1 %v6942_v50  ;;  %6183 = vmatpush3.bf16.msra.mxu0 %v9453_v3 }
0x1e18   :  { %6159 = vmatprep.subr.bf16.mxu1 %v9454_v19  ;;  %6184 = vmatprep.subr.bf16.mxu0 %v9221_v35 }
0x1e1b   :  { %6161 = vmatpush1.bf16.msra.mxu1 %v9455_v40  ;;  %6186 = vmatpush3.bf16.msra.mxu0 %v9456_v59 }
0x1e1c   :  { %6163 = vmatprep.subr.bf16.mxu1 %v9457_v56  ;;  %6187 = vmatprep.subr.bf16.mxu0 %v9221_v35 }
0x1e1f   :  { %6165 = vmatpush1.bf16.msra.mxu1 %v9458_v18  ;;  %6189 = vmatpush3.bf16.msra.mxu0 %v9459_v6 }
0x1e20   :  { %6190 = vmatprep.subr.bf16.mxu0 %v9221_v35  ;;  %5094 = vmatprep.subr.mxu1 %v9222_v49 }
0x1e22   :  { %2961 = vmatmul.mubr.f32.vlgmr.msra.gmra.mrb[24].mxu1 %v8380_v14  ;;  %5057 = vmatmul.mubr.f32.vlgmr.msra.gmra.mrb[32].mxu0 %v8380_v14 }
0x1e23   :  { %6192 = vmatpush3.bf16.msra.mxu0 %v9460_v54  ;;  %5091 = vmatprep.mubr.msk.f32.mxu0 %vm6730_vm0, %v9222_v49 }
0x1e24   :  { %6193 = vmatprep.subr.bf16.mxu0 %v9221_v35  ;;  %5095 = vmatpush3.msra.mxu1 %v9461_v0  ;;  %v9468_v0 = vld [vmem:[#allocation25_spill] sm:$0xff] }
0x1e25   :  { %5096 = vmatprep.mubr.msk.f32.mxu1 %vm6730_vm0, %v9222_v49  ;;  %6215 = vmatprep.subr.bf16.mxu1 %v9462_v51 }
0x1e27   :  { %6195 = vmatpush3.bf16.msra.mxu0 %v9463_v30  ;;  %v9469_v30 = vld [vmem:[#allocation26_spill] sm:$0xff] }
0x1e28   :  { %6196 = vmatprep.subr.bf16.mxu0 %v9221_v35 }
0x1e2b   :  { %6198 = vmatpush3.bf16.msra.mxu0 %v9464_v1  ;;  %v9470_v1 = vld [vmem:[#allocation44_spill] sm:$0xff] }
0x1e2c   :  { %6199 = vmatprep.subr.bf16.mxu0 %v9221_v35 }
0x1e2f   :  { %6201 = vmatpush3.bf16.msra.mxu0 %v9465_v61 }
0x1e30   :  { %6202 = vmatprep.subr.bf16.mxu0 %v9221_v35 }
0x1e33   :  { %6204 = vmatpush3.bf16.msra.mxu0 %v9466_v5  ;;  %v9471_v5 = vld [vmem:[#allocation27_spill] sm:$0xff] }
0x1e34   :  { %6205 = vmatprep.subr.bf16.mxu0 %v9221_v35 }
0x1e37   :  { %6207 = vmatpush3.bf16.msra.mxu0 %v9467_v39 }
0x1e38   :  { %6208 = vmatprep.subr.bf16.mxu0 %v9221_v35 }
0x1e3b   :  { %6210 = vmatpush3.bf16.msra.mxu0 %v9468_v0 }
0x1e3c   :  { %6211 = vmatprep.subr.bf16.mxu0 %v9221_v35 }
0x1e3f   :  { %6213 = vmatpush3.bf16.msra.mxu0 %v9469_v30 }
0x1e40   :  { %6247 = vmatprep.subr.bf16.mxu0 %v9470_v1 }
0x1ed5   :  { %v4544_v51 = vpop.f32.mrb[30].mxu0 }
0x1ed6   :  { %v4545_v61 = vpop.f32.mrb[31].mxu0 }
0x1ed7   :  { %v4546_v54 = vadd.f32 %v4545_v61, %v4544_v51 }
0x1ef5   :  { %v2962_v6 = vpop.f32.mrb[24].mxu1  ;;  %v3033_v18 = vpop.f32.mrb[32].mxu0 }
0x1ef6   :  { %v2963_v56 = vadd.f32 %v2962_v6, %v9471_v5  ;;  %v2964_v59 = vpop.f32.mrb[25].mxu1  ;;  %v5058_v40 = vpop.f32.mrb[33].mxu0  ;;  %v3034_v43 = vadd.f32 %v3033_v18, %v7135_v36 }
0x1ef7   :  { %v2965_v19 = vadd.f32 %v2964_v59, %v7127_v62 }
0x1ef8   :  { %v4111_v39 = vmul.f32 -1.442695, %v2963_v56 }
0x1ef9   :  { %v4112_v0 = vmul.f32 -1.442695, %v2965_v19 }
0x1efa   :  { %6608 = vpow2.f32 %v4111_v39 }
0x1efb   :  { %6610 = vpow2.f32 %v4112_v0  ;;  %v9473_v0 = vld [vmem:[#allocation38_spill] sm:$0xff] }
0x1f04   :  { %v6609_v3 = vpop.eup %6608 }
0x1f05   :  { %v3041_v50 = vadd.f32 1.0, %v6609_v3  ;;  %v6611_v30 = vpop.eup %6610 }
0x1f06   :  { %v3048_v1 = vadd.f32 1.0, %v6611_v30 }
0x1f07   :  { %6612 = vrcp.f32 %v3041_v50 }
0x1f08   :  { %6614 = vrcp.f32 %v3048_v1 }
0x1f11   :  { %v6613_v51 = vpop.eup %6612 }
0x1f12   :  { %v3051_v61 = vmul.f32 %v6613_v51, %v3034_v43  ;;  %v6615_v6 = vpop.eup %6614  ;;  %v9474_v51 = vld [vmem:[#allocation39_spill] sm:$0xff] }
0x1f13   :  { %v3054_v40 = vsub.f32 1.0, %v6615_v6  ;;  %v3056_v59 = vmul.f32 %v6615_v6, %v8380_v14  ;;  %v9476_v6 = vld [vmem:[#allocation41_spill] sm:$0xff] }
0x1f14   :  { %v3052_v63 = vadd.f32 %v4546_v54, %v3051_v61  ;;  %v9475_v61 = vld [vmem:[#allocation40_spill] sm:$0xff] }
0x1f16   :  { %6616 = vtanh.f32 %v3052_v63 }
0x1f20   :  { %v6617_v56 = vpop.eup %6616 }
0x1f21   :  { %v3055_v5 = vmul.f32 %v6617_v56, %v3054_v40  ;;  %v9477_v40 = vld [vmem:[#allocation42_spill] sm:$0xff]  ;;  %v9478_v56 = vld [vmem:[#allocation43_spill] sm:$0xff] }
0x1f23   :  { %v8564_v19 = vadd.f32 %v3056_v59, %v3055_v5  ;;  %v9479_v59 = vld [vmem:[#allocation62_spill] sm:$0xff] }
0x1f25   :  { %5092 = vmatmul.mubr.f32.vlgmr.msra.gmra.mrb[34].mxu0 %v8564_v19 }
0x1f26   :  { %6249 = vmatpush1.bf16.msra.mxu0 %v7316_v53  ;;  %3347 = vmatprep.mubr.f32.mxu0 %v9222_v49 }
0x1f27   :  { %6251 = vmatprep.subr.bf16.mxu0 %v7318_v58 }
0x1f2a   :  { %6253 = vmatpush1.bf16.msra.mxu0 %v7334_v7 }
0x1f2b   :  { %6255 = vmatprep.subr.bf16.mxu0 %v7337_v45 }
0x1f2e   :  { %6257 = vmatpush1.bf16.msra.mxu0 %v9223_v20 }
0x1f2f   :  { %6259 = vmatprep.subr.bf16.mxu0 %v9224_v25 }
0x1f32   :  { %6261 = vmatpush1.bf16.msra.mxu0 %v9225_v28 }
0x1f33   :  { %6263 = vmatprep.subr.bf16.mxu0 %v9226_v47 }
0x1f36   :  { %6265 = vmatpush1.bf16.msra.mxu0 %v9227_v52 }
0x1f37   :  { %6267 = vmatprep.subr.bf16.mxu0 %v9306_v60 }
0x1f3a   :  { %6269 = vmatpush1.bf16.msra.mxu0 %v9307_v2 }
0x1f3b   :  { %6271 = vmatprep.subr.bf16.mxu0 %v9308_v12 }
0x1f3e   :  { %6273 = vmatpush1.bf16.msra.mxu0 %v9309_v17 }
0x1f3f   :  { %6275 = vmatprep.subr.bf16.mxu0 %v9310_v34 }
0x1f42   :  { %6277 = vmatpush1.bf16.msra.mxu0 %v9311_v32 }
0x1f43   :  { %6343 = vmatprep.subr.bf16.mxu0 %v9312_v23  ;;  %v9472_v23 = vld [vmem:[#allocation37_spill] sm:$0xff] }
0x1ff8   :  { %v3124_v43 = vpop.f32.mrb[34].mxu0 }
0x1ff9   :  { %v5093_v50 = vpop.f32.mrb[35].mxu0  ;;  %v3128_v63 = vsel %vm364_vm1, %v3124_v43, -inf }
0x1ffa   :  { %3129 = vmax.xlane.f32.xlu0 %v3128_v63  ;;  %v9480_v63 = vld [vmem:[#allocation63_spill] sm:$0xff] }
0x2087   :  { %v3130_v14 = vpop.xlane.xlu0 %3129 }
0x2088   :  { %v3131_v3 = vsub.f32 %v3124_v43, %v3130_v14  ;;  %v9481_v14 = vld [vmem:[#allocation64_spill] sm:$0xff] }
0x208a   :  { %v3132_v18 = vmul.f32 1.442695, %v3131_v3  ;;  %v9482_v3 = vld [vmem:[#allocation65_spill] sm:$0xff] }
0x208c   :  { %6618 = vpow2.f32 %v3132_v18  ;;  %v9483_v18 = vld [vmem:[#allocation66_spill] sm:$0xff] }
0x2096   :  { %v6619_v54 = vpop.eup %6618 }
0x2097   :  { %v3134_v30 = vsel %vm364_vm1, %v6619_v54, 0.0 }
0x2098   :  { %3135 = vadd.xlane.f32.xlu1 %v3134_v30  ;;  %v9485_v30 = vld [vmem:[#allocation68_spill] sm:$0xff] }
0x2125   :  { %v3136_v1 = vpop.xlane.xlu1 %3135 }
0x2126   :  { %6620 = vrcp.f32 %v3136_v1  ;;  %v9486_v1 = vld [vmem:[#allocation69_spill] sm:$0xff] }
0x2130   :  { %v6621_v5 = vpop.eup %6620 }
0x2131   :  { %v3138_v39 = vmul.f32 %v6621_v5, %v6619_v54  ;;  %v9484_v54 = vld [vmem:[#allocation67_spill] sm:$0xff] }
0x2132   :  { %v9487_v5 = vld [vmem:[#allocation71_spill] sm:$0xff] }
0x2133   :  { %5097 = vmatmul.mubr.msk.f32.vlgmr.msra.gmra.mrb[26].mxu1 %vm376_vm2, %v3138_v39  ;;  %v9488_v39 = vld [vmem:[#allocation74_spill] sm:$0xff] }
0x2134   :  { %6217 = vmatpush3.bf16.msra.mxu1 %v9235_v48 }
0x2135   :  { %6219 = vmatprep.subr.bf16.mxu1 %v9236_v8 }
0x2138   :  { %6221 = vmatpush3.bf16.msra.mxu1 %v9389_v57 }
0x2139   :  { %6223 = vmatprep.subr.bf16.mxu1 %v9390_v11 }
0x213c   :  { %6225 = vmatpush3.bf16.msra.mxu1 %v9391_v42 }
0x213d   :  { %6227 = vmatprep.subr.bf16.mxu1 %v9392_v24 }
0x2140   :  { %6229 = vmatpush3.bf16.msra.mxu1 %v9393_v13 }
0x2141   :  { %6231 = vmatprep.subr.bf16.mxu1 %v9318_v38 }
0x2144   :  { %6233 = vmatpush3.bf16.msra.mxu1 %v9472_v23 }
0x2145   :  { %6235 = vmatprep.subr.bf16.mxu1 %v9473_v0 }
0x2148   :  { %6237 = vmatpush3.bf16.msra.mxu1 %v9474_v51 }
0x2149   :  { %6239 = vmatprep.subr.bf16.mxu1 %v9475_v61 }
0x214c   :  { %6241 = vmatpush3.bf16.msra.mxu1 %v9476_v6 }
0x214d   :  { %6243 = vmatprep.subr.bf16.mxu1 %v9477_v40 }
0x2150   :  { %6245 = vmatpush3.bf16.msra.mxu1 %v9478_v56 }
0x2151   :  { %6279 = vmatprep.subr.bf16.mxu1 %v9479_v59  ;;  %v9489_v59 = vld [vmem:[#allocation76_spill] sm:$0xff] }
0x2206   :  { %v3208_v43 = vpop.f32.mrb[26].mxu1 }
0x2207   :  { %v5098_v50 = vpop.f32.mrb[27].mxu1  ;;  %3276 = vmatprep.mubr.f32.mxu1 %v3208_v43  ;;  %v9490_v43 = vld [vmem:[#allocation78_spill] sm:$0xff] }
0x2208   :  { %3277 = vmatmul.mubr.f32.vlgmr.msra.gmra.mrb[28].mxu1 %v8564_v19  ;;  %v9491_v50 = vld [vmem:[#allocation80_spill] sm:$0xff] }
0x2209   :  { %6281 = vmatpush1.bf16.msra.mxu1 %v9480_v63  ;;  %v9492_v63 = vld [vmem:[#allocation82_spill] sm:$0xff] }
0x220a   :  { %6283 = vmatprep.subr.bf16.mxu1 %v9481_v14  ;;  %v9493_v14 = vld [vmem:[#allocation84_spill] sm:$0xff] }
0x220d   :  { %6285 = vmatpush1.bf16.msra.mxu1 %v9482_v3  ;;  %v9494_v3 = vld [vmem:[#allocation86_spill] sm:$0xff] }
0x220e   :  { %6287 = vmatprep.subr.bf16.mxu1 %v9483_v18  ;;  %v9495_v18 = vld [vmem:[#allocation88_spill] sm:$0xff] }
0x2211   :  { %6289 = vmatpush1.bf16.msra.mxu1 %v9484_v54  ;;  %v9496_v54 = vld [vmem:[#allocation90_spill] sm:$0xff] }
0x2212   :  { %6291 = vmatprep.subr.bf16.mxu1 %v9485_v30  ;;  %v9497_v30 = vld [vmem:[#allocation92_spill] sm:$0xff] }
0x2215   :  { %6293 = vmatpush1.bf16.msra.mxu1 %v9486_v1  ;;  %v9498_v1 = vld [vmem:[#allocation94_spill] sm:$0xff] }
0x2216   :  { %6295 = vmatprep.subr.bf16.mxu1 %v9487_v5  ;;  %v9499_v5 = vld [vmem:[#allocation96_spill] sm:$0xff] }
0x2219   :  { %6297 = vmatpush1.bf16.msra.mxu1 %v9488_v39  ;;  %v9500_v39 = vld [vmem:[#allocation97_spill] sm:$0xff] }
0x221a   :  { %6299 = vmatprep.subr.bf16.mxu1 %v9489_v59  ;;  %v9501_v59 = vld [vmem:[#allocation98_spill] sm:$0xff] }
0x221d   :  { %6301 = vmatpush1.bf16.msra.mxu1 %v9490_v43  ;;  %v9502_v43 = vld [vmem:[#allocation99_spill] sm:$0xff] }
0x221e   :  { %6303 = vmatprep.subr.bf16.mxu1 %v9491_v50  ;;  %v9503_v50 = vld [vmem:[#allocation100_spill] sm:$0xff] }
0x2221   :  { %6305 = vmatpush1.bf16.msra.mxu1 %v9492_v63  ;;  %v9504_v63 = vld [vmem:[#allocation101_spill] sm:$0xff] }
0x2222   :  { %6307 = vmatprep.subr.bf16.mxu1 %v9493_v14  ;;  %v9505_v14 = vld [vmem:[#allocation102_spill] sm:$0xff] }
0x2225   :  { %6309 = vmatpush1.bf16.msra.mxu1 %v9494_v3  ;;  %v9506_v3 = vld [vmem:[#allocation103_spill] sm:$0xff] }
0x2226   :  { %6311 = vmatprep.subr.bf16.mxu1 %v9495_v18  ;;  %v9507_v18 = vld [vmem:[#allocation104_spill] sm:$0xff] }
0x2229   :  { %6313 = vmatpush1.bf16.msra.mxu1 %v9496_v54  ;;  %v9508_v54 = vld [vmem:[#allocation105_spill] sm:$0xff] }
0x222a   :  { %6315 = vmatprep.subr.bf16.mxu1 %v9497_v30  ;;  %v9509_v30 = vld [vmem:[#allocation106_spill] sm:$0xff] }
0x222d   :  { %6317 = vmatpush1.bf16.msra.mxu1 %v9498_v1  ;;  %v9510_v1 = vld [vmem:[#allocation108_spill] sm:$0xff] }
0x222e   :  { %6319 = vmatprep.subr.bf16.mxu1 %v9499_v5  ;;  %v9511_v5 = vld [vmem:[#allocation8_spill] sm:$0xff] }
0x2231   :  { %6321 = vmatpush1.bf16.msra.mxu1 %v9500_v39 }
0x2232   :  { %6323 = vmatprep.subr.bf16.mxu1 %v9501_v59 }
0x2235   :  { %6325 = vmatpush1.bf16.msra.mxu1 %v9502_v43 }
0x2236   :  { %6327 = vmatprep.subr.bf16.mxu1 %v9503_v50  ;;  %v9512_v50 = vld [vmem:[#allocation49_spill] sm:$0xff] }
0x2239   :  { %6329 = vmatpush1.bf16.msra.mxu1 %v9504_v63 }
0x223a   :  { %6331 = vmatprep.subr.bf16.mxu1 %v9505_v14  ;;  %v9513_v14 = vld [vmem:[#allocation72_spill] sm:$0xff] }
0x223d   :  { %6333 = vmatpush1.bf16.msra.mxu1 %v9506_v3  ;;  %v9514_v3 = vld [vmem:[#allocation73_spill] sm:$0xff] }
0x223e   :  { %6335 = vmatprep.subr.bf16.mxu1 %v9507_v18  ;;  %v9515_v18 = vld [vmem:[#allocation75_spill] sm:$0xff] }
0x2241   :  { %6337 = vmatpush1.bf16.msra.mxu1 %v9508_v54  ;;  %v9516_v54 = vld [vmem:[#allocation77_spill] sm:$0xff] }
0x2242   :  { %6339 = vmatprep.subr.bf16.mxu1 %v9509_v30  ;;  %v9517_v30 = vld [vmem:[#allocation79_spill] sm:$0xff] }
0x2245   :  { %6341 = vmatpush1.bf16.msra.mxu1 %v9510_v1  ;;  %v9518_v1 = vld [vmem:[#allocation81_spill] sm:$0xff] }
0x2246   :  { %6375 = vmatprep.subr.bf16.mxu1 %v9511_v5  ;;  %v9519_v5 = vld [vmem:[#allocation83_spill] sm:$0xff] }
0x22db   :  { %v4615_v39 = vpop.f32.mrb[28].mxu1 }
0x22dc   :  { %v4616_v59 = vpop.f32.mrb[29].mxu1 }
0x22dd   :  { %v4617_v43 = vadd.f32 %v4616_v59, %v4615_v39  ;;  %v9520_v39 = vld [vmem:[#allocation85_spill] sm:$0xff]  ;;  %v9521_v59 = vld [vmem:[#allocation87_spill] sm:$0xff] }
0x22df   :  { %v3279_v56 = vadd.f32 %v9512_v50, %v4617_v43  ;;  %v9523_v43 = vld [vmem:[#allocation91_spill] sm:$0xff]  ;;  %v9524_v50 = vld [vmem:[#allocation93_spill] sm:$0xff] }
0x22e1   :  { %6622 = vtanh.f32 %v3279_v56  ;;  %v9522_v56 = vld [vmem:[#allocation89_spill] sm:$0xff] }
0x22eb   :  { %v6623_v63 = vpop.eup %6622 }
0x22ec   :  { %3348 = vmatmul.mubr.f32.vlgmr.msra.gmra.mrb[36].mxu0 %v6623_v63  ;;  %v9525_v63 = vld [vmem:[#allocation95_spill] sm:$0xff] }
0x22ed   :  { %6345 = vmatpush3.bf16.msra.mxu0 %v9513_v14  ;;  %v9526_v14 = vld [vmem:[#allocation107_spill] sm:$0xff] }
0x22ee   :  { %6347 = vmatprep.subr.bf16.mxu0 %v9514_v3  ;;  %v9527_v3 = vld [vmem:[#allocation109_spill] sm:$0xff] }
0x22f1   :  { %6349 = vmatpush3.bf16.msra.mxu0 %v9515_v18 }
0x22f2   :  { %6351 = vmatprep.subr.bf16.mxu0 %v9516_v54  ;;  %v9528_v54 = vld [vmem:[#allocation57_spill] sm:$0xff] }
0x22f5   :  { %6353 = vmatpush3.bf16.msra.mxu0 %v9517_v30 }
0x22f6   :  { %6355 = vmatprep.subr.bf16.mxu0 %v9518_v1 }
0x22f9   :  { %6357 = vmatpush3.bf16.msra.mxu0 %v9519_v5  ;;  %v9530_v5 = vld [vmem:[#allocation58_spill] sm:$0xff] }
0x22fa   :  { %6359 = vmatprep.subr.bf16.mxu0 %v9520_v39 }
0x22fd   :  { %6361 = vmatpush3.bf16.msra.mxu0 %v9521_v59 }
0x22fe   :  { %6363 = vmatprep.subr.bf16.mxu0 %v9522_v56 }
0x2301   :  { %6365 = vmatpush3.bf16.msra.mxu0 %v9523_v43 }
0x2302   :  { %6367 = vmatprep.subr.bf16.mxu0 %v9524_v50 }
0x2305   :  { %6369 = vmatpush3.bf16.msra.mxu0 %v9525_v63 }
0x2306   :  { %6371 = vmatprep.subr.bf16.mxu0 %v9526_v14 }
0x2309   :  { %6373 = vmatpush3.bf16.msra.mxu0 %v9527_v3 }
0x230a   :  { %6406 = vmatprep.subr.bf16.mxu0 %v9221_v35 }
0x23bf   :  { %v3349_v18 = vpop.f32.mrb[36].mxu0 }
0x23c0   :  { %v8654_v30 = vadd.f32 %v3349_v18, %v9528_v54  ;;  %v3351_v1 = vpop.f32.mrb[37].mxu0 }
0x23c1   :  { %v8657_v39 = vadd.f32 %v3351_v1, %v9530_v5 }
0x23c2   :  { %9529 = vst [vmem:[#allocation53_spill] sm:$0xff] %v8654_v30  ;;  %v3354_v59 = vsel %vm669_vm3, %v8654_v30, -inf }
0x23c3   :  { %9531 = vst [vmem:[#allocation54_spill] sm:$0xff] %v8657_v39  ;;  %v3355_v56 = vsel %vm669_vm3, %v8657_v39, -inf }
0x23c4   :  { %v3356_v43 = vmax.f32 %v3354_v59, %v3355_v56 }
0x23c6   :  { %3357 = vmax.xlane.f32.xlu0 %v3356_v43 }
0x2453   :  { %v8663_v50 = vpop.xlane.xlu0 %3357 }
0x2454   :  { %9532 = vst [vmem:[#allocation55_spill] sm:$0xff] %v8663_v50  ;;  %vm3371_vm11 = vcmp.eq.f32.partialorder %v8654_v30, %v8663_v50  ;;  %vm3372_vm12 = vcmp.eq.f32.partialorder %v8657_v39, %v8663_v50 }
0x2455   :  { %v3373_v63 = vsel %vm3371_vm11, %v7469_v26, 256  ;;  %v3374_v14 = vsel %vm3372_vm12, %v7472_v27, 256  ;;  %vm4043_vm11 = vcmask 40960  }
0x2456   :  { %v3375_v3 = vsel %vm669_vm3, %v3373_v63, 2147483647  ;;  %v3376_v18 = vsel %vm669_vm3, %v3374_v14, 2147483647 }
0x2457   :  { %vm3377_vm13 = vcmp.lt.s32.totalorder %v3375_v3, %v3376_v18 }
0x2458   :  { %v3378_v1 = vsel %vm3377_vm13, %v3375_v3, %v3376_v18 }
0x2459   :  { %v3380_v59 = vshra.s32 %v3378_v1, 16  ;;  %v3379_v43 = vand.u32 65535, %v3378_v1 }
0x245b   :  { %v3382_v56 = vcvt.s32.f32 %v3380_v59  ;;  %v3381_v54 = vcvt.s32.f32 %v3379_v43 }
0x245d   :  { %3383 = vmin.xlane.f32.xlu1 %v3382_v56 }
0x24ea   :  { %v3384_v5 = vpop.xlane.xlu1 %3383 }
0x24eb   :  { %vm3385_vm4 = vcmp.eq.f32.partialorder %v3382_v56, %v3384_v5  ;;  %v3390_v39 = vcvt.f32.s32 %v3384_v5  ;;  %v9551_v5 = vld [vmem:[#allocation26_spill] sm:$0xff]  ;;  %v9553_v56 = vld [vmem:[#allocation27_spill] sm:$0xff] }
0x24ec   :  { %v3386_v30 = vsel %vm3385_vm4, %v3381_v54, inf  ;;  %v9549_v54 = vld [vmem:[#allocation24_spill] sm:$0xff] }
0x24ed   :  { %3387 = vmin.xlane.f32.xlu0 %v3386_v30  ;;  %v3391_v40 = vshll.u32 %v3390_v39, 16  ;;  %v9550_v30 = vld [vmem:[#allocation25_spill] sm:$0xff]  ;;  %v9552_v39 = vld [vmem:[#allocation44_spill] sm:$0xff] }
0x257a   :  { %v3388_v50 = vpop.xlane.xlu0 %3387 }
0x257b   :  { %v3389_v6 = vcvt.f32.s32 %v3388_v50 }
0x257d   :  { %v3392_v63 = vadd.s32 %v3391_v40, %v3389_v6  ;;  %v9547_v6 = vld [vmem:[#allocation22_spill] sm:$0xff]  ;;  %v9548_v40 = vld [vmem:[#allocation23_spill] sm:$0xff] }
0x257f   :  { %vm3397_vm6 = vcmp.eq.s32.totalorder %v7472_v27, %v3392_v63  ;;  %vm3396_vm8 = vcmp.eq.s32.totalorder %v7469_v26, %v3392_v63  ;;  %v8679_v14 = vsel %vm3393_vm5, %v3392_v63, %v8495_v4  ;;  %v9546_v4 = vld [vmem:[#allocation21_spill] sm:$0xff] }
0x2580   :  { %4116 = vmatprep.mubr.msk.f32.mxu1 %vm3397_vm6, %v9293_v44  ;;  %4118 = vmatprep.mubr.msk.f32.mxu0 %vm3397_vm6, %v9293_v44 }
0x2581   :  { %4117 = vmatmul.mubr.msk.f32.vlgmr.msra.gmra.mrb[30].mxu1 %vm3396_vm8, %v9293_v44  ;;  %4119 = vmatmul.mubr.msk.f32.vlgmr.msra.gmra.mrb[38].mxu0 %vm3396_vm8, %v9293_v44  ;;  %v9545_v44 = vld [vmem:[#allocation20_spill] sm:$0xff] }
0x2582   :  { %6377 = vmatpush1.bf16.msra.mxu1 %v6816_v9  ;;  %6408 = vmatpush3.bf16.msra.mxu0 %v6877_v29  ;;  %v9533_v9 = vld [vmem:[#allocation14_spill] sm:$0xff]  ;;  %v9539_v29 = vld [vmem:[#allocation17_spill] sm:$0xff] }
0x2583   :  { %6379 = vmatprep.subr.bf16.mxu1 %v6818_v10  ;;  %6409 = vmatprep.subr.bf16.mxu0 %v9221_v35  ;;  %v9534_v10 = vld [vmem:[#allocation9_spill] sm:$0xff] }
0x2584   :  { %3607 = vmatprep.mubr.f32.mxu1 %v9222_v49  ;;  %5131 = vmatprep.mubr.msk.f32.mxu0 %vm6730_vm0, %v9222_v49 }
0x2586   :  { %6381 = vmatpush1.bf16.msra.mxu1 %v6836_v15  ;;  %6411 = vmatpush3.bf16.msra.mxu0 %v6901_v37  ;;  %v9535_v15 = vld [vmem:[#allocation10_spill] sm:$0xff] }
0x2587   :  { %6383 = vmatprep.subr.bf16.mxu1 %v6839_v16  ;;  %6412 = vmatprep.subr.bf16.mxu0 %v9221_v35  ;;  %v9536_v16 = vld [vmem:[#allocation16_spill] sm:$0xff]  ;;  %v9542_v37 = vld [vmem:[#allocation18_spill] sm:$0xff] }
0x258a   :  { %6385 = vmatpush1.bf16.msra.mxu1 %v6854_v21  ;;  %6414 = vmatpush3.bf16.msra.mxu0 %v6929_v46  ;;  %v9537_v21 = vld [vmem:[#allocation11_spill] sm:$0xff] }
0x258b   :  { %6387 = vmatprep.subr.bf16.mxu1 %v6857_v22  ;;  %6415 = vmatprep.subr.bf16.mxu0 %v9221_v35  ;;  %v9538_v22 = vld [vmem:[#allocation12_spill] sm:$0xff] }
0x258c   :  { %v6678_v46 = vld [vmem:[%s8870_s1] sm:$0xff] }
0x258e   :  { %6389 = vmatpush1.bf16.msra.mxu1 %v6883_v31  ;;  %6417 = vmatpush3.bf16.msra.mxu0 %v6957_v55  ;;  %v9540_v31 = vld [vmem:[#allocation13_spill] sm:$0xff]  ;;  %v9544_v55 = vld [vmem:[#allocation28_spill] sm:$0xff] }
0x258f   :  { %6391 = vmatprep.subr.bf16.mxu1 %v6889_v33  ;;  %6418 = vmatprep.subr.bf16.mxu0 %v9221_v35  ;;  %v9541_v33 = vld [vmem:[#allocation15_spill] sm:$0xff] }
0x2592   :  { %6393 = vmatpush1.bf16.msra.mxu1 %v6914_v41  ;;  %6420 = vmatpush3.bf16.msra.mxu0 %v9533_v9  ;;  %v9543_v41 = vld [vmem:[#allocation19_spill] sm:$0xff] }
0x2593   :  { %6395 = vmatprep.subr.bf16.mxu1 %v9534_v10  ;;  %6421 = vmatprep.subr.bf16.mxu0 %v9221_v35 }
0x2596   :  { %6397 = vmatpush1.bf16.msra.mxu1 %v9535_v15  ;;  %6423 = vmatpush3.bf16.msra.mxu0 %v9536_v16 }
0x2597   :  { %6399 = vmatprep.subr.bf16.mxu1 %v9537_v21  ;;  %6424 = vmatprep.subr.bf16.mxu0 %v9221_v35 }
0x259a   :  { %6401 = vmatpush1.bf16.msra.mxu1 %v9538_v22  ;;  %6426 = vmatpush3.bf16.msra.mxu0 %v9539_v29 }
0x259b   :  { %6403 = vmatprep.subr.bf16.mxu1 %v9540_v31  ;;  %6427 = vmatprep.subr.bf16.mxu0 %v9221_v35 }
0x259e   :  { %6405 = vmatpush1.bf16.msra.mxu1 %v9541_v33  ;;  %6429 = vmatpush3.bf16.msra.mxu0 %v9542_v37 }
0x259f   :  { %6430 = vmatprep.subr.bf16.mxu0 %v9221_v35  ;;  %5169 = vmatprep.subr.mxu1 %v9222_v49 }
0x25a1   :  { %3608 = vmatmul.mubr.f32.vlgmr.msra.gmra.mrb[30].mxu1 %v8564_v19  ;;  %5132 = vmatmul.mubr.f32.vlgmr.msra.gmra.mrb[40].mxu0 %v8564_v19 }
0x25a2   :  { %6432 = vmatpush3.bf16.msra.mxu0 %v9543_v41  ;;  %5166 = vmatprep.mubr.msk.f32.mxu0 %vm6730_vm0, %v9222_v49 }
0x25a3   :  { %6433 = vmatprep.subr.bf16.mxu0 %v9221_v35  ;;  %5170 = vmatpush3.msra.mxu1 %v6678_v46 }
0x25a4   :  { %5171 = vmatprep.mubr.msk.f32.mxu1 %vm6730_vm0, %v9222_v49  ;;  %6455 = vmatprep.subr.bf16.mxu1 %v9544_v55 }
0x25a6   :  { %6435 = vmatpush3.bf16.msra.mxu0 %v9545_v44 }
0x25a7   :  { %6436 = vmatprep.subr.bf16.mxu0 %v9221_v35 }
0x25aa   :  { %6438 = vmatpush3.bf16.msra.mxu0 %v9546_v4 }
0x25ab   :  { %6439 = vmatprep.subr.bf16.mxu0 %v9221_v35 }
0x25ae   :  { %6441 = vmatpush3.bf16.msra.mxu0 %v9547_v6 }
0x25af   :  { %6442 = vmatprep.subr.bf16.mxu0 %v9221_v35 }
0x25b2   :  { %6444 = vmatpush3.bf16.msra.mxu0 %v9548_v40 }
0x25b3   :  { %6445 = vmatprep.subr.bf16.mxu0 %v9221_v35 }
0x25b6   :  { %6447 = vmatpush3.bf16.msra.mxu0 %v9549_v54 }
0x25b7   :  { %6448 = vmatprep.subr.bf16.mxu0 %v9221_v35 }
0x25ba   :  { %6450 = vmatpush3.bf16.msra.mxu0 %v9550_v30  ;;  %v9562_v30 = vld [vmem:[#allocation30_spill] sm:$0xff] }
0x25bb   :  { %6451 = vmatprep.subr.bf16.mxu0 %v9221_v35 }
0x25be   :  { %6453 = vmatpush3.bf16.msra.mxu0 %v9551_v5 }
0x25bf   :  { %6487 = vmatprep.subr.bf16.mxu0 %v9552_v39 }
0x2654   :  { %v4650_v50 = vpop.f32.mrb[38].mxu0 }
0x2655   :  { %v4651_v3 = vpop.f32.mrb[39].mxu0 }
0x2656   :  { %v4652_v18 = vadd.f32 %v4651_v3, %v4650_v50  ;;  %v9563_v50 = vld [vmem:[#allocation55_spill] sm:$0xff]  ;;  %v9564_v3 = vld [vmem:[#allocation53_spill] sm:$0xff] }
0x2674   :  { %v3609_v1 = vpop.f32.mrb[30].mxu1  ;;  %v3680_v59 = vpop.f32.mrb[40].mxu0 }
0x2675   :  { %v3610_v43 = vadd.f32 %v3609_v1, %v9553_v56  ;;  %v3611_v63 = vpop.f32.mrb[31].mxu1  ;;  %v5133_v9 = vpop.f32.mrb[41].mxu0  ;;  %v3681_v31 = vadd.f32 %v3680_v59, %v7135_v36  ;;  %v9565_v59 = vld [vmem:[#allocation54_spill] sm:$0xff] }
0x2676   :  { %v3612_v15 = vadd.f32 %v3611_v63, %v7127_v62  ;;  %v3360_v56 = vsub.f32 %v9565_v59, %v9563_v50 }
0x2677   :  { %v4120_v10 = vmul.f32 -1.442695, %v3610_v43 }
0x2678   :  { %v4121_v16 = vmul.f32 -1.442695, %v3612_v15  ;;  %v3363_v63 = vmul.f32 1.442695, %v3360_v56 }
0x2679   :  { %6624 = vpow2.f32 %v4120_v10  ;;  %v9566_v10 = vld [vmem:[#allocation57_spill] sm:$0xff] }
0x267a   :  { %6626 = vpow2.f32 %v4121_v16 }
0x2683   :  { %v6625_v35 = vpop.eup %6624 }
0x2684   :  { %v3688_v21 = vadd.f32 1.0, %v6625_v35  ;;  %v6627_v22 = vpop.eup %6626 }
0x2685   :  { %v3695_v29 = vadd.f32 1.0, %v6627_v22 }
0x2686   :  { %6628 = vrcp.f32 %v3688_v21  ;;  %v9567_v21 = vld [vmem:[#allocation58_spill] sm:$0xff] }
0x2687   :  { %6630 = vrcp.f32 %v3695_v29 }
0x2690   :  { %v6629_v33 = vpop.eup %6628 }
0x2691   :  { %v3698_v37 = vmul.f32 %v6629_v33, %v3681_v31  ;;  %v6631_v46 = vpop.eup %6630 }
0x2692   :  { %v3701_v55 = vsub.f32 1.0, %v6631_v46  ;;  %v3703_v62 = vmul.f32 %v6631_v46, %v8564_v19  ;;  %v9559_v19 = vld [vmem:[#allocation60_spill] sm:$0xff] }
0x2693   :  { %v3699_v41 = vadd.f32 %v4652_v18, %v3698_v37  ;;  %v3359_v18 = vsub.f32 %v9564_v3, %v9563_v50 }
0x2695   :  { %6632 = vtanh.f32 %v3699_v41  ;;  %v3361_v43 = vmul.f32 1.442695, %v3359_v18 }
0x269f   :  { %v6633_v44 = vpop.eup %6632 }
0x26a0   :  { %v3702_v4 = vmul.f32 %v6633_v44, %v3701_v55 }
0x26a2   :  { %v3704_v6 = vadd.f32 %v3703_v62, %v3702_v4 }
0x26a4   :  { %5167 = vmatmul.mubr.f32.vlgmr.msra.gmra.mrb[42].mxu0 %v3704_v6 }
0x26a5   :  { %6489 = vmatpush1.bf16.msra.mxu0 %v7316_v53  ;;  %3994 = vmatprep.mubr.f32.mxu0 %v9222_v49 }
0x26a6   :  { %6491 = vmatprep.subr.bf16.mxu0 %v7318_v58 }
0x26a9   :  { %6493 = vmatpush1.bf16.msra.mxu0 %v7334_v7 }
0x26aa   :  { %6495 = vmatprep.subr.bf16.mxu0 %v7337_v45 }
0x26ad   :  { %6497 = vmatpush1.bf16.msra.mxu0 %v9223_v20 }
0x26ae   :  { %6499 = vmatprep.subr.bf16.mxu0 %v9224_v25 }
0x26b1   :  { %6501 = vmatpush1.bf16.msra.mxu0 %v9225_v28 }
0x26b2   :  { %6503 = vmatprep.subr.bf16.mxu0 %v9226_v47 }
0x26b5   :  { %6505 = vmatpush1.bf16.msra.mxu0 %v9227_v52 }
0x26b6   :  { %6507 = vmatprep.subr.bf16.mxu0 %v9306_v60  ;;  %v9556_v60 = vld [vmem:[#allocation43_spill] sm:$0xff] }
0x26b9   :  { %6509 = vmatpush1.bf16.msra.mxu0 %v9307_v2 }
0x26ba   :  { %6511 = vmatprep.subr.bf16.mxu0 %v9308_v12 }
0x26bd   :  { %6513 = vmatpush1.bf16.msra.mxu0 %v9309_v17 }
0x26be   :  { %6515 = vmatprep.subr.bf16.mxu0 %v9310_v34 }
0x26c1   :  { %6517 = vmatpush1.bf16.msra.mxu0 %v9311_v32 }
0x2777   :  { %v3771_v53 = vpop.f32.mrb[42].mxu0 }
0x2778   :  { %v5168_v58 = vpop.f32.mrb[43].mxu0  ;;  %v3775_v36 = vsel %vm364_vm1, %v3771_v53, -inf }
0x2779   :  { %3776 = vmax.xlane.f32.xlu1 %v3775_v36 }
0x2806   :  { %v3777_v7 = vpop.xlane.xlu1 %3776 }
0x2807   :  { %v3778_v45 = vsub.f32 %v3771_v53, %v3777_v7 }
0x2809   :  { %v3779_v49 = vmul.f32 1.442695, %v3778_v45 }
0x280b   :  { %6634 = vpow2.f32 %v3779_v49 }
0x2815   :  { %v6635_v20 = vpop.eup %6634 }
0x2816   :  { %v3781_v25 = vsel %vm364_vm1, %v6635_v20, 0.0 }
0x2817   :  { %3782 = vadd.xlane.f32.xlu0 %v3781_v25  ;;  %v9569_v25 = vld [vmem:[#allocation45_spill] sm:$0xff] }
0x28a4   :  { %v3783_v28 = vpop.xlane.xlu0 %3782 }
0x28a5   :  { %6636 = vrcp.f32 %v3783_v28 }
0x28af   :  { %v6637_v47 = vpop.eup %6636 }
0x28b0   :  { %v3785_v52 = vmul.f32 %v6637_v47, %v6635_v20  ;;  %v9568_v20 = vld [vmem:[#allocation47_spill] sm:$0xff]  ;;  %v9570_v47 = vld [vmem:[#allocation46_spill] sm:$0xff] }
0x28b1   :  { %v1418_v28 = vsub.f32 %v9569_v25, %v9568_v20 }
0x28b2   :  { %5172 = vmatmul.mubr.msk.f32.vlgmr.msra.gmra.mrb[32].mxu1 %vm376_vm2, %v3785_v52  ;;  %v1419_v52 = vsub.f32 %v9570_v47, %v9568_v20 }
0x28b3   :  { %6457 = vmatpush3.bf16.msra.mxu1 %v9235_v48  ;;  %v9554_v48 = vld [vmem:[#allocation41_spill] sm:$0xff] }
0x28b4   :  { %6459 = vmatprep.subr.bf16.mxu1 %v9236_v8  ;;  %v9555_v8 = vld [vmem:[#allocation42_spill] sm:$0xff] }
0x28b7   :  { %6461 = vmatpush3.bf16.msra.mxu1 %v9389_v57 }
0x28b8   :  { %6463 = vmatprep.subr.bf16.mxu1 %v9390_v11 }
0x28bb   :  { %6465 = vmatpush3.bf16.msra.mxu1 %v9391_v42  ;;  %v9557_v42 = vld [vmem:[#allocation61_spill] sm:$0xff] }
0x28bc   :  { %6467 = vmatprep.subr.bf16.mxu1 %v9392_v24  ;;  %v9558_v24 = vld [vmem:[#allocation59_spill] sm:$0xff] }
0x28bf   :  { %6469 = vmatpush3.bf16.msra.mxu1 %v9393_v13  ;;  %v675_v13 = vsub.f32 %v9558_v24, %v9557_v42 }
0x28c0   :  { %6471 = vmatprep.subr.bf16.mxu1 %v9318_v38  ;;  %v6679_v38 = vld [vmem:[%s8876_s7] sm:$0x1]  ;;  %s6732_s7 = smov [#allocation4]  }
0x28c1   :  { %s4062_s18 = sshll.u32 %s6732_s7, 4  ;;  %s4063_s18 = int_to_ptr.vmem [resolvable:$true] %s4062_s18 }
0x28c2   :  { %s6680_s19 = scalar_lea.vmem %s4063_s18, 16  ;;  %s6684_s3 = scalar_lea.vmem %s4063_s18, 32 }
0x28c3   :  { %6473 = vmatpush3.bf16.msra.mxu1 %v9472_v23  ;;  %v676_v23 = vsub.f32 %v9559_v19, %v9557_v42  ;;  %p6681_p0 = scmp.ne.s32.totalorder %s4063_s18, %s6680_s19  ;;  %p6685_p1 = scmp.lt.s32.totalorder %s4063_s18, %s4063_s18 }
0x28c4   :  { %6475 = vmatprep.subr.bf16.mxu1 %v9473_v0  ;;  %v677_v0 = vmul.f32 1.442695, %v675_v13  ;;  %p6686_p2 = scmp.lt.s32.totalorder %s6684_s3, %s6680_s19 }
0x28c5   :  { %v679_v54 = vmul.f32 1.442695, %v676_v23 }
0x28c6   :  { %p6687_p3 = por %p6686_p2, %p6685_p1 }
0x28c7   :  { %6477 = vmatpush3.bf16.msra.mxu1 %v9474_v51  ;;  %v9560_v51 = vld [vmem:[#allocation56_spill] sm:$0xff] }
0x28c8   :  { %6479 = vmatprep.subr.bf16.mxu1 %v9475_v61  ;;  %v9561_v61 = vld [vmem:[#allocation29_spill] sm:$0xff]  ;;  %v2066_v5 = vsub.f32 %v9562_v30, %v9560_v51  ;;  %p6688_p4 = pnand %p6687_p3, %p6681_p0 }
0x28c9   :  { %v2065_v40 = vsub.f32 %v9561_v61, %v9560_v51 }
0x28ca   :  { %v2069_v1 = vmul.f32 1.442695, %v2066_v5 }
0x28cb   :  { %6481 = vmatpush3.bf16.msra.mxu1 %v9554_v48  ;;  %v2067_v39 = vmul.f32 1.442695, %v2065_v40  ;;  %v9571_v48 = vld [vmem:[#allocation52_spill] sm:$0xff] }
0x28cc   :  { %6483 = vmatprep.subr.bf16.mxu1 %v9555_v8  ;;  %v9572_v8 = vld [vmem:[#allocation50_spill] sm:$0xff] }
0x28cf   :  { %6485 = vmatpush3.bf16.msra.mxu1 %v9556_v60  ;;  %v2712_v60 = vsub.f32 %v9572_v8, %v9571_v48 }
0x2985   :  { %v3855_v2 = vpop.f32.mrb[32].mxu1 }
0x2986   :  { %v5173_v12 = vpop.f32.mrb[33].mxu1  ;;  %3923 = vmatprep.mubr.f32.mxu1 %v3855_v2  ;;  %v1420_v2 = vmul.f32 1.442695, %v1418_v28 }
0x2987   :  { %3924 = vmatmul.mubr.f32.vlgmr.msra.gmra.mrb[34].mxu1 %v3704_v6  ;;  %v9573_v12 = vld [vmem:[#allocation51_spill] sm:$0xff] }
0x2a5a   :  { %v4721_v17 = vpop.f32.mrb[34].mxu1 }
0x2a5b   :  { %v4722_v34 = vpop.f32.mrb[35].mxu1 }
0x2a5c   :  { %v4723_v32 = vadd.f32 %v4722_v34, %v4721_v17  ;;  %v2713_v17 = vsub.f32 %v9573_v12, %v9571_v48  ;;  %v1422_v34 = vmul.f32 1.442695, %v1419_v52 }
0x2a5e   :  { %v3926_v57 = vadd.f32 %v6679_v38, %v4723_v32  ;;  %v2714_v32 = vmul.f32 1.442695, %v2712_v60  ;;  %v2716_v38 = vmul.f32 1.442695, %v2713_v17 }
0x2a60   :  { %6638 = vtanh.f32 %v3926_v57 }
0x2a61   :  { %6640 = vpow2.f32 %v677_v0 }
0x2a62   :  { %6642 = vpow2.f32 %v679_v54 }
0x2a63   :  { %6644 = vpow2.f32 %v2067_v39 }
0x2a64   :  { %6646 = vpow2.f32 %v2069_v1 }
0x2a65   :  { %6648 = vpow2.f32 %v3361_v43 }
0x2a66   :  { %6650 = vpow2.f32 %v3363_v63 }
0x2a67   :  { %6652 = vpow2.f32 %v1420_v2 }
0x2a68   :  { %6654 = vpow2.f32 %v1422_v34 }
0x2a69   :  { %6656 = vpow2.f32 %v2714_v32 }
0x2a6a   :  { %v6639_v11 = vpop.eup %6638  ;;  %6658 = vpow2.f32 %v2716_v38 }
0x2a6b   :  { %3995 = vmatmul.mubr.f32.vlgmr.msra.gmra.mrb[44].mxu0 %v6639_v11  ;;  %v6641_v35 = vpop.eup %6640 }
0x2a6c   :  { %v6643_v29 = vpop.eup %6642  ;;  %v681_v46 = vsel %vm669_vm3, %v6641_v35, 0.0 }
0x2a6d   :  { %v6645_v41 = vpop.eup %6644  ;;  %v682_v55 = vsel %vm669_vm3, %v6643_v29, 0.0 }
0x2a6e   :  { %v6647_v44 = vpop.eup %6646  ;;  %v683_v4 = vadd.f32 %v682_v55, %v681_v46  ;;  %v2071_v6 = vsel %vm669_vm3, %v6645_v41, 0.0 }
0x2a6f   :  { %v6649_v62 = vpop.eup %6648  ;;  %v2072_v53 = vsel %vm669_vm3, %v6647_v44, 0.0 }
0x2a70   :  { %v6651_v58 = vpop.eup %6650  ;;  %v2073_v36 = vadd.f32 %v2072_v53, %v2071_v6  ;;  %v3365_v7 = vsel %vm669_vm3, %v6649_v62, 0.0 }
0x2a71   :  { %v3366_v45 = vsel %vm669_vm3, %v6651_v58, 0.0  ;;  %v6653_v61 = vpop.eup %6652 }
0x2a72   :  { %v3367_v49 = vadd.f32 %v3366_v45, %v3365_v7  ;;  %v6655_v54 = vpop.eup %6654  ;;  %v1424_v3 = vsel %vm669_vm3, %v6653_v61, 0.0 }
0x2a73   :  { %v6657_v5 = vpop.eup %6656 }
0x2a74   :  { %v6659_v50 = vpop.eup %6658  ;;  %v2718_v1 = vsel %vm669_vm3, %v6657_v5, 0.0 }
0x2a75   :  { %v2719_v59 = vsel %vm669_vm3, %v6659_v50, 0.0 }
0x2a76   :  { %v2720_v63 = vadd.f32 %v2719_v59, %v2718_v1 }
0x2b3e   :  { %v3996_v9 = vpop.f32.mrb[44].mxu0 }
0x2b3f   :  { %v3997_v15 = vadd.f32 %v3996_v9, %v9566_v10  ;;  %v3998_v16 = vpop.f32.mrb[45].mxu0 }
0x2b40   :  { %v3999_v22 = vadd.f32 %v3998_v16, %v9567_v21 }
0x2b41   :  { %v4001_v31 = vsel %vm669_vm3, %v3997_v15, -inf }
0x2b42   :  { %v4002_v33 = vsel %vm669_vm3, %v3999_v22, -inf }
0x2b43   :  { %v4003_v37 = vmax.f32 %v4001_v31, %v4002_v33 }
0x2b45   :  { %4004 = vmax.xlane.f32.xlu1 %v4003_v37 }
0x2b49   :  { %684 = vadd.xlane.f32.xlu1 %v683_v4 }
0x2b4d   :  { %2074 = vadd.xlane.f32.xlu1 %v2073_v36 }
0x2b51   :  { %3368 = vadd.xlane.f32.xlu1 %v3367_v49 }
0x2bd2   :  { %v4005_v57 = vpop.xlane.xlu1 %4004 }
0x2bd3   :  { %v4006_v11 = vsub.f32 %v3997_v15, %v4005_v57  ;;  %v4007_v42 = vsub.f32 %v3999_v22, %v4005_v57  ;;  %vm4018_vm0 = vcmp.eq.f32.partialorder %v3997_v15, %v4005_v57  ;;  %vm4019_vm1 = vcmp.eq.f32.partialorder %v3999_v22, %v4005_v57 }
0x2bd4   :  { %v4020_v24 = vsel %vm4018_vm0, %v7469_v26, 256  ;;  %v4021_v13 = vsel %vm4019_vm1, %v7472_v27, 256  ;;  %v1425_v27 = vsel %vm669_vm3, %v6655_v54, 0.0 }
0x2bd5   :  { %v4008_v19 = vmul.f32 1.442695, %v4006_v11  ;;  %v4010_v23 = vmul.f32 1.442695, %v4007_v42  ;;  %v4022_v0 = vsel %vm669_vm3, %v4020_v24, 2147483647  ;;  %v1426_v18 = vadd.f32 %v1425_v27, %v1424_v3 }
0x2bd6   :  { %v4023_v51 = vsel %vm669_vm3, %v4021_v13, 2147483647  ;;  %v685_v35 = vpop.xlane.xlu1 %684 }
0x2bd7   :  { %6660 = vpow2.f32 %v4008_v19  ;;  %vm4024_vm2 = vcmp.lt.s32.totalorder %v4022_v0, %v4023_v51 }
0x2bd8   :  { %6662 = vpow2.f32 %v4010_v23  ;;  %v4025_v40 = vsel %vm4024_vm2, %v4022_v0, %v4023_v51 }
0x2bd9   :  { %v4027_v30 = vshra.s32 %v4025_v40, 16  ;;  %v4026_v16 = vand.u32 65535, %v4025_v40  ;;  %6664 = vrcp.f32 %v685_v35 }
0x2bda   :  { %v2075_v31 = vpop.xlane.xlu1 %2074 }
0x2bdb   :  { %v4029_v39 = vcvt.s32.f32 %v4027_v30  ;;  %v4028_v22 = vcvt.s32.f32 %v4026_v16 }
0x2bdd   :  { %4030 = vmin.xlane.f32.xlu0 %v4029_v39 }
0x2bde   :  { %v3369_v41 = vpop.xlane.xlu1 %3368 }
0x2be1   :  { %v6661_v56 = vpop.eup %6660  ;;  %1427 = vadd.xlane.f32.xlu0 %v1426_v18 }
0x2be2   :  { %v6663_v43 = vpop.eup %6662  ;;  %v4012_v9 = vsel %vm669_vm3, %v6661_v56, 0.0 }
0x2be3   :  { %v4013_v10 = vsel %vm669_vm3, %v6663_v43, 0.0  ;;  %v6665_v46 = vpop.eup %6664  ;;  %vm4040_vm3 = vcmp.eq.s32.totalorder %v7469_v26, 5 }
0x2be4   :  { %v4014_v15 = vadd.f32 %v4013_v10, %v4012_v9  ;;  %v711_v4 = vsel %vm709_vm14, %v6665_v46, 0.0 }
0x2be5   :  { %2721 = vadd.xlane.f32.xlu0 %v2720_v63 }
0x2be9   :  { %4015 = vadd.xlane.f32.xlu0 %v4014_v15 }
0x2c6a   :  { %v4031_v21 = vpop.xlane.xlu0 %4030 }
0x2c6b   :  { %vm4032_vm9 = vcmp.eq.f32.partialorder %v4029_v39, %v4031_v21 }
0x2c6c   :  { %v4033_v29 = vsel %vm4032_vm9, %v4028_v22, inf }
0x2c6d   :  { %4034 = vmin.xlane.f32.xlu1 %v4033_v29 }
0x2c6e   :  { %v1428_v33 = vpop.xlane.xlu0 %1427 }
0x2c6f   :  { %6666 = vrcp.f32 %v1428_v33 }
0x2c70   :  { %6668 = vrcp.f32 %v2075_v31 }
0x2c72   :  { %v2722_v37 = vpop.xlane.xlu0 %2721 }
0x2c73   :  { %6670 = vrcp.f32 %v2722_v37 }
0x2c74   :  { %6672 = vrcp.f32 %v3369_v41 }
0x2c76   :  { %v4016_v55 = vpop.xlane.xlu0 %4015 }
0x2c77   :  { %6674 = vrcp.f32 %v4016_v55 }
0x2c79   :  { %v6667_v44 = vpop.eup %6666 }
0x2c7a   :  { %v1454_v62 = vsel %vm1452_vm15, %v6667_v44, %v711_v4  ;;  %v6669_v6 = vpop.eup %6668 }
0x2c7b   :  { %v2101_v58 = vsel %vm2099_vm10, %v6669_v6, %v1454_v62 }
0x2c7d   :  { %v6671_v53 = vpop.eup %6670 }
0x2c7e   :  { %v2748_v36 = vsel %vm2746_vm7, %v6671_v53, %v2101_v58  ;;  %v6673_v7 = vpop.eup %6672 }
0x2c7f   :  { %v3395_v49 = vsel %vm3393_vm5, %v6673_v7, %v2748_v36 }
0x2c81   :  { %v6675_v45 = vpop.eup %6674 }
0x2c82   :  { %v4042_v20 = vsel %vm4040_vm3, %v6675_v45, %v3395_v49 }
0x2c83   :  { %4045 = vst.msk [vmem:[#allocation4] sm:$0x1] %vm4043_vm11, %v4042_v20 }
0x2c84   :  { %6691 = shalt.err (!%p6688_p4)
}
0x2c85   :  { %s6692_s21 = scalar_lea.hbm %s8880_s11, 16 }
0x2c86   :  { %p6693_p5 = scmp.ne.s32.totalorder %s8880_s11, %s6692_s21  ;;  %p6696_p6 = scmp.lt.u32.totalorder %s6692_s21, %s8880_s11 }
0x2c88   :  { %p6698_p7 = pnand %p6696_p6, %p6693_p5 }
0x2c8a   :  { %6701 = shalt.err (!%p6698_p7)
}
0x2c8b   :  { %4065 = dma.vmem_to_hbm [thread:$0]  %s4063_s18, 16, %s8880_s11, [#allocation5]   ;;  %v4037_v25 = vcvt.f32.s32 %v4031_v21 }
0x2c8c   :  { %s6733_s26 = smov [#allocation2]  }
0x2c8d   :  { %v4038_v47 = vshll.u32 %v4037_v25, 16  ;;  %s4052_s27 = sshll.u32 %s6733_s26, 4  ;;  %s4053_s27 = int_to_ptr.vmem [resolvable:$true] %s4052_s27 }
0x2c8e   :  { %s6702_s28 = scalar_lea.vmem %s4053_s27, 16  ;;  %s6706_s29 = scalar_lea.vmem %s4053_s27, 32 }
0x2c8f   :  { %p6703_p8 = scmp.ne.s32.totalorder %s4053_s27, %s6702_s28  ;;  %p6707_p9 = scmp.lt.s32.totalorder %s4053_s27, %s4053_s27 }
0x2c90   :  { %p6708_p10 = scmp.lt.s32.totalorder %s6706_s29, %s6702_s28 }
0x2c92   :  { %p6709_p11 = por %p6708_p10, %p6707_p9 }
0x2c94   :  { %p6710_p12 = pnand %p6709_p11, %p6703_p8 }
0x2cfa   :  { %v4035_v28 = vpop.xlane.xlu1 %4034 }
0x2cfb   :  { %v4036_v52 = vcvt.f32.s32 %v4035_v28 }
0x2cfd   :  { %v4039_v48 = vadd.s32 %v4038_v47, %v4036_v52 }
0x2cff   :  { %v4041_v8 = vsel %vm4040_vm3, %v4039_v48, %v8679_v14 }
0x2d00   :  { %4044 = vst.msk [vmem:[#allocation2] sm:$0x1] %vm4043_vm11, %v4041_v8 }
0x2d01   :  { %6713 = shalt.err (!%p6710_p12)
}
0x2d02   :  { %s6714_s2 = scalar_lea.hbm %s8879_s10, 16 }
0x2d03   :  { %p6715_p13 = scmp.ne.s32.totalorder %s8879_s10, %s6714_s2  ;;  %p6718_p0 = scmp.lt.u32.totalorder %s6714_s2, %s8879_s10 }
0x2d05   :  { %p6720_p1 = pnand %p6718_p0, %p6715_p13 }
0x2d07   :  { %6723 = shalt.err (!%p6720_p1)
}
0x2d08   :  { %4055 = dma.vmem_to_hbm [thread:$0]  %s4053_s27, 16, %s8879_s10, [#allocation3]  }
0x2d09   :  { %6724 = dma.done.wait [#allocation3], 16  }
0x2d0a   :  { %6725 = vsyncadd [#allocation3], 4294967280 }
0x2d0b   :  { %6726 = dma.done.wait [#allocation5], 16  }
0x2d0c   :  { %6727 = vsyncadd [#allocation5], 4294967280 }
0x2d0d   :  { %4072 = vsyncpa [#allocation3], 1 }
0x2d0e   :  { %4073 = vsyncpa [#allocation5], 1 }

</bundles_post_ra>
